<compile_context>
chip_gen: v7x
topology: tpu7x:2x2x1
jax: 0.10.0
libtpu: 0.0.40
codegen_flags: <defaults>
</compile_context>

<pallas_src>
import functools

import jax
import jax.numpy as jnp
import numpy as np
from jax.experimental import pallas as pl
from jax.experimental.pallas import tpu as pltpu

_LANE = 128          # TPU lane width; task-head outputs are padded to this
_BN_EPS = 1e-5


# --------------------------------------------------------------------------
# Single fused kernel.
# Ref order: att_scalars(SMEM), x, share*(w,b,scale,shift), te*(w,b,scale,shift),
#            te_fc(w,b), ss*(w,b,scale,shift), ss_fc(w,b), out_te, out_ss
# --------------------------------------------------------------------------
def _fused_kernel(att_ref, x_ref, *refs, n_share, n_te, n_ss):
    pos = 0

    def take(n):
        nonlocal pos
        out = refs[pos:pos + n]
        pos += n
        return out

    share_layers = [take(4) for _ in range(n_share)]
    te_layers = [take(4) for _ in range(n_te)]
    te_w, te_b = take(2)
    ss_layers = [take(4) for _ in range(n_ss)]
    ss_w, ss_b = take(2)
    te_o_ref, ss_o_ref = take(2)

    def dense_stack(h, layers):
        # Linear -> Dropout(eval: identity) -> ReLU -> BatchNorm1d (running
        # stats folded into per-channel scale/shift).
        for w_r, b_r, s_r, sh_r in layers:
            y = jnp.dot(h, w_r[...], preferred_element_type=jnp.float32) + b_r[...]
            h = jnp.maximum(y, 0.0) * s_r[...] + sh_r[...]
        return h

    h = dense_stack(x_ref[...], share_layers)        # (B, L) shared features
    hT = jnp.transpose(h)                             # (L, B): one XLU transpose

    def attention(c1, c3):
        # Rank-1 collapse of the Linear(1,64) q/k attention (see header).
        # Work per batch row on the TRANSPOSED sim tile: simT[m,l] = x_m*alpha_l,
        # so softmax reduces over sublanes and no per-row transposes are needed.
        B = h.shape[0]
        rows = []
        for b in range(B):                           # B is small & static
            xrow = h[b:b + 1, :]                     # (1, L)
            xcol = hT[:, b:b + 1]                    # (L, 1)
            alpha = (c1 * xrow + c3) * 0.125         # (1, L)  (/8 folded in)
            simT = xcol * alpha                      # (L, L)
            simT = simT - jnp.max(simT, axis=0, keepdims=True)
            p = jnp.exp(simT)
            attnT = p / jnp.sum(p, axis=0, keepdims=True)
            # result[l] = sum_m attn[l,m] * x_m   (exact f32 VPU mul + XLU reduce)
            rows.append(jnp.sum(attnT * xcol, axis=0, keepdims=True))
        return jnp.concatenate(rows, axis=0)         # (B, L)

    # TODO(synk): on v7x the two independent task branches below could be split
    # across the two TensorCores (core_map / parallel grid axis); single-core
    # here since v5e/v6e have one TC and the branches are tiny.
    te = dense_stack(attention(att_ref[0], att_ref[1]), te_layers)
    te_o_ref[...] = (jnp.dot(te, te_w[...], preferred_element_type=jnp.float32)
                     + te_b[...]).astype(te_o_ref.dtype)

    ss = dense_stack(attention(att_ref[2], att_ref[3]), ss_layers)
    ss_o_ref[...] = (jnp.dot(ss, ss_w[...], preferred_element_type=jnp.float32)
                     + ss_b[...]).astype(ss_o_ref.dtype)


# --------------------------------------------------------------------------
# Wrapper: flatten params, precompute attention scalars, pad task heads to a
# lane-dense 128-wide output slab, run the single fused pallas_call.
# --------------------------------------------------------------------------
def two_task_at_forward(x, params):
    B = x.shape[0]
    share = list(params['share'])
    te_dense = list(params['te_dense'])
    ss_dense = list(params['ss_dense'])

    def att_coefs(wq, bq, wk, bk):
        # Only the coefficient of x_m survives the softmax over m.
        return jnp.sum(wq * wk), jnp.sum(bq * wk)

    c1_te, c3_te = att_coefs(*params['te_at'])
    c1_ss, c3_ss = att_coefs(*params['ss_at'])
    att_c = jnp.stack([c1_te, c3_te, c1_ss, c3_ss]).astype(jnp.float32)

    def pad_head(w, b):
        n = w.shape[1]
        wp = jnp.zeros((w.shape[0], _LANE), jnp.float32).at[:, :n].set(w)
        bp = jnp.zeros((1, _LANE), jnp.float32).at[:, :n].set(b)
        return wp, bp, n

    te_wp, te_bp, n_te_out = pad_head(*params['te_out'])
    ss_wp, ss_bp, n_ss_out = pad_head(*params['ss_out'])

    flat = [att_c, x]
    for layer in share + te_dense:
        flat.extend(layer)
    flat += [te_wp, te_bp]
    for layer in ss_dense:
        flat.extend(layer)
    flat += [ss_wp, ss_bp]

    kernel = functools.partial(_fused_kernel, n_share=len(share),
                               n_te=len(te_dense), n_ss=len(ss_dense))
    smem = pl.BlockSpec(memory_space=pltpu.MemorySpace.SMEM)
    vmem = pl.BlockSpec(memory_space=pltpu.MemorySpace.VMEM)

    te_pad, ss_pad = pl.pallas_call(
        kernel,
        out_shape=(jax.ShapeDtypeStruct((B, _LANE), jnp.float32),
                   jax.ShapeDtypeStruct((B, _LANE), jnp.float32)),
        in_specs=[smem] + [vmem] * (len(flat) - 1),
        out_specs=(vmem, vmem),
    )(*flat)
    return te_pad[:, :n_te_out], ss_pad[:, :n_ss_out]


# --------------------------------------------------------------------------
# Parameter construction (deterministic, PyTorch-shape-equivalent)
# --------------------------------------------------------------------------
def _make_linear(key, in_dim, out_dim):
    kw, kb = jax.random.split(key)
    # stored as (in, out) == PyTorch weight.T
    w = jax.random.normal(kw, (in_dim, out_dim), jnp.float32) / np.sqrt(in_dim)
    b = 0.01 * jax.random.normal(kb, (1, out_dim), jnp.float32)
    return w, b


def _make_bn_affine(key, dim):
    kg, kb = jax.random.split(key)
    gamma = 1.0 + 0.1 * jax.random.normal(kg, (1, dim), jnp.float32)
    beta = 0.1 * jax.random.normal(kb, (1, dim), jnp.float32)
    running_mean = jnp.zeros((1, dim), jnp.float32)
    running_var = jnp.ones((1, dim), jnp.float32)
    scale = gamma / jnp.sqrt(running_var + _BN_EPS)
    shift = beta - running_mean * scale
    return scale, shift


def make_params(key, vae_latent_dim, linear_chann_ls, num_label,
                te_chann_ls=None, ss_chann_ls=None):
    if te_chann_ls is None:
        te_chann_ls = [128, 64, 32, 16]
    if ss_chann_ls is None:
        ss_chann_ls = [128, 32]
    hs_dims = [vae_latent_dim] + list(linear_chann_ls)
    hs_out = linear_chann_ls[-1]
    te_dims = [hs_out] + list(te_chann_ls)
    ss_dims = [hs_out] + list(ss_chann_ls)

    keys = iter(jax.random.split(key, 64))

    def dense_stack(dims):
        stack = []
        for i_d, o_d in zip(dims[:-1], dims[1:]):
            w, b = _make_linear(next(keys), i_d, o_d)
            s, sh = _make_bn_affine(next(keys), o_d)
            stack.append((w, b, s, sh))
        return stack

    def att_params():
        # PyTorch Linear(1, 64): weight (64,1), bias (64,) -> stored as (1,64)
        wq, bq = _make_linear(next(keys), 1, 64)
        wk, bk = _make_linear(next(keys), 1, 64)
        return (wq, bq, wk, bk)

    return {
        'share': dense_stack(hs_dims),
        'te_at': att_params(),
        'te_dense': dense_stack(te_dims),
        'te_out': _make_linear(next(keys), te_dims[-1], num_label[0]),
        'ss_at': att_params(),
        'ss_dense': dense_stack(ss_dims),
        'ss_out': _make_linear(next(keys), ss_dims[-1], num_label[1]),
    }


# --------------------------------------------------------------------------
# Pure-JAX reference (faithful to the PyTorch forward, full q/k attention).
# Attention einsums use HIGHEST precision (true f32) since the kernel computes
# the sim matrix exactly with VPU math; dense matmuls use default precision to
# mirror the in-kernel MXU dots.
# --------------------------------------------------------------------------
def _ref_forward(x, params):
    HI = jax.lax.Precision.HIGHEST

    def dense(h, stack):
        for w, b, s, sh in stack:
            h = jnp.maximum(jnp.dot(h, w) + b, 0.0) * s + sh
        return h

    def attn(h, wq, bq, wk, bk):
        q = h[:, :, None] * wq[None] + bq[None]          # (B, L, 64)
        k = h[:, :, None] * wk[None] + bk[None]
        sim = jnp.einsum('bld,bmd->blm', q, k, precision=HI) / 8.0
        a = jax.nn.softmax(sim, axis=-1)
        return jnp.einsum('blm,bm->bl', a, h, precision=HI)

    h = dense(x, params['share'])
    te = dense(attn(h, *params['te_at']), params['te_dense'])
    te_out = jnp.dot(te, params['te_out'][0]) + params['te_out'][1]
    ss = dense(attn(h, *params['ss_at']), params['ss_dense'])
    ss_out = jnp.dot(ss, params['ss_out'][0]) + params['ss_out'][1]
    return te_out, ss_out


if __name__ == "__main__":
    VAE_LATENT_DIM = 32
    LINEAR_CHANN_LS = [64, 128]     # hs_out = 128 -> attention length L = 128
    NUM_LABEL = (3, 5)
    BATCH = 8

    key = jax.random.PRNGKey(0)
    k_params, k_x = jax.random.split(key)
    params = make_params(k_params, VAE_LATENT_DIM, LINEAR_CHANN_LS, NUM_LABEL)
    x = jax.random.normal(k_x, (BATCH, VAE_LATENT_DIM), jnp.float32)

    fwd = jax.jit(two_task_at_forward)
    te_out, ss_out = jax.block_until_ready(fwd(x, params))

    te_ref, ss_ref = _ref_forward(x, params)
    np.testing.assert_allclose(np.asarray(te_out), np.asarray(te_ref),
                               rtol=1e-3, atol=1e-3)
    np.testing.assert_allclose(np.asarray(ss_out), np.asarray(ss_ref),
                               rtol=1e-3, atol=1e-3)
    assert te_out.shape == (BATCH, NUM_LABEL[0])
    assert ss_out.shape == (BATCH, NUM_LABEL[1])
    print("KERNEL_OK")
</pallas_src>

<mosaic_0001>
module attributes {stable_mosaic.version = 11 : i64} {
  func.func @_fused_kernel(%arg0: memref<4xf32, #tpu.memory_space<smem>>, %arg1: memref<8x32xf32, #tpu.memory_space<vmem>>, %arg2: memref<32x64xf32, #tpu.memory_space<vmem>>, %arg3: memref<1x64xf32, #tpu.memory_space<vmem>>, %arg4: memref<1x64xf32, #tpu.memory_space<vmem>>, %arg5: memref<1x64xf32, #tpu.memory_space<vmem>>, %arg6: memref<64x128xf32, #tpu.memory_space<vmem>>, %arg7: memref<1x128xf32, #tpu.memory_space<vmem>>, %arg8: memref<1x128xf32, #tpu.memory_space<vmem>>, %arg9: memref<1x128xf32, #tpu.memory_space<vmem>>, %arg10: memref<128x128xf32, #tpu.memory_space<vmem>>, %arg11: memref<1x128xf32, #tpu.memory_space<vmem>>, %arg12: memref<1x128xf32, #tpu.memory_space<vmem>>, %arg13: memref<1x128xf32, #tpu.memory_space<vmem>>, %arg14: memref<128x64xf32, #tpu.memory_space<vmem>>, %arg15: memref<1x64xf32, #tpu.memory_space<vmem>>, %arg16: memref<1x64xf32, #tpu.memory_space<vmem>>, %arg17: memref<1x64xf32, #tpu.memory_space<vmem>>, %arg18: memref<64x32xf32, #tpu.memory_space<vmem>>, %arg19: memref<1x32xf32, #tpu.memory_space<vmem>>, %arg20: memref<1x32xf32, #tpu.memory_space<vmem>>, %arg21: memref<1x32xf32, #tpu.memory_space<vmem>>, %arg22: memref<32x16xf32, #tpu.memory_space<vmem>>, %arg23: memref<1x16xf32, #tpu.memory_space<vmem>>, %arg24: memref<1x16xf32, #tpu.memory_space<vmem>>, %arg25: memref<1x16xf32, #tpu.memory_space<vmem>>, %arg26: memref<16x128xf32, #tpu.memory_space<vmem>>, %arg27: memref<1x128xf32, #tpu.memory_space<vmem>>, %arg28: memref<128x128xf32, #tpu.memory_space<vmem>>, %arg29: memref<1x128xf32, #tpu.memory_space<vmem>>, %arg30: memref<1x128xf32, #tpu.memory_space<vmem>>, %arg31: memref<1x128xf32, #tpu.memory_space<vmem>>, %arg32: memref<128x32xf32, #tpu.memory_space<vmem>>, %arg33: memref<1x32xf32, #tpu.memory_space<vmem>>, %arg34: memref<1x32xf32, #tpu.memory_space<vmem>>, %arg35: memref<1x32xf32, #tpu.memory_space<vmem>>, %arg36: memref<32x128xf32, #tpu.memory_space<vmem>>, %arg37: memref<1x128xf32, #tpu.memory_space<vmem>>, %arg38: memref<8x128xf32, #tpu.memory_space<vmem>>, %arg39: memref<8x128xf32, #tpu.memory_space<vmem>>) attributes {dimension_semantics = [], scalar_prefetch = 0 : i64, scratch_operands = 0 : i64, tpu.core_type = #tpu.core_type<tc>} {
    %c0 = arith.constant 0 : index
    %c0_0 = arith.constant 0 : index
    %0 = vector.load %arg1[%c0, %c0_0] : memref<8x32xf32, #tpu.memory_space<vmem>>, vector<8x32xf32>
    %c0_1 = arith.constant 0 : index
    %c0_2 = arith.constant 0 : index
    %1 = vector.load %arg2[%c0_1, %c0_2] : memref<32x64xf32, #tpu.memory_space<vmem>>, vector<32x64xf32>
    %cst = arith.constant dense<0.000000e+00> : vector<8x64xf32>
    %2 = tpu.matmul %0, %1, %cst {dimension_numbers = #tpu.dot_dimension_numbers<[1], [0], [0], [1], [0, 0, 1, 1], [], []>} : vector<8x32xf32>, vector<32x64xf32>, vector<8x64xf32> -> vector<8x64xf32>
    %c0_3 = arith.constant 0 : index
    %c0_4 = arith.constant 0 : index
    %3 = vector.load %arg3[%c0_3, %c0_4] : memref<1x64xf32, #tpu.memory_space<vmem>>, vector<1x64xf32>
    %4 = vector.broadcast %3 : vector<1x64xf32> to vector<8x64xf32>
    %5 = arith.addf %2, %4 : vector<8x64xf32>
    %cst_5 = arith.constant 0.000000e+00 : f32
    %6 = vector.broadcast %cst_5 : f32 to vector<8x64xf32>
    %7 = arith.maximumf %5, %6 : vector<8x64xf32>
    %c0_6 = arith.constant 0 : index
    %c0_7 = arith.constant 0 : index
    %8 = vector.load %arg4[%c0_6, %c0_7] : memref<1x64xf32, #tpu.memory_space<vmem>>, vector<1x64xf32>
    %9 = vector.broadcast %8 : vector<1x64xf32> to vector<8x64xf32>
    %10 = arith.mulf %7, %9 : vector<8x64xf32>
    %c0_8 = arith.constant 0 : index
    %c0_9 = arith.constant 0 : index
    %11 = vector.load %arg5[%c0_8, %c0_9] : memref<1x64xf32, #tpu.memory_space<vmem>>, vector<1x64xf32>
    %12 = vector.broadcast %11 : vector<1x64xf32> to vector<8x64xf32>
    %13 = arith.addf %10, %12 : vector<8x64xf32>
    %c0_10 = arith.constant 0 : index
    %c0_11 = arith.constant 0 : index
    %14 = vector.load %arg6[%c0_10, %c0_11] : memref<64x128xf32, #tpu.memory_space<vmem>>, vector<64x128xf32>
    %cst_12 = arith.constant dense<0.000000e+00> : vector<8x128xf32>
    %15 = tpu.matmul %13, %14, %cst_12 {dimension_numbers = #tpu.dot_dimension_numbers<[1], [0], [0], [1], [0, 0, 1, 1], [], []>} : vector<8x64xf32>, vector<64x128xf32>, vector<8x128xf32> -> vector<8x128xf32>
    %c0_13 = arith.constant 0 : index
    %c0_14 = arith.constant 0 : index
    %16 = vector.load %arg7[%c0_13, %c0_14] : memref<1x128xf32, #tpu.memory_space<vmem>>, vector<1x128xf32>
    %17 = vector.broadcast %16 : vector<1x128xf32> to vector<8x128xf32>
    %18 = arith.addf %15, %17 : vector<8x128xf32>
    %cst_15 = arith.constant 0.000000e+00 : f32
    %19 = vector.broadcast %cst_15 : f32 to vector<8x128xf32>
    %20 = arith.maximumf %18, %19 : vector<8x128xf32>
    %c0_16 = arith.constant 0 : index
    %c0_17 = arith.constant 0 : index
    %21 = vector.load %arg8[%c0_16, %c0_17] : memref<1x128xf32, #tpu.memory_space<vmem>>, vector<1x128xf32>
    %22 = vector.broadcast %21 : vector<1x128xf32> to vector<8x128xf32>
    %23 = arith.mulf %20, %22 : vector<8x128xf32>
    %c0_18 = arith.constant 0 : index
    %c0_19 = arith.constant 0 : index
    %24 = vector.load %arg9[%c0_18, %c0_19] : memref<1x128xf32, #tpu.memory_space<vmem>>, vector<1x128xf32>
    %25 = vector.broadcast %24 : vector<1x128xf32> to vector<8x128xf32>
    %26 = arith.addf %23, %25 : vector<8x128xf32>
    %27 = tpu.transpose %26, [1, 0] : vector<8x128xf32> -> vector<128x8xf32>
    %c0_20 = arith.constant 0 : index
    %28 = memref.load %arg0[%c0_20] : memref<4xf32, #tpu.memory_space<smem>>
    %c1 = arith.constant 1 : index
    %29 = memref.load %arg0[%c1] : memref<4xf32, #tpu.memory_space<smem>>
    %30 = vector.extract_strided_slice %26 {offsets = [0, 0], sizes = [1, 128], strides = [1, 1]} : vector<8x128xf32> to vector<1x128xf32>
    %31 = vector.extract_strided_slice %27 {offsets = [0, 0], sizes = [128, 1], strides = [1, 1]} : vector<128x8xf32> to vector<128x1xf32>
    %32 = vector.broadcast %28 : f32 to vector<1x128xf32>
    %33 = arith.mulf %32, %30 : vector<1x128xf32>
    %34 = vector.broadcast %29 : f32 to vector<1x128xf32>
    %35 = arith.addf %33, %34 : vector<1x128xf32>
    %cst_21 = arith.constant 1.250000e-01 : f32
    %36 = vector.broadcast %cst_21 : f32 to vector<1x128xf32>
    %37 = arith.mulf %35, %36 : vector<1x128xf32>
    %38 = vector.broadcast %31 : vector<128x1xf32> to vector<128x128xf32>
    %39 = vector.broadcast %37 : vector<1x128xf32> to vector<128x128xf32>
    %40 = arith.mulf %38, %39 : vector<128x128xf32>
    %cst_22 = arith.constant dense<0xFF800000> : vector<128xf32>
    %41 = vector.multi_reduction <maximumf>, %40, %cst_22 [0] : vector<128x128xf32> to vector<128xf32>
    %42 = vector.shape_cast %41 : vector<128xf32> to vector<1x128xf32>
    %43 = vector.broadcast %42 : vector<1x128xf32> to vector<128x128xf32>
    %44 = arith.subf %40, %43 : vector<128x128xf32>
    %45 = math.exp %44 : vector<128x128xf32>
    %cst_23 = arith.constant dense<0.000000e+00> : vector<128xf32>
    %46 = vector.multi_reduction <add>, %45, %cst_23 [0] : vector<128x128xf32> to vector<128xf32>
    %47 = vector.shape_cast %46 : vector<128xf32> to vector<1x128xf32>
    %48 = vector.broadcast %47 : vector<1x128xf32> to vector<128x128xf32>
    %49 = arith.divf %45, %48 : vector<128x128xf32>
    %50 = vector.broadcast %31 : vector<128x1xf32> to vector<128x128xf32>
    %51 = arith.mulf %49, %50 : vector<128x128xf32>
    %cst_24 = arith.constant dense<0.000000e+00> : vector<128xf32>
    %52 = vector.multi_reduction <add>, %51, %cst_24 [0] : vector<128x128xf32> to vector<128xf32>
    %53 = vector.shape_cast %52 : vector<128xf32> to vector<1x128xf32>
    %54 = vector.extract_strided_slice %26 {offsets = [1, 0], sizes = [1, 128], strides = [1, 1]} : vector<8x128xf32> to vector<1x128xf32>
    %55 = vector.extract_strided_slice %27 {offsets = [0, 1], sizes = [128, 1], strides = [1, 1]} : vector<128x8xf32> to vector<128x1xf32>
    %56 = vector.broadcast %28 : f32 to vector<1x128xf32>
    %57 = arith.mulf %56, %54 : vector<1x128xf32>
    %58 = vector.broadcast %29 : f32 to vector<1x128xf32>
    %59 = arith.addf %57, %58 : vector<1x128xf32>
    %cst_25 = arith.constant 1.250000e-01 : f32
    %60 = vector.broadcast %cst_25 : f32 to vector<1x128xf32>
    %61 = arith.mulf %59, %60 : vector<1x128xf32>
    %62 = vector.broadcast %55 : vector<128x1xf32> to vector<128x128xf32>
    %63 = vector.broadcast %61 : vector<1x128xf32> to vector<128x128xf32>
    %64 = arith.mulf %62, %63 : vector<128x128xf32>
    %cst_26 = arith.constant dense<0xFF800000> : vector<128xf32>
    %65 = vector.multi_reduction <maximumf>, %64, %cst_26 [0] : vector<128x128xf32> to vector<128xf32>
    %66 = vector.shape_cast %65 : vector<128xf32> to vector<1x128xf32>
    %67 = vector.broadcast %66 : vector<1x128xf32> to vector<128x128xf32>
    %68 = arith.subf %64, %67 : vector<128x128xf32>
    %69 = math.exp %68 : vector<128x128xf32>
    %cst_27 = arith.constant dense<0.000000e+00> : vector<128xf32>
    %70 = vector.multi_reduction <add>, %69, %cst_27 [0] : vector<128x128xf32> to vector<128xf32>
    %71 = vector.shape_cast %70 : vector<128xf32> to vector<1x128xf32>
    %72 = vector.broadcast %71 : vector<1x128xf32> to vector<128x128xf32>
    %73 = arith.divf %69, %72 : vector<128x128xf32>
    %74 = vector.broadcast %55 : vector<128x1xf32> to vector<128x128xf32>
    %75 = arith.mulf %73, %74 : vector<128x128xf32>
    %cst_28 = arith.constant dense<0.000000e+00> : vector<128xf32>
    %76 = vector.multi_reduction <add>, %75, %cst_28 [0] : vector<128x128xf32> to vector<128xf32>
    %77 = vector.shape_cast %76 : vector<128xf32> to vector<1x128xf32>
    %78 = vector.extract_strided_slice %26 {offsets = [2, 0], sizes = [1, 128], strides = [1, 1]} : vector<8x128xf32> to vector<1x128xf32>
    %79 = vector.extract_strided_slice %27 {offsets = [0, 2], sizes = [128, 1], strides = [1, 1]} : vector<128x8xf32> to vector<128x1xf32>
    %80 = vector.broadcast %28 : f32 to vector<1x128xf32>
    %81 = arith.mulf %80, %78 : vector<1x128xf32>
    %82 = vector.broadcast %29 : f32 to vector<1x128xf32>
    %83 = arith.addf %81, %82 : vector<1x128xf32>
    %cst_29 = arith.constant 1.250000e-01 : f32
    %84 = vector.broadcast %cst_29 : f32 to vector<1x128xf32>
    %85 = arith.mulf %83, %84 : vector<1x128xf32>
    %86 = vector.broadcast %79 : vector<128x1xf32> to vector<128x128xf32>
    %87 = vector.broadcast %85 : vector<1x128xf32> to vector<128x128xf32>
    %88 = arith.mulf %86, %87 : vector<128x128xf32>
    %cst_30 = arith.constant dense<0xFF800000> : vector<128xf32>
    %89 = vector.multi_reduction <maximumf>, %88, %cst_30 [0] : vector<128x128xf32> to vector<128xf32>
    %90 = vector.shape_cast %89 : vector<128xf32> to vector<1x128xf32>
    %91 = vector.broadcast %90 : vector<1x128xf32> to vector<128x128xf32>
    %92 = arith.subf %88, %91 : vector<128x128xf32>
    %93 = math.exp %92 : vector<128x128xf32>
    %cst_31 = arith.constant dense<0.000000e+00> : vector<128xf32>
    %94 = vector.multi_reduction <add>, %93, %cst_31 [0] : vector<128x128xf32> to vector<128xf32>
    %95 = vector.shape_cast %94 : vector<128xf32> to vector<1x128xf32>
    %96 = vector.broadcast %95 : vector<1x128xf32> to vector<128x128xf32>
    %97 = arith.divf %93, %96 : vector<128x128xf32>
    %98 = vector.broadcast %79 : vector<128x1xf32> to vector<128x128xf32>
    %99 = arith.mulf %97, %98 : vector<128x128xf32>
    %cst_32 = arith.constant dense<0.000000e+00> : vector<128xf32>
    %100 = vector.multi_reduction <add>, %99, %cst_32 [0] : vector<128x128xf32> to vector<128xf32>
    %101 = vector.shape_cast %100 : vector<128xf32> to vector<1x128xf32>
    %102 = vector.extract_strided_slice %26 {offsets = [3, 0], sizes = [1, 128], strides = [1, 1]} : vector<8x128xf32> to vector<1x128xf32>
    %103 = vector.extract_strided_slice %27 {offsets = [0, 3], sizes = [128, 1], strides = [1, 1]} : vector<128x8xf32> to vector<128x1xf32>
    %104 = vector.broadcast %28 : f32 to vector<1x128xf32>
    %105 = arith.mulf %104, %102 : vector<1x128xf32>
    %106 = vector.broadcast %29 : f32 to vector<1x128xf32>
    %107 = arith.addf %105, %106 : vector<1x128xf32>
    %cst_33 = arith.constant 1.250000e-01 : f32
    %108 = vector.broadcast %cst_33 : f32 to vector<1x128xf32>
    %109 = arith.mulf %107, %108 : vector<1x128xf32>
    %110 = vector.broadcast %103 : vector<128x1xf32> to vector<128x128xf32>
    %111 = vector.broadcast %109 : vector<1x128xf32> to vector<128x128xf32>
    %112 = arith.mulf %110, %111 : vector<128x128xf32>
    %cst_34 = arith.constant dense<0xFF800000> : vector<128xf32>
    %113 = vector.multi_reduction <maximumf>, %112, %cst_34 [0] : vector<128x128xf32> to vector<128xf32>
    %114 = vector.shape_cast %113 : vector<128xf32> to vector<1x128xf32>
    %115 = vector.broadcast %114 : vector<1x128xf32> to vector<128x128xf32>
    %116 = arith.subf %112, %115 : vector<128x128xf32>
    %117 = math.exp %116 : vector<128x128xf32>
    %cst_35 = arith.constant dense<0.000000e+00> : vector<128xf32>
    %118 = vector.multi_reduction <add>, %117, %cst_35 [0] : vector<128x128xf32> to vector<128xf32>
    %119 = vector.shape_cast %118 : vector<128xf32> to vector<1x128xf32>
    %120 = vector.broadcast %119 : vector<1x128xf32> to vector<128x128xf32>
    %121 = arith.divf %117, %120 : vector<128x128xf32>
    %122 = vector.broadcast %103 : vector<128x1xf32> to vector<128x128xf32>
    %123 = arith.mulf %121, %122 : vector<128x128xf32>
    %cst_36 = arith.constant dense<0.000000e+00> : vector<128xf32>
    %124 = vector.multi_reduction <add>, %123, %cst_36 [0] : vector<128x128xf32> to vector<128xf32>
    %125 = vector.shape_cast %124 : vector<128xf32> to vector<1x128xf32>
    %126 = vector.extract_strided_slice %26 {offsets = [4, 0], sizes = [1, 128], strides = [1, 1]} : vector<8x128xf32> to vector<1x128xf32>
    %127 = vector.extract_strided_slice %27 {offsets = [0, 4], sizes = [128, 1], strides = [1, 1]} : vector<128x8xf32> to vector<128x1xf32>
    %128 = vector.broadcast %28 : f32 to vector<1x128xf32>
    %129 = arith.mulf %128, %126 : vector<1x128xf32>
    %130 = vector.broadcast %29 : f32 to vector<1x128xf32>
    %131 = arith.addf %129, %130 : vector<1x128xf32>
    %cst_37 = arith.constant 1.250000e-01 : f32
    %132 = vector.broadcast %cst_37 : f32 to vector<1x128xf32>
    %133 = arith.mulf %131, %132 : vector<1x128xf32>
    %134 = vector.broadcast %127 : vector<128x1xf32> to vector<128x128xf32>
    %135 = vector.broadcast %133 : vector<1x128xf32> to vector<128x128xf32>
    %136 = arith.mulf %134, %135 : vector<128x128xf32>
    %cst_38 = arith.constant dense<0xFF800000> : vector<128xf32>
    %137 = vector.multi_reduction <maximumf>, %136, %cst_38 [0] : vector<128x128xf32> to vector<128xf32>
    %138 = vector.shape_cast %137 : vector<128xf32> to vector<1x128xf32>
    %139 = vector.broadcast %138 : vector<1x128xf32> to vector<128x128xf32>
    %140 = arith.subf %136, %139 : vector<128x128xf32>
    %141 = math.exp %140 : vector<128x128xf32>
    %cst_39 = arith.constant dense<0.000000e+00> : vector<128xf32>
    %142 = vector.multi_reduction <add>, %141, %cst_39 [0] : vector<128x128xf32> to vector<128xf32>
    %143 = vector.shape_cast %142 : vector<128xf32> to vector<1x128xf32>
    %144 = vector.broadcast %143 : vector<1x128xf32> to vector<128x128xf32>
    %145 = arith.divf %141, %144 : vector<128x128xf32>
    %146 = vector.broadcast %127 : vector<128x1xf32> to vector<128x128xf32>
    %147 = arith.mulf %145, %146 : vector<128x128xf32>
    %cst_40 = arith.constant dense<0.000000e+00> : vector<128xf32>
    %148 = vector.multi_reduction <add>, %147, %cst_40 [0] : vector<128x128xf32> to vector<128xf32>
    %149 = vector.shape_cast %148 : vector<128xf32> to vector<1x128xf32>
    %150 = vector.extract_strided_slice %26 {offsets = [5, 0], sizes = [1, 128], strides = [1, 1]} : vector<8x128xf32> to vector<1x128xf32>
    %151 = vector.extract_strided_slice %27 {offsets = [0, 5], sizes = [128, 1], strides = [1, 1]} : vector<128x8xf32> to vector<128x1xf32>
    %152 = vector.broadcast %28 : f32 to vector<1x128xf32>
    %153 = arith.mulf %152, %150 : vector<1x128xf32>
    %154 = vector.broadcast %29 : f32 to vector<1x128xf32>
    %155 = arith.addf %153, %154 : vector<1x128xf32>
    %cst_41 = arith.constant 1.250000e-01 : f32
    %156 = vector.broadcast %cst_41 : f32 to vector<1x128xf32>
    %157 = arith.mulf %155, %156 : vector<1x128xf32>
    %158 = vector.broadcast %151 : vector<128x1xf32> to vector<128x128xf32>
    %159 = vector.broadcast %157 : vector<1x128xf32> to vector<128x128xf32>
    %160 = arith.mulf %158, %159 : vector<128x128xf32>
    %cst_42 = arith.constant dense<0xFF800000> : vector<128xf32>
    %161 = vector.multi_reduction <maximumf>, %160, %cst_42 [0] : vector<128x128xf32> to vector<128xf32>
    %162 = vector.shape_cast %161 : vector<128xf32> to vector<1x128xf32>
    %163 = vector.broadcast %162 : vector<1x128xf32> to vector<128x128xf32>
    %164 = arith.subf %160, %163 : vector<128x128xf32>
    %165 = math.exp %164 : vector<128x128xf32>
    %cst_43 = arith.constant dense<0.000000e+00> : vector<128xf32>
    %166 = vector.multi_reduction <add>, %165, %cst_43 [0] : vector<128x128xf32> to vector<128xf32>
    %167 = vector.shape_cast %166 : vector<128xf32> to vector<1x128xf32>
    %168 = vector.broadcast %167 : vector<1x128xf32> to vector<128x128xf32>
    %169 = arith.divf %165, %168 : vector<128x128xf32>
    %170 = vector.broadcast %151 : vector<128x1xf32> to vector<128x128xf32>
    %171 = arith.mulf %169, %170 : vector<128x128xf32>
    %cst_44 = arith.constant dense<0.000000e+00> : vector<128xf32>
    %172 = vector.multi_reduction <add>, %171, %cst_44 [0] : vector<128x128xf32> to vector<128xf32>
    %173 = vector.shape_cast %172 : vector<128xf32> to vector<1x128xf32>
    %174 = vector.extract_strided_slice %26 {offsets = [6, 0], sizes = [1, 128], strides = [1, 1]} : vector<8x128xf32> to vector<1x128xf32>
    %175 = vector.extract_strided_slice %27 {offsets = [0, 6], sizes = [128, 1], strides = [1, 1]} : vector<128x8xf32> to vector<128x1xf32>
    %176 = vector.broadcast %28 : f32 to vector<1x128xf32>
    %177 = arith.mulf %176, %174 : vector<1x128xf32>
    %178 = vector.broadcast %29 : f32 to vector<1x128xf32>
    %179 = arith.addf %177, %178 : vector<1x128xf32>
    %cst_45 = arith.constant 1.250000e-01 : f32
    %180 = vector.broadcast %cst_45 : f32 to vector<1x128xf32>
    %181 = arith.mulf %179, %180 : vector<1x128xf32>
    %182 = vector.broadcast %175 : vector<128x1xf32> to vector<128x128xf32>
    %183 = vector.broadcast %181 : vector<1x128xf32> to vector<128x128xf32>
    %184 = arith.mulf %182, %183 : vector<128x128xf32>
    %cst_46 = arith.constant dense<0xFF800000> : vector<128xf32>
    %185 = vector.multi_reduction <maximumf>, %184, %cst_46 [0] : vector<128x128xf32> to vector<128xf32>
    %186 = vector.shape_cast %185 : vector<128xf32> to vector<1x128xf32>
    %187 = vector.broadcast %186 : vector<1x128xf32> to vector<128x128xf32>
    %188 = arith.subf %184, %187 : vector<128x128xf32>
    %189 = math.exp %188 : vector<128x128xf32>
    %cst_47 = arith.constant dense<0.000000e+00> : vector<128xf32>
    %190 = vector.multi_reduction <add>, %189, %cst_47 [0] : vector<128x128xf32> to vector<128xf32>
    %191 = vector.shape_cast %190 : vector<128xf32> to vector<1x128xf32>
    %192 = vector.broadcast %191 : vector<1x128xf32> to vector<128x128xf32>
    %193 = arith.divf %189, %192 : vector<128x128xf32>
    %194 = vector.broadcast %175 : vector<128x1xf32> to vector<128x128xf32>
    %195 = arith.mulf %193, %194 : vector<128x128xf32>
    %cst_48 = arith.constant dense<0.000000e+00> : vector<128xf32>
    %196 = vector.multi_reduction <add>, %195, %cst_48 [0] : vector<128x128xf32> to vector<128xf32>
    %197 = vector.shape_cast %196 : vector<128xf32> to vector<1x128xf32>
    %198 = vector.extract_strided_slice %26 {offsets = [7, 0], sizes = [1, 128], strides = [1, 1]} : vector<8x128xf32> to vector<1x128xf32>
    %199 = vector.extract_strided_slice %27 {offsets = [0, 7], sizes = [128, 1], strides = [1, 1]} : vector<128x8xf32> to vector<128x1xf32>
    %200 = vector.broadcast %28 : f32 to vector<1x128xf32>
    %201 = arith.mulf %200, %198 : vector<1x128xf32>
    %202 = vector.broadcast %29 : f32 to vector<1x128xf32>
    %203 = arith.addf %201, %202 : vector<1x128xf32>
    %cst_49 = arith.constant 1.250000e-01 : f32
    %204 = vector.broadcast %cst_49 : f32 to vector<1x128xf32>
    %205 = arith.mulf %203, %204 : vector<1x128xf32>
    %206 = vector.broadcast %199 : vector<128x1xf32> to vector<128x128xf32>
    %207 = vector.broadcast %205 : vector<1x128xf32> to vector<128x128xf32>
    %208 = arith.mulf %206, %207 : vector<128x128xf32>
    %cst_50 = arith.constant dense<0xFF800000> : vector<128xf32>
    %209 = vector.multi_reduction <maximumf>, %208, %cst_50 [0] : vector<128x128xf32> to vector<128xf32>
    %210 = vector.shape_cast %209 : vector<128xf32> to vector<1x128xf32>
    %211 = vector.broadcast %210 : vector<1x128xf32> to vector<128x128xf32>
    %212 = arith.subf %208, %211 : vector<128x128xf32>
    %213 = math.exp %212 : vector<128x128xf32>
    %cst_51 = arith.constant dense<0.000000e+00> : vector<128xf32>
    %214 = vector.multi_reduction <add>, %213, %cst_51 [0] : vector<128x128xf32> to vector<128xf32>
    %215 = vector.shape_cast %214 : vector<128xf32> to vector<1x128xf32>
    %216 = vector.broadcast %215 : vector<1x128xf32> to vector<128x128xf32>
    %217 = arith.divf %213, %216 : vector<128x128xf32>
    %218 = vector.broadcast %199 : vector<128x1xf32> to vector<128x128xf32>
    %219 = arith.mulf %217, %218 : vector<128x128xf32>
    %cst_52 = arith.constant dense<0.000000e+00> : vector<128xf32>
    %220 = vector.multi_reduction <add>, %219, %cst_52 [0] : vector<128x128xf32> to vector<128xf32>
    %221 = vector.shape_cast %220 : vector<128xf32> to vector<1x128xf32>
    %222 = tpu.concatenate %53, %77, %101, %125, %149, %173, %197, %221 in 0 : vector<1x128xf32>, vector<1x128xf32>, vector<1x128xf32>, vector<1x128xf32>, vector<1x128xf32>, vector<1x128xf32>, vector<1x128xf32>, vector<1x128xf32> -> vector<8x128xf32>
    %c0_53 = arith.constant 0 : index
    %c0_54 = arith.constant 0 : index
    %223 = vector.load %arg10[%c0_53, %c0_54] : memref<128x128xf32, #tpu.memory_space<vmem>>, vector<128x128xf32>
    %cst_55 = arith.constant dense<0.000000e+00> : vector<8x128xf32>
    %224 = tpu.matmul %222, %223, %cst_55 {dimension_numbers = #tpu.dot_dimension_numbers<[1], [0], [0], [1], [0, 0, 1, 1], [], []>} : vector<8x128xf32>, vector<128x128xf32>, vector<8x128xf32> -> vector<8x128xf32>
    %c0_56 = arith.constant 0 : index
    %c0_57 = arith.constant 0 : index
    %225 = vector.load %arg11[%c0_56, %c0_57] : memref<1x128xf32, #tpu.memory_space<vmem>>, vector<1x128xf32>
    %226 = vector.broadcast %225 : vector<1x128xf32> to vector<8x128xf32>
    %227 = arith.addf %224, %226 : vector<8x128xf32>
    %cst_58 = arith.constant 0.000000e+00 : f32
    %228 = vector.broadcast %cst_58 : f32 to vector<8x128xf32>
    %229 = arith.maximumf %227, %228 : vector<8x128xf32>
    %c0_59 = arith.constant 0 : index
    %c0_60 = arith.constant 0 : index
    %230 = vector.load %arg12[%c0_59, %c0_60] : memref<1x128xf32, #tpu.memory_space<vmem>>, vector<1x128xf32>
    %231 = vector.broadcast %230 : vector<1x128xf32> to vector<8x128xf32>
    %232 = arith.mulf %229, %231 : vector<8x128xf32>
    %c0_61 = arith.constant 0 : index
    %c0_62 = arith.constant 0 : index
    %233 = vector.load %arg13[%c0_61, %c0_62] : memref<1x128xf32, #tpu.memory_space<vmem>>, vector<1x128xf32>
    %234 = vector.broadcast %233 : vector<1x128xf32> to vector<8x128xf32>
    %235 = arith.addf %232, %234 : vector<8x128xf32>
    %c0_63 = arith.constant 0 : index
    %c0_64 = arith.constant 0 : index
    %236 = vector.load %arg14[%c0_63, %c0_64] : memref<128x64xf32, #tpu.memory_space<vmem>>, vector<128x64xf32>
    %cst_65 = arith.constant dense<0.000000e+00> : vector<8x64xf32>
    %237 = tpu.matmul %235, %236, %cst_65 {dimension_numbers = #tpu.dot_dimension_numbers<[1], [0], [0], [1], [0, 0, 1, 1], [], []>} : vector<8x128xf32>, vector<128x64xf32>, vector<8x64xf32> -> vector<8x64xf32>
    %c0_66 = arith.constant 0 : index
    %c0_67 = arith.constant 0 : index
    %238 = vector.load %arg15[%c0_66, %c0_67] : memref<1x64xf32, #tpu.memory_space<vmem>>, vector<1x64xf32>
    %239 = vector.broadcast %238 : vector<1x64xf32> to vector<8x64xf32>
    %240 = arith.addf %237, %239 : vector<8x64xf32>
    %cst_68 = arith.constant 0.000000e+00 : f32
    %241 = vector.broadcast %cst_68 : f32 to vector<8x64xf32>
    %242 = arith.maximumf %240, %241 : vector<8x64xf32>
    %c0_69 = arith.constant 0 : index
    %c0_70 = arith.constant 0 : index
    %243 = vector.load %arg16[%c0_69, %c0_70] : memref<1x64xf32, #tpu.memory_space<vmem>>, vector<1x64xf32>
    %244 = vector.broadcast %243 : vector<1x64xf32> to vector<8x64xf32>
    %245 = arith.mulf %242, %244 : vector<8x64xf32>
    %c0_71 = arith.constant 0 : index
    %c0_72 = arith.constant 0 : index
    %246 = vector.load %arg17[%c0_71, %c0_72] : memref<1x64xf32, #tpu.memory_space<vmem>>, vector<1x64xf32>
    %247 = vector.broadcast %246 : vector<1x64xf32> to vector<8x64xf32>
    %248 = arith.addf %245, %247 : vector<8x64xf32>
    %c0_73 = arith.constant 0 : index
    %c0_74 = arith.constant 0 : index
    %249 = vector.load %arg18[%c0_73, %c0_74] : memref<64x32xf32, #tpu.memory_space<vmem>>, vector<64x32xf32>
    %cst_75 = arith.constant dense<0.000000e+00> : vector<8x32xf32>
    %250 = tpu.matmul %248, %249, %cst_75 {dimension_numbers = #tpu.dot_dimension_numbers<[1], [0], [0], [1], [0, 0, 1, 1], [], []>} : vector<8x64xf32>, vector<64x32xf32>, vector<8x32xf32> -> vector<8x32xf32>
    %c0_76 = arith.constant 0 : index
    %c0_77 = arith.constant 0 : index
    %251 = vector.load %arg19[%c0_76, %c0_77] : memref<1x32xf32, #tpu.memory_space<vmem>>, vector<1x32xf32>
    %252 = vector.broadcast %251 : vector<1x32xf32> to vector<8x32xf32>
    %253 = arith.addf %250, %252 : vector<8x32xf32>
    %cst_78 = arith.constant 0.000000e+00 : f32
    %254 = vector.broadcast %cst_78 : f32 to vector<8x32xf32>
    %255 = arith.maximumf %253, %254 : vector<8x32xf32>
    %c0_79 = arith.constant 0 : index
    %c0_80 = arith.constant 0 : index
    %256 = vector.load %arg20[%c0_79, %c0_80] : memref<1x32xf32, #tpu.memory_space<vmem>>, vector<1x32xf32>
    %257 = vector.broadcast %256 : vector<1x32xf32> to vector<8x32xf32>
    %258 = arith.mulf %255, %257 : vector<8x32xf32>
    %c0_81 = arith.constant 0 : index
    %c0_82 = arith.constant 0 : index
    %259 = vector.load %arg21[%c0_81, %c0_82] : memref<1x32xf32, #tpu.memory_space<vmem>>, vector<1x32xf32>
    %260 = vector.broadcast %259 : vector<1x32xf32> to vector<8x32xf32>
    %261 = arith.addf %258, %260 : vector<8x32xf32>
    %c0_83 = arith.constant 0 : index
    %c0_84 = arith.constant 0 : index
    %262 = vector.load %arg22[%c0_83, %c0_84] : memref<32x16xf32, #tpu.memory_space<vmem>>, vector<32x16xf32>
    %cst_85 = arith.constant dense<0.000000e+00> : vector<8x16xf32>
    %263 = tpu.matmul %261, %262, %cst_85 {dimension_numbers = #tpu.dot_dimension_numbers<[1], [0], [0], [1], [0, 0, 1, 1], [], []>} : vector<8x32xf32>, vector<32x16xf32>, vector<8x16xf32> -> vector<8x16xf32>
    %c0_86 = arith.constant 0 : index
    %c0_87 = arith.constant 0 : index
    %264 = vector.load %arg23[%c0_86, %c0_87] : memref<1x16xf32, #tpu.memory_space<vmem>>, vector<1x16xf32>
    %265 = vector.broadcast %264 : vector<1x16xf32> to vector<8x16xf32>
    %266 = arith.addf %263, %265 : vector<8x16xf32>
    %cst_88 = arith.constant 0.000000e+00 : f32
    %267 = vector.broadcast %cst_88 : f32 to vector<8x16xf32>
    %268 = arith.maximumf %266, %267 : vector<8x16xf32>
    %c0_89 = arith.constant 0 : index
    %c0_90 = arith.constant 0 : index
    %269 = vector.load %arg24[%c0_89, %c0_90] : memref<1x16xf32, #tpu.memory_space<vmem>>, vector<1x16xf32>
    %270 = vector.broadcast %269 : vector<1x16xf32> to vector<8x16xf32>
    %271 = arith.mulf %268, %270 : vector<8x16xf32>
    %c0_91 = arith.constant 0 : index
    %c0_92 = arith.constant 0 : index
    %272 = vector.load %arg25[%c0_91, %c0_92] : memref<1x16xf32, #tpu.memory_space<vmem>>, vector<1x16xf32>
    %273 = vector.broadcast %272 : vector<1x16xf32> to vector<8x16xf32>
    %274 = arith.addf %271, %273 : vector<8x16xf32>
    %c0_93 = arith.constant 0 : index
    %c0_94 = arith.constant 0 : index
    %275 = vector.load %arg26[%c0_93, %c0_94] : memref<16x128xf32, #tpu.memory_space<vmem>>, vector<16x128xf32>
    %cst_95 = arith.constant dense<0.000000e+00> : vector<8x128xf32>
    %276 = tpu.matmul %274, %275, %cst_95 {dimension_numbers = #tpu.dot_dimension_numbers<[1], [0], [0], [1], [0, 0, 1, 1], [], []>} : vector<8x16xf32>, vector<16x128xf32>, vector<8x128xf32> -> vector<8x128xf32>
    %c0_96 = arith.constant 0 : index
    %c0_97 = arith.constant 0 : index
    %277 = vector.load %arg27[%c0_96, %c0_97] : memref<1x128xf32, #tpu.memory_space<vmem>>, vector<1x128xf32>
    %278 = vector.broadcast %277 : vector<1x128xf32> to vector<8x128xf32>
    %279 = arith.addf %276, %278 : vector<8x128xf32>
    %c0_98 = arith.constant 0 : index
    %c0_99 = arith.constant 0 : index
    %280 = vector.load %arg38[%c0_98, %c0_99] : memref<8x128xf32, #tpu.memory_space<vmem>>, vector<8x128xf32>
    tpu.vector_store %arg38[%c0_98, %c0_99], %279 {strides = array<i32>} : memref<8x128xf32, #tpu.memory_space<vmem>>, vector<8x128xf32>,
    %c2 = arith.constant 2 : index
    %281 = memref.load %arg0[%c2] : memref<4xf32, #tpu.memory_space<smem>>
    %c3 = arith.constant 3 : index
    %282 = memref.load %arg0[%c3] : memref<4xf32, #tpu.memory_space<smem>>
    %283 = vector.extract_strided_slice %26 {offsets = [0, 0], sizes = [1, 128], strides = [1, 1]} : vector<8x128xf32> to vector<1x128xf32>
    %284 = vector.extract_strided_slice %27 {offsets = [0, 0], sizes = [128, 1], strides = [1, 1]} : vector<128x8xf32> to vector<128x1xf32>
    %285 = vector.broadcast %281 : f32 to vector<1x128xf32>
    %286 = arith.mulf %285, %283 : vector<1x128xf32>
    %287 = vector.broadcast %282 : f32 to vector<1x128xf32>
    %288 = arith.addf %286, %287 : vector<1x128xf32>
    %cst_100 = arith.constant 1.250000e-01 : f32
    %289 = vector.broadcast %cst_100 : f32 to vector<1x128xf32>
    %290 = arith.mulf %288, %289 : vector<1x128xf32>
    %291 = vector.broadcast %284 : vector<128x1xf32> to vector<128x128xf32>
    %292 = vector.broadcast %290 : vector<1x128xf32> to vector<128x128xf32>
    %293 = arith.mulf %291, %292 : vector<128x128xf32>
    %cst_101 = arith.constant dense<0xFF800000> : vector<128xf32>
    %294 = vector.multi_reduction <maximumf>, %293, %cst_101 [0] : vector<128x128xf32> to vector<128xf32>
    %295 = vector.shape_cast %294 : vector<128xf32> to vector<1x128xf32>
    %296 = vector.broadcast %295 : vector<1x128xf32> to vector<128x128xf32>
    %297 = arith.subf %293, %296 : vector<128x128xf32>
    %298 = math.exp %297 : vector<128x128xf32>
    %cst_102 = arith.constant dense<0.000000e+00> : vector<128xf32>
    %299 = vector.multi_reduction <add>, %298, %cst_102 [0] : vector<128x128xf32> to vector<128xf32>
    %300 = vector.shape_cast %299 : vector<128xf32> to vector<1x128xf32>
    %301 = vector.broadcast %300 : vector<1x128xf32> to vector<128x128xf32>
    %302 = arith.divf %298, %301 : vector<128x128xf32>
    %303 = vector.broadcast %284 : vector<128x1xf32> to vector<128x128xf32>
    %304 = arith.mulf %302, %303 : vector<128x128xf32>
    %cst_103 = arith.constant dense<0.000000e+00> : vector<128xf32>
    %305 = vector.multi_reduction <add>, %304, %cst_103 [0] : vector<128x128xf32> to vector<128xf32>
    %306 = vector.shape_cast %305 : vector<128xf32> to vector<1x128xf32>
    %307 = vector.extract_strided_slice %26 {offsets = [1, 0], sizes = [1, 128], strides = [1, 1]} : vector<8x128xf32> to vector<1x128xf32>
    %308 = vector.extract_strided_slice %27 {offsets = [0, 1], sizes = [128, 1], strides = [1, 1]} : vector<128x8xf32> to vector<128x1xf32>
    %309 = vector.broadcast %281 : f32 to vector<1x128xf32>
    %310 = arith.mulf %309, %307 : vector<1x128xf32>
    %311 = vector.broadcast %282 : f32 to vector<1x128xf32>
    %312 = arith.addf %310, %311 : vector<1x128xf32>
    %cst_104 = arith.constant 1.250000e-01 : f32
    %313 = vector.broadcast %cst_104 : f32 to vector<1x128xf32>
    %314 = arith.mulf %312, %313 : vector<1x128xf32>
    %315 = vector.broadcast %308 : vector<128x1xf32> to vector<128x128xf32>
    %316 = vector.broadcast %314 : vector<1x128xf32> to vector<128x128xf32>
    %317 = arith.mulf %315, %316 : vector<128x128xf32>
    %cst_105 = arith.constant dense<0xFF800000> : vector<128xf32>
    %318 = vector.multi_reduction <maximumf>, %317, %cst_105 [0] : vector<128x128xf32> to vector<128xf32>
    %319 = vector.shape_cast %318 : vector<128xf32> to vector<1x128xf32>
    %320 = vector.broadcast %319 : vector<1x128xf32> to vector<128x128xf32>
    %321 = arith.subf %317, %320 : vector<128x128xf32>
    %322 = math.exp %321 : vector<128x128xf32>
    %cst_106 = arith.constant dense<0.000000e+00> : vector<128xf32>
    %323 = vector.multi_reduction <add>, %322, %cst_106 [0] : vector<128x128xf32> to vector<128xf32>
    %324 = vector.shape_cast %323 : vector<128xf32> to vector<1x128xf32>
    %325 = vector.broadcast %324 : vector<1x128xf32> to vector<128x128xf32>
    %326 = arith.divf %322, %325 : vector<128x128xf32>
    %327 = vector.broadcast %308 : vector<128x1xf32> to vector<128x128xf32>
    %328 = arith.mulf %326, %327 : vector<128x128xf32>
    %cst_107 = arith.constant dense<0.000000e+00> : vector<128xf32>
    %329 = vector.multi_reduction <add>, %328, %cst_107 [0] : vector<128x128xf32> to vector<128xf32>
    %330 = vector.shape_cast %329 : vector<128xf32> to vector<1x128xf32>
    %331 = vector.extract_strided_slice %26 {offsets = [2, 0], sizes = [1, 128], strides = [1, 1]} : vector<8x128xf32> to vector<1x128xf32>
    %332 = vector.extract_strided_slice %27 {offsets = [0, 2], sizes = [128, 1], strides = [1, 1]} : vector<128x8xf32> to vector<128x1xf32>
    %333 = vector.broadcast %281 : f32 to vector<1x128xf32>
    %334 = arith.mulf %333, %331 : vector<1x128xf32>
    %335 = vector.broadcast %282 : f32 to vector<1x128xf32>
    %336 = arith.addf %334, %335 : vector<1x128xf32>
    %cst_108 = arith.constant 1.250000e-01 : f32
    %337 = vector.broadcast %cst_108 : f32 to vector<1x128xf32>
    %338 = arith.mulf %336, %337 : vector<1x128xf32>
    %339 = vector.broadcast %332 : vector<128x1xf32> to vector<128x128xf32>
    %340 = vector.broadcast %338 : vector<1x128xf32> to vector<128x128xf32>
    %341 = arith.mulf %339, %340 : vector<128x128xf32>
    %cst_109 = arith.constant dense<0xFF800000> : vector<128xf32>
    %342 = vector.multi_reduction <maximumf>, %341, %cst_109 [0] : vector<128x128xf32> to vector<128xf32>
    %343 = vector.shape_cast %342 : vector<128xf32> to vector<1x128xf32>
    %344 = vector.broadcast %343 : vector<1x128xf32> to vector<128x128xf32>
    %345 = arith.subf %341, %344 : vector<128x128xf32>
    %346 = math.exp %345 : vector<128x128xf32>
    %cst_110 = arith.constant dense<0.000000e+00> : vector<128xf32>
    %347 = vector.multi_reduction <add>, %346, %cst_110 [0] : vector<128x128xf32> to vector<128xf32>
    %348 = vector.shape_cast %347 : vector<128xf32> to vector<1x128xf32>
    %349 = vector.broadcast %348 : vector<1x128xf32> to vector<128x128xf32>
    %350 = arith.divf %346, %349 : vector<128x128xf32>
    %351 = vector.broadcast %332 : vector<128x1xf32> to vector<128x128xf32>
    %352 = arith.mulf %350, %351 : vector<128x128xf32>
    %cst_111 = arith.constant dense<0.000000e+00> : vector<128xf32>
    %353 = vector.multi_reduction <add>, %352, %cst_111 [0] : vector<128x128xf32> to vector<128xf32>
    %354 = vector.shape_cast %353 : vector<128xf32> to vector<1x128xf32>
    %355 = vector.extract_strided_slice %26 {offsets = [3, 0], sizes = [1, 128], strides = [1, 1]} : vector<8x128xf32> to vector<1x128xf32>
    %356 = vector.extract_strided_slice %27 {offsets = [0, 3], sizes = [128, 1], strides = [1, 1]} : vector<128x8xf32> to vector<128x1xf32>
    %357 = vector.broadcast %281 : f32 to vector<1x128xf32>
    %358 = arith.mulf %357, %355 : vector<1x128xf32>
    %359 = vector.broadcast %282 : f32 to vector<1x128xf32>
    %360 = arith.addf %358, %359 : vector<1x128xf32>
    %cst_112 = arith.constant 1.250000e-01 : f32
    %361 = vector.broadcast %cst_112 : f32 to vector<1x128xf32>
    %362 = arith.mulf %360, %361 : vector<1x128xf32>
    %363 = vector.broadcast %356 : vector<128x1xf32> to vector<128x128xf32>
    %364 = vector.broadcast %362 : vector<1x128xf32> to vector<128x128xf32>
    %365 = arith.mulf %363, %364 : vector<128x128xf32>
    %cst_113 = arith.constant dense<0xFF800000> : vector<128xf32>
    %366 = vector.multi_reduction <maximumf>, %365, %cst_113 [0] : vector<128x128xf32> to vector<128xf32>
    %367 = vector.shape_cast %366 : vector<128xf32> to vector<1x128xf32>
    %368 = vector.broadcast %367 : vector<1x128xf32> to vector<128x128xf32>
    %369 = arith.subf %365, %368 : vector<128x128xf32>
    %370 = math.exp %369 : vector<128x128xf32>
    %cst_114 = arith.constant dense<0.000000e+00> : vector<128xf32>
    %371 = vector.multi_reduction <add>, %370, %cst_114 [0] : vector<128x128xf32> to vector<128xf32>
    %372 = vector.shape_cast %371 : vector<128xf32> to vector<1x128xf32>
    %373 = vector.broadcast %372 : vector<1x128xf32> to vector<128x128xf32>
    %374 = arith.divf %370, %373 : vector<128x128xf32>
    %375 = vector.broadcast %356 : vector<128x1xf32> to vector<128x128xf32>
    %376 = arith.mulf %374, %375 : vector<128x128xf32>
    %cst_115 = arith.constant dense<0.000000e+00> : vector<128xf32>
    %377 = vector.multi_reduction <add>, %376, %cst_115 [0] : vector<128x128xf32> to vector<128xf32>
    %378 = vector.shape_cast %377 : vector<128xf32> to vector<1x128xf32>
    %379 = vector.extract_strided_slice %26 {offsets = [4, 0], sizes = [1, 128], strides = [1, 1]} : vector<8x128xf32> to vector<1x128xf32>
    %380 = vector.extract_strided_slice %27 {offsets = [0, 4], sizes = [128, 1], strides = [1, 1]} : vector<128x8xf32> to vector<128x1xf32>
    %381 = vector.broadcast %281 : f32 to vector<1x128xf32>
    %382 = arith.mulf %381, %379 : vector<1x128xf32>
    %383 = vector.broadcast %282 : f32 to vector<1x128xf32>
    %384 = arith.addf %382, %383 : vector<1x128xf32>
    %cst_116 = arith.constant 1.250000e-01 : f32
    %385 = vector.broadcast %cst_116 : f32 to vector<1x128xf32>
    %386 = arith.mulf %384, %385 : vector<1x128xf32>
    %387 = vector.broadcast %380 : vector<128x1xf32> to vector<128x128xf32>
    %388 = vector.broadcast %386 : vector<1x128xf32> to vector<128x128xf32>
    %389 = arith.mulf %387, %388 : vector<128x128xf32>
    %cst_117 = arith.constant dense<0xFF800000> : vector<128xf32>
    %390 = vector.multi_reduction <maximumf>, %389, %cst_117 [0] : vector<128x128xf32> to vector<128xf32>
    %391 = vector.shape_cast %390 : vector<128xf32> to vector<1x128xf32>
    %392 = vector.broadcast %391 : vector<1x128xf32> to vector<128x128xf32>
    %393 = arith.subf %389, %392 : vector<128x128xf32>
    %394 = math.exp %393 : vector<128x128xf32>
    %cst_118 = arith.constant dense<0.000000e+00> : vector<128xf32>
    %395 = vector.multi_reduction <add>, %394, %cst_118 [0] : vector<128x128xf32> to vector<128xf32>
    %396 = vector.shape_cast %395 : vector<128xf32> to vector<1x128xf32>
    %397 = vector.broadcast %396 : vector<1x128xf32> to vector<128x128xf32>
    %398 = arith.divf %394, %397 : vector<128x128xf32>
    %399 = vector.broadcast %380 : vector<128x1xf32> to vector<128x128xf32>
    %400 = arith.mulf %398, %399 : vector<128x128xf32>
    %cst_119 = arith.constant dense<0.000000e+00> : vector<128xf32>
    %401 = vector.multi_reduction <add>, %400, %cst_119 [0] : vector<128x128xf32> to vector<128xf32>
    %402 = vector.shape_cast %401 : vector<128xf32> to vector<1x128xf32>
    %403 = vector.extract_strided_slice %26 {offsets = [5, 0], sizes = [1, 128], strides = [1, 1]} : vector<8x128xf32> to vector<1x128xf32>
    %404 = vector.extract_strided_slice %27 {offsets = [0, 5], sizes = [128, 1], strides = [1, 1]} : vector<128x8xf32> to vector<128x1xf32>
    %405 = vector.broadcast %281 : f32 to vector<1x128xf32>
    %406 = arith.mulf %405, %403 : vector<1x128xf32>
    %407 = vector.broadcast %282 : f32 to vector<1x128xf32>
    %408 = arith.addf %406, %407 : vector<1x128xf32>
    %cst_120 = arith.constant 1.250000e-01 : f32
    %409 = vector.broadcast %cst_120 : f32 to vector<1x128xf32>
    %410 = arith.mulf %408, %409 : vector<1x128xf32>
    %411 = vector.broadcast %404 : vector<128x1xf32> to vector<128x128xf32>
    %412 = vector.broadcast %410 : vector<1x128xf32> to vector<128x128xf32>
    %413 = arith.mulf %411, %412 : vector<128x128xf32>
    %cst_121 = arith.constant dense<0xFF800000> : vector<128xf32>
    %414 = vector.multi_reduction <maximumf>, %413, %cst_121 [0] : vector<128x128xf32> to vector<128xf32>
    %415 = vector.shape_cast %414 : vector<128xf32> to vector<1x128xf32>
    %416 = vector.broadcast %415 : vector<1x128xf32> to vector<128x128xf32>
    %417 = arith.subf %413, %416 : vector<128x128xf32>
    %418 = math.exp %417 : vector<128x128xf32>
    %cst_122 = arith.constant dense<0.000000e+00> : vector<128xf32>
    %419 = vector.multi_reduction <add>, %418, %cst_122 [0] : vector<128x128xf32> to vector<128xf32>
    %420 = vector.shape_cast %419 : vector<128xf32> to vector<1x128xf32>
    %421 = vector.broadcast %420 : vector<1x128xf32> to vector<128x128xf32>
    %422 = arith.divf %418, %421 : vector<128x128xf32>
    %423 = vector.broadcast %404 : vector<128x1xf32> to vector<128x128xf32>
    %424 = arith.mulf %422, %423 : vector<128x128xf32>
    %cst_123 = arith.constant dense<0.000000e+00> : vector<128xf32>
    %425 = vector.multi_reduction <add>, %424, %cst_123 [0] : vector<128x128xf32> to vector<128xf32>
    %426 = vector.shape_cast %425 : vector<128xf32> to vector<1x128xf32>
    %427 = vector.extract_strided_slice %26 {offsets = [6, 0], sizes = [1, 128], strides = [1, 1]} : vector<8x128xf32> to vector<1x128xf32>
    %428 = vector.extract_strided_slice %27 {offsets = [0, 6], sizes = [128, 1], strides = [1, 1]} : vector<128x8xf32> to vector<128x1xf32>
    %429 = vector.broadcast %281 : f32 to vector<1x128xf32>
    %430 = arith.mulf %429, %427 : vector<1x128xf32>
    %431 = vector.broadcast %282 : f32 to vector<1x128xf32>
    %432 = arith.addf %430, %431 : vector<1x128xf32>
    %cst_124 = arith.constant 1.250000e-01 : f32
    %433 = vector.broadcast %cst_124 : f32 to vector<1x128xf32>
    %434 = arith.mulf %432, %433 : vector<1x128xf32>
    %435 = vector.broadcast %428 : vector<128x1xf32> to vector<128x128xf32>
    %436 = vector.broadcast %434 : vector<1x128xf32> to vector<128x128xf32>
    %437 = arith.mulf %435, %436 : vector<128x128xf32>
    %cst_125 = arith.constant dense<0xFF800000> : vector<128xf32>
    %438 = vector.multi_reduction <maximumf>, %437, %cst_125 [0] : vector<128x128xf32> to vector<128xf32>
    %439 = vector.shape_cast %438 : vector<128xf32> to vector<1x128xf32>
    %440 = vector.broadcast %439 : vector<1x128xf32> to vector<128x128xf32>
    %441 = arith.subf %437, %440 : vector<128x128xf32>
    %442 = math.exp %441 : vector<128x128xf32>
    %cst_126 = arith.constant dense<0.000000e+00> : vector<128xf32>
    %443 = vector.multi_reduction <add>, %442, %cst_126 [0] : vector<128x128xf32> to vector<128xf32>
    %444 = vector.shape_cast %443 : vector<128xf32> to vector<1x128xf32>
    %445 = vector.broadcast %444 : vector<1x128xf32> to vector<128x128xf32>
    %446 = arith.divf %442, %445 : vector<128x128xf32>
    %447 = vector.broadcast %428 : vector<128x1xf32> to vector<128x128xf32>
    %448 = arith.mulf %446, %447 : vector<128x128xf32>
    %cst_127 = arith.constant dense<0.000000e+00> : vector<128xf32>
    %449 = vector.multi_reduction <add>, %448, %cst_127 [0] : vector<128x128xf32> to vector<128xf32>
    %450 = vector.shape_cast %449 : vector<128xf32> to vector<1x128xf32>
    %451 = vector.extract_strided_slice %26 {offsets = [7, 0], sizes = [1, 128], strides = [1, 1]} : vector<8x128xf32> to vector<1x128xf32>
    %452 = vector.extract_strided_slice %27 {offsets = [0, 7], sizes = [128, 1], strides = [1, 1]} : vector<128x8xf32> to vector<128x1xf32>
    %453 = vector.broadcast %281 : f32 to vector<1x128xf32>
    %454 = arith.mulf %453, %451 : vector<1x128xf32>
    %455 = vector.broadcast %282 : f32 to vector<1x128xf32>
    %456 = arith.addf %454, %455 : vector<1x128xf32>
    %cst_128 = arith.constant 1.250000e-01 : f32
    %457 = vector.broadcast %cst_128 : f32 to vector<1x128xf32>
    %458 = arith.mulf %456, %457 : vector<1x128xf32>
    %459 = vector.broadcast %452 : vector<128x1xf32> to vector<128x128xf32>
    %460 = vector.broadcast %458 : vector<1x128xf32> to vector<128x128xf32>
    %461 = arith.mulf %459, %460 : vector<128x128xf32>
    %cst_129 = arith.constant dense<0xFF800000> : vector<128xf32>
    %462 = vector.multi_reduction <maximumf>, %461, %cst_129 [0] : vector<128x128xf32> to vector<128xf32>
    %463 = vector.shape_cast %462 : vector<128xf32> to vector<1x128xf32>
    %464 = vector.broadcast %463 : vector<1x128xf32> to vector<128x128xf32>
    %465 = arith.subf %461, %464 : vector<128x128xf32>
    %466 = math.exp %465 : vector<128x128xf32>
    %cst_130 = arith.constant dense<0.000000e+00> : vector<128xf32>
    %467 = vector.multi_reduction <add>, %466, %cst_130 [0] : vector<128x128xf32> to vector<128xf32>
    %468 = vector.shape_cast %467 : vector<128xf32> to vector<1x128xf32>
    %469 = vector.broadcast %468 : vector<1x128xf32> to vector<128x128xf32>
    %470 = arith.divf %466, %469 : vector<128x128xf32>
    %471 = vector.broadcast %452 : vector<128x1xf32> to vector<128x128xf32>
    %472 = arith.mulf %470, %471 : vector<128x128xf32>
    %cst_131 = arith.constant dense<0.000000e+00> : vector<128xf32>
    %473 = vector.multi_reduction <add>, %472, %cst_131 [0] : vector<128x128xf32> to vector<128xf32>
    %474 = vector.shape_cast %473 : vector<128xf32> to vector<1x128xf32>
    %475 = tpu.concatenate %306, %330, %354, %378, %402, %426, %450, %474 in 0 : vector<1x128xf32>, vector<1x128xf32>, vector<1x128xf32>, vector<1x128xf32>, vector<1x128xf32>, vector<1x128xf32>, vector<1x128xf32>, vector<1x128xf32> -> vector<8x128xf32>
    %c0_132 = arith.constant 0 : index
    %c0_133 = arith.constant 0 : index
    %476 = vector.load %arg28[%c0_132, %c0_133] : memref<128x128xf32, #tpu.memory_space<vmem>>, vector<128x128xf32>
    %cst_134 = arith.constant dense<0.000000e+00> : vector<8x128xf32>
    %477 = tpu.matmul %475, %476, %cst_134 {dimension_numbers = #tpu.dot_dimension_numbers<[1], [0], [0], [1], [0, 0, 1, 1], [], []>} : vector<8x128xf32>, vector<128x128xf32>, vector<8x128xf32> -> vector<8x128xf32>
    %c0_135 = arith.constant 0 : index
    %c0_136 = arith.constant 0 : index
    %478 = vector.load %arg29[%c0_135, %c0_136] : memref<1x128xf32, #tpu.memory_space<vmem>>, vector<1x128xf32>
    %479 = vector.broadcast %478 : vector<1x128xf32> to vector<8x128xf32>
    %480 = arith.addf %477, %479 : vector<8x128xf32>
    %cst_137 = arith.constant 0.000000e+00 : f32
    %481 = vector.broadcast %cst_137 : f32 to vector<8x128xf32>
    %482 = arith.maximumf %480, %481 : vector<8x128xf32>
    %c0_138 = arith.constant 0 : index
    %c0_139 = arith.constant 0 : index
    %483 = vector.load %arg30[%c0_138, %c0_139] : memref<1x128xf32, #tpu.memory_space<vmem>>, vector<1x128xf32>
    %484 = vector.broadcast %483 : vector<1x128xf32> to vector<8x128xf32>
    %485 = arith.mulf %482, %484 : vector<8x128xf32>
    %c0_140 = arith.constant 0 : index
    %c0_141 = arith.constant 0 : index
    %486 = vector.load %arg31[%c0_140, %c0_141] : memref<1x128xf32, #tpu.memory_space<vmem>>, vector<1x128xf32>
    %487 = vector.broadcast %486 : vector<1x128xf32> to vector<8x128xf32>
    %488 = arith.addf %485, %487 : vector<8x128xf32>
    %c0_142 = arith.constant 0 : index
    %c0_143 = arith.constant 0 : index
    %489 = vector.load %arg32[%c0_142, %c0_143] : memref<128x32xf32, #tpu.memory_space<vmem>>, vector<128x32xf32>
    %cst_144 = arith.constant dense<0.000000e+00> : vector<8x32xf32>
    %490 = tpu.matmul %488, %489, %cst_144 {dimension_numbers = #tpu.dot_dimension_numbers<[1], [0], [0], [1], [0, 0, 1, 1], [], []>} : vector<8x128xf32>, vector<128x32xf32>, vector<8x32xf32> -> vector<8x32xf32>
    %c0_145 = arith.constant 0 : index
    %c0_146 = arith.constant 0 : index
    %491 = vector.load %arg33[%c0_145, %c0_146] : memref<1x32xf32, #tpu.memory_space<vmem>>, vector<1x32xf32>
    %492 = vector.broadcast %491 : vector<1x32xf32> to vector<8x32xf32>
    %493 = arith.addf %490, %492 : vector<8x32xf32>
    %cst_147 = arith.constant 0.000000e+00 : f32
    %494 = vector.broadcast %cst_147 : f32 to vector<8x32xf32>
    %495 = arith.maximumf %493, %494 : vector<8x32xf32>
    %c0_148 = arith.constant 0 : index
    %c0_149 = arith.constant 0 : index
    %496 = vector.load %arg34[%c0_148, %c0_149] : memref<1x32xf32, #tpu.memory_space<vmem>>, vector<1x32xf32>
    %497 = vector.broadcast %496 : vector<1x32xf32> to vector<8x32xf32>
    %498 = arith.mulf %495, %497 : vector<8x32xf32>
    %c0_150 = arith.constant 0 : index
    %c0_151 = arith.constant 0 : index
    %499 = vector.load %arg35[%c0_150, %c0_151] : memref<1x32xf32, #tpu.memory_space<vmem>>, vector<1x32xf32>
    %500 = vector.broadcast %499 : vector<1x32xf32> to vector<8x32xf32>
    %501 = arith.addf %498, %500 : vector<8x32xf32>
    %c0_152 = arith.constant 0 : index
    %c0_153 = arith.constant 0 : index
    %502 = vector.load %arg36[%c0_152, %c0_153] : memref<32x128xf32, #tpu.memory_space<vmem>>, vector<32x128xf32>
    %cst_154 = arith.constant dense<0.000000e+00> : vector<8x128xf32>
    %503 = tpu.matmul %501, %502, %cst_154 {dimension_numbers = #tpu.dot_dimension_numbers<[1], [0], [0], [1], [0, 0, 1, 1], [], []>} : vector<8x32xf32>, vector<32x128xf32>, vector<8x128xf32> -> vector<8x128xf32>
    %c0_155 = arith.constant 0 : index
    %c0_156 = arith.constant 0 : index
    %504 = vector.load %arg37[%c0_155, %c0_156] : memref<1x128xf32, #tpu.memory_space<vmem>>, vector<1x128xf32>
    %505 = vector.broadcast %504 : vector<1x128xf32> to vector<8x128xf32>
    %506 = arith.addf %503, %505 : vector<8x128xf32>
    %c0_157 = arith.constant 0 : index
    %c0_158 = arith.constant 0 : index
    %507 = vector.load %arg39[%c0_157, %c0_158] : memref<8x128xf32, #tpu.memory_space<vmem>>, vector<8x128xf32>
    tpu.vector_store %arg39[%c0_157, %c0_158], %506 {strides = array<i32>} : memref<8x128xf32, #tpu.memory_space<vmem>>, vector<8x128xf32>,
    return
  }
}

</mosaic_0001>

<bundles_post_ra>
// kernel: two_task_at_forward.1
= control target key start
LH: loop header
LB: loop body
LE: loop exit
PB: predicated region body
PF: predicated region fallthrough
CT: control target
= control target key end

     0   :  { %s5735_s6 = smov 1   ;;  %s5736_s10 = smov 2   ;;  %s10777_s0 = inlined_call_operand.smem [shape: u32[40], index: -1, kind: input, shape index: {}] }
   0x1   :  { %s5795_s5 = sld [smem:[%s10777_s0]]   ;;  %s5737_s14 = smov 3  }
   0x2   :  { %s5800_s9 = sld [smem:[%s10777_s0 + %s5735_s6]]   ;;  %s5738_s18 = smov 4  }
   0x3   :  { %s5805_s13 = sld [smem:[%s10777_s0 + %s5736_s10]]   ;;  %s5739_s22 = smov 5  }
   0x4   :  { %s5810_s17 = sld [smem:[%s10777_s0 + %s5737_s14]]   ;;  %s5740_s26 = smov 6  }
   0x5   :  { %s5815_s21 = sld [smem:[%s10777_s0 + %s5738_s18]]   ;;  %s5741_s30 = smov 7  }
   0x6   :  { %s5820_s25 = sld [smem:[%s10777_s0 + %s5739_s22]]   ;;  %s5742_s4 = smov 8  }
   0x7   :  { %s5825_s29 = sld [smem:[%s10777_s0 + %s5740_s26]]   ;;  %s5743_s10 = smov 9  }
   0x8   :  { %s5830_s3 = sld [smem:[%s10777_s0 + %s5741_s30]]   ;;  %s5744_s15 = smov 10  }
   0x9   :  { %s5835_s8 = sld [smem:[%s10777_s0 + %s5742_s4]]   ;;  %s5745_s20 = smov 11  }
   0xa   :  { %s5840_s14 = sld [smem:[%s10777_s0 + %s5743_s10]]   ;;  %s5746_s26 = smov 12  }
   0xb   :  { %s5845_s19 = sld [smem:[%s10777_s0 + %s5744_s15]]   ;;  %s5747_s1 = smov 13  }
   0xc   :  { %s5850_s24 = sld [smem:[%s10777_s0 + %s5745_s20]]   ;;  %s5748_s7 = smov 14  }
   0xd   :  { %s5855_s30 = sld [smem:[%s10777_s0 + %s5746_s26]]   ;;  %s5749_s15 = smov 15  }
   0xe   :  { %s5860_s6 = sld [smem:[%s10777_s0 + %s5747_s1]]   ;;  %s5750_s22 = smov 16  }
   0xf   :  { %s5865_s12 = sld [smem:[%s10777_s0 + %s5748_s7]]   ;;  %s5751_s28 = smov 17  }
  0x10   :  { %s5870_s20 = sld [smem:[%s10777_s0 + %s5749_s15]]   ;;  %s5752_s7 = smov 18  }
  0x11   :  { %s5875_s27 = sld [smem:[%s10777_s0 + %s5750_s22]]   ;;  %s5753_s15 = smov 19  }
  0x12   :  { %s5880_s4 = sld [smem:[%s10777_s0 + %s5751_s28]]   ;;  %s5754_s22 = smov 20  }
  0x13   :  { %11522 = sst [smem:[#allocation8_spill]] %s5855_s30  ;;  %s5755_s28 = smov 21  }
  0x14   :  { %11523 = sst [smem:[#allocation9_spill]] %s5860_s6 }
  0x15   :  { %s5885_s6 = sld [smem:[%s10777_s0 + %s5752_s7]]   ;;  %s5756_s7 = smov 22  }
  0x16   :  { %11524 = sst [smem:[#allocation10_spill]] %s5870_s20 }
  0x17   :  { %11525 = sst [smem:[#allocation11_spill]] %s5875_s27 }
  0x18   :  { %11526 = sst [smem:[#allocation12_spill]] %s5880_s4 }
  0x19   :  { %s5890_s20 = sld [smem:[%s10777_s0 + %s5753_s15]]   ;;  %s5757_s15 = smov 23  }
  0x1a   :  { %s5895_s27 = sld [smem:[%s10777_s0 + %s5754_s22]]   ;;  %s5758_s22 = smov 24  }
  0x1b   :  { %s5900_s4 = sld [smem:[%s10777_s0 + %s5755_s28]]   ;;  %s5759_s28 = smov 25  }
  0x1c   :  { %s5905_s30 = sld [smem:[%s10777_s0 + %s5756_s7]]   ;;  %s5760_s7 = smov 26  }
  0x1f   :  { %11527 = sst [smem:[#allocation13_spill]] %s5890_s20 }
  0x20   :  { %11528 = sst [smem:[#allocation14_spill]] %s5895_s27 }
  0x21   :  { %11529 = sst [smem:[#allocation15_spill]] %s5900_s4 }
  0x22   :  { %11530 = sst [smem:[#allocation16_spill]] %s5905_s30 }
  0x23   :  { %s5910_s20 = sld [smem:[%s10777_s0 + %s5757_s15]]   ;;  %s5761_s15 = smov 27  }
  0x24   :  { %s5915_s27 = sld [smem:[%s10777_s0 + %s5758_s22]]   ;;  %s5762_s22 = smov 28  }
  0x25   :  { %s5920_s4 = sld [smem:[%s10777_s0 + %s5759_s28]]   ;;  %s5763_s28 = smov 29  }
  0x26   :  { %s5925_s30 = sld [smem:[%s10777_s0 + %s5760_s7]]   ;;  %s5764_s7 = smov 30  }
  0x29   :  { %11531 = sst [smem:[#allocation17_spill]] %s5910_s20 }
  0x2a   :  { %11532 = sst [smem:[#allocation18_spill]] %s5915_s27 }
  0x2b   :  { %11533 = sst [smem:[#allocation19_spill]] %s5920_s4 }
  0x2c   :  { %11534 = sst [smem:[#allocation20_spill]] %s5925_s30 }
  0x2d   :  { %s5930_s20 = sld [smem:[%s10777_s0 + %s5761_s15]]   ;;  %s5765_s15 = smov 31  }
  0x2e   :  { %s5935_s27 = sld [smem:[%s10777_s0 + %s5762_s22]]   ;;  %s5766_s22 = smov 32  }
  0x2f   :  { %s5940_s4 = sld [smem:[%s10777_s0 + %s5763_s28]]   ;;  %s5767_s28 = smov 33  }
  0x30   :  { %s5945_s30 = sld [smem:[%s10777_s0 + %s5764_s7]]   ;;  %s5768_s7 = smov 34  }
  0x33   :  { %11535 = sst [smem:[#allocation21_spill]] %s5930_s20 }
  0x34   :  { %11536 = sst [smem:[#allocation22_spill]] %s5935_s27 }
  0x35   :  { %11537 = sst [smem:[#allocation23_spill]] %s5940_s4 }
  0x36   :  { %11538 = sst [smem:[#allocation24_spill]] %s5945_s30 }
  0x37   :  { %s5950_s20 = sld [smem:[%s10777_s0 + %s5765_s15]]   ;;  %s5769_s15 = smov 35  }
  0x38   :  { %s5955_s27 = sld [smem:[%s10777_s0 + %s5766_s22]]   ;;  %s5770_s22 = smov 36  }
  0x39   :  { %s5960_s4 = sld [smem:[%s10777_s0 + %s5767_s28]]   ;;  %s5771_s28 = smov 37  }
  0x3a   :  { %s5965_s30 = sld [smem:[%s10777_s0 + %s5768_s7]]   ;;  %s5772_s7 = smov 38  }
  0x3d   :  { %11539 = sst [smem:[#allocation25_spill]] %s5950_s20 }
  0x3e   :  { %11540 = sst [smem:[#allocation26_spill]] %s5955_s27 }
  0x3f   :  { %11541 = sst [smem:[#allocation27_spill]] %s5960_s4 }
  0x40   :  { %11542 = sst [smem:[#allocation28_spill]] %s5965_s30 }
  0x41   :  { %s5970_s20 = sld [smem:[%s10777_s0 + %s5769_s15]]   ;;  %s5773_s15 = smov 39  }
  0x42   :  { %s5975_s27 = sld [smem:[%s10777_s0 + %s5770_s22]]  }
  0x43   :  { %s5980_s4 = sld [smem:[%s10777_s0 + %s5771_s28]]  }
  0x44   :  { %s5985_s30 = sld [smem:[%s10777_s0 + %s5772_s7]]  }
  0x47   :  { %11543 = sst [smem:[#allocation29_spill]] %s5970_s20 }
  0x48   :  { %s5990_s20 = sld [smem:[%s10777_s0 + %s5773_s15]]  }
  0x49   :  { %85 = vsyncpa [#allocation4], 0 }
  0x4a   :  { %86 = vsyncpa [#allocation3], 0  ;;  %s93_s22 = sshll.u32 %s5795_s5, 4  ;;  %s94_s22 = int_to_ptr.vmem [resolvable:$true] %s93_s22 }
  0x4b   :  { %s5697_s23 = scalar_lea.vmem %s94_s22, 16  ;;  %p5702_p1 = scmp.lt.s32.totalorder %s94_s22, %s94_s22 }
  0x4c   :  { %p5698_p0 = scmp.ne.s32.totalorder %s94_s22, %s5697_s23  ;;  %p5703_p2 = scmp.lt.s32.totalorder %s5697_s23, %s5697_s23 }
  0x4e   :  { %p5704_p3 = por %p5703_p2, %p5702_p1 }
  0x50   :  { %p5705_p4 = pnand %p5704_p3, %p5698_p0 }
  0x52   :  { %5708 = shalt.err (!%p5705_p4)
}
  0x53   :  { %s5774_s26 = smov [#allocation2]  }
  0x54   :  { %96 = dma.vmem_to_smem %s94_s22, 16, %s5774_s26, [#allocation4]  }
  0x55   :  { %5731 = dma.done.wait [#allocation4], 16  }
  0x56   :  { %5732 = vsyncadd [#allocation4], 4294967280 }
  0x57   :  { %174 = sfence }
  0x58   :  { %v176_v0 = vld [vmem:[%s5805_s13] sm:$0xff]  ;;  %v177_v1 = vld [vmem:[%s5805_s13 + $0x8] sm:$0xff]  ;;  %v178_v2 = vld [vmem:[%s5805_s13 + $0x10] sm:$0xff]  ;;  %v10784_v3 = vmov 0.0|0.0   ;;  %vm5776_vm0 = vmmov 0   ;;  %v10782_v6 = vmov 0.0   ;;  %v503_v38 = vlaneseq }
  0x59   :  { %4833 = vmatprep.subr.bf16.mxu0 %v10784_v3  ;;  %v4834_v4 = vpack.c.bf16 %v177_v1, %v176_v0  ;;  %v179_v5 = vld [vmem:[%s5805_s13 + $0x18] sm:$0xff]  ;;  %4623 = vmatprep.mubr.msk.f32.mxu0 %vm5776_vm0, %v10782_v6  ;;  %v278_v7 = vld [vmem:[%s5825_s29] sm:$0xff]  ;;  %v279_v8 = vld [vmem:[%s5825_s29 + $0x8] sm:$0xff]  ;;  %vm187_vm1 = vcmask 261120   ;;  %vm293_vm2 = vcmask 523264   ;;  %v10794_v30 = vmov 1  }
  0x5a   :  { %4839 = vmatprep.subr.bf16.mxu1 %v10784_v3  ;;  %v280_v9 = vld [vmem:[%s5825_s29 + $0x10] sm:$0xff]  ;;  %v281_v10 = vld [vmem:[%s5825_s29 + $0x18] sm:$0xff]  ;;  %4642 = vmatprep.mubr.msk.f32.mxu1 %vm5776_vm0, %v10782_v6  ;;  %v4837_v11 = vpack.c.bf16 %v179_v5, %v178_v2  ;;  %v4840_v12 = vpack.c.bf16 %v279_v8, %v278_v7  ;;  %v175_v14 = vld [vmem:[%s5800_s9] sm:$0xff]  ;;  %s4501_s0 = sld [smem:[#allocation2 + $0x2]]  ;;  %s4502_s5 = sld [smem:[#allocation2 + $0x3]]  ;;  %v6033_v42 = vshrl.u32 %v503_v38, 7 }
  0x5b   :  { %4835 = vmatpush3.bf16.msra.mxu0 %v4834_v4  ;;  %v4843_v13 = vpack.c.bf16 %v281_v10, %v280_v9  ;;  %v282_v15 = vld [vmem:[%s5825_s29 + $0x20] sm:$0xff]  ;;  %v283_v16 = vld [vmem:[%s5825_s29 + $0x28] sm:$0xff]  ;;  %v284_v18 = vld [vmem:[%s5825_s29 + $0x30] sm:$0xff]  ;;  %5027 = vset.pattern.permute.xlu1 %v10794_v30  ;;  %v10800_v63 = vmov 0   ;;  %v10796_v1 = vmov 2   ;;  %v10809_v2 = vmov 6  }
  0x5c   :  { %4836 = vmatprep.subr.bf16.mxu0 %v10784_v3  ;;  %4841 = vmatpush3.bf16.msra.mxu1 %v4840_v12  ;;  %v4846_v17 = vpack.c.bf16 %v283_v16, %v282_v15  ;;  %v285_v19 = vld [vmem:[%s5825_s29 + $0x38] sm:$0xff]  ;;  %v4476_v21 = vld [vmem:[%s5810_s17] ss:$0 sm:$0xff]  ;;  %v10792_v46 = vsub.s32 0, %v6033_v42  ;;  %v10793_v47 = vsub.s32 1, %v6033_v42  ;;  %v10791_v48 = vsub.s32 2, %v6033_v42 }
  0x5d   :  { %4842 = vmatprep.subr.bf16.mxu1 %v10784_v3  ;;  %v4849_v20 = vpack.c.bf16 %v285_v19, %v284_v18  ;;  %v4478_v25 = vld [vmem:[%s5815_s21] ss:$0 sm:$0xff]  ;;  %v10790_v49 = vsub.s32 3, %v6033_v42  ;;  %v10789_v51 = vsub.s32 4, %v6033_v42  ;;  %v10788_v52 = vsub.s32 5, %v6033_v42  ;;  %s416_s9 = sld [smem:[#allocation2]] }
  0x5e   :  { %v4479_v27 = vld [vmem:[%s5820_s25] ss:$0 sm:$0xff]  ;;  %v10787_v53 = vsub.s32 6, %v6033_v42  ;;  %v10786_v54 = vsub.s32 7, %v6033_v42  ;;  %v10798_v5 = vmov 3   ;;  %v10802_v7 = vmov 4  }
  0x5f   :  { %4838 = vmatpush3.bf16.msra.mxu0 %v4837_v11  ;;  %v4480_v31 = vld [vmem:[%s5830_s3] ss:$0 sm:$0xff]  ;;  %v10805_v8 = vmov 5   ;;  %v10813_v10 = vmov 7   ;;  %s4484_s13 = sld [smem:[#allocation2 + $0x1]]  ;;  %vm2263_vm3 = vcmask 1040384  }
  0x60   :  { %4851 = vmatprep.subr.bf16.mxu0 %v10784_v3  ;;  %4844 = vmatpush3.bf16.msra.mxu1 %v4843_v13  ;;  %v4482_v35 = vld [vmem:[%s5835_s8] ss:$0 sm:$0xff]  ;;  %v2789_v40 = vstv %s4501_s0  ;;  %v2791_v43 = vstv %s4502_s5  ;;  %vm2265_vm4 = vcmask 1041408   ;;  %vm2267_vm5 = vcmask 1042432   ;;  %s12843_s17 = sld [smem:[#allocation8_spill]]  ;;  %s12844_s21 = sld [smem:[#allocation9_spill]] }
  0x61   :  { %4845 = vmatprep.subr.bf16.mxu1 %v10784_v3  ;;  %v4483_v37 = vld [vmem:[%s5840_s14] ss:$0 sm:$0xff]  ;;  %vm2269_vm6 = vcmask 1043456   ;;  %vm2271_vm7 = vcmask 1044480   ;;  %vm2273_vm8 = vcmask 1045504   ;;  %vm2275_vm9 = vcmask 1046528  }
  0x62   :  { %4624 = vmatmul.mubr.msk.f32.vlgmr.msra.gmra.mrb[0].mxu0 %vm187_vm1, %v175_v14  ;;  %s12846_s25 = sld [smem:[#allocation10_spill]]  ;;  %s12847_s29 = sld [smem:[#allocation11_spill]]  ;;  %vm2712_vm10 = vcmask 130048  }
  0x63   :  { %4677 = vmatprep.mubr.msk.f32.mxu0 %vm5776_vm0, %v10782_v6  ;;  %s12848_s3 = sld [smem:[#allocation12_spill]]  ;;  %s12849_s8 = sld [smem:[#allocation16_spill]] }
  0x64   :  { %4847 = vmatpush3.bf16.msra.mxu1 %v4846_v17  ;;  %s12850_s14 = sld [smem:[#allocation13_spill]]  ;;  %s12855_s28 = sld [smem:[#allocation17_spill]] }
  0x65   :  { %4848 = vmatprep.subr.bf16.mxu1 %v10784_v3  ;;  %s12856_s1 = sld [smem:[#allocation18_spill]]  ;;  %s12858_s7 = sld [smem:[#allocation19_spill]] }
  0x66   :  { %s12857_s2 = sld [smem:[#allocation26_spill]]  ;;  %s12859_s10 = sld [smem:[#allocation23_spill]] }
  0x67   :  { %s12860_s11 = sld [smem:[#allocation24_spill]]  ;;  %s12861_s15 = sld [smem:[#allocation25_spill]] }
  0x68   :  { %4850 = vmatpush3.bf16.msra.mxu1 %v4849_v20  ;;  %s12862_s16 = sld [smem:[#allocation21_spill]]  ;;  %s12863_s18 = sld [smem:[#allocation27_spill]] }
  0x69   :  { %4875 = vmatprep.subr.bf16.mxu1 %v10784_v3  ;;  %s12864_s22 = sld [smem:[#allocation28_spill]]  ;;  %s12865_s23 = sld [smem:[#allocation29_spill]] }
 0x135   :  { %v257_v22 = vpop.f32.mrb[0].mxu0 }
 0x136   :  { %v258_v23 = vadd.f32 %v4476_v21, %v257_v22  ;;  %v4625_v24 = vpop.f32.mrb[1].mxu0 }
 0x138   :  { %v261_v26 = vmax.f32 %v258_v23, 0.0 }
 0x13a   :  { %v269_v28 = vmul.f32 %v4478_v25, %v261_v26 }
 0x13c   :  { %v277_v29 = vadd.f32 %v4479_v27, %v269_v28 }
 0x13e   :  { %4643 = vmatmul.mubr.msk.f32.vlgmr.msra.gmra.mrb[0].mxu1 %vm293_vm2, %v277_v29 }
 0x13f   :  { %4712 = vmatprep.mubr.msk.f32.mxu1 %vm5776_vm0, %v10782_v6 }
 0x211   :  { %v363_v32 = vpop.f32.mrb[0].mxu1 }
 0x212   :  { %v364_v33 = vadd.f32 %v4480_v31, %v363_v32  ;;  %v4644_v34 = vpop.f32.mrb[1].mxu1 }
 0x214   :  { %v367_v36 = vmax.f32 %v364_v33, 0.0 }
 0x216   :  { %v375_v39 = vmul.f32 %v4482_v35, %v367_v36 }
 0x218   :  { %v6031_v41 = vadd.f32 %v4483_v37, %v375_v39 }
 0x21a   :  { %384 = vxpose.xlu0.b32.start.end [1/1] (short) %v6031_v41, 128  ;;  %v2790_v44 = vmul.f32 %v2789_v40, %v6031_v41 }
 0x21c   :  { %v2792_v45 = vadd.f32 %v2791_v43, %v2790_v44 }
 0x21e   :  { %v2793_v50 = vmul.f32 0.125, %v2792_v45 }
 0x220   :  { %v6047_v55 = vrot.slane %v2793_v50, %v10792_v46  ;;  %v6051_v56 = vrot.slane %v2793_v50, %v10793_v47  ;;  %v6055_v57 = vrot.slane %v2793_v50, %v10791_v48  ;;  %v6059_v58 = vrot.slane %v2793_v50, %v10790_v49 }
 0x221   :  { %v6063_v59 = vrot.slane %v2793_v50, %v10789_v51  ;;  %v6067_v60 = vrot.slane %v2793_v50, %v10788_v52  ;;  %v6071_v61 = vrot.slane %v2793_v50, %v10787_v53  ;;  %v6075_v62 = vrot.slane %v2793_v50, %v10786_v54 }
 0x222   :  { %11544 = vst [vmem:[#allocation30_spill] sm:$0xff] %v6051_v56  ;;  %11545 = vst [vmem:[#allocation31_spill] sm:$0xff] %v6059_v58 }
 0x223   :  { %11546 = vst [vmem:[#allocation32_spill] sm:$0xff] %v6071_v61  ;;  %11547 = vst [vmem:[#allocation33_spill] sm:$0xff] %v6075_v62 }
 0x243   :  { %5026 = vset.pattern.permute.xlu0 %v10800_v63 }
 0x29a   :  { %v400_v0 = vpop.trf.xlu0 }
 0x29b   :  { %668 = vperm.xlu1 %5027, %v400_v0   ;;  %425 = vperm.xlu0 %5026, %v400_v0  }
 0x29e   :  { %v401_v4 = vpop.trf.xlu0 }
 0x29f   :  { %5028 = vset.pattern.permute.xlu1 %v10796_v1  ;;  %5032 = vset.pattern.permute.xlu0 %v10809_v2 }
 0x2a0   :  { %896 = vperm.xlu1 %5028, %v400_v0   ;;  %1808 = vperm.xlu0 %5032, %v400_v0  }
 0x2a2   :  { %v402_v9 = vpop.trf.xlu0 }
 0x2a4   :  { %5029 = vset.pattern.permute.xlu1 %v10798_v5  ;;  %5037 = vset.pattern.permute.xlu0 %v10798_v5 }
 0x2a5   :  { %1124 = vperm.xlu1 %5029, %v400_v0   ;;  %1128 = vperm.xlu0 %5037, %v401_v4  }
 0x2a6   :  { %v6088_v11 = vpop.trf.xlu0 }
 0x2a9   :  { %5030 = vset.pattern.permute.xlu1 %v10802_v7  ;;  %5038 = vset.pattern.permute.xlu0 %v10802_v7 }
 0x2aa   :  { %1352 = vperm.xlu1 %5030, %v400_v0   ;;  %1356 = vperm.xlu0 %5038, %v401_v4   ;;  %v6093_v12 = vpop.trf.xlu0 }
 0x2ae   :  { %5031 = vset.pattern.permute.xlu1 %v10805_v8  ;;  %5039 = vset.pattern.permute.xlu0 %v10805_v8  ;;  %v6107_v13 = vpop.trf.xlu0 }
 0x2af   :  { %1580 = vperm.xlu1 %5031, %v400_v0   ;;  %1584 = vperm.xlu0 %5039, %v401_v4  }
 0x2b2   :  { %v6112_v14 = vpop.trf.xlu0 }
 0x2b3   :  { %5033 = vset.pattern.permute.xlu1 %v10813_v10  ;;  %5041 = vset.pattern.permute.xlu0 %v10813_v10 }
 0x2b4   :  { %2036 = vperm.xlu1 %5033, %v400_v0   ;;  %2040 = vperm.xlu0 %5041, %v401_v4  }
 0x2b6   :  { %v6126_v15 = vpop.trf.xlu0 }
 0x2b8   :  { %5034 = vset.pattern.permute.xlu1 %v10800_v63  ;;  %5056 = vset.pattern.permute.xlu0 %v10809_v2 }
 0x2b9   :  { %430 = vperm.xlu1 %5034, %v401_v4   ;;  %1820 = vperm.xlu0 %5056, %v6088_v11  }
 0x2ba   :  { %v6131_v16 = vpop.trf.xlu0 }
 0x2bd   :  { %5035 = vset.pattern.permute.xlu1 %v10794_v30  ;;  %5061 = vset.pattern.permute.xlu0 %v10798_v5 }
 0x2be   :  { %672 = vperm.xlu1 %5035, %v401_v4   ;;  %1140 = vperm.xlu0 %5061, %v6093_v12   ;;  %v6148_v17 = vpop.trf.xlu0 }
 0x2c2   :  { %5036 = vset.pattern.permute.xlu1 %v10796_v1  ;;  %5062 = vset.pattern.permute.xlu0 %v10802_v7  ;;  %v6158_v18 = vpop.trf.xlu0 }
 0x2c3   :  { %900 = vperm.xlu1 %5036, %v401_v4   ;;  %1368 = vperm.xlu0 %5062, %v6093_v12  }
 0x2c6   :  { %v6164_v19 = vpop.trf.xlu0 }
 0x2c7   :  { %5040 = vset.pattern.permute.xlu1 %v10809_v2  ;;  %5063 = vset.pattern.permute.xlu0 %v10805_v8 }
 0x2c8   :  { %1812 = vperm.xlu1 %5040, %v401_v4   ;;  %1596 = vperm.xlu0 %5063, %v6093_v12  }
 0x2ca   :  { %v6188_v23 = vpop.trf.xlu0 }
 0x2cc   :  { %5042 = vset.pattern.permute.xlu1 %v10800_v63  ;;  %5065 = vset.pattern.permute.xlu0 %v10813_v10 }
 0x2cd   :  { %435 = vperm.xlu1 %5042, %v402_v9   ;;  %2052 = vperm.xlu0 %5065, %v6093_v12  }
 0x2ce   :  { %v6220_v29 = vpop.trf.xlu0 }
 0x2d1   :  { %5043 = vset.pattern.permute.xlu1 %v10794_v30  ;;  %5072 = vset.pattern.permute.xlu0 %v10809_v2 }
 0x2d2   :  { %676 = vperm.xlu1 %5043, %v402_v9   ;;  %1828 = vperm.xlu0 %5072, %v6107_v13   ;;  %v6228_v32 = vpop.trf.xlu0 }
 0x2d6   :  { %5044 = vset.pattern.permute.xlu1 %v10796_v1  ;;  %5077 = vset.pattern.permute.xlu0 %v10798_v5  ;;  %v6237_v34 = vpop.trf.xlu0 }
 0x2d7   :  { %904 = vperm.xlu1 %5044, %v402_v9   ;;  %1148 = vperm.xlu0 %5077, %v6112_v14  }
 0x2db   :  { %5045 = vset.pattern.permute.xlu1 %v10798_v5  ;;  %5078 = vset.pattern.permute.xlu0 %v10802_v7 }
 0x2dc   :  { %1132 = vperm.xlu1 %5045, %v402_v9   ;;  %1376 = vperm.xlu0 %5078, %v6112_v14  }
 0x2e0   :  { %5046 = vset.pattern.permute.xlu1 %v10802_v7  ;;  %5079 = vset.pattern.permute.xlu0 %v10805_v8 }
 0x2e1   :  { %1360 = vperm.xlu1 %5046, %v402_v9   ;;  %1604 = vperm.xlu0 %5079, %v6112_v14  }
 0x2e5   :  { %5047 = vset.pattern.permute.xlu1 %v10805_v8  ;;  %5081 = vset.pattern.permute.xlu0 %v10813_v10 }
 0x2e6   :  { %1588 = vperm.xlu1 %5047, %v402_v9   ;;  %2060 = vperm.xlu0 %5081, %v6112_v14  }
 0x2ea   :  { %5048 = vset.pattern.permute.xlu1 %v10809_v2  ;;  %5088 = vset.pattern.permute.xlu0 %v10809_v2 }
 0x2eb   :  { %1816 = vperm.xlu1 %5048, %v402_v9   ;;  %1836 = vperm.xlu0 %5088, %v6126_v15  }
 0x2ef   :  { %5049 = vset.pattern.permute.xlu1 %v10813_v10  ;;  %5091 = vset.pattern.permute.xlu0 %v10794_v30 }
 0x2f0   :  { %2044 = vperm.xlu1 %5049, %v402_v9   ;;  %700 = vperm.xlu0 %5091, %v6131_v16  }
 0x2f4   :  { %5050 = vset.pattern.permute.xlu1 %v10800_v63  ;;  %5092 = vset.pattern.permute.xlu0 %v10796_v1 }
 0x2f5   :  { %440 = vperm.xlu1 %5050, %v6088_v11   ;;  %928 = vperm.xlu0 %5092, %v6131_v16  }
 0x2f9   :  { %5051 = vset.pattern.permute.xlu1 %v10794_v30  ;;  %5093 = vset.pattern.permute.xlu0 %v10798_v5 }
 0x2fa   :  { %680 = vperm.xlu1 %5051, %v6088_v11   ;;  %1156 = vperm.xlu0 %5093, %v6131_v16  }
 0x2fe   :  { %5052 = vset.pattern.permute.xlu1 %v10796_v1  ;;  %5095 = vset.pattern.permute.xlu0 %v10805_v8 }
 0x2ff   :  { %908 = vperm.xlu1 %5052, %v6088_v11   ;;  %1612 = vperm.xlu0 %5095, %v6131_v16  }
 0x303   :  { %5053 = vset.pattern.permute.xlu1 %v10798_v5  ;;  %5102 = vset.pattern.permute.xlu0 %v10802_v7 }
 0x304   :  { %1136 = vperm.xlu1 %5053, %v6088_v11   ;;  %1388 = vperm.xlu0 %5102, %v6148_v17  }
 0x308   :  { %5054 = vset.pattern.permute.xlu1 %v10802_v7  ;;  %5104 = vset.pattern.permute.xlu0 %v10809_v2 }
 0x309   :  { %1364 = vperm.xlu1 %5054, %v6088_v11   ;;  %1844 = vperm.xlu0 %5104, %v6148_v17  }
 0x30d   :  { %5055 = vset.pattern.permute.xlu1 %v10805_v8  ;;  %5105 = vset.pattern.permute.xlu0 %v10813_v10 }
 0x30e   :  { %1592 = vperm.xlu1 %5055, %v6088_v11   ;;  %2072 = vperm.xlu0 %5105, %v6148_v17  }
 0x312   :  { %5057 = vset.pattern.permute.xlu1 %v10813_v10  ;;  %5115 = vset.pattern.permute.xlu0 %v10794_v30 }
 0x313   :  { %2048 = vperm.xlu1 %5057, %v6088_v11   ;;  %712 = vperm.xlu0 %5115, %v6164_v19  }
 0x317   :  { %5058 = vset.pattern.permute.xlu1 %v10800_v63  ;;  %5116 = vset.pattern.permute.xlu0 %v10796_v1 }
 0x318   :  { %445 = vperm.xlu1 %5058, %v6093_v12   ;;  %940 = vperm.xlu0 %5116, %v6164_v19  }
 0x31a   :  { %v6174_v20 = vpop.permute.xlu1 %668  ;;  %v6334_v54 = vpop.permute.xlu0 %425 }
 0x31b   :  { %11548 = vst [vmem:[#allocation34_spill] sm:$0xff] %v6174_v20  ;;  %11579 = vst [vmem:[#allocation65_spill] sm:$0xff] %v6334_v54 }
 0x31c   :  { %5059 = vset.pattern.permute.xlu1 %v10794_v30  ;;  %5117 = vset.pattern.permute.xlu0 %v10798_v5 }
 0x31d   :  { %684 = vperm.xlu1 %5059, %v6093_v12   ;;  %1168 = vperm.xlu0 %5117, %v6164_v19  }
 0x31f   :  { %v6180_v21 = vpop.permute.xlu1 %896  ;;  %v6340_v52 = vpop.permute.xlu0 %1808 }
 0x320   :  { %11549 = vst [vmem:[#allocation35_spill] sm:$0xff] %v6180_v21  ;;  %11581 = vst [vmem:[#allocation67_spill] sm:$0xff] %v6340_v52 }
 0x321   :  { %5060 = vset.pattern.permute.xlu1 %v10796_v1  ;;  %5119 = vset.pattern.permute.xlu0 %v10805_v8 }
 0x322   :  { %912 = vperm.xlu1 %5060, %v6093_v12   ;;  %1624 = vperm.xlu0 %5119, %v6164_v19  }
 0x324   :  { %v6186_v22 = vpop.permute.xlu1 %1124  ;;  %v6346_v49 = vpop.permute.xlu0 %1128 }
 0x325   :  { %11550 = vst [vmem:[#allocation36_spill] sm:$0xff] %v6186_v22  ;;  %11583 = vst [vmem:[#allocation69_spill] sm:$0xff] %v6346_v49 }
 0x326   :  { %5064 = vset.pattern.permute.xlu1 %v10809_v2  ;;  %5122 = vset.pattern.permute.xlu0 %v10800_v63 }
 0x327   :  { %1824 = vperm.xlu1 %5064, %v6093_v12   ;;  %485 = vperm.xlu0 %5122, %v6188_v23  }
 0x329   :  { %v6194_v24 = vpop.permute.xlu1 %1352  ;;  %v6353_v48 = vpop.permute.xlu0 %1356 }
 0x32a   :  { %11551 = vst [vmem:[#allocation37_spill] sm:$0xff] %v6194_v24  ;;  %11585 = vst [vmem:[#allocation71_spill] sm:$0xff] %v6353_v48 }
 0x32b   :  { %5066 = vset.pattern.permute.xlu1 %v10800_v63  ;;  %5124 = vset.pattern.permute.xlu0 %v10796_v1 }
 0x32c   :  { %450 = vperm.xlu1 %5066, %v6107_v13   ;;  %944 = vperm.xlu0 %5124, %v6188_v23  }
 0x32e   :  { %v6200_v25 = vpop.permute.xlu1 %1580  ;;  %v6360_v47 = vpop.permute.xlu0 %1584 }
 0x32f   :  { %11552 = vst [vmem:[#allocation38_spill] sm:$0xff] %v6200_v25  ;;  %11587 = vst [vmem:[#allocation73_spill] sm:$0xff] %v6360_v47 }
 0x330   :  { %5067 = vset.pattern.permute.xlu1 %v10794_v30  ;;  %5126 = vset.pattern.permute.xlu0 %v10802_v7 }
 0x331   :  { %688 = vperm.xlu1 %5067, %v6107_v13   ;;  %1400 = vperm.xlu0 %5126, %v6188_v23  }
 0x333   :  { %v6206_v26 = vpop.permute.xlu1 %2036 }
 0x334   :  { %11553 = vst [vmem:[#allocation39_spill] sm:$0xff] %v6206_v26 }
 0x335   :  { %5068 = vset.pattern.permute.xlu1 %v10796_v1  ;;  %5127 = vset.pattern.permute.xlu0 %v10805_v8 }
 0x336   :  { %916 = vperm.xlu1 %5068, %v6107_v13   ;;  %1628 = vperm.xlu0 %5127, %v6188_v23  }
 0x338   :  { %v6212_v27 = vpop.permute.xlu1 %430 }
 0x339   :  { %11554 = vst [vmem:[#allocation40_spill] sm:$0xff] %v6212_v27 }
 0x33a   :  { %5069 = vset.pattern.permute.xlu1 %v10798_v5  ;;  %5128 = vset.pattern.permute.xlu0 %v10809_v2 }
 0x33b   :  { %1144 = vperm.xlu1 %5069, %v6107_v13   ;;  %1856 = vperm.xlu0 %5128, %v6188_v23  }
 0x33d   :  { %v6218_v28 = vpop.permute.xlu1 %672 }
 0x33e   :  { %11555 = vst [vmem:[#allocation41_spill] sm:$0xff] %v6218_v28 }
 0x33f   :  { %5070 = vset.pattern.permute.xlu1 %v10802_v7  ;;  %5131 = vset.pattern.permute.xlu0 %v10794_v30 }
 0x340   :  { %1372 = vperm.xlu1 %5070, %v6107_v13   ;;  %720 = vperm.xlu0 %5131, %v6220_v29  }
 0x342   :  { %v6226_v31 = vpop.permute.xlu1 %900 }
 0x343   :  { %11556 = vst [vmem:[#allocation42_spill] sm:$0xff] %v6226_v31 }
 0x344   :  { %5071 = vset.pattern.permute.xlu1 %v10805_v8  ;;  %5133 = vset.pattern.permute.xlu0 %v10798_v5 }
 0x345   :  { %1600 = vperm.xlu1 %5071, %v6107_v13   ;;  %1176 = vperm.xlu0 %5133, %v6220_v29  }
 0x347   :  { %v6234_v33 = vpop.permute.xlu1 %1812 }
 0x348   :  { %11557 = vst [vmem:[#allocation43_spill] sm:$0xff] %v6234_v33 }
 0x349   :  { %5073 = vset.pattern.permute.xlu1 %v10813_v10  ;;  %5144 = vset.pattern.permute.xlu0 %v10800_v63 }
 0x34a   :  { %2056 = vperm.xlu1 %5073, %v6107_v13   ;;  %500 = vperm.xlu0 %5144, %v6237_v34  }
 0x34c   :  { %v6242_v35 = vpop.permute.xlu1 %435 }
 0x34d   :  { %11558 = vst [vmem:[#allocation44_spill] sm:$0xff] %v6242_v35 }
 0x34e   :  { %5074 = vset.pattern.permute.xlu1 %v10800_v63  ;;  %5146 = vset.pattern.permute.xlu0 %v10796_v1 }
 0x34f   :  { %455 = vperm.xlu1 %5074, %v6112_v14   ;;  %956 = vperm.xlu0 %5146, %v6237_v34  }
 0x351   :  { %v6248_v36 = vpop.permute.xlu1 %676 }
 0x352   :  { %11559 = vst [vmem:[#allocation45_spill] sm:$0xff] %v6248_v36 }
 0x353   :  { %5075 = vset.pattern.permute.xlu1 %v10794_v30  ;;  %5148 = vset.pattern.permute.xlu0 %v10802_v7 }
 0x354   :  { %692 = vperm.xlu1 %5075, %v6112_v14   ;;  %1412 = vperm.xlu0 %5148, %v6237_v34  }
 0x356   :  { %v6254_v37 = vpop.permute.xlu1 %904 }
 0x357   :  { %11560 = vst [vmem:[#allocation46_spill] sm:$0xff] %v6254_v37 }
 0x358   :  { %5076 = vset.pattern.permute.xlu1 %v10796_v1  ;;  %5149 = vset.pattern.permute.xlu0 %v10805_v8 }
 0x359   :  { %920 = vperm.xlu1 %5076, %v6112_v14   ;;  %1640 = vperm.xlu0 %5149, %v6237_v34  }
 0x35b   :  { %v6260_v38 = vpop.permute.xlu1 %1132 }
 0x35c   :  { %11561 = vst [vmem:[#allocation47_spill] sm:$0xff] %v6260_v38 }
 0x35d   :  { %5080 = vset.pattern.permute.xlu1 %v10809_v2  ;;  %5150 = vset.pattern.permute.xlu0 %v10809_v2 }
 0x35e   :  { %1832 = vperm.xlu1 %5080, %v6112_v14   ;;  %1868 = vperm.xlu0 %5150, %v6237_v34  }
 0x360   :  { %v6266_v39 = vpop.permute.xlu1 %1360 }
 0x361   :  { %11562 = vst [vmem:[#allocation48_spill] sm:$0xff] %v6266_v39 }
 0x362   :  { %5082 = vset.pattern.permute.xlu1 %v10800_v63  ;;  %5151 = vset.pattern.permute.xlu0 %v10813_v10 }
 0x363   :  { %460 = vperm.xlu1 %5082, %v6126_v15   ;;  %2088 = vperm.xlu0 %5151, %v6220_v29  }
 0x365   :  { %v6272_v40 = vpop.permute.xlu1 %1588 }
 0x366   :  { %11563 = vst [vmem:[#allocation49_spill] sm:$0xff] %v6272_v40 }
 0x367   :  { %5083 = vset.pattern.permute.xlu1 %v10794_v30 }
 0x368   :  { %696 = vperm.xlu1 %5083, %v6126_v15  }
 0x36a   :  { %v6276_v43 = vpop.permute.xlu1 %1816 }
 0x36b   :  { %11564 = vst [vmem:[#allocation50_spill] sm:$0xff] %v6276_v43 }
 0x36c   :  { %5084 = vset.pattern.permute.xlu1 %v10796_v1 }
 0x36d   :  { %924 = vperm.xlu1 %5084, %v6126_v15  }
 0x36f   :  { %v6280_v44 = vpop.permute.xlu1 %2044 }
 0x370   :  { %11565 = vst [vmem:[#allocation51_spill] sm:$0xff] %v6280_v44 }
 0x371   :  { %5085 = vset.pattern.permute.xlu1 %v10798_v5 }
 0x372   :  { %1152 = vperm.xlu1 %5085, %v6126_v15  }
 0x374   :  { %v6284_v45 = vpop.permute.xlu1 %440 }
 0x375   :  { %11566 = vst [vmem:[#allocation52_spill] sm:$0xff] %v6284_v45 }
 0x376   :  { %5086 = vset.pattern.permute.xlu1 %v10802_v7 }
 0x377   :  { %1380 = vperm.xlu1 %5086, %v6126_v15  }
 0x379   :  { %v6288_v50 = vpop.permute.xlu1 %680 }
 0x37a   :  { %11567 = vst [vmem:[#allocation53_spill] sm:$0xff] %v6288_v50  ;;  %v6596_v50 = vmul.f32 %v6059_v58, %v6346_v49 }
 0x37b   :  { %5087 = vset.pattern.permute.xlu1 %v10805_v8 }
 0x37c   :  { %1608 = vperm.xlu1 %5087, %v6126_v15   ;;  %11670 = vst [vmem:[#allocation140_spill] sm:$0xff] %v6596_v50 }
 0x37e   :  { %v6292_v0 = vpop.permute.xlu1 %908 }
 0x37f   :  { %11568 = vst [vmem:[#allocation54_spill] sm:$0xff] %v6292_v0 }
 0x380   :  { %5089 = vset.pattern.permute.xlu1 %v10813_v10 }
 0x381   :  { %2064 = vperm.xlu1 %5089, %v6126_v15  }
 0x383   :  { %v6296_v4 = vpop.permute.xlu1 %1136 }
 0x384   :  { %11569 = vst [vmem:[#allocation55_spill] sm:$0xff] %v6296_v4 }
 0x385   :  { %5090 = vset.pattern.permute.xlu1 %v10800_v63 }
 0x386   :  { %465 = vperm.xlu1 %5090, %v6131_v16  }
 0x388   :  { %v6300_v9 = vpop.permute.xlu1 %1364 }
 0x389   :  { %11570 = vst [vmem:[#allocation56_spill] sm:$0xff] %v6300_v9 }
 0x38a   :  { %5094 = vset.pattern.permute.xlu1 %v10802_v7 }
 0x38b   :  { %1384 = vperm.xlu1 %5094, %v6131_v16  }
 0x38d   :  { %v6304_v11 = vpop.permute.xlu1 %1592 }
 0x38e   :  { %11571 = vst [vmem:[#allocation57_spill] sm:$0xff] %v6304_v11 }
 0x38f   :  { %5096 = vset.pattern.permute.xlu1 %v10809_v2 }
 0x390   :  { %1840 = vperm.xlu1 %5096, %v6131_v16  }
 0x392   :  { %v6308_v12 = vpop.permute.xlu1 %2048 }
 0x393   :  { %11572 = vst [vmem:[#allocation58_spill] sm:$0xff] %v6308_v12  ;;  %v11620_v12 = vmov 5  }
 0x394   :  { %5097 = vset.pattern.permute.xlu1 %v10813_v10 }
 0x395   :  { %2068 = vperm.xlu1 %5097, %v6131_v16  }
 0x397   :  { %v6312_v13 = vpop.permute.xlu1 %445 }
 0x398   :  { %11573 = vst [vmem:[#allocation59_spill] sm:$0xff] %v6312_v13 }
 0x399   :  { %5098 = vset.pattern.permute.xlu1 %v10800_v63 }
 0x39a   :  { %470 = vperm.xlu1 %5098, %v6148_v17  }
 0x39c   :  { %v6316_v14 = vpop.permute.xlu1 %684 }
 0x39d   :  { %11574 = vst [vmem:[#allocation60_spill] sm:$0xff] %v6316_v14  ;;  %v11615_v14 = vmov 2  }
 0x39e   :  { %5099 = vset.pattern.permute.xlu1 %v10794_v30 }
 0x39f   :  { %704 = vperm.xlu1 %5099, %v6148_v17  }
 0x3a1   :  { %v6320_v15 = vpop.permute.xlu1 %912 }
 0x3a2   :  { %11575 = vst [vmem:[#allocation61_spill] sm:$0xff] %v6320_v15  ;;  %v11609_v15 = vmov 3  }
 0x3a3   :  { %5100 = vset.pattern.permute.xlu1 %v10796_v1 }
 0x3a4   :  { %932 = vperm.xlu1 %5100, %v6148_v17  }
 0x3a6   :  { %v6324_v6 = vpop.permute.xlu1 %1824 }
 0x3a7   :  { %11576 = vst [vmem:[#allocation62_spill] sm:$0xff] %v6324_v6 }
 0x3a8   :  { %5101 = vset.pattern.permute.xlu1 %v10798_v5 }
 0x3a9   :  { %1160 = vperm.xlu1 %5101, %v6148_v17  }
 0x3ab   :  { %v6328_v16 = vpop.permute.xlu1 %450 }
 0x3ac   :  { %11577 = vst [vmem:[#allocation63_spill] sm:$0xff] %v6328_v16 }
 0x3ad   :  { %5103 = vset.pattern.permute.xlu1 %v10805_v8 }
 0x3ae   :  { %1616 = vperm.xlu1 %5103, %v6148_v17  }
 0x3b0   :  { %v6332_v3 = vpop.permute.xlu1 %688 }
 0x3b1   :  { %11578 = vst [vmem:[#allocation64_spill] sm:$0xff] %v6332_v3 }
 0x3b2   :  { %5106 = vset.pattern.permute.xlu1 %v10800_v63 }
 0x3b3   :  { %475 = vperm.xlu1 %5106, %v6158_v18  }
 0x3b5   :  { %v6338_v53 = vpop.permute.xlu1 %916 }
 0x3b6   :  { %11580 = vst [vmem:[#allocation66_spill] sm:$0xff] %v6338_v53  ;;  %v11603_v53 = vmov 7  }
 0x3b7   :  { %5107 = vset.pattern.permute.xlu1 %v10794_v30 }
 0x3b8   :  { %708 = vperm.xlu1 %5107, %v6158_v18  }
 0x3ba   :  { %v6344_v51 = vpop.permute.xlu1 %1144 }
 0x3bb   :  { %11582 = vst [vmem:[#allocation68_spill] sm:$0xff] %v6344_v51 }
 0x3bc   :  { %5108 = vset.pattern.permute.xlu1 %v10796_v1  ;;  %v6366_v1 = vpop.permute.xlu0 %2040 }
 0x3bd   :  { %936 = vperm.xlu1 %5108, %v6158_v18   ;;  %11589 = vst [vmem:[#allocation75_spill] sm:$0xff] %v6366_v1  ;;  %v6676_v43 = vmul.f32 %v6075_v62, %v6366_v1 }
 0x3bf   :  { %v6350_v17 = vpop.permute.xlu1 %1372  ;;  %11690 = vst [vmem:[#allocation160_spill] sm:$0xff] %v6676_v43 }
 0x3c0   :  { %11584 = vst [vmem:[#allocation70_spill] sm:$0xff] %v6350_v17 }
 0x3c1   :  { %5109 = vset.pattern.permute.xlu1 %v10798_v5 }
 0x3c2   :  { %1164 = vperm.xlu1 %5109, %v6158_v18  }
 0x3c4   :  { %v6356_v46 = vpop.permute.xlu1 %1600 }
 0x3c5   :  { %11586 = vst [vmem:[#allocation72_spill] sm:$0xff] %v6356_v46  ;;  %v11595_v46 = vmov 0  }
 0x3c6   :  { %5110 = vset.pattern.permute.xlu1 %v10802_v7  ;;  %v6374_v7 = vpop.permute.xlu0 %1820 }
 0x3c7   :  { %1392 = vperm.xlu1 %5110, %v6158_v18   ;;  %11592 = vst [vmem:[#allocation78_spill] sm:$0xff] %v6374_v7 }
 0x3c9   :  { %v6362_v30 = vpop.permute.xlu1 %2056 }
 0x3ca   :  { %11588 = vst [vmem:[#allocation74_spill] sm:$0xff] %v6362_v30 }
 0x3cb   :  { %5111 = vset.pattern.permute.xlu1 %v10805_v8  ;;  %v6380_v8 = vpop.permute.xlu0 %1140 }
 0x3cc   :  { %1620 = vperm.xlu1 %5111, %v6158_v18   ;;  %11594 = vst [vmem:[#allocation80_spill] sm:$0xff] %v6380_v8 }
 0x3ce   :  { %v6368_v5 = vpop.permute.xlu1 %455 }
 0x3cf   :  { %11590 = vst [vmem:[#allocation76_spill] sm:$0xff] %v6368_v5  ;;  %v6387_v51 = vpop.permute.xlu0 %1368  ;;  %v11606_v5 = vmov 1  }
 0x3d0   :  { %5112 = vset.pattern.permute.xlu1 %v10809_v2  ;;  %v11597_v2 = vmov 4   ;;  %11598 = vst [vmem:[#allocation82_spill] sm:$0xff] %v6387_v51 }
 0x3d1   :  { %1848 = vperm.xlu1 %5112, %v6158_v18  }
 0x3d3   :  { %v6372_v63 = vpop.permute.xlu1 %692 }
 0x3d4   :  { %11591 = vst [vmem:[#allocation77_spill] sm:$0xff] %v6372_v63 }
 0x3d5   :  { %5113 = vset.pattern.permute.xlu1 %v10813_v10  ;;  %v11600_v10 = vmov 6  }
 0x3d6   :  { %2076 = vperm.xlu1 %5113, %v6158_v18   ;;  %v6394_v18 = vpop.permute.xlu0 %1596 }
 0x3d7   :  { %11601 = vst [vmem:[#allocation84_spill] sm:$0xff] %v6394_v18 }
 0x3d8   :  { %v6378_v30 = vpop.permute.xlu1 %920 }
 0x3d9   :  { %11593 = vst [vmem:[#allocation79_spill] sm:$0xff] %v6378_v30 }
 0x3da   :  { %5114 = vset.pattern.permute.xlu1 %v11595_v46 }
 0x3db   :  { %480 = vperm.xlu1 %5114, %v6164_v19  }
 0x3dd   :  { %v6384_v17 = vpop.permute.xlu1 %1832 }
 0x3de   :  { %11596 = vst [vmem:[#allocation81_spill] sm:$0xff] %v6384_v17  ;;  %v6400_v17 = vpop.permute.xlu0 %2052 }
 0x3df   :  { %5118 = vset.pattern.permute.xlu1 %v11597_v2  ;;  %11604 = vst [vmem:[#allocation86_spill] sm:$0xff] %v6400_v17 }
 0x3e0   :  { %1396 = vperm.xlu1 %5118, %v6164_v19  }
 0x3e2   :  { %v6390_v63 = vpop.permute.xlu1 %460  ;;  %v6408_v6 = vpop.permute.xlu0 %1828 }
 0x3e3   :  { %11599 = vst [vmem:[#allocation83_spill] sm:$0xff] %v6390_v63  ;;  %11608 = vst [vmem:[#allocation89_spill] sm:$0xff] %v6408_v6 }
 0x3e4   :  { %5120 = vset.pattern.permute.xlu1 %v11600_v10 }
 0x3e5   :  { %1852 = vperm.xlu1 %5120, %v6164_v19  }
 0x3e6   :  { %v6414_v16 = vpop.permute.xlu0 %1148 }
 0x3e7   :  { %v6396_v30 = vpop.permute.xlu1 %696  ;;  %11611 = vst [vmem:[#allocation91_spill] sm:$0xff] %v6414_v16 }
 0x3e8   :  { %11602 = vst [vmem:[#allocation85_spill] sm:$0xff] %v6396_v30 }
 0x3e9   :  { %5121 = vset.pattern.permute.xlu1 %v11603_v53 }
 0x3ea   :  { %2080 = vperm.xlu1 %5121, %v6164_v19  }
 0x3ec   :  { %v6402_v3 = vpop.permute.xlu1 %924 }
 0x3ed   :  { %11605 = vst [vmem:[#allocation87_spill] sm:$0xff] %v6402_v3  ;;  %v6421_v3 = vpop.permute.xlu0 %1376 }
 0x3ee   :  { %5123 = vset.pattern.permute.xlu1 %v11606_v5  ;;  %11613 = vst [vmem:[#allocation93_spill] sm:$0xff] %v6421_v3 }
 0x3ef   :  { %716 = vperm.xlu1 %5123, %v6188_v23  }
 0x3f1   :  { %v6406_v63 = vpop.permute.xlu1 %1152 }
 0x3f2   :  { %11607 = vst [vmem:[#allocation88_spill] sm:$0xff] %v6406_v63 }
 0x3f3   :  { %5125 = vset.pattern.permute.xlu1 %v11609_v15 }
 0x3f4   :  { %1172 = vperm.xlu1 %5125, %v6188_v23  }
 0x3f6   :  { %v6412_v30 = vpop.permute.xlu1 %1380 }
 0x3f7   :  { %11610 = vst [vmem:[#allocation90_spill] sm:$0xff] %v6412_v30  ;;  %v6428_v30 = vpop.permute.xlu0 %1604 }
 0x3f8   :  { %5129 = vset.pattern.permute.xlu1 %v11603_v53  ;;  %11616 = vst [vmem:[#allocation95_spill] sm:$0xff] %v6428_v30 }
 0x3f9   :  { %2084 = vperm.xlu1 %5129, %v6188_v23  }
 0x3fb   :  { %v6418_v19 = vpop.permute.xlu1 %1608  ;;  %v6434_v23 = vpop.permute.xlu0 %2060 }
 0x3fc   :  { %11612 = vst [vmem:[#allocation92_spill] sm:$0xff] %v6418_v19  ;;  %11618 = vst [vmem:[#allocation97_spill] sm:$0xff] %v6434_v23  ;;  %v6642_v23 = vmul.f32 %v6067_v60, %v6360_v47 }
 0x3fd   :  { %5130 = vset.pattern.permute.xlu1 %v11595_v46 }
 0x3fe   :  { %490 = vperm.xlu1 %5130, %v6220_v29   ;;  %11681 = vst [vmem:[#allocation151_spill] sm:$0xff] %v6642_v23 }
 0x3ff   :  { %v6442_v11 = vpop.permute.xlu0 %1836 }
 0x400   :  { %v6424_v63 = vpop.permute.xlu1 %2064  ;;  %11622 = vst [vmem:[#allocation100_spill] sm:$0xff] %v6442_v11 }
 0x401   :  { %11614 = vst [vmem:[#allocation94_spill] sm:$0xff] %v6424_v63 }
 0x402   :  { %5132 = vset.pattern.permute.xlu1 %v11615_v14 }
 0x403   :  { %948 = vperm.xlu1 %5132, %v6220_v29   ;;  %v6448_v9 = vpop.permute.xlu0 %700 }
 0x404   :  { %11624 = vst [vmem:[#allocation102_spill] sm:$0xff] %v6448_v9 }
 0x405   :  { %v6430_v13 = vpop.permute.xlu1 %465 }
 0x406   :  { %11617 = vst [vmem:[#allocation96_spill] sm:$0xff] %v6430_v13 }
 0x407   :  { %5134 = vset.pattern.permute.xlu1 %v11597_v2  ;;  %v6455_v4 = vpop.permute.xlu0 %928 }
 0x408   :  { %1404 = vperm.xlu1 %5134, %v6220_v29   ;;  %11626 = vst [vmem:[#allocation104_spill] sm:$0xff] %v6455_v4  ;;  %v6604_v4 = vmul.f32 %v6063_v59, %v6194_v24 }
 0x40a   :  { %v6436_v19 = vpop.permute.xlu1 %1384  ;;  %11672 = vst [vmem:[#allocation142_spill] sm:$0xff] %v6604_v4 }
 0x40b   :  { %11619 = vst [vmem:[#allocation98_spill] sm:$0xff] %v6436_v19 }
 0x40c   :  { %5135 = vset.pattern.permute.xlu1 %v11620_v12 }
 0x40d   :  { %1632 = vperm.xlu1 %5135, %v6220_v29  }
 0x40f   :  { %v6440_v63 = vpop.permute.xlu1 %1840 }
 0x410   :  { %11621 = vst [vmem:[#allocation99_spill] sm:$0xff] %v6440_v63 }
 0x411   :  { %5136 = vset.pattern.permute.xlu1 %v11600_v10 }
 0x412   :  { %1860 = vperm.xlu1 %5136, %v6220_v29   ;;  %v6462_v29 = vpop.permute.xlu0 %1156 }
 0x413   :  { %11628 = vst [vmem:[#allocation106_spill] sm:$0xff] %v6462_v29  ;;  %v6588_v29 = vmul.f32 %v6059_v58, %v6186_v22 }
 0x414   :  { %v6446_v13 = vpop.permute.xlu1 %2068 }
 0x415   :  { %11623 = vst [vmem:[#allocation101_spill] sm:$0xff] %v6446_v13  ;;  %11668 = vst [vmem:[#allocation138_spill] sm:$0xff] %v6588_v29 }
 0x416   :  { %5137 = vset.pattern.permute.xlu1 %v11595_v46  ;;  %v6468_v46 = vpop.permute.xlu0 %1612 }
 0x417   :  { %495 = vperm.xlu1 %5137, %v6228_v32   ;;  %11630 = vst [vmem:[#allocation108_spill] sm:$0xff] %v6468_v46 }
 0x419   :  { %v6452_v19 = vpop.permute.xlu1 %470 }
 0x41a   :  { %11625 = vst [vmem:[#allocation103_spill] sm:$0xff] %v6452_v19 }
 0x41b   :  { %5138 = vset.pattern.permute.xlu1 %v11606_v5 }
 0x41c   :  { %724 = vperm.xlu1 %5138, %v6228_v32  }
 0x41e   :  { %v6458_v63 = vpop.permute.xlu1 %704 }
 0x41f   :  { %11627 = vst [vmem:[#allocation105_spill] sm:$0xff] %v6458_v63 }
 0x420   :  { %5139 = vset.pattern.permute.xlu1 %v11615_v14  ;;  %v6476_v14 = vpop.permute.xlu0 %1388 }
 0x421   :  { %952 = vperm.xlu1 %5139, %v6228_v32   ;;  %11633 = vst [vmem:[#allocation111_spill] sm:$0xff] %v6476_v14 }
 0x423   :  { %v6464_v13 = vpop.permute.xlu1 %932 }
 0x424   :  { %11629 = vst [vmem:[#allocation107_spill] sm:$0xff] %v6464_v13  ;;  %v6482_v0 = vpop.permute.xlu0 %1844 }
 0x425   :  { %5140 = vset.pattern.permute.xlu1 %v11609_v15  ;;  %11635 = vst [vmem:[#allocation113_spill] sm:$0xff] %v6482_v0 }
 0x426   :  { %1180 = vperm.xlu1 %5140, %v6228_v32  }
 0x428   :  { %v6470_v19 = vpop.permute.xlu1 %1160 }
 0x429   :  { %11631 = vst [vmem:[#allocation109_spill] sm:$0xff] %v6470_v19 }
 0x42a   :  { %5141 = vset.pattern.permute.xlu1 %v11597_v2  ;;  %v6489_v2 = vpop.permute.xlu0 %2072 }
 0x42b   :  { %1408 = vperm.xlu1 %5141, %v6228_v32   ;;  %11637 = vst [vmem:[#allocation115_spill] sm:$0xff] %v6489_v2 }
 0x42d   :  { %v6474_v63 = vpop.permute.xlu1 %1616 }
 0x42e   :  { %11632 = vst [vmem:[#allocation110_spill] sm:$0xff] %v6474_v63  ;;  %v6496_v63 = vpop.permute.xlu0 %712 }
 0x42f   :  { %5142 = vset.pattern.permute.xlu1 %v11620_v12  ;;  %11639 = vst [vmem:[#allocation117_spill] sm:$0xff] %v6496_v63 }
 0x430   :  { %1636 = vperm.xlu1 %5142, %v6228_v32  }
 0x432   :  { %v6480_v13 = vpop.permute.xlu1 %475  ;;  %v6503_v2 = vpop.permute.xlu0 %940 }
 0x433   :  { %11634 = vst [vmem:[#allocation112_spill] sm:$0xff] %v6480_v13  ;;  %v418_v13 = vstv %s416_s9  ;;  %11641 = vst [vmem:[#allocation119_spill] sm:$0xff] %v6503_v2 }
 0x434   :  { %5143 = vset.pattern.permute.xlu1 %v11600_v10 }
 0x435   :  { %1864 = vperm.xlu1 %5143, %v6228_v32  }
 0x436   :  { %v6510_v63 = vpop.permute.xlu0 %1168 }
 0x437   :  { %v6486_v19 = vpop.permute.xlu1 %708  ;;  %11644 = vst [vmem:[#allocation122_spill] sm:$0xff] %v6510_v63 }
 0x438   :  { %11636 = vst [vmem:[#allocation114_spill] sm:$0xff] %v6486_v19  ;;  %v420_v19 = vstv %s4484_s13 }
 0x439   :  { %5145 = vset.pattern.permute.xlu1 %v11606_v5  ;;  %v419_v5 = vmul.f32 %v418_v13, %v6031_v41  ;;  %v11648_v41 = vsub.s32 0, %v6033_v42 }
 0x43a   :  { %728 = vperm.xlu1 %5145, %v6237_v34  }
 0x43c   :  { %v6492_v12 = vpop.permute.xlu1 %936 }
 0x43d   :  { %11638 = vst [vmem:[#allocation116_spill] sm:$0xff] %v6492_v12 }
 0x43e   :  { %5147 = vset.pattern.permute.xlu1 %v11609_v15  ;;  %v421_v15 = vadd.f32 %v420_v19, %v419_v5  ;;  %v11652_v5 = vsub.s32 4, %v6033_v42 }
 0x43f   :  { %1184 = vperm.xlu1 %5147, %v6237_v34  }
 0x441   :  { %v6498_v10 = vpop.permute.xlu1 %1164 }
 0x442   :  { %11640 = vst [vmem:[#allocation118_spill] sm:$0xff] %v6498_v10  ;;  %v422_v10 = vmul.f32 0.125, %v421_v15 }
 0x443   :  { %5152 = vset.pattern.permute.xlu1 %v11603_v53  ;;  %v11646_v53 = vsub.s32 1, %v6033_v42 }
 0x444   :  { %2092 = vperm.xlu1 %5152, %v6228_v32   ;;  %v6520_v13 = vrot.slane %v422_v10, %v11648_v41  ;;  %v6532_v15 = vrot.slane %v422_v10, %v11652_v5  ;;  %v11655_v41 = vsub.s32 6, %v6033_v42  ;;  %v6554_v5 = vmul.f32 %v6051_v56, %v6174_v20 }
 0x445   :  { %v6516_v32 = vrot.slane %v422_v10, %v11646_v53  ;;  %v11654_v53 = vsub.s32 5, %v6033_v42 }
 0x446   :  { %v6505_v12 = vpop.permute.xlu1 %1392  ;;  %v6542_v63 = vrot.slane %v422_v10, %v11655_v41  ;;  %11660 = vst [vmem:[#allocation130_spill] sm:$0xff] %v6554_v5  ;;  %v6562_v41 = vmul.f32 %v6047_v55, %v6334_v54  ;;  %v6628_v11 = vmul.f32 %v6520_v13, %v6212_v27  ;;  %v6690_v39 = vmul.f32 %v6532_v15, %v6387_v51 }
 0x447   :  { %11642 = vst [vmem:[#allocation120_spill] sm:$0xff] %v6505_v12  ;;  %11647 = vst [vmem:[#allocation124_spill] sm:$0xff] %v6516_v32  ;;  %v11649_v12 = vsub.s32 2, %v6033_v42 }
 0x448   :  { %2096 = vperm.xlu1 %5152, %v6237_v34   ;;  %v11650_v34 = vsub.s32 3, %v6033_v42  ;;  %11656 = vst [vmem:[#allocation127_spill] sm:$0xff] %v6542_v63  ;;  %11661 = vst [vmem:[#allocation131_spill] sm:$0xff] %v6562_v41  ;;  %v6650_v30 = vmul.f32 %v6542_v63, %v6374_v7 }
 0x449   :  { %v6524_v2 = vrot.slane %v422_v10, %v11649_v12  ;;  %v11657_v12 = vsub.s32 7, %v6033_v42  ;;  %11692 = vst [vmem:[#allocation162_spill] sm:$0xff] %v6690_v39 }
 0x44a   :  { %v6528_v19 = vrot.slane %v422_v10, %v11650_v34  ;;  %v6550_v34 = vmul.f32 %v6516_v32, %v6174_v20  ;;  %v6578_v20 = vmul.f32 %v6071_v61, %v6340_v52  ;;  %11683 = vst [vmem:[#allocation153_spill] sm:$0xff] %v6650_v30 }
 0x44b   :  { %v6508_v0 = vpop.permute.xlu1 %1620  ;;  %v6546_v14 = vrot.slane %v422_v10, %v11657_v12  ;;  %v6566_v42 = vmul.f32 %v6524_v2, %v6180_v21  ;;  %v6574_v12 = vmul.f32 %v6542_v63, %v6340_v52  ;;  %v6600_v52 = vmul.f32 %v6532_v15, %v6194_v24 }
 0x44c   :  { %11643 = vst [vmem:[#allocation121_spill] sm:$0xff] %v6508_v0  ;;  %11651 = vst [vmem:[#allocation125_spill] sm:$0xff] %v6528_v19  ;;  %v6538_v0 = vrot.slane %v422_v10, %v11654_v53  ;;  %v6558_v53 = vmul.f32 %v6520_v13, %v6334_v54  ;;  %v6570_v10 = vmul.f32 %v6055_v57, %v6180_v21 }
 0x44d   :  { %11658 = vst [vmem:[#allocation128_spill] sm:$0xff] %v6546_v14  ;;  %11659 = vst [vmem:[#allocation129_spill] sm:$0xff] %v6550_v34  ;;  %v6582_v54 = vmul.f32 %v6528_v19, %v6186_v22  ;;  %v6592_v21 = vmul.f32 %v6528_v19, %v6346_v49  ;;  %v6608_v22 = vmul.f32 %v6532_v15, %v6353_v48 }
 0x44e   :  { %11662 = vst [vmem:[#allocation132_spill] sm:$0xff] %v6566_v42  ;;  %11663 = vst [vmem:[#allocation133_spill] sm:$0xff] %v6570_v10  ;;  %v6616_v49 = vmul.f32 %v6528_v19, %v6380_v8  ;;  %v6620_v45 = vmul.f32 %v6538_v0, %v6200_v25  ;;  %v6624_v24 = vmul.f32 %v6067_v60, %v6200_v25 }
 0x44f   :  { %11664 = vst [vmem:[#allocation134_spill] sm:$0xff] %v6574_v12  ;;  %11665 = vst [vmem:[#allocation135_spill] sm:$0xff] %v6578_v20  ;;  %v6638_v44 = vmul.f32 %v6538_v0, %v6360_v47  ;;  %v6646_v25 = vmul.f32 %v6047_v55, %v6212_v27  ;;  %v6662_v47 = vmul.f32 %v6071_v61, %v6374_v7 }
 0x450   :  { %v6512_v46 = vpop.permute.xlu1 %1848  ;;  %11666 = vst [vmem:[#allocation136_spill] sm:$0xff] %v6582_v54  ;;  %11669 = vst [vmem:[#allocation139_spill] sm:$0xff] %v6592_v21  ;;  %v6666_v27 = vmul.f32 %v6516_v32, %v6218_v28  ;;  %v6672_v3 = vmul.f32 %v6546_v14, %v6366_v1  ;;  %v1207_v7 = vmax.f32 %v6582_v54, %v6616_v49 }
 0x451   :  { %11645 = vst [vmem:[#allocation123_spill] sm:$0xff] %v6512_v46  ;;  %v6534_v46 = vpop.permute.xlu0 %1624  ;;  %11671 = vst [vmem:[#allocation141_spill] sm:$0xff] %v6600_v52  ;;  %v526_v16 = vmax.f32 %v6628_v11, %v6558_v53  ;;  %v6694_v1 = vmul.f32 %v6063_v59, %v6387_v51  ;;  %v6702_v54 = vmul.f32 %v6538_v0, %v6394_v18 }
 0x452   :  { %11653 = vst [vmem:[#allocation126_spill] sm:$0xff] %v6534_v46  ;;  %11673 = vst [vmem:[#allocation143_spill] sm:$0xff] %v6608_v22  ;;  %v751_v51 = vmax.f32 %v6550_v34, %v6666_v27 }
 0x453   :  { %11675 = vst [vmem:[#allocation145_spill] sm:$0xff] %v6616_v49  ;;  %11676 = vst [vmem:[#allocation146_spill] sm:$0xff] %v6620_v45  ;;  %v1894_v49 = vmax.f32 %v6650_v30, %v6574_v12  ;;  %v6718_v30 = vmul.f32 %v6075_v62, %v6400_v17 }
 0x454   :  { %11677 = vst [vmem:[#allocation147_spill] sm:$0xff] %v6624_v24  ;;  %11680 = vst [vmem:[#allocation150_spill] sm:$0xff] %v6638_v44 }
 0x455   :  { %v6584_v46 = vpop.permute.xlu1 %2076  ;;  %v6634_v9 = vpop.permute.xlu0 %485  ;;  %11682 = vst [vmem:[#allocation152_spill] sm:$0xff] %v6646_v25  ;;  %11686 = vst [vmem:[#allocation156_spill] sm:$0xff] %v6662_v47 }
 0x456   :  { %11667 = vst [vmem:[#allocation137_spill] sm:$0xff] %v6584_v46  ;;  %v6612_v46 = vmul.f32 %v6063_v59, %v6353_v48  ;;  %v6632_v48 = vmul.f32 %v6059_v58, %v6380_v8  ;;  %11679 = vst [vmem:[#allocation149_spill] sm:$0xff] %v6634_v9  ;;  %v6654_v8 = vmul.f32 %v6546_v14, %v6206_v26 }
 0x457   :  { %v6658_v9 = vmul.f32 %v6075_v62, %v6206_v26  ;;  %11687 = vst [vmem:[#allocation157_spill] sm:$0xff] %v6666_v27  ;;  %11689 = vst [vmem:[#allocation159_spill] sm:$0xff] %v6672_v3  ;;  %v6680_v26 = vmul.f32 %v6051_v56, %v6218_v28  ;;  %v2817_v28 = vmax.f32 %v6646_v25, %v6562_v41 }
 0x458   :  { %11674 = vst [vmem:[#allocation144_spill] sm:$0xff] %v6612_v46  ;;  %11678 = vst [vmem:[#allocation148_spill] sm:$0xff] %v6632_v48  ;;  %v6714_v25 = vmul.f32 %v6546_v14, %v6400_v17  ;;  %v6725_v41 = vmax.f32 %v1207_v7, %v6592_v21  ;;  %v6733_v27 = vmul.f32 %v6055_v57, %v6226_v31 }
 0x459   :  { %11684 = vst [vmem:[#allocation154_spill] sm:$0xff] %v6654_v8  ;;  %11685 = vst [vmem:[#allocation155_spill] sm:$0xff] %v6658_v9  ;;  %v6720_v12 = vpop.permute.xlu0 %944  ;;  %v3470_v7 = vmax.f32 %v6604_v4, %v6694_v1  ;;  %v6746_v21 = vmul.f32 %v6542_v63, %v6408_v6  ;;  %v6782_v4 = vmul.f32 %v6516_v32, %v6248_v36 }
 0x45a   :  { %v6668_v40 = vpop.permute.xlu1 %480  ;;  %11691 = vst [vmem:[#allocation161_spill] sm:$0xff] %v6680_v26  ;;  %11693 = vst [vmem:[#allocation163_spill] sm:$0xff] %v6694_v1  ;;  %v6766_v1 = vmul.f32 %v6047_v55, %v6242_v35 }
 0x45b   :  { %11688 = vst [vmem:[#allocation158_spill] sm:$0xff] %v6668_v40  ;;  %v3306_v40 = vmax.f32 %v6588_v29, %v6632_v48  ;;  %11694 = vst [vmem:[#allocation164_spill] sm:$0xff] %v6702_v54  ;;  %v6706_v48 = vmul.f32 %v6067_v60, %v6394_v18  ;;  %v3801_v29 = vmax.f32 %v6662_v47, %v6578_v20 }
 0x45c   :  { %11696 = vst [vmem:[#allocation166_spill] sm:$0xff] %v6714_v25  ;;  %11697 = vst [vmem:[#allocation167_spill] sm:$0xff] %v6718_v30  ;;  %v2978_v18 = vmax.f32 %v6554_v5, %v6680_v26  ;;  %v6729_v47 = vmul.f32 %v6524_v2, %v6226_v31  ;;  %v1435_v20 = vmax.f32 %v6600_v52, %v6690_v39 }
 0x45d   :  { %11695 = vst [vmem:[#allocation165_spill] sm:$0xff] %v6706_v48  ;;  %11698 = vst [vmem:[#allocation168_spill] sm:$0xff] %v6720_v12  ;;  %v6738_v17 = vmax.f32 %v3306_v40, %v6596_v50  ;;  %v1663_v26 = vmax.f32 %v6620_v45, %v6702_v54  ;;  %v3634_v5 = vmax.f32 %v6624_v24, %v6706_v48 }
 0x45e   :  { %11699 = vst [vmem:[#allocation169_spill] sm:$0xff] %v6729_v47  ;;  %11700 = vst [vmem:[#allocation170_spill] sm:$0xff] %v6733_v27  ;;  %v6754_v40 = vmul.f32 %v6520_v13, %v6242_v35  ;;  %v6758_v50 = vmul.f32 %v6071_v61, %v6408_v6  ;;  %v6762_v31 = vmul.f32 %v6542_v63, %v6234_v33 }
 0x45f   :  { %v6735_v34 = vpop.permute.xlu1 %1396  ;;  %11702 = vst [vmem:[#allocation172_spill] sm:$0xff] %v6746_v21  ;;  %11706 = vst [vmem:[#allocation176_spill] sm:$0xff] %v6766_v1  ;;  %v2119_v54 = vmax.f32 %v6654_v8, %v6714_v25  ;;  %v3962_v48 = vmax.f32 %v6658_v9, %v6718_v30  ;;  %v979_v24 = vmax.f32 %v6566_v42, %v6729_v47  ;;  %v6796_v8 = vpop.permute.xlu0 %1400  ;;  %v11759_v47 = vld [vmem:[#allocation106_spill] sm:$0xff] }
 0x460   :  { %11701 = vst [vmem:[#allocation171_spill] sm:$0xff] %v6735_v34  ;;  %11703 = vst [vmem:[#allocation173_spill] sm:$0xff] %v6754_v40  ;;  %v3142_v6 = vmax.f32 %v6570_v10, %v6733_v27  ;;  %v6778_v45 = vmul.f32 %v6071_v61, %v6234_v33  ;;  %v6785_v35 = vmax.f32 %v6608_v22, %v1435_v20  ;;  %v11730_v22 = vld [vmem:[#allocation49_spill] sm:$0xff]  ;;  %v11752_v10 = vld [vmem:[#allocation104_spill] sm:$0xff] }
 0x461   :  { %11704 = vst [vmem:[#allocation174_spill] sm:$0xff] %v6758_v50  ;;  %11705 = vst [vmem:[#allocation175_spill] sm:$0xff] %v6762_v31  ;;  %v6788_v25 = vmax.f32 %v6612_v46, %v3470_v7  ;;  %v6792_v30 = vmul.f32 %v6051_v56, %v6248_v36  ;;  %v1892_v9 = vmax.f32 %v6762_v31, %v6746_v21 }
 0x462   :  { %11707 = vst [vmem:[#allocation177_spill] sm:$0xff] %v6778_v45  ;;  %11708 = vst [vmem:[#allocation178_spill] sm:$0xff] %v6782_v4  ;;  %v6801_v39 = vmax.f32 %v1663_v26, %v6638_v44  ;;  %v6804_v20 = vmax.f32 %v3634_v5, %v6642_v23  ;;  %v6807_v7 = vmax.f32 %v6754_v40, %v526_v16  ;;  %v11722_v44 = vld [vmem:[#allocation50_spill] sm:$0xff] }
 0x463   :  { %11709 = vst [vmem:[#allocation179_spill] sm:$0xff] %v6792_v30  ;;  %11710 = vst [vmem:[#allocation180_spill] sm:$0xff] %v6796_v8  ;;  %v3799_v36 = vmax.f32 %v6778_v45, %v6758_v50  ;;  %v6812_v46 = vmax.f32 %v6766_v1, %v2817_v28  ;;  %v6815_v21 = vmax.f32 %v6672_v3, %v2119_v54  ;;  %v11716_v3 = vld [vmem:[#allocation48_spill] sm:$0xff]  ;;  %v11719_v45 = vld [vmem:[#allocation91_spill] sm:$0xff] }
 0x464   :  { %v6798_v33 = vpop.permute.xlu1 %1852  ;;  %v6818_v31 = vmax.f32 %v6676_v43, %v3962_v48  ;;  %v6822_v26 = vmul.f32 %v6524_v2, %v6254_v37  ;;  %v754_v5 = vmax.f32 %v6782_v4, %v751_v51  ;;  %v6827_v16 = vmul.f32 %v6055_v57, %v6254_v37 }
 0x465   :  { %11711 = vst [vmem:[#allocation181_spill] sm:$0xff] %v6798_v33  ;;  %v6831_v28 = vmul.f32 %v6528_v19, %v6260_v38  ;;  %v6835_v54 = vmul.f32 %v6059_v58, %v6260_v38  ;;  %v2981_v48 = vmax.f32 %v6792_v30, %v2978_v18  ;;  %v1896_v43 = vmax.f32 %v1892_v9, %v1894_v49  ;;  %v11725_v30 = vld [vmem:[#allocation93_spill] sm:$0xff] }
 0x466   :  { %11712 = vst [vmem:[#allocation182_spill] sm:$0xff] %v6822_v26  ;;  %11713 = vst [vmem:[#allocation183_spill] sm:$0xff] %v6827_v16  ;;  %v6840_v50 = vmul.f32 %v6532_v15, %v11716_v3  ;;  %v6844_v51 = vmul.f32 %v6063_v59, %v11716_v3  ;;  %v3803_v4 = vmax.f32 %v3799_v36, %v3801_v29 }
 0x467   :  { %11714 = vst [vmem:[#allocation184_spill] sm:$0xff] %v6831_v28  ;;  %11715 = vst [vmem:[#allocation185_spill] sm:$0xff] %v6835_v54  ;;  %v6848_v23 = vmul.f32 %v6528_v19, %v11719_v45  ;;  %v6852_v38 = vmul.f32 %v6059_v58, %v11719_v45  ;;  %v6856_v49 = vmul.f32 %v6542_v63, %v11722_v44  ;;  %v6873_v45 = vpop.permute.xlu0 %1628 }
 0x468   :  { %11717 = vst [vmem:[#allocation186_spill] sm:$0xff] %v6840_v50  ;;  %11718 = vst [vmem:[#allocation187_spill] sm:$0xff] %v6844_v51  ;;  %v983_v18 = vmax.f32 %v979_v24, %v6822_v26  ;;  %v6863_v3 = vmul.f32 %v6532_v15, %v11725_v30  ;;  %v6867_v36 = vmul.f32 %v6063_v59, %v11725_v30  ;;  %v11732_v30 = vld [vmem:[#allocation95_spill] sm:$0xff] }
 0x469   :  { %11720 = vst [vmem:[#allocation188_spill] sm:$0xff] %v6848_v23  ;;  %11721 = vst [vmem:[#allocation189_spill] sm:$0xff] %v6852_v38  ;;  %v6858_v9 = vpop.permute.xlu1 %2080  ;;  %v6871_v29 = vmul.f32 %v6071_v61, %v11722_v44  ;;  %v3146_v37 = vmax.f32 %v3142_v6, %v6827_v16  ;;  %v6878_v52 = vmul.f32 %v6538_v0, %v11730_v22  ;;  %v11736_v23 = vld [vmem:[#allocation97_spill] sm:$0xff]  ;;  %v11739_v6 = vld [vmem:[#allocation51_spill] sm:$0xff] }
 0x46a   :  { %11723 = vst [vmem:[#allocation190_spill] sm:$0xff] %v6856_v49  ;;  %11724 = vst [vmem:[#allocation191_spill] sm:$0xff] %v6858_v9  ;;  %v6886_v33 = vmul.f32 %v6538_v0, %v11732_v30  ;;  %v6890_v44 = vmul.f32 %v6067_v60, %v11732_v30  ;;  %v6898_v24 = vmul.f32 %v6067_v60, %v11730_v22  ;;  %v11741_v16 = vld [vmem:[#allocation102_spill] sm:$0xff] }
 0x46b   :  { %11726 = vst [vmem:[#allocation192_spill] sm:$0xff] %v6863_v3  ;;  %11727 = vst [vmem:[#allocation193_spill] sm:$0xff] %v6867_v36  ;;  %v6902_v9 = vmul.f32 %v6546_v14, %v11736_v23  ;;  %v6906_v38 = vmul.f32 %v6075_v62, %v11736_v23  ;;  %v1893_v30 = vmax.f32 %v6856_v49, %v1896_v43  ;;  %v11745_v23 = vld [vmem:[#allocation100_spill] sm:$0xff]  ;;  %v6954_v3 = vpop.permute.xlu0 %1856 }
 0x46c   :  { %11728 = vst [vmem:[#allocation194_spill] sm:$0xff] %v6871_v29  ;;  %11729 = vst [vmem:[#allocation195_spill] sm:$0xff] %v6873_v45  ;;  %v3800_v54 = vmax.f32 %v6871_v29, %v3803_v4  ;;  %v6912_v28 = vmul.f32 %v6546_v14, %v11739_v6  ;;  %v6916_v22 = vmul.f32 %v6516_v32, %v11741_v16  ;;  %v11748_v4 = vld [vmem:[#allocation52_spill] sm:$0xff] }
 0x46d   :  { %11731 = vst [vmem:[#allocation196_spill] sm:$0xff] %v6878_v52  ;;  %11733 = vst [vmem:[#allocation197_spill] sm:$0xff] %v6886_v33  ;;  %v6920_v36 = vmul.f32 %v6051_v56, %v11741_v16  ;;  %v6926_v27 = vmul.f32 %v6542_v63, %v11745_v23  ;;  %v6930_v43 = vmul.f32 %v6075_v62, %v11739_v6  ;;  %v11756_v33 = vld [vmem:[#allocation53_spill] sm:$0xff] }
 0x46e   :  { %11734 = vst [vmem:[#allocation198_spill] sm:$0xff] %v6890_v44  ;;  %11735 = vst [vmem:[#allocation199_spill] sm:$0xff] %v6898_v24  ;;  %v6922_v51 = vpop.permute.xlu1 %716  ;;  %v6934_v29 = vmul.f32 %v6520_v13, %v11748_v4  ;;  %v6940_v16 = vmul.f32 %v6071_v61, %v11745_v23  ;;  %v6948_v34 = vmul.f32 %v6524_v2, %v11752_v10  ;;  %v11779_v44 = vld [vmem:[#allocation113_spill] sm:$0xff]  ;;  %v11785_v24 = vld [vmem:[#allocation115_spill] sm:$0xff] }
 0x46f   :  { %11737 = vst [vmem:[#allocation200_spill] sm:$0xff] %v6902_v9  ;;  %11738 = vst [vmem:[#allocation201_spill] sm:$0xff] %v6906_v38  ;;  %v6952_v6 = vmul.f32 %v6055_v57, %v11752_v10  ;;  %v6957_v49 = vmax.f32 %v6926_v27, %v1893_v30  ;;  %v6961_v23 = vmul.f32 %v6516_v32, %v11756_v33 }
 0x470   :  { %11740 = vst [vmem:[#allocation202_spill] sm:$0xff] %v6912_v28  ;;  %11742 = vst [vmem:[#allocation203_spill] sm:$0xff] %v6916_v22  ;;  %v6970_v50 = vmax.f32 %v6940_v16, %v3800_v54  ;;  %v752_v10 = vmax.f32 %v6916_v22, %v754_v5  ;;  %v2979_v26 = vmax.f32 %v6920_v36, %v2981_v48 }
 0x471   :  { %11743 = vst [vmem:[#allocation204_spill] sm:$0xff] %v6920_v36  ;;  %11744 = vst [vmem:[#allocation205_spill] sm:$0xff] %v6922_v51  ;;  %v6944_v51 = vmul.f32 %v6047_v55, %v11748_v4  ;;  %v6965_v4 = vmul.f32 %v6051_v56, %v11756_v33  ;;  %v6980_v33 = vmul.f32 %v6528_v19, %v11759_v47  ;;  %v11763_v36 = vld [vmem:[#allocation54_spill] sm:$0xff] }
 0x472   :  { %11746 = vst [vmem:[#allocation206_spill] sm:$0xff] %v6926_v27  ;;  %11747 = vst [vmem:[#allocation207_spill] sm:$0xff] %v6930_v43  ;;  %v6984_v52 = vmul.f32 %v6059_v58, %v11759_v47  ;;  %v987_v30 = vmax.f32 %v983_v18, %v6948_v34  ;;  %v3150_v27 = vmax.f32 %v3146_v37, %v6952_v6  ;;  %v11768_v18 = vld [vmem:[#allocation108_spill] sm:$0xff] }
 0x473   :  { %11749 = vst [vmem:[#allocation208_spill] sm:$0xff] %v6934_v29  ;;  %11750 = vst [vmem:[#allocation209_spill] sm:$0xff] %v6940_v16  ;;  %v6988_v5 = vpop.permute.xlu1 %1172  ;;  %v2818_v48 = vmax.f32 %v6812_v46, %v6944_v51  ;;  %v6996_v22 = vmul.f32 %v6524_v2, %v11763_v36  ;;  %v6999_v16 = vmax.f32 %v752_v10, %v6961_v23  ;;  %v11771_v10 = vld [vmem:[#allocation55_spill] sm:$0xff]  ;;  %v11776_v43 = vld [vmem:[#allocation56_spill] sm:$0xff] }
 0x474   :  { %11751 = vst [vmem:[#allocation210_spill] sm:$0xff] %v6944_v51  ;;  %11753 = vst [vmem:[#allocation211_spill] sm:$0xff] %v6948_v34  ;;  %v7002_v47 = vmax.f32 %v2979_v26, %v6965_v4  ;;  %v7006_v54 = vmul.f32 %v6055_v57, %v11763_v36  ;;  %v7014_v37 = vmul.f32 %v6538_v0, %v11768_v18 }
 0x475   :  { %11754 = vst [vmem:[#allocation212_spill] sm:$0xff] %v6952_v6  ;;  %11755 = vst [vmem:[#allocation213_spill] sm:$0xff] %v6954_v3  ;;  %v7018_v6 = vmul.f32 %v6067_v60, %v11768_v18  ;;  %v7022_v26 = vmul.f32 %v6528_v19, %v11771_v10  ;;  %v1210_v36 = vmax.f32 %v6980_v33, %v6725_v41 }
 0x476   :  { %11757 = vst [vmem:[#allocation214_spill] sm:$0xff] %v6961_v23  ;;  %11758 = vst [vmem:[#allocation215_spill] sm:$0xff] %v6965_v4  ;;  %v7028_v23 = vpop.permute.xlu0 %720  ;;  %v3309_v38 = vmax.f32 %v6984_v52, %v6738_v17  ;;  %v7036_v18 = vmul.f32 %v6059_v58, %v11771_v10  ;;  %v7040_v9 = vmul.f32 %v6532_v15, %v11776_v43 }
 0x477   :  { %11760 = vst [vmem:[#allocation216_spill] sm:$0xff] %v6980_v33  ;;  %11761 = vst [vmem:[#allocation217_spill] sm:$0xff] %v6984_v52  ;;  %v7043_v28 = vmax.f32 %v6996_v22, %v987_v30  ;;  %v7051_v41 = vmul.f32 %v6542_v63, %v11779_v44  ;;  %v7055_v17 = vmul.f32 %v6071_v61, %v11779_v44  ;;  %v11783_v33 = vld [vmem:[#allocation57_spill] sm:$0xff] }
 0x478   :  { %11762 = vst [vmem:[#allocation218_spill] sm:$0xff] %v6988_v5  ;;  %11764 = vst [vmem:[#allocation219_spill] sm:$0xff] %v6996_v22  ;;  %v11766_v5 = vld [vmem:[#allocation111_spill] sm:$0xff]  ;;  %v7057_v10 = vpop.permute.xlu1 %2084  ;;  %v7060_v52 = vmax.f32 %v7006_v54, %v3150_v27  ;;  %v7070_v34 = vmul.f32 %v6546_v14, %v11785_v24  ;;  %v1671_v44 = vmax.f32 %v6801_v39, %v7014_v37 }
 0x479   :  { %11765 = vst [vmem:[#allocation220_spill] sm:$0xff] %v7006_v54  ;;  %v7010_v46 = vmul.f32 %v6532_v15, %v11766_v5  ;;  %11769 = vst [vmem:[#allocation222_spill] sm:$0xff] %v7014_v37  ;;  %v7026_v4 = vmul.f32 %v6063_v59, %v11766_v5  ;;  %v7047_v5 = vmul.f32 %v6063_v59, %v11776_v43  ;;  %v11797_v37 = vld [vmem:[#allocation59_spill] sm:$0xff] }
 0x47a   :  { %11770 = vst [vmem:[#allocation223_spill] sm:$0xff] %v7018_v6  ;;  %11772 = vst [vmem:[#allocation224_spill] sm:$0xff] %v7022_v26  ;;  %v7066_v43 = vmul.f32 %v6538_v0, %v11783_v33  ;;  %v7077_v27 = vmax.f32 %v7022_v26, %v1210_v36  ;;  %v7089_v22 = vmul.f32 %v6067_v60, %v11783_v33  ;;  %v11789_v36 = vld [vmem:[#allocation58_spill] sm:$0xff] }
 0x47b   :  { %11767 = vst [vmem:[#allocation221_spill] sm:$0xff] %v7010_v46  ;;  %11773 = vst [vmem:[#allocation225_spill] sm:$0xff] %v7026_v4  ;;  %v1438_v30 = vmax.f32 %v7010_v46, %v6785_v35  ;;  %v3473_v35 = vmax.f32 %v7026_v4, %v6788_v25  ;;  %v7082_v46 = vmax.f32 %v7036_v18, %v3309_v38  ;;  %v11793_v25 = vld [vmem:[#allocation117_spill] sm:$0xff] }
 0x47c   :  { %11774 = vst [vmem:[#allocation226_spill] sm:$0xff] %v7028_v23  ;;  %11775 = vst [vmem:[#allocation227_spill] sm:$0xff] %v7036_v18  ;;  %v7093_v39 = vmul.f32 %v6075_v62, %v11785_v24  ;;  %v7106_v18 = vpop.permute.xlu0 %1176  ;;  %v7109_v26 = vmax.f32 %v7066_v43, %v1671_v44  ;;  %v2124_v24 = vmax.f32 %v6815_v21, %v7070_v34 }
 0x47d   :  { %11777 = vst [vmem:[#allocation228_spill] sm:$0xff] %v7040_v9  ;;  %11778 = vst [vmem:[#allocation229_spill] sm:$0xff] %v7047_v5  ;;  %v7085_v54 = vmax.f32 %v7040_v9, %v1438_v30  ;;  %v7104_v30 = vmul.f32 %v6546_v14, %v11789_v36  ;;  %v7119_v33 = vmul.f32 %v6516_v32, %v11793_v25  ;;  %v7121_v38 = vpop.permute.xlu1 %490 }
 0x47e   :  { %11780 = vst [vmem:[#allocation230_spill] sm:$0xff] %v7051_v41  ;;  %11781 = vst [vmem:[#allocation231_spill] sm:$0xff] %v7055_v17  ;;  %v7129_v44 = vmul.f32 %v6520_v13, %v11797_v37  ;;  %v7133_v21 = vmul.f32 %v6047_v55, %v11797_v37  ;;  %v3967_v4 = vmax.f32 %v6818_v31, %v7093_v39 }
 0x47f   :  { %11782 = vst [vmem:[#allocation232_spill] sm:$0xff] %v7057_v10  ;;  %11784 = vst [vmem:[#allocation233_spill] sm:$0xff] %v7066_v43  ;;  %v3642_v10 = vmax.f32 %v6804_v20, %v7018_v6  ;;  %v7096_v20 = vmax.f32 %v7047_v5, %v3473_v35  ;;  %v7115_v35 = vmul.f32 %v6075_v62, %v11789_v36  ;;  %v11800_v36 = vld [vmem:[#allocation119_spill] sm:$0xff]  ;;  %v11803_v5 = vld [vmem:[#allocation60_spill] sm:$0xff] }
 0x480   :  { %11786 = vst [vmem:[#allocation234_spill] sm:$0xff] %v7070_v34  ;;  %11787 = vst [vmem:[#allocation235_spill] sm:$0xff] %v7089_v22  ;;  %v7125_v6 = vmul.f32 %v6051_v56, %v11793_v25  ;;  %v7137_v34 = vmul.f32 %v6524_v2, %v11800_v36  ;;  %v7146_v25 = vmul.f32 %v6055_v57, %v11800_v36 }
 0x481   :  { %11788 = vst [vmem:[#allocation236_spill] sm:$0xff] %v7093_v39  ;;  %11790 = vst [vmem:[#allocation237_spill] sm:$0xff] %v7104_v30  ;;  %v7140_v43 = vmax.f32 %v7089_v22, %v3642_v10  ;;  %v7150_v9 = vmul.f32 %v6516_v32, %v11803_v5  ;;  %v7153_v37 = vmax.f32 %v2124_v24, %v7104_v30  ;;  %v11806_v10 = vld [vmem:[#allocation122_spill] sm:$0xff]  ;;  %v11809_v24 = vld [vmem:[#allocation149_spill] sm:$0xff] }
 0x482   :  { %11791 = vst [vmem:[#allocation238_spill] sm:$0xff] %v7106_v18  ;;  %11792 = vst [vmem:[#allocation239_spill] sm:$0xff] %v7115_v35  ;;  %v7157_v42 = vmul.f32 %v6051_v56, %v11803_v5  ;;  %v7161_v22 = vmul.f32 %v6528_v19, %v11806_v10  ;;  %v7165_v31 = vmul.f32 %v6059_v58, %v11806_v10  ;;  %v7191_v1 = vpop.permute.xlu1 %948 }
 0x483   :  { %11794 = vst [vmem:[#allocation240_spill] sm:$0xff] %v7119_v33  ;;  %11795 = vst [vmem:[#allocation241_spill] sm:$0xff] %v7121_v38  ;;  %v7168_v39 = vmax.f32 %v3967_v4, %v7115_v35  ;;  %v760_v36 = vmax.f32 %v6999_v16, %v7119_v33  ;;  %v7174_v30 = vmul.f32 %v6520_v13, %v11809_v24  ;;  %v7189_v33 = vpop.permute.xlu0 %500 }
 0x484   :  { %11796 = vst [vmem:[#allocation242_spill] sm:$0xff] %v7125_v6  ;;  %11798 = vst [vmem:[#allocation243_spill] sm:$0xff] %v7129_v44  ;;  %v7178_v5 = vmul.f32 %v6047_v55, %v11809_v24  ;;  %v2987_v51 = vmax.f32 %v7002_v47, %v7125_v6  ;;  %v11812_v10 = vmax.f32 %v6807_v7, %v6934_v29  ;;  %v11815_v47 = vld [vmem:[#allocation63_spill] sm:$0xff]  ;;  %v11838_v29 = vld [vmem:[#allocation96_spill] sm:$0xff] }
 0x485   :  { %11799 = vst [vmem:[#allocation244_spill] sm:$0xff] %v7133_v21  ;;  %11801 = vst [vmem:[#allocation245_spill] sm:$0xff] %v7137_v34  ;;  %v2822_v35 = vmax.f32 %v2818_v48, %v7133_v21  ;;  %v982_v16 = vmax.f32 %v7137_v34, %v7043_v28  ;;  %v3145_v24 = vmax.f32 %v7146_v25, %v7060_v52  ;;  %v11823_v52 = vld [vmem:[#allocation126_spill] sm:$0xff] }
 0x486   :  { %11802 = vst [vmem:[#allocation246_spill] sm:$0xff] %v7146_v25  ;;  %11804 = vst [vmem:[#allocation247_spill] sm:$0xff] %v7150_v9  ;;  %v531_v4 = vmax.f32 %v11812_v10, %v7129_v44  ;;  %v7196_v40 = vmax.f32 %v7150_v9, %v760_v36  ;;  %v7200_v6 = vmul.f32 %v6520_v13, %v11815_v47  ;;  %v11818_v10 = vld [vmem:[#allocation61_spill] sm:$0xff] }
 0x487   :  { %11805 = vst [vmem:[#allocation248_spill] sm:$0xff] %v7157_v42  ;;  %11807 = vst [vmem:[#allocation249_spill] sm:$0xff] %v7161_v22  ;;  %v7204_v7 = vmul.f32 %v6047_v55, %v11815_v47  ;;  %v7207_v28 = vmax.f32 %v7157_v42, %v2987_v51  ;;  %v7215_v36 = vmul.f32 %v6524_v2, %v11818_v10  ;;  %v7253_v44 = vpop.permute.xlu1 %1404 }
 0x488   :  { %11808 = vst [vmem:[#allocation250_spill] sm:$0xff] %v7165_v31  ;;  %11810 = vst [vmem:[#allocation251_spill] sm:$0xff] %v7174_v30  ;;  %v524_v9 = vmax.f32 %v7174_v30, %v531_v4  ;;  %v2815_v25 = vmax.f32 %v7178_v5, %v2822_v35  ;;  %v7221_v47 = vmul.f32 %v6520_v13, %v7189_v33  ;;  %v11826_v35 = vld [vmem:[#allocation62_spill] sm:$0xff]  ;;  %v11828_v30 = vld [vmem:[#allocation76_spill] sm:$0xff] }
 0x489   :  { %11811 = vst [vmem:[#allocation252_spill] sm:$0xff] %v7178_v5  ;;  %11813 = vst [vmem:[#allocation253_spill] sm:$0xff] %v7189_v33  ;;  %v7225_v51 = vmul.f32 %v6047_v55, %v7189_v33  ;;  %v7229_v48 = vmul.f32 %v6055_v57, %v11818_v10  ;;  %v7233_v42 = vmul.f32 %v6538_v0, %v11823_v52 }
 0x48a   :  { %11814 = vst [vmem:[#allocation254_spill] sm:$0xff] %v7191_v1  ;;  %11816 = vst [vmem:[#allocation255_spill] sm:$0xff] %v7200_v6  ;;  %v7237_v4 = vmul.f32 %v6067_v60, %v11823_v52  ;;  %v7241_v34 = vmul.f32 %v6542_v63, %v11826_v35  ;;  %v528_v5 = vmax.f32 %v524_v9, %v7200_v6  ;;  %v11834_v6 = vld [vmem:[#allocation83_spill] sm:$0xff] }
 0x48b   :  { %11817 = vst [vmem:[#allocation256_spill] sm:$0xff] %v7204_v7  ;;  %11819 = vst [vmem:[#allocation257_spill] sm:$0xff] %v7215_v36  ;;  %v2819_v33 = vmax.f32 %v2815_v25, %v7204_v7  ;;  %v7247_v10 = vmul.f32 %v6520_v13, %v11828_v30  ;;  %v7251_v21 = vmul.f32 %v6047_v55, %v11828_v30 }
 0x48c   :  { %11820 = vst [vmem:[#allocation258_spill] sm:$0xff] %v7221_v47  ;;  %11821 = vst [vmem:[#allocation259_spill] sm:$0xff] %v7225_v51  ;;  %v986_v52 = vmax.f32 %v982_v16, %v7215_v36  ;;  %v7258_v1 = vmul.f32 %v6071_v61, %v11826_v35  ;;  %v7262_v9 = vmul.f32 %v6524_v2, %v6720_v12 }
 0x48d   :  { %11822 = vst [vmem:[#allocation260_spill] sm:$0xff] %v7229_v48  ;;  %11824 = vst [vmem:[#allocation261_spill] sm:$0xff] %v7233_v42  ;;  %v7266_v25 = vmul.f32 %v6055_v57, %v6720_v12  ;;  %v525_v7 = vmax.f32 %v7221_v47, %v528_v5  ;;  %v2816_v30 = vmax.f32 %v7225_v51, %v2819_v33  ;;  %v7289_v51 = vpop.permute.xlu0 %956 }
 0x48e   :  { %11825 = vst [vmem:[#allocation262_spill] sm:$0xff] %v7237_v4  ;;  %11827 = vst [vmem:[#allocation263_spill] sm:$0xff] %v7241_v34  ;;  %v7276_v16 = vmul.f32 %v6047_v55, %v11834_v6  ;;  %v3149_v35 = vmax.f32 %v3145_v24, %v7229_v48  ;;  %v1670_v36 = vmax.f32 %v7109_v26, %v7233_v42 }
 0x48f   :  { %11829 = vst [vmem:[#allocation264_spill] sm:$0xff] %v7251_v21  ;;  %11830 = vst [vmem:[#allocation265_spill] sm:$0xff] %v7253_v44  ;;  %v7272_v44 = vmul.f32 %v6520_v13, %v11834_v6  ;;  %v3641_v12 = vmax.f32 %v7140_v43, %v7237_v4  ;;  %v11836_v33 = vmax.f32 %v6957_v49, %v7051_v41  ;;  %v11841_v41 = vld [vmem:[#allocation64_spill] sm:$0xff] }
 0x490   :  { %11831 = vst [vmem:[#allocation266_spill] sm:$0xff] %v7258_v1  ;;  %11832 = vst [vmem:[#allocation267_spill] sm:$0xff] %v7262_v9  ;;  %v529_v47 = vmax.f32 %v525_v7, %v7247_v10  ;;  %v2820_v6 = vmax.f32 %v2816_v30, %v7251_v21  ;;  %v7295_v24 = vmul.f32 %v6520_v13, %v11838_v29 }
 0x491   :  { %11833 = vst [vmem:[#allocation268_spill] sm:$0xff] %v7266_v25  ;;  %11835 = vst [vmem:[#allocation269_spill] sm:$0xff] %v7276_v16  ;;  %v7287_v5 = vmax.f32 %v11836_v33, %v7241_v34  ;;  %v7299_v26 = vmul.f32 %v6047_v55, %v11838_v29  ;;  %v11840_v49 = vmax.f32 %v6970_v50, %v7055_v17  ;;  %v7313_v34 = vpop.permute.xlu1 %1632  ;;  %v11844_v29 = vld [vmem:[#allocation103_spill] sm:$0xff] }
 0x492   :  { %11837 = vst [vmem:[#allocation270_spill] sm:$0xff] %v7289_v51  ;;  %v980_v33 = vmax.f32 %v7262_v9, %v986_v52  ;;  %v3143_v7 = vmax.f32 %v7266_v25, %v3149_v35  ;;  %v7311_v30 = vmul.f32 %v6516_v32, %v11841_v41  ;;  %11843 = vst [vmem:[#allocation273_spill] sm:$0xff] %v7313_v34  ;;  %v7365_v9 = vpop.permute.xlu0 %1412 }
 0x493   :  { %11839 = vst [vmem:[#allocation271_spill] sm:$0xff] %v7299_v26  ;;  %v7305_v43 = vmax.f32 %v11840_v49, %v7258_v1  ;;  %v530_v4 = vmax.f32 %v7272_v44, %v529_v47  ;;  %v2821_v42 = vmax.f32 %v7276_v16, %v2820_v6  ;;  %v7319_v48 = vmul.f32 %v6520_v13, %v11844_v29  ;;  %v11850_v6 = vld [vmem:[#allocation66_spill] sm:$0xff] }
 0x494   :  { %11842 = vst [vmem:[#allocation272_spill] sm:$0xff] %v7311_v30  ;;  %v7323_v50 = vmul.f32 %v6047_v55, %v11844_v29  ;;  %v7327_v52 = vmul.f32 %v6051_v56, %v11841_v41  ;;  %v7331_v35 = vmul.f32 %v6532_v15, %v6796_v8  ;;  %v7335_v47 = vmul.f32 %v6063_v59, %v6796_v8  ;;  %v11852_v29 = vld [vmem:[#allocation112_spill] sm:$0xff]  ;;  %v11858_v16 = vld [vmem:[#allocation158_spill] sm:$0xff] }
 0x495   :  { %11845 = vst [vmem:[#allocation274_spill] sm:$0xff] %v7319_v48  ;;  %v7339_v49 = vmul.f32 %v6524_v2, %v11850_v6  ;;  %v534_v17 = vmax.f32 %v530_v4, %v7295_v24  ;;  %v2825_v1 = vmax.f32 %v2821_v42, %v7299_v26  ;;  %v7345_v41 = vmul.f32 %v6520_v13, %v11852_v29 }
 0x496   :  { %11846 = vst [vmem:[#allocation275_spill] sm:$0xff] %v7323_v50  ;;  %11847 = vst [vmem:[#allocation276_spill] sm:$0xff] %v7327_v52  ;;  %v7349_v25 = vmul.f32 %v6047_v55, %v11852_v29  ;;  %v757_v8 = vmax.f32 %v7196_v40, %v7311_v30  ;;  %v7355_v34 = vmul.f32 %v6055_v57, %v11850_v6  ;;  %v7377_v6 = vpop.permute.xlu1 %1860 }
 0x497   :  { %11848 = vst [vmem:[#allocation277_spill] sm:$0xff] %v7331_v35  ;;  %11849 = vst [vmem:[#allocation278_spill] sm:$0xff] %v7335_v47  ;;  %v7359_v4 = vmul.f32 %v6538_v0, %v6873_v45  ;;  %v7363_v42 = vmul.f32 %v6067_v60, %v6873_v45  ;;  %v532_v29 = vmax.f32 %v7319_v48, %v534_v17 }
 0x498   :  { %11851 = vst [vmem:[#allocation279_spill] sm:$0xff] %v7339_v49  ;;  %11853 = vst [vmem:[#allocation280_spill] sm:$0xff] %v7349_v25  ;;  %v2823_v26 = vmax.f32 %v7323_v50, %v2825_v1  ;;  %v7371_v40 = vmul.f32 %v6520_v13, %v11858_v16  ;;  %v7375_v30 = vmul.f32 %v6047_v55, %v11858_v16 }
 0x499   :  { %11854 = vst [vmem:[#allocation281_spill] sm:$0xff] %v7355_v34  ;;  %11855 = vst [vmem:[#allocation282_spill] sm:$0xff] %v7359_v4  ;;  %v2984_v45 = vmax.f32 %v7207_v28, %v7327_v52  ;;  %v1443_v21 = vmax.f32 %v7085_v54, %v7331_v35  ;;  %v3478_v17 = vmax.f32 %v7096_v20, %v7335_v47  ;;  %v7437_v35 = vpop.permute.xlu0 %1640 }
 0x49a   :  { %11856 = vst [vmem:[#allocation283_spill] sm:$0xff] %v7363_v42  ;;  %11857 = vst [vmem:[#allocation284_spill] sm:$0xff] %v7365_v9  ;;  %v7386_v1 = vmax.f32 %v980_v33, %v7339_v49  ;;  %v535_v50 = vmax.f32 %v7345_v41, %v532_v29  ;;  %v2826_v48 = vmax.f32 %v7349_v25, %v2823_v26  ;;  %v11863_v29 = vld [vmem:[#allocation68_spill] sm:$0xff] }
 0x49b   :  { %11859 = vst [vmem:[#allocation285_spill] sm:$0xff] %v7375_v30  ;;  %11860 = vst [vmem:[#allocation286_spill] sm:$0xff] %v7377_v6  ;;  %v7392_v16 = vmul.f32 %v6520_v13, %v7121_v38  ;;  %v7396_v28 = vmul.f32 %v6047_v55, %v7121_v38  ;;  %v7399_v54 = vmax.f32 %v3143_v7, %v7355_v34  ;;  %v11876_v49 = vld [vmem:[#allocation72_spill] sm:$0xff] }
 0x49c   :  { %v7402_v20 = vmax.f32 %v7359_v4, %v1670_v36  ;;  %v7405_v33 = vmax.f32 %v7363_v42, %v3641_v12  ;;  %v7409_v26 = vmul.f32 %v6528_v19, %v11863_v29  ;;  %v7413_v52 = vmul.f32 %v6059_v58, %v11863_v29  ;;  %v11868_v42 = vld [vmem:[#allocation70_spill] sm:$0xff]  ;;  %11872 = vst [vmem:[#allocation296_spill] sm:$0xff] %v7437_v35 }
 0x49d   :  { %11861 = vst [vmem:[#allocation287_spill] sm:$0xff] %v7392_v16  ;;  %11862 = vst [vmem:[#allocation288_spill] sm:$0xff] %v7396_v28  ;;  %v7417_v47 = vmul.f32 %v6542_v63, %v6954_v3  ;;  %v533_v7 = vmax.f32 %v7371_v40, %v535_v50  ;;  %v2824_v36 = vmax.f32 %v7375_v30, %v2826_v48  ;;  %v7439_v50 = vpop.permute.xlu1 %495 }
 0x49e   :  { %11864 = vst [vmem:[#allocation289_spill] sm:$0xff] %v7409_v26  ;;  %11865 = vst [vmem:[#allocation290_spill] sm:$0xff] %v7413_v52  ;;  %v7423_v12 = vmul.f32 %v6071_v61, %v6954_v3  ;;  %v7427_v4 = vmul.f32 %v6532_v15, %v11868_v42  ;;  %v7431_v29 = vmul.f32 %v6063_v59, %v11868_v42 }
 0x49f   :  { %11866 = vst [vmem:[#allocation291_spill] sm:$0xff] %v7417_v47  ;;  %v7435_v38 = vmul.f32 %v6516_v32, %v7028_v23  ;;  %11873 = vst [vmem:[#allocation297_spill] sm:$0xff] %v7439_v50  ;;  %v536_v48 = vmax.f32 %v533_v7, %v7392_v16  ;;  %v2827_v3 = vmax.f32 %v2824_v36, %v7396_v28 }
 0x4a0   :  { %11867 = vst [vmem:[#allocation292_spill] sm:$0xff] %v7423_v12  ;;  %11869 = vst [vmem:[#allocation293_spill] sm:$0xff] %v7427_v4  ;;  %v7445_v6 = vmul.f32 %v6520_v13, %v7439_v50  ;;  %v7449_v42 = vmul.f32 %v6047_v55, %v7439_v50  ;;  %v7453_v34 = vmul.f32 %v6051_v56, %v7028_v23 }
 0x4a1   :  { %11870 = vst [vmem:[#allocation294_spill] sm:$0xff] %v7431_v29  ;;  %11871 = vst [vmem:[#allocation295_spill] sm:$0xff] %v7435_v38  ;;  %v7457_v30 = vmul.f32 %v6538_v0, %v11876_v49  ;;  %v7461_v7 = vmul.f32 %v6067_v60, %v11876_v49  ;;  %v7465_v13 = vmul.f32 %v6528_v19, %v7106_v18 }
 0x4a2   :  { %11874 = vst [vmem:[#allocation298_spill] sm:$0xff] %v7449_v42  ;;  %11875 = vst [vmem:[#allocation299_spill] sm:$0xff] %v7453_v34  ;;  %v11880_v55 = vmax.f32 %v7077_v27, %v7161_v22  ;;  %v11881_v23 = vmax.f32 %v7082_v46, %v7165_v31  ;;  %v537_v28 = vmax.f32 %v7445_v6, %v536_v48  ;;  %v7511_v31 = vpop.permute.xlu0 %1868 }
 0x4a3   :  { %11877 = vst [vmem:[#allocation300_spill] sm:$0xff] %v7457_v30  ;;  %11878 = vst [vmem:[#allocation301_spill] sm:$0xff] %v7461_v7  ;;  %v2828_v49 = vmax.f32 %v7449_v42, %v2827_v3  ;;  %v1897_v25 = vmax.f32 %v7417_v47, %v7287_v5  ;;  %v3804_v16 = vmax.f32 %v7423_v12, %v7305_v43  ;;  %v11883_v3 = vld [vmem:[#allocation74_spill] sm:$0xff]  ;;  %v11896_v47 = vld [vmem:[#allocation81_spill] sm:$0xff] }
 0x4a4   :  { %11879 = vst [vmem:[#allocation302_spill] sm:$0xff] %v7465_v13  ;;  %v7471_v36 = vmax.f32 %v11880_v55, %v7409_v26  ;;  %v7477_v50 = vmax.f32 %v11881_v23, %v7413_v52  ;;  %v7486_v27 = vmax.f32 %v7427_v4, %v1443_v21  ;;  %v7490_v55 = vmul.f32 %v6059_v58, %v7106_v18 }
 0x4a5   :  { %v7493_v23 = vmax.f32 %v7431_v29, %v3478_v17  ;;  %v7496_v46 = vmax.f32 %v7435_v38, %v757_v8  ;;  %v7500_v48 = vmul.f32 %v6546_v14, %v11883_v3  ;;  %v538_v5 = vrot.slane %v537_v28, 4  ;;  %11885 = vst [vmem:[#allocation305_spill] sm:$0xff] %v7511_v31  ;;  %v11889_v17 = vld [vmem:[#allocation77_spill] sm:$0xff]  ;;  %v11894_v38 = vld [vmem:[#allocation79_spill] sm:$0xff] }
 0x4a6   :  { %11882 = vst [vmem:[#allocation303_spill] sm:$0xff] %v7490_v55  ;;  %v7503_v43 = vmax.f32 %v7453_v34, %v2984_v45  ;;  %v1668_v21 = vmax.f32 %v7402_v20, %v7457_v30  ;;  %v3639_v18 = vmax.f32 %v7405_v33, %v7461_v7  ;;  %v7515_v8 = vmul.f32 %v6075_v62, %v11883_v3  ;;  %v7575_v42 = vpop.permute.xlu0 %2088 }
 0x4a7   :  { %11884 = vst [vmem:[#allocation304_spill] sm:$0xff] %v7500_v48  ;;  %v7519_v52 = vmul.f32 %v6524_v2, %v7289_v51  ;;  %v539_v45 = vmax.f32 %v537_v28, %v538_v5  ;;  %v2829_v22 = vrot.slane %v2828_v49, 4  ;;  %v7525_v33 = vmul.f32 %v6055_v57, %v7289_v51  ;;  %11900 = vst [vmem:[#allocation317_spill] sm:$0xff] %v7575_v42 }
 0x4a8   :  { %11886 = vst [vmem:[#allocation306_spill] sm:$0xff] %v7515_v8  ;;  %v7529_v26 = vmul.f32 %v6516_v32, %v11889_v17  ;;  %v7533_v3 = vmul.f32 %v6051_v56, %v11889_v17  ;;  %v2122_v34 = vmax.f32 %v7500_v48, %v7153_v37  ;;  %v7539_v28 = vmul.f32 %v6532_v15, %v7365_v9 }
 0x4a9   :  { %11887 = vst [vmem:[#allocation307_spill] sm:$0xff] %v7519_v52  ;;  %11888 = vst [vmem:[#allocation308_spill] sm:$0xff] %v7525_v33  ;;  %v7543_v5 = vmul.f32 %v6063_v59, %v7365_v9  ;;  %v540_v20 = vrot.slane %v539_v45, 2  ;;  %v7547_v12 = vmul.f32 %v6524_v2, %v11894_v38  ;;  %v7551_v17 = vmul.f32 %v6055_v57, %v11894_v38 }
 0x4aa   :  { %11890 = vst [vmem:[#allocation309_spill] sm:$0xff] %v7529_v26  ;;  %11891 = vst [vmem:[#allocation310_spill] sm:$0xff] %v7533_v3  ;;  %v7555_v37 = vmul.f32 %v6542_v63, %v11896_v47  ;;  %v7559_v48 = vmul.f32 %v6071_v61, %v11896_v47  ;;  %v3965_v9 = vmax.f32 %v7515_v8, %v7168_v39 }
 0x4ab   :  { %11892 = vst [vmem:[#allocation311_spill] sm:$0xff] %v7539_v28  ;;  %11893 = vst [vmem:[#allocation312_spill] sm:$0xff] %v7543_v5  ;;  %v985_v7 = vmax.f32 %v7519_v52, %v7386_v1  ;;  %v541_v51 = vmax.f32 %v539_v45, %v540_v20  ;;  %v2830_v30 = vmax.f32 %v2828_v49, %v2829_v22  ;;  %v11903_v22 = vld [vmem:[#allocation87_spill] sm:$0xff] }
 0x4ac   :  { %11895 = vst [vmem:[#allocation313_spill] sm:$0xff] %v7551_v17  ;;  %11897 = vst [vmem:[#allocation314_spill] sm:$0xff] %v7555_v37  ;;  %v3148_v38 = vmax.f32 %v7525_v33, %v7399_v54  ;;  %v759_v29 = vmax.f32 %v7496_v46, %v7529_v26  ;;  %v2986_v4 = vmax.f32 %v7503_v43, %v7533_v3  ;;  %v11912_v33 = vld [vmem:[#allocation116_spill] sm:$0xff] }
 0x4ad   :  { %11898 = vst [vmem:[#allocation315_spill] sm:$0xff] %v7559_v48  ;;  %v7573_v47 = vmul.f32 %v6538_v0, %v7437_v35  ;;  %v7583_v49 = vmul.f32 %v6067_v60, %v7437_v35  ;;  %v542_v1 = vrot.slane %v541_v51, 1  ;;  %v988_v54 = vmax.f32 %v7547_v12, %v985_v7  ;;  %v7605_v35 = vpop.permute.xlu1 %724 }
 0x4ae   :  { %v7587_v46 = vmax.f32 %v7551_v17, %v3148_v38  ;;  %v7590_v43 = vmax.f32 %v7555_v37, %v1897_v25  ;;  %v7593_v45 = vmax.f32 %v7559_v48, %v3804_v16  ;;  %v7597_v20 = vmul.f32 %v6546_v14, %v7575_v42  ;;  %11904 = vst [vmem:[#allocation320_spill] sm:$0xff] %v7605_v35  ;;  %v11909_v37 = vld [vmem:[#allocation85_spill] sm:$0xff] }
 0x4af   :  { %11899 = vst [vmem:[#allocation316_spill] sm:$0xff] %v7573_v47  ;;  %11901 = vst [vmem:[#allocation318_spill] sm:$0xff] %v7583_v49  ;;  %v7601_v39 = vmul.f32 %v6524_v2, %v11903_v22  ;;  %v7603_v8 = vmax.f32 %v541_v51, %v542_v1  ;;  %v2831_v7 = vrot.slane %v2830_v30, 2  ;;  %v7608_v38 = vmax.f32 %v1668_v21, %v7573_v47  ;;  %v11908_v1 = vld [vmem:[#allocation107_spill] sm:$0xff] }
 0x4b0   :  { %11902 = vst [vmem:[#allocation319_spill] sm:$0xff] %v7597_v20  ;;  %v7612_v25 = vmul.f32 %v6542_v63, %v7511_v31  ;;  %v7616_v16 = vmul.f32 %v6071_v61, %v7511_v31  ;;  %v7620_v3 = vmul.f32 %v6075_v62, %v7575_v42  ;;  %v7623_v51 = vmax.f32 %v3639_v18, %v7583_v49  ;;  %v11911_v49 = vld [vmem:[#allocation173_spill] sm:$0xff] }
 0x4b1   :  { %v7627_v26 = vmul.f32 %v6524_v2, %v11908_v1  ;;  %v544_v21 = vsub.f32 %v6558_v53, %v7603_v8  ;;  %v545_v48 = vsub.f32 %v6628_v11, %v7603_v8  ;;  %v7639_v18 = vmul.f32 %v6516_v32, %v11909_v37  ;;  %v11920_v32 = vld [vmem:[#allocation243_spill] sm:$0xff] }
 0x4b2   :  { %11905 = vst [vmem:[#allocation321_spill] sm:$0xff] %v7612_v25  ;;  %11906 = vst [vmem:[#allocation322_spill] sm:$0xff] %v7616_v16  ;;  %v546_v47 = vsub.f32 %v11911_v49, %v7603_v8  ;;  %v7644_v35 = vmax.f32 %v7597_v20, %v2122_v34  ;;  %v991_v53 = vmax.f32 %v7601_v39, %v988_v54  ;;  %v11914_v34 = vld [vmem:[#allocation208_spill] sm:$0xff] }
 0x4b3   :  { %11907 = vst [vmem:[#allocation323_spill] sm:$0xff] %v7620_v3  ;;  %11910 = vst [vmem:[#allocation324_spill] sm:$0xff] %v7639_v18  ;;  %v7649_v11 = vmul.f32 %v6524_v2, %v11912_v33  ;;  %v2832_v31 = vmax.f32 %v2830_v30, %v2831_v7  ;;  %v7652_v52 = vmax.f32 %v7620_v3, %v3965_v9  ;;  %v11915_v54 = vld [vmem:[#allocation88_spill] sm:$0xff]  ;;  %v560_v7 = vmul.f32 1.442695, %v544_v21  ;;  %v7669_v3 = vpop.permute.xlu1 %952 }
 0x4b4   :  { %v7656_v42 = vmul.f32 %v6051_v56, %v11909_v37  ;;  %v7660_v49 = vmul.f32 %v6055_v57, %v11903_v22  ;;  %v547_v20 = vsub.f32 %v11914_v34, %v7603_v8  ;;  %v7666_v17 = vmul.f32 %v6528_v19, %v11915_v54  ;;  %11917 = vst [vmem:[#allocation325_spill] sm:$0xff] %v7669_v3  ;;  %v11919_v56 = vld [vmem:[#allocation254_spill] sm:$0xff] }
 0x4b5   :  { %v989_v30 = vmax.f32 %v7627_v26, %v991_v53  ;;  %v562_v9 = vmul.f32 1.442695, %v545_v48  ;;  %v7672_v37 = vmax.f32 %v759_v29, %v7639_v18  ;;  %v7676_v22 = vmul.f32 %v6524_v2, %v11919_v56  ;;  %v11922_v53 = vld [vmem:[#allocation255_spill] sm:$0xff] }
 0x4b6   :  { %11913 = vst [vmem:[#allocation173_spill] sm:$0xff] %v7656_v42  ;;  %11916 = vst [vmem:[#allocation208_spill] sm:$0xff] %v7666_v17  ;;  %v548_v34 = vsub.f32 %v11920_v32, %v7603_v8  ;;  %v564_v16 = vmul.f32 1.442695, %v546_v47  ;;  %v7682_v19 = vmul.f32 %v6059_v58, %v11915_v54  ;;  %5153 = vpow2.f32 %v560_v7  ;;  %v11924_v54 = vld [vmem:[#allocation90_spill] sm:$0xff] }
 0x4b7   :  { %11918 = vst [vmem:[#allocation326_spill] sm:$0xff] %v7672_v37  ;;  %v990_v21 = vmax.f32 %v7649_v11, %v989_v30  ;;  %v2833_v48 = vrot.slane %v2832_v31, 1  ;;  %v549_v29 = vsub.f32 %v11922_v53, %v7603_v8  ;;  %5155 = vpow2.f32 %v562_v9 }
 0x4b8   :  { %11921 = vst [vmem:[#allocation243_spill] sm:$0xff] %v7682_v19  ;;  %v566_v18 = vmul.f32 1.442695, %v547_v20  ;;  %v7689_v37 = vmul.f32 %v6524_v2, %v7669_v3  ;;  %v7692_v32 = vmax.f32 %v2986_v4, %v7656_v42  ;;  %v3154_v47 = vmax.f32 %v7660_v49, %v7587_v46 }
 0x4b9   :  { %v11923_v30 = vmax.f32 %v7465_v13, %v7471_v36  ;;  %v7704_v9 = vmul.f32 %v6532_v15, %v11924_v54  ;;  %v992_v20 = vmax.f32 %v7676_v22, %v990_v21  ;;  %v550_v2 = vsub.f32 %v7247_v10, %v7603_v8 }
 0x4ba   :  { %5157 = vpow2.f32 %v564_v16  ;;  %v568_v4 = vmul.f32 1.442695, %v548_v34  ;;  %v11926_v46 = vmax.f32 %v7490_v55, %v7477_v50  ;;  %v7717_v36 = vmul.f32 %v6063_v59, %v11924_v54  ;;  %v11929_v55 = vld [vmem:[#allocation92_spill] sm:$0xff] }
 0x4bb   :  { %v7700_v7 = vmax.f32 %v11923_v30, %v7666_v17  ;;  %11925 = vst [vmem:[#allocation255_spill] sm:$0xff] %v7704_v9  ;;  %v7721_v30 = vmul.f32 %v6055_v57, %v11908_v1  ;;  %v7723_v21 = vmax.f32 %v2832_v31, %v2833_v48  ;;  %v551_v10 = vsub.f32 %v7272_v44, %v7603_v8  ;;  %v11935_v17 = vld [vmem:[#allocation131_spill] sm:$0xff] }
 0x4bc   :  { %v7713_v53 = vmax.f32 %v11926_v46, %v7682_v19  ;;  %11927 = vst [vmem:[#allocation327_spill] sm:$0xff] %v7717_v36  ;;  %5159 = vpow2.f32 %v566_v18  ;;  %v570_v16 = vmul.f32 1.442695, %v549_v29  ;;  %v993_v34 = vmax.f32 %v7689_v37, %v992_v20 }
 0x4bd   :  { %v11928_v50 = vmax.f32 %v7486_v27, %v7539_v28  ;;  %v7736_v19 = vmul.f32 %v6538_v0, %v11929_v55  ;;  %v7740_v31 = vmul.f32 %v6055_v57, %v11912_v33  ;;  %v552_v44 = vsub.f32 %v7295_v24, %v7603_v8  ;;  %v11932_v27 = vld [vmem:[#allocation274_spill] sm:$0xff] }
 0x4be   :  { %v7746_v18 = vmul.f32 %v6067_v60, %v11929_v55  ;;  %v553_v48 = vsub.f32 %v11932_v27, %v7603_v8  ;;  %5161 = vpow2.f32 %v568_v4  ;;  %v572_v29 = vmul.f32 1.442695, %v550_v2  ;;  %v11936_v4 = vld [vmem:[#allocation152_spill] sm:$0xff] }
 0x4bf   :  { %v7732_v46 = vmax.f32 %v7704_v9, %v11928_v50  ;;  %11930 = vst [vmem:[#allocation328_spill] sm:$0xff] %v7736_v19  ;;  %v11933_v20 = vmax.f32 %v7493_v23, %v7543_v5  ;;  %v3152_v13 = vmax.f32 %v7721_v30, %v3154_v47  ;;  %v7759_v24 = vmul.f32 %v6055_v57, %v11919_v56  ;;  %v11940_v5 = vld [vmem:[#allocation94_spill] sm:$0xff] }
 0x4c0   :  { %11931 = vst [vmem:[#allocation329_spill] sm:$0xff] %v7746_v18  ;;  %v2835_v42 = vsub.f32 %v11935_v17, %v7723_v21  ;;  %5163 = vpow2.f32 %v570_v16  ;;  %v574_v55 = vmul.f32 1.442695, %v551_v10  ;;  %v2836_v2 = vsub.f32 %v11936_v4, %v7723_v21  ;;  %v7765_v54 = vpop.eup %5153  ;;  %v11939_v16 = vld [vmem:[#allocation176_spill] sm:$0xff]  ;;  %v11943_v17 = vld [vmem:[#allocation210_spill] sm:$0xff] }
 0x4c1   :  { %v7754_v50 = vmax.f32 %v7717_v36, %v11933_v20  ;;  %11934 = vst [vmem:[#allocation274_spill] sm:$0xff] %v7759_v24  ;;  %v994_v27 = vrot.slane %v993_v34, 4  ;;  %11937 = vst [vmem:[#allocation131_spill] sm:$0xff] %v7765_v54  ;;  %v3153_v47 = vmax.f32 %v7740_v31, %v3152_v13  ;;  %v554_v20 = vsub.f32 %v7345_v41, %v7603_v8  ;;  %v7772_v33 = vpop.eup %5155 }
 0x4c2   :  { %v576_v56 = vmul.f32 1.442695, %v552_v44  ;;  %11938 = vst [vmem:[#allocation152_spill] sm:$0xff] %v7772_v33  ;;  %5165 = vpow2.f32 %v572_v29  ;;  %v578_v10 = vmul.f32 1.442695, %v553_v48  ;;  %v2837_v4 = vsub.f32 %v11939_v16, %v7723_v21 }
 0x4c3   :  { %v7780_v1 = vmul.f32 %v6546_v14, %v11940_v5  ;;  %v3155_v13 = vmax.f32 %v7759_v24, %v3153_v47  ;;  %v592_v41 = vadd.f32 %v7772_v33, %v7765_v54  ;;  %v2851_v44 = vmul.f32 1.442695, %v2835_v42  ;;  %v11945_v42 = vld [vmem:[#allocation244_spill] sm:$0xff]  ;;  %v11946_v54 = vld [vmem:[#allocation251_spill] sm:$0xff] }
 0x4c4   :  { %v7785_v23 = vpop.eup %5157  ;;  %5167 = vpow2.f32 %v574_v55  ;;  %v2838_v29 = vsub.f32 %v11943_v17, %v7723_v21  ;;  %v2853_v48 = vmul.f32 1.442695, %v2836_v2  ;;  %v995_v36 = vmax.f32 %v993_v34, %v994_v27  ;;  %v11949_v2 = vld [vmem:[#allocation256_spill] sm:$0xff] }
 0x4c5   :  { %11941 = vst [vmem:[#allocation176_spill] sm:$0xff] %v7780_v1  ;;  %11942 = vst [vmem:[#allocation330_spill] sm:$0xff] %v7785_v23  ;;  %v555_v16 = vsub.f32 %v7371_v40, %v7603_v8  ;;  %5169 = vpow2.f32 %v576_v56  ;;  %v580_v28 = vmul.f32 1.442695, %v554_v20  ;;  %v593_v9 = vadd.f32 %v7785_v23, %v592_v41 }
 0x4c6   :  { %v7792_v47 = vpop.eup %5159  ;;  %5171 = vpow2.f32 %v578_v10  ;;  %v2839_v24 = vsub.f32 %v11945_v42, %v7723_v21  ;;  %v2855_v33 = vmul.f32 1.442695, %v2837_v4  ;;  %v996_v55 = vrot.slane %v995_v36, 2  ;;  %v11950_v4 = vld [vmem:[#allocation287_spill] sm:$0xff] }
 0x4c7   :  { %11944 = vst [vmem:[#allocation210_spill] sm:$0xff] %v7792_v47  ;;  %v556_v17 = vsub.f32 %v11946_v54, %v7603_v8  ;;  %v594_v34 = vadd.f32 %v7792_v47, %v593_v9  ;;  %5173 = vpow2.f32 %v2851_v44  ;;  %v7801_v56 = vmul.f32 %v6055_v57, %v7669_v3  ;;  %v11952_v57 = vld [vmem:[#allocation264_spill] sm:$0xff] }
 0x4c8   :  { %v7803_v40 = vpop.eup %5161  ;;  %v2840_v27 = vsub.f32 %v11949_v2, %v7723_v21  ;;  %5175 = vpow2.f32 %v2853_v48  ;;  %v2857_v20 = vmul.f32 1.442695, %v2838_v29  ;;  %v997_v10 = vmax.f32 %v995_v36, %v996_v55 }
 0x4c9   :  { %11947 = vst [vmem:[#allocation244_spill] sm:$0xff] %v7801_v56  ;;  %11948 = vst [vmem:[#allocation251_spill] sm:$0xff] %v7803_v40  ;;  %v557_v41 = vsub.f32 %v11950_v4, %v7603_v8  ;;  %5177 = vpow2.f32 %v580_v28  ;;  %v582_v54 = vmul.f32 1.442695, %v555_v16  ;;  %v595_v9 = vadd.f32 %v7803_v40, %v594_v34  ;;  %v11954_v16 = vld [vmem:[#allocation269_spill] sm:$0xff] }
 0x4ca   :  { %v7810_v44 = vpop.eup %5163  ;;  %v2841_v42 = vsub.f32 %v11952_v57, %v7723_v21  ;;  %5179 = vpow2.f32 %v2855_v33  ;;  %v2859_v3 = vmul.f32 1.442695, %v2839_v24  ;;  %v998_v47 = vrot.slane %v997_v10, 1 }
 0x4cb   :  { %11951 = vst [vmem:[#allocation256_spill] sm:$0xff] %v7810_v44  ;;  %v558_v48 = vsub.f32 %v7445_v6, %v7603_v8  ;;  %v584_v29 = vmul.f32 1.442695, %v556_v17  ;;  %v596_v36 = vadd.f32 %v7810_v44, %v595_v9  ;;  %v3156_v55 = vmax.f32 %v7801_v56, %v3155_v13  ;;  %v11955_v6 = vld [vmem:[#allocation271_spill] sm:$0xff] }
 0x4cc   :  { %v7818_v28 = vpop.eup %5165  ;;  %v2842_v34 = vsub.f32 %v11954_v16, %v7723_v21  ;;  %5181 = vpow2.f32 %v2857_v20  ;;  %v2861_v2 = vmul.f32 1.442695, %v2840_v27  ;;  %v7822_v4 = vmax.f32 %v997_v10, %v998_v47  ;;  %v11958_v9 = vld [vmem:[#allocation275_spill] sm:$0xff] }
 0x4cd   :  { %11953 = vst [vmem:[#allocation287_spill] sm:$0xff] %v7818_v28  ;;  %5183 = vpow2.f32 %v582_v54  ;;  %v586_v33 = vmul.f32 1.442695, %v557_v41  ;;  %v597_v24 = vadd.f32 %v7818_v28, %v596_v36  ;;  %v2843_v17 = vsub.f32 %v11955_v6, %v7723_v21  ;;  %v11961_v36 = vld [vmem:[#allocation280_spill] sm:$0xff] }
 0x4ce   :  { %v7827_v57 = vpop.eup %5167  ;;  %v7831_v13 = vmul.f32 %v6075_v62, %v11940_v5  ;;  %v2844_v16 = vsub.f32 %v11958_v9, %v7723_v21  ;;  %5185 = vpow2.f32 %v2859_v3  ;;  %v2863_v27 = vmul.f32 1.442695, %v2841_v42  ;;  %v11962_v28 = vld [vmem:[#allocation132_spill] sm:$0xff] }
 0x4cf   :  { %11956 = vst [vmem:[#allocation264_spill] sm:$0xff] %v7827_v57  ;;  %v7835_v47 = vpop.eup %5169  ;;  %5187 = vpow2.f32 %v584_v29  ;;  %v588_v20 = vmul.f32 1.442695, %v558_v48  ;;  %v598_v10 = vadd.f32 %v7827_v57, %v597_v24  ;;  %v3157_v41 = vrot.slane %v3156_v55, 4  ;;  %v11964_v48 = vld [vmem:[#allocation169_spill] sm:$0xff]  ;;  %v11966_v57 = vld [vmem:[#allocation258_spill] sm:$0xff] }
 0x4d0   :  { %11957 = vst [vmem:[#allocation269_spill] sm:$0xff] %v7831_v13  ;;  %11959 = vst [vmem:[#allocation271_spill] sm:$0xff] %v7835_v47  ;;  %v7838_v54 = vpop.eup %5171  ;;  %v2845_v6 = vsub.f32 %v11961_v36, %v7723_v21  ;;  %5189 = vpow2.f32 %v2861_v2  ;;  %v2865_v5 = vmul.f32 1.442695, %v2842_v34  ;;  %v1000_v44 = vsub.f32 %v11962_v28, %v7822_v4  ;;  %v11967_v34 = vld [vmem:[#allocation182_spill] sm:$0xff] }
 0x4d1   :  { %11960 = vst [vmem:[#allocation275_spill] sm:$0xff] %v7838_v54  ;;  %v7844_v9 = vpop.eup %5173  ;;  %5191 = vpow2.f32 %v586_v33  ;;  %v599_v3 = vadd.f32 %v7835_v47, %v598_v10  ;;  %v2867_v42 = vmul.f32 1.442695, %v2843_v17  ;;  %v1001_v29 = vsub.f32 %v11964_v48, %v7822_v4  ;;  %v11969_v17 = vld [vmem:[#allocation285_spill] sm:$0xff] }
 0x4d2   :  { %11963 = vst [vmem:[#allocation280_spill] sm:$0xff] %v7844_v9  ;;  %v7849_v24 = vpop.eup %5175  ;;  %v559_v56 = vsub.f32 %v11966_v57, %v7603_v8  ;;  %5193 = vpow2.f32 %v2863_v27  ;;  %v2869_v2 = vmul.f32 1.442695, %v2844_v16  ;;  %v1002_v36 = vsub.f32 %v11967_v34, %v7822_v4  ;;  %v11971_v57 = vld [vmem:[#allocation219_spill] sm:$0xff] }
 0x4d3   :  { %11965 = vst [vmem:[#allocation132_spill] sm:$0xff] %v7849_v24  ;;  %v7855_v28 = vpop.eup %5177  ;;  %5195 = vpow2.f32 %v588_v20  ;;  %v600_v33 = vadd.f32 %v7838_v54, %v599_v3  ;;  %v2846_v10 = vsub.f32 %v11969_v17, %v7723_v21  ;;  %v2883_v48 = vadd.f32 %v7849_v24, %v7844_v9  ;;  %v11973_v17 = vld [vmem:[#allocation252_spill] sm:$0xff] }
 0x4d4   :  { %11968 = vst [vmem:[#allocation169_spill] sm:$0xff] %v7855_v28  ;;  %v7862_v47 = vpop.eup %5179  ;;  %5197 = vpow2.f32 %v2865_v5  ;;  %v2871_v8 = vmul.f32 1.442695, %v2845_v6  ;;  %v1003_v16 = vsub.f32 %v11971_v57, %v7822_v4  ;;  %v1016_v27 = vmul.f32 1.442695, %v1000_v44  ;;  %v11975_v6 = vld [vmem:[#allocation288_spill] sm:$0xff] }
 0x4d5   :  { %11970 = vst [vmem:[#allocation258_spill] sm:$0xff] %v7862_v47  ;;  %v601_v34 = vadd.f32 %v7855_v28, %v600_v33  ;;  %5199 = vpow2.f32 %v2867_v42  ;;  %v2884_v20 = vadd.f32 %v7862_v47, %v2883_v48  ;;  %v1018_v3 = vmul.f32 1.442695, %v1001_v29  ;;  %v11977_v48 = vld [vmem:[#allocation257_spill] sm:$0xff] }
 0x4d6   :  { %v7868_v54 = vpop.eup %5181  ;;  %v2847_v40 = vsub.f32 %v11973_v17, %v7723_v21  ;;  %5201 = vpow2.f32 %v2869_v2  ;;  %v1020_v24 = vmul.f32 1.442695, %v1002_v36  ;;  %v3158_v9 = vmax.f32 %v3156_v55, %v3157_v41  ;;  %v11983_v55 = vld [vmem:[#allocation279_spill] sm:$0xff] }
 0x4d7   :  { %11972 = vst [vmem:[#allocation182_spill] sm:$0xff] %v7868_v54  ;;  %v7872_v5 = vpop.eup %5183  ;;  %v2848_v57 = vsub.f32 %v11975_v6, %v7723_v21  ;;  %v2873_v44 = vmul.f32 1.442695, %v2846_v10  ;;  %v2885_v33 = vadd.f32 %v7868_v54, %v2884_v20  ;;  %5203 = vpow2.f32 %v1016_v27  ;;  %v11985_v27 = vld [vmem:[#allocation98_spill] sm:$0xff] }
 0x4d8   :  { %11974 = vst [vmem:[#allocation285_spill] sm:$0xff] %v7872_v5  ;;  %v7877_v42 = vpop.eup %5185  ;;  %v602_v29 = vadd.f32 %v7872_v5, %v601_v34  ;;  %v1004_v28 = vsub.f32 %v11977_v48, %v7822_v4  ;;  %5205 = vpow2.f32 %v1018_v3  ;;  %v1022_v2 = vmul.f32 1.442695, %v1003_v16  ;;  %v11981_v16 = vld [vmem:[#allocation298_spill] sm:$0xff] }
 0x4d9   :  { %11976 = vst [vmem:[#allocation219_spill] sm:$0xff] %v7877_v42  ;;  %v7882_v36 = vpop.eup %5187  ;;  %v590_v41 = vmul.f32 1.442695, %v559_v56  ;;  %5207 = vpow2.f32 %v2871_v8  ;;  %v2886_v10 = vadd.f32 %v7877_v42, %v2885_v33  ;;  %v2875_v34 = vmul.f32 1.442695, %v2847_v40 }
 0x4da   :  { %11978 = vst [vmem:[#allocation252_spill] sm:$0xff] %v7882_v36  ;;  %v7887_v20 = vpop.eup %5189  ;;  %5209 = vpow2.f32 %v1020_v24  ;;  %v3159_v17 = vrot.slane %v3158_v9, 2  ;;  %v2849_v3 = vsub.f32 %v11981_v16, %v7723_v21  ;;  %v2877_v48 = vmul.f32 1.442695, %v2848_v57 }
 0x4db   :  { %11979 = vst [vmem:[#allocation288_spill] sm:$0xff] %v7887_v20  ;;  %v7891_v6 = vpop.eup %5191  ;;  %5211 = vpow2.f32 %v2873_v44  ;;  %v2887_v56 = vadd.f32 %v7887_v20, %v2886_v10  ;;  %v603_v33 = vadd.f32 %v7882_v36, %v602_v29  ;;  %v1005_v5 = vsub.f32 %v11983_v55, %v7822_v4  ;;  %v11988_v29 = vld [vmem:[#allocation99_spill] sm:$0xff] }
 0x4dc   :  { %11980 = vst [vmem:[#allocation257_spill] sm:$0xff] %v7891_v6  ;;  %v7896_v8 = vpop.eup %5193  ;;  %5213 = vpow2.f32 %v1022_v2  ;;  %v1024_v40 = vmul.f32 1.442695, %v1004_v28  ;;  %v7905_v42 = vmul.f32 %v6532_v15, %v11985_v27  ;;  %v7909_v57 = vmul.f32 %v6063_v59, %v11985_v27  ;;  %v11990_v28 = vld [vmem:[#allocation120_spill] sm:$0xff]  ;;  %v11993_v27 = vld [vmem:[#allocation259_spill] sm:$0xff] }
 0x4dd   :  { %11982 = vst [vmem:[#allocation298_spill] sm:$0xff] %v7896_v8  ;;  %v7901_v24 = vpop.eup %5195  ;;  %5215 = vpow2.f32 %v590_v41  ;;  %v2888_v44 = vadd.f32 %v7896_v8, %v2887_v56  ;;  %v7916_v55 = vmul.f32 %v6542_v63, %v11988_v29  ;;  %v7920_v2 = vmul.f32 %v6532_v15, %v11990_v28 }
 0x4de   :  { %11984 = vst [vmem:[#allocation279_spill] sm:$0xff] %v7901_v24  ;;  %11986 = vst [vmem:[#allocation331_spill] sm:$0xff] %v7905_v42  ;;  %v7912_v10 = vpop.eup %5197  ;;  %5217 = vpow2.f32 %v2875_v34  ;;  %v3160_v16 = vmax.f32 %v3158_v9, %v3159_v17  ;;  %v2850_v20 = vsub.f32 %v11993_v27, %v7723_v21  ;;  %v2879_v41 = vmul.f32 1.442695, %v2849_v3  ;;  %v7932_v34 = vpop.permute.xlu1 %1180 }
 0x4df   :  { %11987 = vst [vmem:[#allocation332_spill] sm:$0xff] %v7912_v10  ;;  %11989 = vst [vmem:[#allocation333_spill] sm:$0xff] %v7916_v55  ;;  %v7922_v36 = vpop.eup %5199  ;;  %5219 = vpow2.f32 %v2877_v48  ;;  %v2889_v56 = vadd.f32 %v7912_v10, %v2888_v44  ;;  %v604_v54 = vadd.f32 %v7891_v6, %v603_v33  ;;  %v1006_v47 = vsub.f32 %v7547_v12, %v7822_v4  ;;  %v12000_v33 = vld [vmem:[#allocation101_spill] sm:$0xff]  ;;  %v12003_v44 = vld [vmem:[#allocation192_spill] sm:$0xff] }
 0x4e0   :  { %11991 = vst [vmem:[#allocation334_spill] sm:$0xff] %v7920_v2  ;;  %11992 = vst [vmem:[#allocation335_spill] sm:$0xff] %v7922_v36  ;;  %v7927_v8 = vpop.eup %5201  ;;  %5221 = vpow2.f32 %v1024_v40  ;;  %v1026_v23 = vmul.f32 1.442695, %v1005_v5  ;;  %v1444_v21 = vmax.f32 %v7732_v46, %v7905_v42  ;;  %v7942_v17 = vmul.f32 %v6071_v61, %v11988_v29  ;;  %v12002_v40 = vld [vmem:[#allocation186_spill] sm:$0xff] }
 0x4e1   :  { %11994 = vst [vmem:[#allocation259_spill] sm:$0xff] %v7927_v8  ;;  %11995 = vst [vmem:[#allocation336_spill] sm:$0xff] %v7932_v34  ;;  %v7934_v9 = vpop.eup %5203  ;;  %v2890_v3 = vadd.f32 %v7922_v36, %v2889_v56  ;;  %v11999_v12 = vmax.f32 %v7590_v43, %v7612_v25  ;;  %v7955_v46 = vmul.f32 %v6546_v14, %v12000_v33  ;;  %v3161_v34 = vrot.slane %v3160_v16, 1 }
 0x4e2   :  { %11996 = vst [vmem:[#allocation337_spill] sm:$0xff] %v7934_v9  ;;  %11997 = vst [vmem:[#allocation338_spill] sm:$0xff] %v7942_v17  ;;  %v7945_v48 = vpop.eup %5205  ;;  %v12004_v27 = vmax.f32 %v12002_v40, %v12003_v44  ;;  %5223 = vpow2.f32 %v2879_v41  ;;  %v2881_v56 = vmul.f32 1.442695, %v2850_v20  ;;  %v605_v25 = vadd.f32 %v7901_v24, %v604_v54 }
 0x4e3   :  { %11998 = vst [vmem:[#allocation339_spill] sm:$0xff] %v7945_v48  ;;  %v7951_v5 = vmax.f32 %v7916_v55, %v11999_v12  ;;  %12001 = vst [vmem:[#allocation340_spill] sm:$0xff] %v7955_v46  ;;  %v7961_v6 = vpop.eup %5207  ;;  %v2891_v36 = vadd.f32 %v7927_v8, %v2890_v3  ;;  %v1048_v43 = vadd.f32 %v7945_v48, %v7934_v9  ;;  %5225 = vpow2.f32 %v1026_v23  ;;  %v12010_v3 = vld [vmem:[#allocation171_spill] sm:$0xff] }
 0x4e4   :  { %v1441_v29 = vmax.f32 %v12004_v27, %v7920_v2  ;;  %12005 = vst [vmem:[#allocation341_spill] sm:$0xff] %v7961_v6  ;;  %v7966_v12 = vpop.eup %5209  ;;  %v1007_v55 = vsub.f32 %v7601_v39, %v7822_v4  ;;  %v1028_v10 = vmul.f32 1.442695, %v1006_v47  ;;  %v12008_v2 = vld [vmem:[#allocation322_spill] sm:$0xff]  ;;  %v7981_v48 = vmul.f32 %v6532_v15, %v12010_v3 }
 0x4e5   :  { %12006 = vst [vmem:[#allocation342_spill] sm:$0xff] %v7966_v12  ;;  %v7971_v27 = vpop.eup %5211  ;;  %v12009_v41 = vmax.f32 %v7593_v45, %v12008_v2  ;;  %v2892_v9 = vadd.f32 %v7961_v6, %v2891_v36  ;;  %v1049_v54 = vadd.f32 %v7966_v12, %v1048_v43  ;;  %v12013_v39 = vmax.f32 %v7644_v35, %v7780_v1  ;;  %v7999_v2 = vpop.permute.xlu1 %1408  ;;  %v12017_v43 = vld [vmem:[#allocation265_spill] sm:$0xff]  ;;  %v12023_v12 = vld [vmem:[#allocation124_spill] sm:$0xff] }
 0x4e6   :  { %12007 = vst [vmem:[#allocation343_spill] sm:$0xff] %v7971_v27  ;;  %12011 = vst [vmem:[#allocation344_spill] sm:$0xff] %v7981_v48  ;;  %v7985_v24 = vpop.eup %5213  ;;  %v7995_v45 = vmul.f32 %v6075_v62, %v12000_v33  ;;  %v1447_v47 = vmax.f32 %v1441_v29, %v1444_v21  ;;  %5227 = vpow2.f32 %v2881_v56  ;;  %v12020_v29 = vld [vmem:[#allocation211_spill] sm:$0xff]  ;;  %v12022_v1 = vld [vmem:[#allocation105_spill] sm:$0xff]  ;;  %v1009_v44 = vsub.f32 %v7627_v26, %v7822_v4 }
 0x4e7   :  { %v7977_v20 = vmax.f32 %v7942_v17, %v12009_v41  ;;  %12012 = vst [vmem:[#allocation345_spill] sm:$0xff] %v7985_v24  ;;  %v7991_v23 = vmax.f32 %v12013_v39, %v7955_v46  ;;  %v7997_v41 = vmax.f32 %v3160_v16, %v3161_v34  ;;  %12015 = vst [vmem:[#allocation347_spill] sm:$0xff] %v7999_v2  ;;  %v8001_v36 = vpop.eup %5215  ;;  %5229 = vpow2.f32 %v1028_v10 }
 0x4e8   :  { %12014 = vst [vmem:[#allocation346_spill] sm:$0xff] %v7995_v45  ;;  %12016 = vst [vmem:[#allocation348_spill] sm:$0xff] %v8001_v36  ;;  %v8005_v17 = vmul.f32 %v6532_v15, %v12017_v43  ;;  %v2893_v35 = vadd.f32 %v7971_v27, %v2892_v9  ;;  %v1050_v39 = vadd.f32 %v7985_v24, %v1049_v54  ;;  %v8009_v46 = vpop.eup %5217  ;;  %v1030_v34 = vmul.f32 1.442695, %v1007_v55  ;;  %v12029_v55 = vld [vmem:[#allocation109_spill] sm:$0xff] }
 0x4e9   :  { %12019 = vst [vmem:[#allocation350_spill] sm:$0xff] %v8009_v46  ;;  %v606_v33 = vadd.f32 %v8001_v36, %v605_v25  ;;  %v1008_v16 = vsub.f32 %v12020_v29, %v7822_v4  ;;  %v8014_v21 = vpop.eup %5219  ;;  %v8018_v6 = vmul.f32 %v12023_v12, %v12022_v1  ;;  %v1445_v56 = vmax.f32 %v7981_v48, %v1447_v47  ;;  %v12027_v29 = vld [vmem:[#allocation30_spill] sm:$0xff]  ;;  %v12030_v24 = vld [vmem:[#allocation125_spill] sm:$0xff] }
 0x4ea   :  { %12018 = vst [vmem:[#allocation349_spill] sm:$0xff] %v8005_v17  ;;  %12021 = vst [vmem:[#allocation211_spill] sm:$0xff] %v8014_v21  ;;  %v2894_v9 = vadd.f32 %v8009_v46, %v2893_v35  ;;  %v8024_v54 = vmul.f32 %v6532_v15, %v7999_v2  ;;  %v8026_v25 = vpop.eup %5221  ;;  %v8030_v10 = vmul.f32 %v12027_v29, %v12022_v1  ;;  %v12033_v47 = vld [vmem:[#allocation133_spill] sm:$0xff]  ;;  %v12034_v1 = vld [vmem:[#allocation170_spill] sm:$0xff]  ;;  %5231 = vpow2.f32 %v1030_v34 }
 0x4eb   :  { %12024 = vst [vmem:[#allocation351_spill] sm:$0xff] %v8018_v6  ;;  %12026 = vst [vmem:[#allocation353_spill] sm:$0xff] %v8026_v25  ;;  %v8034_v36 = vmul.f32 %v12030_v24, %v12029_v55  ;;  %v8038_v27 = vmul.f32 %v6059_v58, %v12029_v55  ;;  %v3163_v35 = vsub.f32 %v12033_v47, %v7997_v41  ;;  %v607_v42 = vrot.slane %v606_v33, 4 }
 0x4ec   :  { %12025 = vst [vmem:[#allocation352_spill] sm:$0xff] %v8024_v54  ;;  %12028 = vst [vmem:[#allocation30_spill] sm:$0xff] %v8030_v10  ;;  %v1448_v15 = vmax.f32 %v1445_v56, %v8005_v17  ;;  %v2895_v46 = vadd.f32 %v8014_v21, %v2894_v9  ;;  %v1051_v8 = vadd.f32 %v8026_v25, %v1050_v39  ;;  %v1032_v40 = vmul.f32 1.442695, %v1008_v16  ;;  %v8049_v55 = vpop.eup %5223  ;;  %v12037_v9 = vld [vmem:[#allocation110_spill] sm:$0xff] }
 0x4ed   :  { %12031 = vst [vmem:[#allocation354_spill] sm:$0xff] %v8034_v36  ;;  %12032 = vst [vmem:[#allocation355_spill] sm:$0xff] %v8038_v27  ;;  %v3164_v48 = vsub.f32 %v12034_v1, %v7997_v41  ;;  %v12036_v47 = vmax.f32 %v7652_v52, %v7831_v13  ;;  %v8059_v39 = vmul.f32 %v6538_v0, %v12037_v9  ;;  %v8066_v34 = vpop.eup %5225  ;;  %v12041_v16 = vld [vmem:[#allocation326_spill] sm:$0xff] }
 0x4ee   :  { %12035 = vst [vmem:[#allocation133_spill] sm:$0xff] %v8049_v55  ;;  %v8063_v1 = vmul.f32 %v6067_v60, %v12037_v9  ;;  %v1449_v26 = vmax.f32 %v8024_v54, %v1448_v15  ;;  %12040 = vst [vmem:[#allocation357_spill] sm:$0xff] %v8066_v34  ;;  %v761_v25 = vmax.f32 %v8018_v6, %v12041_v16  ;;  %5233 = vpow2.f32 %v1032_v40 }
 0x4ef   :  { %v8055_v56 = vmax.f32 %v12036_v47, %v7995_v45  ;;  %12038 = vst [vmem:[#allocation170_spill] sm:$0xff] %v8059_v39  ;;  %v2988_v52 = vmax.f32 %v8030_v10, %v7692_v32  ;;  %v1217_v47 = vmax.f32 %v8034_v36, %v7700_v7  ;;  %v3179_v45 = vmul.f32 1.442695, %v3163_v35 }
 0x4f0   :  { %12039 = vst [vmem:[#allocation356_spill] sm:$0xff] %v8063_v1  ;;  %v3316_v13 = vmax.f32 %v8038_v27, %v7713_v53  ;;  %v2896_v9 = vadd.f32 %v8049_v55, %v2895_v46  ;;  %v1052_v21 = vadd.f32 %v8066_v34, %v1051_v8  ;;  %v3181_v15 = vmul.f32 1.442695, %v3164_v48  ;;  %v8080_v6 = vpop.eup %5227  ;;  %v12047_v46 = vld [vmem:[#allocation114_spill] sm:$0xff]  ;;  %v12053_v27 = vld [vmem:[#allocation245_spill] sm:$0xff] }
 0x4f1   :  { %v608_v54 = vadd.f32 %v607_v42, %v606_v33  ;;  %v1010_v17 = vsub.f32 %v7649_v11, %v7822_v4  ;;  %v1034_v16 = vmul.f32 1.442695, %v1009_v44  ;;  %12042 = vst [vmem:[#allocation326_spill] sm:$0xff] %v8080_v6  ;;  %v12043_v32 = vmax.f32 %v7736_v19, %v7608_v38  ;;  %v12045_v42 = vld [vmem:[#allocation183_spill] sm:$0xff]  ;;  %v8096_v33 = vpop.eup %5229  ;;  %v12049_v38 = vld [vmem:[#allocation118_spill] sm:$0xff]  ;;  %v12061_v19 = vld [vmem:[#allocation189_spill] sm:$0xff] }
 0x4f2   :  { %v12044_v53 = vmax.f32 %v7746_v18, %v7623_v51  ;;  %v3165_v48 = vsub.f32 %v12045_v42, %v7997_v41  ;;  %v1450_v11 = vrot.slane %v1449_v26, 4  ;;  %12046 = vst [vmem:[#allocation183_spill] sm:$0xff] %v8096_v33  ;;  %v8100_v40 = vmul.f32 %v12023_v12, %v12047_v46 }
 0x4f3   :  { %v8086_v7 = vmax.f32 %v8059_v39, %v12043_v32  ;;  %v8104_v44 = vmul.f32 %v12030_v24, %v12049_v38  ;;  %v8108_v51 = vmul.f32 %v6059_v58, %v12049_v38  ;;  %5235 = vpow2.f32 %v3179_v45  ;;  %v12055_v45 = vld [vmem:[#allocation220_spill] sm:$0xff] }
 0x4f4   :  { %v8092_v8 = vmax.f32 %v8063_v1, %v12044_v53  ;;  %12048 = vst [vmem:[#allocation358_spill] sm:$0xff] %v8100_v40  ;;  %v8112_v35 = vmul.f32 %v6063_v59, %v11990_v28  ;;  %v2897_v32 = vadd.f32 %v8080_v6, %v2896_v9  ;;  %v1053_v53 = vadd.f32 %v8096_v33, %v1052_v21  ;;  %v8124_v39 = vpop.eup %5231  ;;  %v12057_v9 = vld [vmem:[#allocation184_spill] sm:$0xff]  ;;  %v12063_v6 = vld [vmem:[#allocation121_spill] sm:$0xff] }
 0x4f5   :  { %12050 = vst [vmem:[#allocation359_spill] sm:$0xff] %v8104_v44  ;;  %12051 = vst [vmem:[#allocation360_spill] sm:$0xff] %v8108_v51  ;;  %5237 = vpow2.f32 %v3181_v15  ;;  %v609_v42 = vrot.slane %v608_v54, 2  ;;  %v1011_v36 = vsub.f32 %v12053_v27, %v7822_v4  ;;  %v1036_v10 = vmul.f32 1.442695, %v1010_v17  ;;  %v12058_v15 = vld [vmem:[#allocation188_spill] sm:$0xff] }
 0x4f6   :  { %12052 = vst [vmem:[#allocation361_spill] sm:$0xff] %v8112_v35  ;;  %5239 = vpow2.f32 %v1034_v16  ;;  %v8120_v38 = vmul.f32 %v12027_v29, %v12047_v46  ;;  %v3166_v1 = vsub.f32 %v12055_v45, %v7997_v41  ;;  %v3183_v28 = vmul.f32 1.442695, %v3165_v48  ;;  %12056 = vst [vmem:[#allocation220_spill] sm:$0xff] %v8124_v39  ;;  %v12060_v17 = vld [vmem:[#allocation185_spill] sm:$0xff] }
 0x4f7   :  { %v1451_v18 = vmax.f32 %v1449_v26, %v1450_v11  ;;  %v8127_v21 = vmax.f32 %v8100_v40, %v761_v25  ;;  %v12059_v27 = vmax.f32 %v12057_v9, %v12058_v15  ;;  %v12062_v46 = vmax.f32 %v12060_v17, %v12061_v19  ;;  %v12065_v26 = vld [vmem:[#allocation187_spill] sm:$0xff]  ;;  %v12066_v48 = vld [vmem:[#allocation193_spill] sm:$0xff]  ;;  %v12070_v17 = vld [vmem:[#allocation260_spill] sm:$0xff] }
 0x4f8   :  { %12054 = vst [vmem:[#allocation245_spill] sm:$0xff] %v8120_v38  ;;  %v8139_v45 = vmul.f32 %v6538_v0, %v12063_v6  ;;  %v12067_v11 = vmax.f32 %v12065_v26, %v12066_v48  ;;  %v8147_v40 = vmul.f32 %v6067_v60, %v12063_v6  ;;  %v2898_v15 = vrot.slane %v2897_v32, 4  ;;  %v12069_v19 = vld [vmem:[#allocation267_spill] sm:$0xff] }
 0x4f9   :  { %v1213_v16 = vmax.f32 %v12059_v27, %v8104_v44  ;;  %v3312_v33 = vmax.f32 %v12062_v46, %v8108_v51  ;;  %v1054_v27 = vadd.f32 %v8124_v39, %v1053_v53  ;;  %v610_v44 = vadd.f32 %v609_v42, %v608_v54  ;;  %v12072_v54 = vld [vmem:[#allocation196_spill] sm:$0xff] }
 0x4fa   :  { %12064 = vst [vmem:[#allocation362_spill] sm:$0xff] %v8139_v45  ;;  %v3476_v25 = vmax.f32 %v12067_v11, %v8112_v35  ;;  %12068 = vst [vmem:[#allocation187_spill] sm:$0xff] %v8147_v40  ;;  %v1012_v46 = vsub.f32 %v12069_v19, %v7822_v4  ;;  %5241 = vpow2.f32 %v1036_v10  ;;  %v1038_v51 = vmul.f32 1.442695, %v1011_v36  ;;  %v8154_v11 = vpop.eup %5233  ;;  %v12073_v19 = vld [vmem:[#allocation197_spill] sm:$0xff] }
 0x4fb   :  { %v3167_v9 = vsub.f32 %v12070_v17, %v7997_v41  ;;  %5243 = vpow2.f32 %v3183_v28  ;;  %v3185_v34 = vmul.f32 1.442695, %v3166_v1  ;;  %v1452_v55 = vrot.slane %v1451_v18, 2  ;;  %12071 = vst [vmem:[#allocation193_spill] sm:$0xff] %v8154_v11 }
 0x4fc   :  { %v8157_v6 = vmax.f32 %v8120_v38, %v2988_v52  ;;  %v8159_v35 = vmax.f32 %v1213_v16, %v1217_v47  ;;  %v8161_v53 = vmax.f32 %v3312_v33, %v3316_v13  ;;  %v12074_v10 = vmax.f32 %v12072_v54, %v12073_v19  ;;  %v12077_v13 = vld [vmem:[#allocation199_spill] sm:$0xff]  ;;  %v12078_v33 = vld [vmem:[#allocation198_spill] sm:$0xff] }
 0x4fd   :  { %v12075_v28 = vmax.f32 %v7754_v50, %v7909_v57  ;;  %v2899_v42 = vadd.f32 %v2898_v15, %v2897_v32  ;;  %v1013_v52 = vsub.f32 %v7676_v22, %v7822_v4  ;;  %v1055_v47 = vadd.f32 %v8154_v11, %v1054_v27  ;;  %v8177_v16 = vpop.eup %5235  ;;  %v12081_v32 = vld [vmem:[#allocation281_spill] sm:$0xff]  ;;  %v12083_v19 = vld [vmem:[#allocation123_spill] sm:$0xff] }
 0x4fe   :  { %v8167_v36 = vmax.f32 %v12074_v10, %v8139_v45  ;;  %12076 = vst [vmem:[#allocation267_spill] sm:$0xff] %v8177_v16  ;;  %v12079_v17 = vmax.f32 %v12077_v13, %v12078_v33  ;;  %v611_v10 = vrot.slane %v610_v44, 1  ;;  %5245 = vpow2.f32 %v1038_v51  ;;  %v12089_v13 = vld [vmem:[#allocation313_spill] sm:$0xff] }
 0x4ff   :  { %v8172_v1 = vmax.f32 %v3476_v25, %v12075_v28  ;;  %v1040_v45 = vmul.f32 1.442695, %v1012_v46  ;;  %v8185_v50 = vpop.eup %5237  ;;  %v3168_v15 = vsub.f32 %v12081_v32, %v7997_v41  ;;  %5247 = vpow2.f32 %v3185_v34 }
 0x500   :  { %v8183_v38 = vmax.f32 %v12079_v17, %v8147_v40  ;;  %12080 = vst [vmem:[#allocation260_spill] sm:$0xff] %v8185_v50  ;;  %v3187_v22 = vmul.f32 1.442695, %v3167_v9  ;;  %v1453_v25 = vmax.f32 %v1451_v18, %v1452_v55  ;;  %v8189_v27 = vpop.eup %5239  ;;  %v8195_v17 = vmul.f32 %v6542_v63, %v12083_v19  ;;  %v12085_v40 = vld [vmem:[#allocation137_spill] sm:$0xff] }
 0x501   :  { %12082 = vst [vmem:[#allocation281_spill] sm:$0xff] %v8189_v27  ;;  %v8199_v51 = vmul.f32 %v6546_v14, %v12085_v40  ;;  %v8203_v46 = vmul.f32 %v6075_v62, %v12085_v40  ;;  %v8207_v18 = vmul.f32 %v6071_v61, %v12083_v19  ;;  %v2900_v55 = vrot.slane %v2899_v42, 2 }
 0x502   :  { %12084 = vst [vmem:[#allocation363_spill] sm:$0xff] %v8195_v17  ;;  %v1042_v34 = vmul.f32 1.442695, %v1013_v52  ;;  %v1056_v9 = vadd.f32 %v8189_v27, %v1055_v47  ;;  %v612_v32 = vadd.f32 %v611_v10, %v610_v44  ;;  %v1014_v28 = vsub.f32 %v7689_v37, %v7822_v4  ;;  %v12091_v37 = vld [vmem:[#allocation202_spill] sm:$0xff] }
 0x503   :  { %12086 = vst [vmem:[#allocation364_spill] sm:$0xff] %v8199_v51  ;;  %12087 = vst [vmem:[#allocation365_spill] sm:$0xff] %v8203_v46  ;;  %5249 = vpow2.f32 %v1040_v45  ;;  %v3211_v33 = vadd.f32 %v8185_v50, %v8177_v16  ;;  %v3169_v40 = vsub.f32 %v12089_v13, %v7997_v41  ;;  %v3189_v54 = vmul.f32 1.442695, %v3168_v15  ;;  %v12092_v45 = vld [vmem:[#allocation200_spill] sm:$0xff]  ;;  %v12094_v50 = vld [vmem:[#allocation207_spill] sm:$0xff] }
 0x504   :  { %12088 = vst [vmem:[#allocation366_spill] sm:$0xff] %v8207_v18  ;;  %5251 = vpow2.f32 %v3187_v22  ;;  %v1454_v11 = vrot.slane %v1453_v25, 1  ;;  %v8216_v19 = vpop.eup %5241  ;;  %v1903_v44 = vmax.f32 %v8195_v17, %v7951_v5  ;;  %v12093_v47 = vmax.f32 %v12091_v37, %v12092_v45  ;;  %v12095_v16 = vld [vmem:[#allocation201_spill] sm:$0xff]  ;;  %v12098_v5 = vld [vmem:[#allocation307_spill] sm:$0xff] }
 0x505   :  { %12090 = vst [vmem:[#allocation313_spill] sm:$0xff] %v8216_v19  ;;  %v12096_v13 = vmax.f32 %v12094_v50, %v12095_v16  ;;  %v8230_v15 = vpop.eup %5243  ;;  %v3810_v27 = vmax.f32 %v8207_v18, %v7977_v20  ;;  %v2901_v39 = vadd.f32 %v2900_v55, %v2899_v42  ;;  %5253 = vpow2.f32 %v1042_v34 }
 0x506   :  { %v2125_v10 = vmax.f32 %v12093_v47, %v8199_v51  ;;  %12097 = vst [vmem:[#allocation367_spill] sm:$0xff] %v8230_v15  ;;  %v1057_v52 = vadd.f32 %v8216_v19, %v1056_v9  ;;  %5255 = vrcp.f32 %v612_v32  ;;  %v1015_v17 = vsub.f32 %v12098_v5, %v7822_v4  ;;  %v12100_v4 = vld [vmem:[#allocation181_spill] sm:$0xff]  ;;  %v12171_v19 = vld [vmem:[#allocation182_spill] sm:$0xff] }
 0x507   :  { %v3968_v22 = vmax.f32 %v12096_v13, %v8203_v46  ;;  %v1044_v45 = vmul.f32 1.442695, %v1014_v28  ;;  %v3212_v47 = vadd.f32 %v8230_v15, %v3211_v33  ;;  %v3170_v16 = vsub.f32 %v7660_v49, %v7997_v41 }
 0x508   :  { %5257 = vpow2.f32 %v3189_v54  ;;  %v3191_v13 = vmul.f32 1.442695, %v3169_v40  ;;  %v8240_v46 = vmax.f32 %v1453_v25, %v1454_v11  ;;  %v8242_v50 = vpop.eup %5245  ;;  %v2129_v20 = vmax.f32 %v2125_v10, %v7991_v23  ;;  %v12104_v40 = vld [vmem:[#allocation191_spill] sm:$0xff]  ;;  %v12106_v25 = vld [vmem:[#allocation212_spill] sm:$0xff] }
 0x509   :  { %12099 = vst [vmem:[#allocation307_spill] sm:$0xff] %v8242_v50  ;;  %v3972_v42 = vmax.f32 %v3968_v22, %v8055_v56  ;;  %v8248_v55 = vmul.f32 %v6063_v59, %v12010_v3  ;;  %v8252_v33 = vmul.f32 %v6542_v63, %v12100_v4  ;;  %v8254_v28 = vpop.eup %5247  ;;  %v8258_v49 = vmul.f32 %v6071_v61, %v12100_v4  ;;  %v12108_v22 = vld [vmem:[#allocation141_spill] sm:$0xff] }
 0x50a   :  { %12102 = vst [vmem:[#allocation369_spill] sm:$0xff] %v8254_v28  ;;  %v8262_v11 = vmul.f32 %v6546_v14, %v12104_v40  ;;  %v2902_v23 = vrot.slane %v2901_v39, 1  ;;  %v1058_v56 = vadd.f32 %v8242_v50, %v1057_v52  ;;  %5259 = vpow2.f32 %v1044_v45  ;;  %v12111_v45 = vld [vmem:[#allocation205_spill] sm:$0xff] }
 0x50b   :  { %12101 = vst [vmem:[#allocation368_spill] sm:$0xff] %v8252_v33  ;;  %12103 = vst [vmem:[#allocation370_spill] sm:$0xff] %v8258_v49  ;;  %v1046_v54 = vmul.f32 1.442695, %v1015_v17  ;;  %v3171_v34 = vsub.f32 %v12106_v25, %v7997_v41  ;;  %v3213_v9 = vadd.f32 %v8254_v28, %v3212_v47  ;;  %v8270_v32 = vmul.f32 %v6075_v62, %v12104_v40  ;;  %v12113_v25 = vld [vmem:[#allocation143_spill] sm:$0xff] }
 0x50c   :  { %12105 = vst [vmem:[#allocation371_spill] sm:$0xff] %v8262_v11  ;;  %5261 = vpow2.f32 %v3191_v13  ;;  %v3193_v10 = vmul.f32 1.442695, %v3170_v16  ;;  %v1456_v5 = vsub.f32 %v12108_v22, %v8240_v46  ;;  %v3480_v52 = vmax.f32 %v8248_v55, %v8172_v1 }
 0x50d   :  { %12107 = vst [vmem:[#allocation212_spill] sm:$0xff] %v8270_v32  ;;  %v8274_v51 = vpop.eup %5249  ;;  %v8279_v17 = vmax.f32 %v8252_v33, %v1903_v44  ;;  %v8283_v47 = vmul.f32 %v12023_v12, %v12111_v45  ;;  %v1457_v40 = vsub.f32 %v12113_v25, %v8240_v46  ;;  %v8290_v16 = vmax.f32 %v8258_v49, %v3810_v27 }
 0x50e   :  { %12109 = vst [vmem:[#allocation141_spill] sm:$0xff] %v8274_v51  ;;  %v8287_v13 = vpop.eup %5251  ;;  %v8294_v22 = vmul.f32 %v6063_v59, %v12017_v43  ;;  %v2903_v1 = vadd.f32 %v2902_v23, %v2901_v39  ;;  %v1059_v44 = vadd.f32 %v8274_v51, %v1058_v56  ;;  %v8298_v37 = vmax.f32 %v2129_v20, %v8262_v11 }
 0x50f   :  { %12110 = vst [vmem:[#allocation372_spill] sm:$0xff] %v8279_v17  ;;  %12112 = vst [vmem:[#allocation373_spill] sm:$0xff] %v8283_v47  ;;  %5263 = vpow2.f32 %v1046_v54  ;;  %v3195_v4 = vmul.f32 1.442695, %v3171_v34  ;;  %v3214_v18 = vadd.f32 %v8287_v13, %v3213_v9  ;;  %v8301_v25 = vpop.eup %5253  ;;  %v8304_v33 = vmax.f32 %v3972_v42, %v8270_v32  ;;  %v12121_v34 = vld [vmem:[#allocation218_spill] sm:$0xff]  ;;  %v12124_v32 = vld [vmem:[#allocation131_spill] sm:$0xff] }
 0x510   :  { %12114 = vst [vmem:[#allocation143_spill] sm:$0xff] %v8287_v13  ;;  %12115 = vst [vmem:[#allocation374_spill] sm:$0xff] %v8290_v16  ;;  %v3172_v27 = vsub.f32 %v7721_v30, %v7997_v41  ;;  %5265 = vpow2.f32 %v3193_v10  ;;  %v1472_v49 = vmul.f32 1.442695, %v1456_v5  ;;  %v8308_v39 = vpop.eup %5255  ;;  %v8314_v23 = vmul.f32 %v12027_v29, %v12111_v45  ;;  %v12125_v45 = vld [vmem:[#allocation152_spill] sm:$0xff] }
 0x511   :  { %12116 = vst [vmem:[#allocation375_spill] sm:$0xff] %v8298_v37  ;;  %12117 = vst [vmem:[#allocation376_spill] sm:$0xff] %v8301_v25  ;;  %v1474_v56 = vmul.f32 1.442695, %v1457_v40  ;;  %v8318_v54 = vmul.f32 %v6063_v59, %v7999_v2  ;;  %v8324_v30 = vmul.f32 %v12030_v24, %v12121_v34  ;;  %v3483_v9 = vmax.f32 %v3480_v52, %v8294_v22  ;;  %v12123_v59 = vld [vmem:[#allocation186_spill] sm:$0xff]  ;;  %v12135_v13 = vld [vmem:[#allocation40_spill] sm:$0xff] }
 0x512   :  { %12118 = vst [vmem:[#allocation377_spill] sm:$0xff] %v8304_v33  ;;  %12119 = vst [vmem:[#allocation378_spill] sm:$0xff] %v8314_v23  ;;  %v8320_v42 = vpop.eup %5257  ;;  %5267 = vrcp.f32 %v2903_v1  ;;  %v1060_v10 = vadd.f32 %v8301_v25, %v1059_v44  ;;  %v3173_v5 = vsub.f32 %v7740_v31, %v7997_v41  ;;  %v1458_v20 = vsub.f32 %v12123_v59, %v8240_v46  ;;  %v12132_v59 = vld [vmem:[#allocation246_spill] sm:$0xff]  ;;  %v12133_v1 = vld [vmem:[#allocation228_spill] sm:$0xff] }
 0x513   :  { %12120 = vst [vmem:[#allocation379_spill] sm:$0xff] %v8320_v42  ;;  %12122 = vst [vmem:[#allocation380_spill] sm:$0xff] %v8324_v30  ;;  %5269 = vpow2.f32 %v3195_v4  ;;  %v3215_v40 = vadd.f32 %v8320_v42, %v3214_v18  ;;  %v614_v11 = vmul.f32 %v8308_v39, %v12124_v32  ;;  %v615_v2 = vmul.f32 %v8308_v39, %v12125_v45  ;;  %v12129_v45 = vld [vmem:[#allocation232_spill] sm:$0xff]  ;;  %v12134_v32 = vld [vmem:[#allocation65_spill] sm:$0xff] }
 0x514   :  { %v3197_v43 = vmul.f32 1.442695, %v3172_v27  ;;  %5271 = vpow2.f32 %v1472_v49  ;;  %v8337_v52 = vpop.eup %5259  ;;  %v8343_v31 = vmul.f32 %v6059_v58, %v12121_v34  ;;  %v3484_v18 = vmax.f32 %v8318_v54, %v3483_v9  ;;  %v12152_v33 = vld [vmem:[#allocation280_spill] sm:$0xff] }
 0x515   :  { %12126 = vst [vmem:[#allocation186_spill] sm:$0xff] %v8337_v52  ;;  %5273 = vpow2.f32 %v1474_v56  ;;  %v8352_v49 = vmul.f32 %v6546_v14, %v12129_v45  ;;  %v8356_v44 = vmul.f32 %v6075_v62, %v12129_v45  ;;  %v1061_v27 = vadd.f32 %v8337_v52, %v1060_v10  ;;  %v12137_v45 = vld [vmem:[#allocation273_spill] sm:$0xff]  ;;  %v12142_v10 = vld [vmem:[#allocation162_spill] sm:$0xff] }
 0x516   :  { %12127 = vst [vmem:[#allocation131_spill] sm:$0xff] %v8343_v31  ;;  %v8346_v4 = vpop.eup %5261  ;;  %v3174_v56 = vsub.f32 %v12132_v59, %v7997_v41  ;;  %v1459_v34 = vsub.f32 %v12133_v1, %v8240_v46  ;;  %v1476_v3 = vmul.f32 1.442695, %v1458_v20  ;;  %v630_v42 = vmul.f32 %v614_v11, %v12134_v32 }
 0x517   :  { %12128 = vst [vmem:[#allocation152_spill] sm:$0xff] %v8346_v4  ;;  %12130 = vst [vmem:[#allocation381_spill] sm:$0xff] %v8352_v49  ;;  %v3216_v9 = vadd.f32 %v8346_v4, %v3215_v40  ;;  %v631_v14 = vmul.f32 %v615_v2, %v12135_v13  ;;  %5275 = vpow2.f32 %v3197_v43  ;;  %v3199_v28 = vmul.f32 1.442695, %v3173_v5  ;;  %v12141_v43 = vld [vmem:[#allocation330_spill] sm:$0xff]  ;;  %v12143_v2 = vld [vmem:[#allocation268_spill] sm:$0xff] }
 0x518   :  { %12131 = vst [vmem:[#allocation382_spill] sm:$0xff] %v8356_v44  ;;  %v8372_v59 = vmul.f32 %v6538_v0, %v12137_v45  ;;  %v8376_v40 = vmul.f32 %v6067_v60, %v12137_v45  ;;  %v3485_v20 = vrot.slane %v3484_v18, 4  ;;  %v616_v11 = vmul.f32 %v8308_v39, %v12141_v43 }
 0x519   :  { %v8366_v25 = vpop.eup %5263  ;;  %v1460_v62 = vsub.f32 %v12142_v10, %v8240_v46  ;;  %5277 = vpow2.f32 %v1476_v3  ;;  %v1478_v52 = vmul.f32 1.442695, %v1459_v34  ;;  %v646_v15 = vadd.f32 %v631_v14, %v630_v42  ;;  %v12147_v14 = vld [vmem:[#allocation210_spill] sm:$0xff] }
 0x51a   :  { %12136 = vst [vmem:[#allocation246_spill] sm:$0xff] %v8366_v25  ;;  %12138 = vst [vmem:[#allocation228_spill] sm:$0xff] %v8372_v59  ;;  %v8378_v1 = vpop.eup %5265  ;;  %v1062_v5 = vadd.f32 %v8366_v25, %v1061_v27  ;;  %v3175_v49 = vsub.f32 %v12143_v2, %v7997_v41  ;;  %5279 = vpow2.f32 %v3199_v28  ;;  %v3201_v43 = vmul.f32 1.442695, %v3174_v56  ;;  %v12149_v56 = vld [vmem:[#allocation44_spill] sm:$0xff] }
 0x51b   :  { %12139 = vst [vmem:[#allocation65_spill] sm:$0xff] %v8376_v40  ;;  %12140 = vst [vmem:[#allocation40_spill] sm:$0xff] %v8378_v1  ;;  %v3217_v45 = vadd.f32 %v8378_v1, %v3216_v9  ;;  %v12145_v27 = vmax.f32 %v8167_v36, %v8086_v7  ;;  %v12146_v3 = vmax.f32 %v8183_v38, %v8092_v8  ;;  %v12150_v7 = vld [vmem:[#allocation293_spill] sm:$0xff]  ;;  %v12153_v38 = vld [vmem:[#allocation132_spill] sm:$0xff]  ;;  %5281 = vpow2.f32 %v1478_v52 }
 0x51c   :  { %v8390_v51 = vpop.eup %5267  ;;  %v617_v42 = vmul.f32 %v8308_v39, %v12147_v14  ;;  %v3486_v9 = vmax.f32 %v3484_v18, %v3485_v20  ;;  %v632_v2 = vmul.f32 %v616_v11, %v12149_v56  ;;  %v1063_v4 = vrot.slane %v1062_v5, 4  ;;  %v12154_v20 = vld [vmem:[#allocation274_spill] sm:$0xff] }
 0x51d   :  { %v8394_v37 = vpop.eup %5269  ;;  %v8400_v10 = vmax.f32 %v8372_v59, %v12145_v27  ;;  %v8406_v34 = vmax.f32 %v8376_v40, %v12146_v3  ;;  %v1461_v36 = vsub.f32 %v12150_v7, %v8240_v46  ;;  %v1480_v27 = vmul.f32 1.442695, %v1460_v62  ;;  %v12155_v59 = vld [vmem:[#allocation286_spill] sm:$0xff]  ;;  %v12157_v7 = vld [vmem:[#allocation251_spill] sm:$0xff] }
 0x51e   :  { %12144 = vst [vmem:[#allocation330_spill] sm:$0xff] %v8394_v37  ;;  %v8410_v28 = vpop.eup %5271  ;;  %v2905_v8 = vmul.f32 %v8390_v51, %v12152_v33  ;;  %v2906_v3 = vmul.f32 %v8390_v51, %v12153_v38  ;;  %v3218_v14 = vadd.f32 %v8394_v37, %v3217_v45  ;;  %v647_v18 = vadd.f32 %v646_v15, %v632_v2  ;;  %v12158_v33 = vld [vmem:[#allocation52_spill] sm:$0xff] }
 0x51f   :  { %12148 = vst [vmem:[#allocation162_spill] sm:$0xff] %v8410_v28  ;;  %v8415_v44 = vpop.eup %5273  ;;  %v3176_v11 = vsub.f32 %v12154_v20, %v7997_v41  ;;  %5283 = vpow2.f32 %v3201_v43  ;;  %v3203_v40 = vmul.f32 1.442695, %v3175_v49  ;;  %v8426_v62 = vmul.f32 %v6542_v63, %v12155_v59  ;;  %v12160_v15 = vld [vmem:[#allocation192_spill] sm:$0xff] }
 0x520   :  { %12151 = vst [vmem:[#allocation268_spill] sm:$0xff] %v8415_v44  ;;  %v618_v1 = vmul.f32 %v8308_v39, %v12157_v7  ;;  %v633_v25 = vmul.f32 %v617_v42, %v12158_v33  ;;  %v3487_v50 = vrot.slane %v3486_v9, 2  ;;  %v1064_v45 = vadd.f32 %v1063_v4, %v1062_v5  ;;  %v12161_v42 = vld [vmem:[#allocation244_spill] sm:$0xff] }
 0x521   :  { %12156 = vst [vmem:[#allocation210_spill] sm:$0xff] %v8426_v62  ;;  %v8431_v38 = vpop.eup %5275  ;;  %v1462_v52 = vsub.f32 %v12160_v15, %v8240_v46  ;;  %v1482_v2 = vmul.f32 1.442695, %v1461_v36  ;;  %v1504_v49 = vadd.f32 %v8415_v44, %v8410_v28  ;;  %v2921_v43 = vmul.f32 %v2905_v8, %v12134_v32  ;;  %v12164_v15 = vld [vmem:[#allocation256_spill] sm:$0xff]  ;;  %v12165_v8 = vld [vmem:[#allocation258_spill] sm:$0xff]  ;;  %v12196_v62 = vld [vmem:[#allocation169_spill] sm:$0xff] }
 0x522   :  { %12159 = vst [vmem:[#allocation44_spill] sm:$0xff] %v8431_v38  ;;  %v2922_v20 = vmul.f32 %v2906_v3, %v12135_v13  ;;  %v3219_v37 = vadd.f32 %v8431_v38, %v3218_v14  ;;  %5285 = vpow2.f32 %v1480_v27  ;;  %v648_v7 = vadd.f32 %v647_v18, %v633_v25  ;;  %v12166_v25 = vld [vmem:[#allocation59_spill] sm:$0xff]  ;;  %v12168_v28 = vld [vmem:[#allocation308_spill] sm:$0xff] }
 0x523   :  { %v3177_v63 = vsub.f32 %v12161_v42, %v7997_v41  ;;  %5287 = vpow2.f32 %v3203_v40  ;;  %v3205_v4 = vmul.f32 1.442695, %v3176_v11  ;;  %v8442_v5 = vpop.eup %5277  ;;  %v8446_v36 = vmul.f32 %v6071_v61, %v12155_v59  ;;  %v12167_v40 = vld [vmem:[#allocation255_spill] sm:$0xff] }
 0x524   :  { %12162 = vst [vmem:[#allocation293_spill] sm:$0xff] %v8442_v5  ;;  %v619_v32 = vmul.f32 %v8308_v39, %v12164_v15  ;;  %v2907_v13 = vmul.f32 %v8390_v51, %v12165_v8  ;;  %v3488_v3 = vmax.f32 %v3486_v9, %v3487_v50  ;;  %v8452_v27 = vpop.eup %5279  ;;  %v634_v14 = vmul.f32 %v618_v1, %v12166_v25  ;;  %v12170_v1 = vld [vmem:[#allocation287_spill] sm:$0xff] }
 0x525   :  { %12163 = vst [vmem:[#allocation280_spill] sm:$0xff] %v8446_v36  ;;  %v1065_v18 = vrot.slane %v1064_v45, 2  ;;  %v1463_v11 = vsub.f32 %v12167_v40, %v8240_v46  ;;  %v1505_v42 = vadd.f32 %v8442_v5, %v1504_v49  ;;  %v2937_v44 = vadd.f32 %v2922_v20, %v2921_v43  ;;  %v8461_v9 = vpop.eup %5281 }
 0x526   :  { %v3220_v59 = vadd.f32 %v8452_v27, %v3219_v37  ;;  %5289 = vpow2.f32 %v1482_v2  ;;  %v1484_v61 = vmul.f32 1.442695, %v1462_v52  ;;  %v649_v15 = vadd.f32 %v648_v7, %v634_v14  ;;  %12169 = vst [vmem:[#allocation132_spill] sm:$0xff] %v8461_v9  ;;  %v8468_v37 = vpop.permute.xlu1 %1636  ;;  %v12173_v2 = vld [vmem:[#allocation63_spill] sm:$0xff] }
 0x527   :  { %v3178_v8 = vsub.f32 %v12168_v28, %v7997_v41  ;;  %5291 = vpow2.f32 %v3205_v4  ;;  %v3207_v50 = vmul.f32 1.442695, %v3177_v63  ;;  %v620_v38 = vmul.f32 %v8308_v39, %v12170_v1  ;;  %12172 = vst [vmem:[#allocation274_spill] sm:$0xff] %v8468_v37  ;;  %v12174_v63 = vld [vmem:[#allocation331_spill] sm:$0xff] }
 0x528   :  { %v2908_v40 = vmul.f32 %v8390_v51, %v12171_v19  ;;  %v2923_v49 = vmul.f32 %v2907_v13, %v12149_v56  ;;  %v3489_v43 = vrot.slane %v3488_v3, 1  ;;  %v635_v20 = vmul.f32 %v619_v32, %v12173_v2 }
 0x529   :  { %v8470_v52 = vpop.eup %5283  ;;  %v1066_v41 = vadd.f32 %v1065_v18, %v1064_v45  ;;  %v1464_v28 = vsub.f32 %v12174_v63, %v8240_v46  ;;  %v1506_v7 = vadd.f32 %v8461_v9, %v1505_v42  ;;  %5293 = vpow2.f32 %v1484_v61  ;;  %v12177_v45 = vld [vmem:[#allocation264_spill] sm:$0xff]  ;;  %v12178_v18 = vld [vmem:[#allocation219_spill] sm:$0xff] }
 0x52a   :  { %v2938_v4 = vadd.f32 %v2937_v44, %v2923_v49  ;;  %v3221_v14 = vadd.f32 %v8470_v52, %v3220_v59  ;;  %v1486_v19 = vmul.f32 1.442695, %v1463_v11  ;;  %v650_v1 = vadd.f32 %v649_v15, %v635_v20  ;;  %v12180_v11 = vld [vmem:[#allocation76_spill] sm:$0xff] }
 0x52b   :  { %5295 = vpow2.f32 %v3207_v50  ;;  %v3209_v56 = vmul.f32 1.442695, %v3178_v8  ;;  %v8479_v13 = vmul.f32 %v6538_v0, %v8468_v37  ;;  %v621_v32 = vmul.f32 %v8308_v39, %v12177_v45  ;;  %v12181_v0 = vld [vmem:[#allocation221_spill] sm:$0xff] }
 0x52c   :  { %v8481_v5 = vpop.eup %5285  ;;  %v2909_v42 = vmul.f32 %v8390_v51, %v12178_v18  ;;  %v2924_v44 = vmul.f32 %v2908_v40, %v12158_v33  ;;  %v8488_v59 = vmax.f32 %v3488_v3, %v3489_v43  ;;  %v636_v15 = vmul.f32 %v620_v38, %v12180_v11  ;;  %v12182_v18 = vld [vmem:[#allocation271_spill] sm:$0xff] }
 0x52d   :  { %12175 = vst [vmem:[#allocation251_spill] sm:$0xff] %v8479_v13  ;;  %12176 = vst [vmem:[#allocation52_spill] sm:$0xff] %v8481_v5  ;;  %v8490_v61 = vpop.eup %5287  ;;  %v1067_v8 = vrot.slane %v1066_v41, 1  ;;  %v1465_v50 = vsub.f32 %v12181_v0, %v8240_v46  ;;  %v1507_v49 = vadd.f32 %v8481_v5, %v1506_v7  ;;  %5297 = vpow2.f32 %v1486_v19  ;;  %v12184_v43 = vld [vmem:[#allocation83_spill] sm:$0xff]  ;;  %v12185_v0 = vld [vmem:[#allocation288_spill] sm:$0xff] }
 0x52e   :  { %12179 = vst [vmem:[#allocation192_spill] sm:$0xff] %v8490_v61  ;;  %v2939_v20 = vadd.f32 %v2938_v4, %v2924_v44  ;;  %v3222_v63 = vadd.f32 %v8490_v61, %v3221_v14  ;;  %v1488_v45 = vmul.f32 1.442695, %v1464_v28  ;;  %v622_v33 = vmul.f32 %v8308_v39, %v12182_v18  ;;  %v12186_v14 = vld [vmem:[#allocation334_spill] sm:$0xff] }
 0x52f   :  { %v651_v3 = vadd.f32 %v650_v1, %v636_v15  ;;  %5299 = vpow2.f32 %v3209_v56  ;;  %v1677_v40 = vmax.f32 %v8479_v13, %v8400_v10  ;;  %v637_v9 = vmul.f32 %v621_v32, %v12184_v43  ;;  %v12188_v10 = vld [vmem:[#allocation142_spill] sm:$0xff] }
 0x530   :  { %v8501_v38 = vpop.eup %5289  ;;  %v2910_v7 = vmul.f32 %v8390_v51, %v12185_v0  ;;  %v2925_v4 = vmul.f32 %v2909_v42, %v12166_v25  ;;  %v1466_v28 = vsub.f32 %v12186_v14, %v8240_v46  ;;  %v1068_v44 = vadd.f32 %v1067_v8, %v1066_v41  ;;  %v12189_v0 = vld [vmem:[#allocation144_spill] sm:$0xff]  ;;  %v12190_v42 = vld [vmem:[#allocation275_spill] sm:$0xff] }
 0x531   :  { %12183 = vst [vmem:[#allocation244_spill] sm:$0xff] %v8501_v38  ;;  %v8509_v19 = vpop.eup %5291  ;;  %v1490_v1 = vmul.f32 1.442695, %v1465_v50  ;;  %v1508_v56 = vadd.f32 %v8501_v38, %v1507_v49  ;;  %v3491_v15 = vsub.f32 %v12188_v10, %v8488_v59  ;;  %5301 = vpow2.f32 %v1488_v45  ;;  %v12192_v49 = vld [vmem:[#allocation96_spill] sm:$0xff]  ;;  %v12193_v10 = vld [vmem:[#allocation298_spill] sm:$0xff] }
 0x532   :  { %12187 = vst [vmem:[#allocation256_spill] sm:$0xff] %v8509_v19  ;;  %v2940_v18 = vadd.f32 %v2939_v20, %v2925_v4  ;;  %v3223_v32 = vadd.f32 %v8509_v19, %v3222_v63  ;;  %v3492_v13 = vsub.f32 %v12189_v0, %v8488_v59  ;;  %v623_v14 = vmul.f32 %v8308_v39, %v12190_v42  ;;  %v12195_v0 = vld [vmem:[#allocation344_spill] sm:$0xff] }
 0x533   :  { %v652_v41 = vadd.f32 %v651_v3, %v637_v9  ;;  %v1678_v8 = vrot.slane %v1677_v40, 4  ;;  %v8521_v50 = vpop.eup %5293  ;;  %v638_v38 = vmul.f32 %v622_v33, %v12192_v49  ;;  %v2911_v20 = vmul.f32 %v8390_v51, %v12193_v10 }
 0x534   :  { %12191 = vst [vmem:[#allocation258_spill] sm:$0xff] %v8521_v50  ;;  %v2926_v63 = vmul.f32 %v2910_v7, %v12173_v2  ;;  %v1492_v45 = vmul.f32 1.442695, %v1466_v28  ;;  %5303 = vrcp.f32 %v1068_v44  ;;  %v1467_v25 = vsub.f32 %v12195_v0, %v8240_v46  ;;  %v12198_v0 = vld [vmem:[#allocation332_spill] sm:$0xff] }
 0x535   :  { %v8527_v4 = vpop.eup %5295  ;;  %v1509_v42 = vadd.f32 %v8521_v50, %v1508_v56  ;;  %v3507_v9 = vmul.f32 1.442695, %v3491_v15  ;;  %5305 = vpow2.f32 %v1490_v1  ;;  %v3509_v33 = vmul.f32 1.442695, %v3492_v13  ;;  %v12210_v50 = vld [vmem:[#allocation163_spill] sm:$0xff] }
 0x536   :  { %12194 = vst [vmem:[#allocation59_spill] sm:$0xff] %v8527_v4  ;;  %v2941_v3 = vadd.f32 %v2940_v18, %v2926_v63  ;;  %v3224_v5 = vadd.f32 %v8527_v4, %v3223_v32  ;;  %v624_v2 = vmul.f32 %v8308_v39, %v12196_v62  ;;  %v653_v7 = vadd.f32 %v652_v41, %v638_v38  ;;  %v12200_v18 = vld [vmem:[#allocation103_spill] sm:$0xff]  ;;  %v12201_v62 = vld [vmem:[#allocation277_spill] sm:$0xff] }
 0x537   :  { %v8537_v28 = vmax.f32 %v1677_v40, %v1678_v8  ;;  %v8539_v44 = vpop.eup %5297  ;;  %v2912_v56 = vmul.f32 %v8390_v51, %v12198_v0  ;;  %v2927_v15 = vmul.f32 %v2911_v20, %v12180_v11  ;;  %5307 = vpow2.f32 %v1492_v45  ;;  %v12202_v11 = vld [vmem:[#allocation285_spill] sm:$0xff] }
 0x538   :  { %12197 = vst [vmem:[#allocation255_spill] sm:$0xff] %v8539_v44  ;;  %v3493_v13 = vsub.f32 %v12065_v26, %v8488_v59  ;;  %v639_v32 = vmul.f32 %v623_v14, %v12200_v18  ;;  %v1468_v38 = vsub.f32 %v12201_v62, %v8240_v46  ;;  %v1510_v40 = vadd.f32 %v8539_v44, %v1509_v42  ;;  %v12203_v26 = vld [vmem:[#allocation320_spill] sm:$0xff]  ;;  %v12206_v62 = vld [vmem:[#allocation335_spill] sm:$0xff] }
 0x539   :  { %v8546_v1 = vpop.eup %5299  ;;  %5309 = vpow2.f32 %v3507_v9  ;;  %v2942_v41 = vadd.f32 %v2941_v3, %v2927_v15  ;;  %v1494_v63 = vmul.f32 1.442695, %v1467_v25  ;;  %v625_v20 = vmul.f32 %v8308_v39, %v12202_v11 }
 0x53a   :  { %12199 = vst [vmem:[#allocation308_spill] sm:$0xff] %v8546_v1  ;;  %v3225_v8 = vadd.f32 %v8546_v1, %v3224_v5  ;;  %5311 = vpow2.f32 %v3509_v33  ;;  %v654_v45 = vadd.f32 %v653_v7, %v639_v32  ;;  %v8557_v0 = vmul.f32 %v12023_v12, %v12203_v26  ;;  %v12207_v5 = vld [vmem:[#allocation229_spill] sm:$0xff]  ;;  %v12208_v33 = vld [vmem:[#allocation112_spill] sm:$0xff] }
 0x53b   :  { %v8560_v10 = vpop.eup %5301  ;;  %v2913_v42 = vmul.f32 %v8390_v51, %v12206_v62  ;;  %v2928_v9 = vmul.f32 %v2912_v56, %v12184_v43  ;;  %v3494_v25 = vsub.f32 %v12207_v5, %v8488_v59  ;;  %v3511_v3 = vmul.f32 1.442695, %v3493_v13  ;;  %v12209_v7 = vld [vmem:[#allocation349_spill] sm:$0xff]  ;;  %v12211_v43 = vld [vmem:[#allocation252_spill] sm:$0xff]  ;;  %v12213_v5 = vld [vmem:[#allocation158_spill] sm:$0xff] }
 0x53c   :  { %12204 = vst [vmem:[#allocation287_spill] sm:$0xff] %v8557_v0  ;;  %12205 = vst [vmem:[#allocation182_spill] sm:$0xff] %v8560_v10  ;;  %v640_v15 = vmul.f32 %v624_v2, %v12208_v33  ;;  %v1469_v32 = vsub.f32 %v12209_v7, %v8240_v46  ;;  %v1496_v11 = vmul.f32 1.442695, %v1468_v38  ;;  %v1511_v12 = vadd.f32 %v8560_v10, %v1510_v40  ;;  %v12212_v13 = vld [vmem:[#allocation257_spill] sm:$0xff]  ;;  %v12214_v7 = vld [vmem:[#allocation259_spill] sm:$0xff] }
 0x53d   :  { %v2943_v14 = vadd.f32 %v2942_v41, %v2928_v9  ;;  %v3226_v44 = vrot.slane %v3225_v8, 4  ;;  %5313 = vpow2.f32 %v1494_v63  ;;  %v3495_v62 = vsub.f32 %v12210_v50, %v8488_v59  ;;  %v12216_v9 = vld [vmem:[#allocation352_spill] sm:$0xff] }
 0x53e   :  { %v8573_v36 = vpop.eup %5303  ;;  %v626_v56 = vmul.f32 %v8308_v39, %v12211_v43  ;;  %v627_v2 = vmul.f32 %v8308_v39, %v12212_v13  ;;  %v641_v16 = vmul.f32 %v625_v20, %v12213_v5  ;;  %v2914_v38 = vmul.f32 %v8390_v51, %v12214_v7  ;;  %v12217_v13 = vld [vmem:[#allocation294_spill] sm:$0xff] }
 0x53f   :  { %v8582_v40 = vpop.eup %5305  ;;  %v655_v41 = vadd.f32 %v654_v45, %v640_v15  ;;  %v2929_v63 = vmul.f32 %v2913_v42, %v12192_v49  ;;  %5315 = vpow2.f32 %v3511_v3  ;;  %v3513_v50 = vmul.f32 1.442695, %v3494_v25  ;;  %v12220_v49 = vld [vmem:[#allocation149_spill] sm:$0xff]  ;;  %v12222_v15 = vld [vmem:[#allocation339_spill] sm:$0xff] }
 0x540   :  { %12215 = vst [vmem:[#allocation63_spill] sm:$0xff] %v8582_v40  ;;  %v1470_v10 = vsub.f32 %v12216_v9, %v8240_v46  ;;  %v1498_v17 = vmul.f32 1.442695, %v1469_v32  ;;  %v1512_v43 = vadd.f32 %v8582_v40, %v1511_v12  ;;  %v3496_v1 = vsub.f32 %v12217_v13, %v8488_v59  ;;  %v12221_v25 = vld [vmem:[#allocation337_spill] sm:$0xff]  ;;  %v12223_v12 = vld [vmem:[#allocation311_spill] sm:$0xff] }
 0x541   :  { %v8590_v20 = vpop.eup %5307  ;;  %v2944_v4 = vadd.f32 %v2943_v14, %v2929_v63  ;;  %v3227_v7 = vadd.f32 %v3226_v44, %v3225_v8  ;;  %5317 = vpow2.f32 %v1496_v11  ;;  %v3515_v19 = vmul.f32 1.442695, %v3495_v62  ;;  %v12225_v14 = vld [vmem:[#allocation341_spill] sm:$0xff] }
 0x542   :  { %12218 = vst [vmem:[#allocation331_spill] sm:$0xff] %v8590_v20  ;;  %v642_v42 = vmul.f32 %v626_v56, %v12220_v49  ;;  %v1070_v3 = vmul.f32 %v8573_v36, %v12221_v25  ;;  %v1071_v32 = vmul.f32 %v8573_v36, %v12222_v15  ;;  %v1471_v9 = vsub.f32 %v12223_v12, %v8240_v46  ;;  %v12226_v46 = vld [vmem:[#allocation279_spill] sm:$0xff] }
 0x543   :  { %v8592_v45 = vpop.eup %5309  ;;  %v656_v40 = vadd.f32 %v655_v41, %v641_v16  ;;  %v2915_v44 = vmul.f32 %v8390_v51, %v12225_v14  ;;  %v2930_v8 = vmul.f32 %v2914_v38, %v12200_v18  ;;  %5319 = vpow2.f32 %v3513_v50  ;;  %v12227_v41 = vld [vmem:[#allocation35_spill] sm:$0xff]  ;;  %v12228_v14 = vld [vmem:[#allocation42_spill] sm:$0xff] }
 0x544   :  { %12219 = vst [vmem:[#allocation264_spill] sm:$0xff] %v8592_v45  ;;  %v8601_v13 = vpop.eup %5311  ;;  %5321 = vpow2.f32 %v1498_v17  ;;  %v1513_v11 = vadd.f32 %v8590_v20, %v1512_v43  ;;  %v3497_v62 = vsub.f32 %v12066_v48, %v8488_v59  ;;  %v3517_v56 = vmul.f32 1.442695, %v3496_v1  ;;  %v12229_v50 = vld [vmem:[#allocation343_spill] sm:$0xff]  ;;  %v12231_v1 = vld [vmem:[#allocation342_spill] sm:$0xff] }
 0x545   :  { %12224 = vst [vmem:[#allocation219_spill] sm:$0xff] %v8601_v13  ;;  %v2945_v63 = vadd.f32 %v2944_v4, %v2930_v8  ;;  %v3228_v25 = vrot.slane %v3227_v7, 2  ;;  %v1500_v15 = vmul.f32 1.442695, %v1470_v10  ;;  %5323 = vpow2.f32 %v3515_v19  ;;  %v12230_v19 = vld [vmem:[#allocation327_spill] sm:$0xff] }
 0x546   :  { %v628_v16 = vmul.f32 %v8308_v39, %v12226_v46  ;;  %v1086_v12 = vmul.f32 %v1070_v3, %v12227_v41  ;;  %v1087_v61 = vmul.f32 %v1071_v32, %v12228_v14  ;;  %v3539_v17 = vadd.f32 %v8601_v13, %v8592_v45 }
 0x547   :  { %v8615_v18 = vpop.eup %5313  ;;  %v657_v38 = vadd.f32 %v656_v40, %v642_v42  ;;  %v2916_v48 = vmul.f32 %v8390_v51, %v12229_v50  ;;  %v2931_v4 = vmul.f32 %v2915_v44, %v12208_v33  ;;  %v3498_v10 = vsub.f32 %v12230_v19, %v8488_v59  ;;  %v12232_v42 = vld [vmem:[#allocation348_spill] sm:$0xff]  ;;  %v12233_v33 = vld [vmem:[#allocation241_spill] sm:$0xff] }
 0x548   :  { %v1072_v43 = vmul.f32 %v8573_v36, %v12231_v1  ;;  %v1514_v3 = vadd.f32 %v8615_v18, %v1513_v11  ;;  %5325 = vpow2.f32 %v3517_v56  ;;  %v3519_v32 = vmul.f32 1.442695, %v3497_v62  ;;  %v12235_v1 = vld [vmem:[#allocation350_spill] sm:$0xff]  ;;  %v12236_v56 = vld [vmem:[#allocation345_spill] sm:$0xff] }
 0x549   :  { %v8625_v8 = vpop.eup %5315  ;;  %v2946_v46 = vadd.f32 %v2945_v63, %v2931_v4  ;;  %v3229_v20 = vadd.f32 %v3228_v25, %v3227_v7  ;;  %5327 = vpow2.f32 %v1500_v15  ;;  %v1502_v40 = vmul.f32 1.442695, %v1471_v9  ;;  %v12237_v63 = vld [vmem:[#allocation46_spill] sm:$0xff] }
 0x54a   :  { %v629_v50 = vmul.f32 %v8308_v39, %v12232_v42  ;;  %v643_v44 = vmul.f32 %v627_v2, %v12233_v33  ;;  %v1102_v13 = vadd.f32 %v1087_v61, %v1086_v12  ;;  %v3540_v19 = vadd.f32 %v8625_v8, %v3539_v17  ;;  %v12240_v42 = vld [vmem:[#allocation211_spill] sm:$0xff] }
 0x54b   :  { %v8631_v45 = vpop.eup %5317  ;;  %v2917_v11 = vmul.f32 %v8390_v51, %v12235_v1  ;;  %v2932_v62 = vmul.f32 %v2916_v48, %v12213_v5  ;;  %v1073_v7 = vmul.f32 %v8573_v36, %v12236_v56  ;;  %v3499_v9 = vsub.f32 %v7909_v57, %v8488_v59  ;;  %v12239_v5 = vld [vmem:[#allocation297_spill] sm:$0xff] }
 0x54c   :  { %12234 = vst [vmem:[#allocation76_spill] sm:$0xff] %v8631_v45  ;;  %v1088_v39 = vmul.f32 %v1072_v43, %v12237_v63  ;;  %v1515_v2 = vadd.f32 %v8631_v45, %v1514_v3  ;;  %5329 = vpow2.f32 %v3519_v32  ;;  %v3521_v61 = vmul.f32 1.442695, %v3498_v10  ;;  %v12241_v3 = vld [vmem:[#allocation353_spill] sm:$0xff]  ;;  %v12242_v32 = vld [vmem:[#allocation54_spill] sm:$0xff] }
 0x54d   :  { %v8642_v25 = vpop.eup %5319  ;;  %v658_v15 = vadd.f32 %v657_v38, %v643_v44  ;;  %v2947_v12 = vadd.f32 %v2946_v46, %v2932_v62  ;;  %v3230_v17 = vrot.slane %v3229_v20, 1  ;;  %5331 = vpow2.f32 %v1502_v40  ;;  %v12243_v40 = vld [vmem:[#allocation225_spill] sm:$0xff] }
 0x54e   :  { %12238 = vst [vmem:[#allocation221_spill] sm:$0xff] %v8642_v25  ;;  %v8644_v4 = vpop.eup %5321  ;;  %v644_v48 = vmul.f32 %v628_v16, %v12239_v5  ;;  %v2918_v1 = vmul.f32 %v8390_v51, %v12240_v42  ;;  %v1103_v57 = vadd.f32 %v1102_v13, %v1088_v39  ;;  %v3541_v43 = vadd.f32 %v8642_v25, %v3540_v19  ;;  %v12245_v25 = vld [vmem:[#allocation133_spill] sm:$0xff] }
 0x54f   :  { %v8650_v56 = vpop.eup %5323  ;;  %v2933_v10 = vmul.f32 %v2917_v11, %v12220_v49  ;;  %v1074_v38 = vmul.f32 %v8573_v36, %v12241_v3  ;;  %v1089_v46 = vmul.f32 %v1073_v7, %v12242_v32  ;;  %v3500_v44 = vsub.f32 %v12243_v40, %v8488_v59  ;;  %v12244_v3 = vld [vmem:[#allocation253_spill] sm:$0xff] }
 0x550   :  { %v1516_v16 = vadd.f32 %v8644_v4, %v1515_v2  ;;  %5333 = vpow2.f32 %v3521_v61  ;;  %v3523_v62 = vmul.f32 1.442695, %v3499_v9  ;;  %v3542_v13 = vadd.f32 %v8650_v56, %v3541_v43 }
 0x551   :  { %v659_v39 = vadd.f32 %v658_v15, %v644_v48  ;;  %v2948_v19 = vadd.f32 %v2947_v12, %v2933_v10  ;;  %v3231_v42 = vadd.f32 %v3230_v17, %v3229_v20  ;;  %v8662_v49 = vmul.f32 %v6067_v60, %v8468_v37  ;;  %v12247_v15 = vld [vmem:[#allocation357_spill] sm:$0xff] }
 0x552   :  { %v8664_v11 = vpop.eup %5325  ;;  %v645_v7 = vmul.f32 %v629_v50, %v12244_v3  ;;  %v2919_v40 = vmul.f32 %v8390_v51, %v12245_v25  ;;  %v1104_v45 = vadd.f32 %v1103_v57, %v1089_v46  ;;  %v12246_v2 = vrot.slane %v8537_v28, 2  ;;  %v12248_v12 = vld [vmem:[#allocation361_spill] sm:$0xff] }
 0x553   :  { %v8672_v61 = vpop.eup %5327  ;;  %v2934_v20 = vmul.f32 %v2918_v1, %v12233_v33  ;;  %v1075_v60 = vmul.f32 %v8573_v36, %v12247_v15  ;;  %v3501_v17 = vsub.f32 %v12248_v12, %v8488_v59  ;;  %v3543_v50 = vadd.f32 %v8664_v11, %v3542_v13  ;;  %v12249_v48 = vld [vmem:[#allocation61_spill] sm:$0xff]  ;;  %v12251_v1 = vld [vmem:[#allocation326_spill] sm:$0xff] }
 0x554   :  { %v1681_v9 = vmax.f32 %v8537_v28, %v12246_v2  ;;  %v1090_v43 = vmul.f32 %v1074_v38, %v12249_v48  ;;  %v1517_v25 = vadd.f32 %v8672_v61, %v1516_v16  ;;  %5335 = vpow2.f32 %v3523_v62  ;;  %v12252_v62 = vld [vmem:[#allocation183_spill] sm:$0xff] }
 0x555   :  { %v3525_v57 = vmul.f32 1.442695, %v3500_v44  ;;  %v660_v10 = vadd.f32 %v659_v39, %v645_v7  ;;  %v2949_v28 = vadd.f32 %v2948_v19, %v2934_v20  ;;  %v8684_v46 = vmul.f32 %v12027_v29, %v12203_v26  ;;  %v12253_v7 = vld [vmem:[#allocation66_spill] sm:$0xff] }
 0x556   :  { %5337 = vrcp.f32 %v3231_v42  ;;  %v8686_v33 = vpop.eup %5329  ;;  %v2920_v2 = vmul.f32 %v8390_v51, %v12251_v1  ;;  %v1105_v15 = vadd.f32 %v1104_v45, %v1090_v43  ;;  %v1682_v13 = vrot.slane %v1681_v9, 1 }
 0x557   :  { %12250 = vst [vmem:[#allocation271_spill] sm:$0xff] %v8684_v46  ;;  %v3648_v38 = vmax.f32 %v8662_v49, %v8406_v34  ;;  %v8692_v16 = vpop.eup %5331  ;;  %v2935_v44 = vmul.f32 %v2919_v40, %v12239_v5  ;;  %v1076_v39 = vmul.f32 %v8573_v36, %v12252_v62  ;;  %v3502_v19 = vsub.f32 %v8248_v55, %v8488_v59  ;;  %v12255_v40 = vld [vmem:[#allocation336_spill] sm:$0xff]  ;;  %v12260_v62 = vld [vmem:[#allocation278_spill] sm:$0xff] }
 0x558   :  { %v3544_v42 = vadd.f32 %v8686_v33, %v3543_v50  ;;  %v1091_v20 = vmul.f32 %v1075_v60, %v12253_v7  ;;  %v1518_v51 = vadd.f32 %v8692_v16, %v1517_v25  ;;  %5339 = vpow2.f32 %v3525_v57  ;;  %v12258_v57 = vld [vmem:[#allocation220_spill] sm:$0xff] }
 0x559   :  { %v3527_v45 = vmul.f32 1.442695, %v3501_v17  ;;  %v661_v12 = vrot.slane %v660_v10, 4  ;;  %v2950_v34 = vadd.f32 %v2949_v28, %v2935_v44  ;;  %v12254_v43 = vmax.f32 %v8127_v21, %v8283_v47  ;;  %v12259_v28 = vld [vmem:[#allocation79_spill] sm:$0xff] }
 0x55a   :  { %v8710_v1 = vmul.f32 %v12030_v24, %v12255_v40  ;;  %v8712_v55 = vpop.eup %5333  ;;  %v2936_v60 = vmul.f32 %v2920_v2, %v12244_v3  ;;  %v1106_v50 = vadd.f32 %v1105_v15, %v1091_v20  ;;  %v8717_v17 = vmul.f32 %v6059_v58, %v12255_v40 }
 0x55b   :  { %v8706_v5 = vmax.f32 %v8557_v0, %v12254_v43  ;;  %v8719_v25 = vmax.f32 %v1681_v9, %v1682_v13  ;;  %v1077_v21 = vmul.f32 %v8573_v36, %v12258_v57  ;;  %v1092_v44 = vmul.f32 %v1076_v39, %v12259_v28 }
 0x55c   :  { %12256 = vst [vmem:[#allocation83_spill] sm:$0xff] %v8710_v1  ;;  %12257 = vst [vmem:[#allocation288_spill] sm:$0xff] %v8717_v17  ;;  %v3503_v43 = vsub.f32 %v12260_v62, %v8488_v59  ;;  %v3545_v26 = vadd.f32 %v8712_v55, %v3544_v42  ;;  %v1519_v37 = vrot.slane %v1518_v51, 4  ;;  %5341 = vpow2.f32 %v3527_v45 }
 0x55d   :  { %v3529_v3 = vmul.f32 1.442695, %v3502_v19  ;;  %v3649_v2 = vrot.slane %v3648_v38, 4  ;;  %v8727_v15 = vadd.f32 %v661_v12, %v660_v10  ;;  %v2951_v20 = vadd.f32 %v2950_v34, %v2936_v60  ;;  %v12267_v12 = vld [vmem:[#allocation146_spill] sm:$0xff] }
 0x55e   :  { %v12262_v9 = vmax.f32 %v8157_v6, %v8314_v23  ;;  %v12263_v39 = vmax.f32 %v8159_v35, %v8324_v30  ;;  %v8741_v42 = vpop.eup %5335  ;;  %v1107_v45 = vadd.f32 %v1106_v50, %v1092_v44  ;;  %v12265_v10 = vmax.f32 %v8161_v53, %v8343_v31  ;;  %v12268_v35 = vld [vmem:[#allocation193_spill] sm:$0xff]  ;;  %v12270_v53 = vld [vmem:[#allocation150_spill] sm:$0xff] }
 0x55f   :  { %12261 = vst [vmem:[#allocation334_spill] sm:$0xff] %v8727_v15  ;;  %v3504_v6 = vsub.f32 %v8294_v22, %v8488_v59  ;;  %v1684_v34 = vsub.f32 %v12267_v12, %v8719_v25  ;;  %v1078_v62 = vmul.f32 %v8573_v36, %v12268_v35  ;;  %v3546_v50 = vadd.f32 %v8741_v42, %v3545_v26  ;;  %v12271_v12 = vld [vmem:[#allocation281_spill] sm:$0xff]  ;;  %v12272_v26 = vld [vmem:[#allocation267_spill] sm:$0xff] }
 0x560   :  { %v8733_v13 = vmax.f32 %v8684_v46, %v12262_v9  ;;  %v8739_v57 = vmax.f32 %v8710_v1, %v12263_v39  ;;  %v8747_v19 = vmax.f32 %v8717_v17, %v12265_v10  ;;  %v8753_v60 = vpop.eup %5337  ;;  %v12269_v9 = vld [vmem:[#allocation87_spill] sm:$0xff]  ;;  %v1685_v44 = vsub.f32 %v12270_v53, %v8719_v25  ;;  %v12273_v53 = vld [vmem:[#allocation260_spill] sm:$0xff] }
 0x561   :  { %v1093_v39 = vmul.f32 %v1077_v21, %v12269_v9  ;;  %v1520_v10 = vadd.f32 %v1519_v37, %v1518_v51  ;;  %5343 = vpow2.f32 %v3529_v3  ;;  %v3531_v40 = vmul.f32 1.442695, %v3503_v43  ;;  %v12275_v3 = vld [vmem:[#allocation104_spill] sm:$0xff] }
 0x562   :  { %12264 = vst [vmem:[#allocation142_spill] sm:$0xff] %v8739_v57  ;;  %12266 = vst [vmem:[#allocation144_spill] sm:$0xff] %v8747_v19  ;;  %v3650_v17 = vmax.f32 %v3648_v38, %v3649_v2  ;;  %v2952_v31 = vrot.slane %v2951_v20, 4  ;;  %v1079_v1 = vmul.f32 %v8573_v36, %v12271_v12  ;;  %v3505_v35 = vsub.f32 %v8318_v54, %v8488_v59  ;;  %v8766_v30 = vpop.eup %5339  ;;  %v12274_v38 = vld [vmem:[#allocation313_spill] sm:$0xff]  ;;  %v12277_v19 = vld [vmem:[#allocation107_spill] sm:$0xff] }
 0x563   :  { %v1108_v21 = vadd.f32 %v1107_v45, %v1093_v39  ;;  %v3233_v46 = vmul.f32 %v8753_v60, %v12272_v26  ;;  %v3234_v37 = vmul.f32 %v8753_v60, %v12273_v53  ;;  %v1700_v51 = vmul.f32 1.442695, %v1684_v34  ;;  %v12276_v39 = vld [vmem:[#allocation307_spill] sm:$0xff]  ;;  %v12278_v34 = vld [vmem:[#allocation196_spill] sm:$0xff] }
 0x564   :  { %v1080_v43 = vmul.f32 %v8573_v36, %v12274_v38  ;;  %v1094_v2 = vmul.f32 %v1078_v62, %v12275_v3  ;;  %v3547_v12 = vadd.f32 %v8766_v30, %v3546_v50  ;;  %v1702_v22 = vmul.f32 1.442695, %v1685_v44  ;;  %v12280_v44 = vld [vmem:[#allocation367_spill] sm:$0xff] }
 0x565   :  { %v1521_v15 = vrot.slane %v1520_v10, 2  ;;  %5345 = vpow2.f32 %v3531_v40  ;;  %v3533_v54 = vmul.f32 1.442695, %v3504_v6  ;;  %v3651_v23 = vrot.slane %v3650_v17, 2  ;;  %v12279_v40 = vld [vmem:[#allocation312_spill] sm:$0xff] }
 0x566   :  { %v2953_v45 = vadd.f32 %v2952_v31, %v2951_v20  ;;  %v1081_v26 = vmul.f32 %v8573_v36, %v12276_v39  ;;  %v1095_v58 = vmul.f32 %v1079_v1, %v12277_v19  ;;  %v1686_v53 = vsub.f32 %v12278_v34, %v8719_v25  ;;  %v8781_v0 = vpop.eup %5341 }
 0x567   :  { %v1109_v38 = vadd.f32 %v1108_v21, %v1094_v2  ;;  %v3249_v62 = vmul.f32 %v3233_v46, %v12227_v41  ;;  %v3250_v50 = vmul.f32 %v3234_v37, %v12228_v14  ;;  %5347 = vpow2.f32 %v1700_v51  ;;  %v12281_v21 = vld [vmem:[#allocation141_spill] sm:$0xff] }
 0x568   :  { %v3506_v6 = vsub.f32 %v12279_v40, %v8488_v59  ;;  %v3535_v31 = vmul.f32 1.442695, %v3505_v35  ;;  %v3548_v20 = vadd.f32 %v8781_v0, %v3547_v12  ;;  %5349 = vpow2.f32 %v1702_v22  ;;  %v12282_v14 = vld [vmem:[#allocation233_spill] sm:$0xff]  ;;  %v12284_v59 = vld [vmem:[#allocation376_spill] sm:$0xff]  ;;  %v12285_v22 = vld [vmem:[#allocation186_spill] sm:$0xff] }
 0x569   :  { %v3235_v1 = vmul.f32 %v8753_v60, %v12280_v44  ;;  %v1522_v39 = vadd.f32 %v1521_v15, %v1520_v10  ;;  %5351 = vpow2.f32 %v3533_v54  ;;  %v3652_v34 = vmax.f32 %v3650_v17, %v3651_v23  ;;  %v12286_v10 = vld [vmem:[#allocation116_spill] sm:$0xff]  ;;  %v12287_v40 = vld [vmem:[#allocation369_spill] sm:$0xff] }
 0x56a   :  { %v2954_v57 = vrot.slane %v2953_v45, 2  ;;  %v1082_v41 = vmul.f32 %v8573_v36, %v12281_v21  ;;  %v1687_v46 = vsub.f32 %v12282_v14, %v8719_v25  ;;  %v1704_v37 = vmul.f32 1.442695, %v1686_v53 }
 0x56b   :  { %v8794_v51 = vpop.eup %5343  ;;  %v1083_v35 = vmul.f32 %v8573_v36, %v12284_v59  ;;  %v1084_v2 = vmul.f32 %v8573_v36, %v12285_v22  ;;  %v1110_v12 = vadd.f32 %v1109_v38, %v1095_v58  ;;  %v3265_v15 = vadd.f32 %v3250_v50, %v3249_v62  ;;  %v12288_v59 = vld [vmem:[#allocation164_spill] sm:$0xff]  ;;  %v12291_v50 = vld [vmem:[#allocation119_spill] sm:$0xff] }
 0x56c   :  { %12283 = vst [vmem:[#allocation275_spill] sm:$0xff] %v8794_v51  ;;  %v1096_v23 = vmul.f32 %v1080_v43, %v12286_v10  ;;  %5353 = vpow2.f32 %v3535_v31  ;;  %v3537_v17 = vmul.f32 1.442695, %v3506_v6  ;;  %v3549_v54 = vadd.f32 %v8794_v51, %v3548_v20  ;;  %v12290_v43 = vld [vmem:[#allocation246_spill] sm:$0xff]  ;;  %v12292_v22 = vld [vmem:[#allocation168_spill] sm:$0xff]  ;;  %v12294_v51 = vld [vmem:[#allocation143_spill] sm:$0xff] }
 0x56d   :  { %v3236_v44 = vmul.f32 %v8753_v60, %v12287_v40  ;;  %v3251_v53 = vmul.f32 %v3235_v1, %v12237_v63  ;;  %v1523_v21 = vrot.slane %v1522_v39, 1  ;;  %v3653_v14 = vrot.slane %v3652_v34, 1  ;;  %v12293_v63 = vld [vmem:[#allocation254_spill] sm:$0xff] }
 0x56e   :  { %v2955_v47 = vadd.f32 %v2954_v57, %v2953_v45  ;;  %v1688_v24 = vsub.f32 %v12288_v59, %v8719_v25  ;;  %5355 = vpow2.f32 %v1704_v37  ;;  %v1706_v58 = vmul.f32 1.442695, %v1687_v46 }
 0x56f   :  { %v8807_v38 = vpop.eup %5345  ;;  %v1085_v62 = vmul.f32 %v8573_v36, %v12290_v43  ;;  %v1097_v6 = vmul.f32 %v1081_v26, %v12291_v50  ;;  %v1111_v31 = vadd.f32 %v1110_v12, %v1096_v23  ;;  %v3266_v20 = vadd.f32 %v3265_v15, %v3251_v53  ;;  %v8822_v26 = vpop.permute.xlu1 %1864  ;;  %v12301_v43 = vld [vmem:[#allocation270_spill] sm:$0xff] }
 0x570   :  { %12289 = vst [vmem:[#allocation96_spill] sm:$0xff] %v8807_v38  ;;  %v1098_v40 = vmul.f32 %v1082_v41, %v12292_v22  ;;  %v1099_v1 = vmul.f32 %v1083_v35, %v12293_v63  ;;  %v3237_v57 = vmul.f32 %v8753_v60, %v12294_v51  ;;  %v3550_v45 = vadd.f32 %v8807_v38, %v3549_v54  ;;  %v12298_v35 = vld [vmem:[#allocation300_spill] sm:$0xff]  ;;  %v12300_v54 = vld [vmem:[#allocation325_spill] sm:$0xff] }
 0x571   :  { %v8817_v37 = vpop.eup %5347  ;;  %v3252_v46 = vmul.f32 %v3236_v44, %v12242_v32  ;;  %v1524_v59 = vadd.f32 %v1523_v21, %v1522_v39  ;;  %5357 = vpow2.f32 %v3537_v17  ;;  %v8820_v36 = vmax.f32 %v3652_v34, %v3653_v14  ;;  %12296 = vst [vmem:[#allocation344_spill] sm:$0xff] %v8822_v26  ;;  %v12302_v17 = vld [vmem:[#allocation379_spill] sm:$0xff]  ;;  %v12303_v14 = vld [vmem:[#allocation197_spill] sm:$0xff] }
 0x572   :  { %12295 = vst [vmem:[#allocation298_spill] sm:$0xff] %v8817_v37  ;;  %v8824_v12 = vpop.eup %5349  ;;  %v2956_v41 = vrot.slane %v2955_v47, 1  ;;  %v1689_v15 = vsub.f32 %v12298_v35, %v8719_v25  ;;  %5359 = vpow2.f32 %v1706_v58  ;;  %v1708_v51 = vmul.f32 1.442695, %v1688_v24  ;;  %v12304_v58 = vld [vmem:[#allocation127_spill] sm:$0xff] }
 0x573   :  { %12297 = vst [vmem:[#allocation169_spill] sm:$0xff] %v8824_v12  ;;  %v8828_v23 = vpop.eup %5351  ;;  %v1100_v53 = vmul.f32 %v1084_v2, %v12300_v54  ;;  %v8832_v32 = vmul.f32 %v1085_v62, %v12301_v43  ;;  %v1112_v39 = vadd.f32 %v1111_v31, %v1097_v6  ;;  %v3267_v34 = vadd.f32 %v3266_v20, %v3252_v46  ;;  %v12306_v62 = vld [vmem:[#allocation147_spill] sm:$0xff] }
 0x574   :  { %12299 = vst [vmem:[#allocation332_spill] sm:$0xff] %v8828_v23  ;;  %v3238_v44 = vmul.f32 %v8753_v60, %v12302_v17  ;;  %v3551_v21 = vadd.f32 %v8828_v23, %v3550_v45  ;;  %v1690_v38 = vsub.f32 %v12303_v14, %v8719_v25  ;;  %v8841_v24 = vmul.f32 %v12304_v58, %v8822_v26  ;;  %v12309_v46 = vld [vmem:[#allocation151_spill] sm:$0xff]  ;;  %v12310_v58 = vld [vmem:[#allocation152_spill] sm:$0xff] }
 0x575   :  { %v3253_v35 = vmul.f32 %v3237_v57, %v12249_v48  ;;  %5361 = vrcp.f32 %v1524_v59  ;;  %v1732_v2 = vadd.f32 %v8824_v12, %v8817_v37  ;;  %v3655_v6 = vsub.f32 %v12306_v62, %v8820_v36  ;;  %v12311_v57 = vld [vmem:[#allocation40_spill] sm:$0xff]  ;;  %v12313_v62 = vld [vmem:[#allocation330_spill] sm:$0xff] }
 0x576   :  { %12305 = vst [vmem:[#allocation103_spill] sm:$0xff] %v8841_v24  ;;  %v8848_v31 = vpop.eup %5353  ;;  %v8850_v20 = vadd.f32 %v2956_v41, %v2955_v47  ;;  %5363 = vpow2.f32 %v1708_v51  ;;  %v1710_v45 = vmul.f32 1.442695, %v1689_v15  ;;  %v3656_v17 = vsub.f32 %v12309_v46, %v8820_v36  ;;  %v12314_v47 = vld [vmem:[#allocation44_spill] sm:$0xff] }
 0x577   :  { %12307 = vst [vmem:[#allocation277_spill] sm:$0xff] %v8848_v31  ;;  %v1113_v14 = vadd.f32 %v1112_v39, %v1098_v40  ;;  %v3239_v48 = vmul.f32 %v8753_v60, %v12310_v58  ;;  %v3240_v59 = vmul.f32 %v8753_v60, %v12311_v57  ;;  %v3268_v12 = vadd.f32 %v3267_v34, %v3253_v35  ;;  %v12315_v35 = vld [vmem:[#allocation328_spill] sm:$0xff] }
 0x578   :  { %12308 = vst [vmem:[#allocation285_spill] sm:$0xff] %v8850_v20  ;;  %v8858_v37 = vpop.eup %5355  ;;  %v3241_v23 = vmul.f32 %v8753_v60, %v12313_v62  ;;  %v3242_v41 = vmul.f32 %v8753_v60, %v12314_v47  ;;  %v3552_v15 = vadd.f32 %v8848_v31, %v3551_v21  ;;  %v1712_v51 = vmul.f32 1.442695, %v1690_v38  ;;  %v12317_v38 = vld [vmem:[#allocation192_spill] sm:$0xff] }
 0x579   :  { %12312 = vst [vmem:[#allocation335_spill] sm:$0xff] %v8858_v37  ;;  %v3243_v40 = vmul.f32 %v8753_v60, %v8452_v27  ;;  %v3254_v39 = vmul.f32 %v3238_v44, %v12253_v7  ;;  %v1733_v46 = vadd.f32 %v8858_v37, %v1732_v2  ;;  %v3671_v58 = vmul.f32 1.442695, %v3655_v6  ;;  %v12318_v27 = vld [vmem:[#allocation256_spill] sm:$0xff]  ;;  %v12320_v6 = vld [vmem:[#allocation59_spill] sm:$0xff] }
 0x57a   :  { %v3244_v34 = vmul.f32 %v8753_v60, %v8470_v52  ;;  %v1691_v57 = vsub.f32 %v12315_v35, %v8719_v25  ;;  %5365 = vpow2.f32 %v1710_v45  ;;  %v3673_v62 = vmul.f32 1.442695, %v3656_v17  ;;  %v12321_v45 = vld [vmem:[#allocation199_spill] sm:$0xff] }
 0x57b   :  { %v8873_v47 = vpop.eup %5357  ;;  %v1114_v21 = vadd.f32 %v1113_v14, %v1099_v1  ;;  %v3245_v20 = vmul.f32 %v8753_v60, %v12317_v38  ;;  %v3246_v7 = vmul.f32 %v8753_v60, %v12318_v27  ;;  %v3269_v44 = vadd.f32 %v3268_v12, %v3254_v39  ;;  %v12322_v1 = vld [vmem:[#allocation308_spill] sm:$0xff]  ;;  %v12323_v27 = vld [vmem:[#allocation222_spill] sm:$0xff] }
 0x57c   :  { %12316 = vst [vmem:[#allocation229_spill] sm:$0xff] %v8873_v47  ;;  %v8879_v2 = vpop.eup %5359  ;;  %v8883_v52 = vmul.f32 %v8753_v60, %v12320_v6  ;;  %v3553_v35 = vadd.f32 %v8873_v47, %v3552_v15  ;;  %5367 = vpow2.f32 %v1712_v51  ;;  %v3657_v17 = vsub.f32 %v12321_v45, %v8820_v36  ;;  %v12325_v47 = vld [vmem:[#allocation210_spill] sm:$0xff] }
 0x57d   :  { %12319 = vst [vmem:[#allocation112_spill] sm:$0xff] %v8879_v2  ;;  %v8890_v14 = vmul.f32 %v8753_v60, %v12322_v1  ;;  %v3255_v38 = vmul.f32 %v3239_v48, %v12259_v28  ;;  %v1734_v12 = vadd.f32 %v8879_v2, %v1733_v46  ;;  %5369 = vpow2.f32 %v3671_v58  ;;  %v12324_v1 = vld [vmem:[#allocation372_spill] sm:$0xff]  ;;  %v12328_v58 = vld [vmem:[#allocation235_spill] sm:$0xff] }
 0x57e   :  { %v3256_v39 = vmul.f32 %v3240_v59, %v12269_v9  ;;  %v1692_v6 = vsub.f32 %v12323_v27, %v8719_v25  ;;  %v1714_v37 = vmul.f32 1.442695, %v1691_v57  ;;  %5371 = vpow2.f32 %v3673_v62 }
 0x57f   :  { %v8897_v15 = vpop.eup %5361  ;;  %v8899_v51 = vadd.f32 %v1114_v21, %v1100_v53  ;;  %v3257_v45 = vmul.f32 %v3241_v23, %v12275_v3  ;;  %v3270_v60 = vadd.f32 %v3269_v44, %v3255_v38  ;;  %v12326_v28 = vmax.f32 %v12324_v1, %v12325_v47  ;;  %v12329_v3 = vld [vmem:[#allocation170_spill] sm:$0xff] }
 0x580   :  { %v8906_v46 = vpop.eup %5363  ;;  %v3258_v9 = vmul.f32 %v3242_v41, %v12277_v19  ;;  %v3554_v59 = vrot.slane %v3553_v35, 4  ;;  %v3658_v57 = vsub.f32 %v12328_v58, %v8820_v36  ;;  %v3675_v62 = vmul.f32 1.442695, %v3657_v17  ;;  %v12330_v41 = vld [vmem:[#allocation165_spill] sm:$0xff]  ;;  %v12331_v17 = vld [vmem:[#allocation162_spill] sm:$0xff] }
 0x581   :  { %v1905_v48 = vmax.f32 %v8841_v24, %v12326_v28  ;;  %12327 = vst [vmem:[#allocation349_spill] sm:$0xff] %v8906_v46  ;;  %v3259_v53 = vmul.f32 %v3243_v40, %v12286_v10  ;;  %v8913_v21 = vmul.f32 %v3244_v34, %v12291_v50  ;;  %v1693_v23 = vsub.f32 %v12329_v3, %v8719_v25  ;;  %v12332_v40 = vld [vmem:[#allocation268_spill] sm:$0xff] }
 0x582   :  { %v1735_v44 = vadd.f32 %v8906_v46, %v1734_v12  ;;  %v8919_v38 = vmul.f32 %v3245_v20, %v12292_v22  ;;  %5373 = vpow2.f32 %v1714_v37  ;;  %v1716_v19 = vmul.f32 1.442695, %v1692_v6  ;;  %v12334_v12 = vld [vmem:[#allocation301_spill] sm:$0xff]  ;;  %v12340_v46 = vld [vmem:[#allocation71_spill] sm:$0xff] }
 0x583   :  { %v3659_v27 = vsub.f32 %v12330_v41, %v8820_v36  ;;  %v3271_v1 = vadd.f32 %v3270_v60, %v3256_v39  ;;  %v1526_v10 = vmul.f32 %v8897_v15, %v12331_v17  ;;  %v1527_v50 = vmul.f32 %v8897_v15, %v12332_v40  ;;  %v12335_v39 = vld [vmem:[#allocation362_spill] sm:$0xff]  ;;  %v12337_v17 = vld [vmem:[#allocation261_spill] sm:$0xff] }
 0x584   :  { %v1906_v34 = vrot.slane %v1905_v48, 4  ;;  %v8927_v28 = vpop.eup %5365  ;;  %v3555_v58 = vadd.f32 %v3554_v59, %v3553_v35  ;;  %v3660_v22 = vsub.f32 %v12334_v12, %v8820_v36  ;;  %5375 = vpow2.f32 %v3675_v62  ;;  %v12338_v35 = vld [vmem:[#allocation198_spill] sm:$0xff] }
 0x585   :  { %12333 = vst [vmem:[#allocation163_spill] sm:$0xff] %v8927_v28  ;;  %v3677_v37 = vmul.f32 1.442695, %v3658_v57  ;;  %v8932_v20 = vmul.f32 %v3246_v7, %v12293_v63  ;;  %v1694_v6 = vsub.f32 %v12335_v39, %v8719_v25  ;;  %v1718_v60 = vmul.f32 1.442695, %v1693_v23  ;;  %v12339_v7 = vld [vmem:[#allocation37_spill] sm:$0xff] }
 0x586   :  { %v1736_v3 = vadd.f32 %v8927_v28, %v1735_v44  ;;  %v8937_v41 = vpop.eup %5367  ;;  %v1695_v40 = vsub.f32 %v12337_v17, %v8719_v25  ;;  %5377 = vpow2.f32 %v1716_v19  ;;  %v3661_v59 = vsub.f32 %v12338_v35, %v8820_v36  ;;  %v12341_v28 = vld [vmem:[#allocation329_spill] sm:$0xff] }
 0x587   :  { %12336 = vst [vmem:[#allocation252_spill] sm:$0xff] %v8937_v41  ;;  %v3679_v62 = vmul.f32 1.442695, %v3659_v27  ;;  %v8943_v57 = vpop.eup %5369  ;;  %v3272_v63 = vadd.f32 %v3271_v1, %v3257_v45  ;;  %v1542_v12 = vmul.f32 %v1526_v10, %v12339_v7  ;;  %v1543_v39 = vmul.f32 %v1527_v50, %v12340_v46  ;;  %v12342_v17 = vld [vmem:[#allocation293_spill] sm:$0xff]  ;;  %v12343_v1 = vld [vmem:[#allocation282_spill] sm:$0xff] }
 0x588   :  { %v1907_v23 = vmax.f32 %v1905_v48, %v1906_v34  ;;  %v8947_v2 = vpop.eup %5371  ;;  %v3556_v44 = vrot.slane %v3555_v58, 2  ;;  %v3662_v31 = vsub.f32 %v12341_v28, %v8820_v36  ;;  %5379 = vpow2.f32 %v3677_v37  ;;  %v12344_v48 = vld [vmem:[#allocation223_spill] sm:$0xff] }
 0x589   :  { %v3681_v19 = vmul.f32 1.442695, %v3660_v22  ;;  %v1528_v35 = vmul.f32 %v8897_v15, %v12342_v17  ;;  %5381 = vpow2.f32 %v1718_v60  ;;  %v1720_v27 = vmul.f32 1.442695, %v1694_v6  ;;  %v12346_v6 = vld [vmem:[#allocation356_spill] sm:$0xff] }
 0x58a   :  { %v1737_v45 = vadd.f32 %v8937_v41, %v1736_v3  ;;  %v1696_v10 = vsub.f32 %v12343_v1, %v8719_v25  ;;  %v3663_v50 = vsub.f32 %v12344_v48, %v8820_v36  ;;  %5383 = vpow2.f32 %v3679_v62  ;;  %v12347_v1 = vld [vmem:[#allocation48_spill] sm:$0xff] }
 0x58b   :  { %v3683_v34 = vmul.f32 1.442695, %v3661_v59  ;;  %v3273_v24 = vadd.f32 %v3272_v63, %v3258_v9  ;;  %v1558_v47 = vadd.f32 %v1543_v39, %v1542_v12  ;;  %v3703_v28 = vadd.f32 %v8947_v2, %v8943_v57  ;;  %v12349_v63 = vld [vmem:[#allocation132_spill] sm:$0xff] }
 0x58c   :  { %v1908_v22 = vrot.slane %v1907_v23, 2  ;;  %v8960_v37 = vpop.eup %5373  ;;  %v3557_v60 = vadd.f32 %v3556_v44, %v3555_v58  ;;  %v3664_v3 = vsub.f32 %v12346_v6, %v8820_v36  ;;  %5385 = vpow2.f32 %v3681_v19 }
 0x58d   :  { %12345 = vst [vmem:[#allocation257_spill] sm:$0xff] %v8960_v37  ;;  %v3685_v17 = vmul.f32 1.442695, %v3662_v31  ;;  %v1544_v41 = vmul.f32 %v1528_v35, %v12347_v1  ;;  %5387 = vpow2.f32 %v1720_v27  ;;  %v1722_v48 = vmul.f32 1.442695, %v1695_v40  ;;  %v12350_v31 = vld [vmem:[#allocation187_spill] sm:$0xff] }
 0x58e   :  { %v1738_v59 = vadd.f32 %v8960_v37, %v1737_v45  ;;  %v8966_v9 = vpop.eup %5375  ;;  %v8970_v62 = vmul.f32 %v8883_v52, %v12300_v54  ;;  %v1529_v58 = vmul.f32 %v8897_v15, %v12349_v63  ;;  %5389 = vpow2.f32 %v3683_v34  ;;  %v12352_v54 = vld [vmem:[#allocation228_spill] sm:$0xff] }
 0x58f   :  { %12348 = vst [vmem:[#allocation158_spill] sm:$0xff] %v8966_v9  ;;  %v3687_v12 = vmul.f32 1.442695, %v3663_v50  ;;  %v3274_v39 = vadd.f32 %v3273_v24, %v3259_v53  ;;  %v1559_v44 = vadd.f32 %v1558_v47, %v1544_v41  ;;  %v3665_v19 = vsub.f32 %v12350_v31, %v8820_v36  ;;  %v12354_v47 = vld [vmem:[#allocation52_spill] sm:$0xff] }
 0x590   :  { %v3704_v40 = vadd.f32 %v8966_v9, %v3703_v28  ;;  %v8977_v35 = vpop.eup %5377  ;;  %v3558_v27 = vrot.slane %v3557_v60, 1  ;;  %5391 = vpow2.f32 %v3685_v17  ;;  %v3689_v45 = vmul.f32 1.442695, %v3664_v3  ;;  %v12355_v41 = vld [vmem:[#allocation56_spill] sm:$0xff] }
 0x591   :  { %12351 = vst [vmem:[#allocation259_spill] sm:$0xff] %v8977_v35  ;;  %v1909_v6 = vmax.f32 %v1907_v23, %v1908_v22  ;;  %v1697_v52 = vsub.f32 %v12352_v54, %v8719_v25  ;;  %5393 = vpow2.f32 %v1722_v48  ;;  %v1724_v63 = vmul.f32 1.442695, %v1696_v10  ;;  %v12356_v28 = vld [vmem:[#allocation32_spill] sm:$0xff]  ;;  %v12358_v10 = vld [vmem:[#allocation262_spill] sm:$0xff] }
 0x592   :  { %v1739_v50 = vadd.f32 %v8977_v35, %v1738_v59  ;;  %v8982_v24 = vpop.eup %5379  ;;  %v1530_v53 = vmul.f32 %v8897_v15, %v12354_v47  ;;  %v1545_v34 = vmul.f32 %v1529_v58, %v12355_v41  ;;  %5395 = vpow2.f32 %v3687_v12  ;;  %v12360_v12 = vld [vmem:[#allocation251_spill] sm:$0xff] }
 0x593   :  { %12353 = vst [vmem:[#allocation352_spill] sm:$0xff] %v8982_v24  ;;  %v8989_v17 = vmul.f32 %v12356_v28, %v8822_v26  ;;  %v8991_v23 = vpop.eup %5381  ;;  %v3275_v22 = vadd.f32 %v3274_v39, %v8913_v21  ;;  %v3666_v3 = vsub.f32 %v12358_v10, %v8820_v36  ;;  %v3691_v48 = vmul.f32 1.442695, %v3665_v19  ;;  %v12362_v10 = vld [vmem:[#allocation244_spill] sm:$0xff] }
 0x594   :  { %12357 = vst [vmem:[#allocation294_spill] sm:$0xff] %v8991_v23  ;;  %v3705_v59 = vadd.f32 %v8982_v24, %v3704_v40  ;;  %v8997_v31 = vpop.eup %5383  ;;  %v1560_v54 = vadd.f32 %v1559_v44, %v1545_v34  ;;  %v3559_v47 = vadd.f32 %v3558_v27, %v3557_v60  ;;  %5397 = vpow2.f32 %v3689_v45  ;;  %v12363_v40 = vld [vmem:[#allocation82_spill] sm:$0xff]  ;;  %v12365_v60 = vld [vmem:[#allocation280_spill] sm:$0xff] }
 0x595   :  { %12359 = vst [vmem:[#allocation149_spill] sm:$0xff] %v8997_v31  ;;  %v1910_v58 = vrot.slane %v1909_v6, 1  ;;  %v1698_v28 = vsub.f32 %v12360_v12, %v8719_v25  ;;  %v1726_v26 = vmul.f32 1.442695, %v1697_v52  ;;  %v1740_v35 = vadd.f32 %v8991_v23, %v1739_v50  ;;  %v12364_v44 = vld [vmem:[#allocation374_spill] sm:$0xff]  ;;  %v12367_v52 = vld [vmem:[#allocation283_spill] sm:$0xff] }
 0x596   :  { %v3706_v21 = vadd.f32 %v8997_v31, %v3705_v59  ;;  %v9003_v39 = vpop.eup %5385  ;;  %v1531_v19 = vmul.f32 %v8897_v15, %v12362_v10  ;;  %v1546_v24 = vmul.f32 %v1530_v53, %v12363_v40  ;;  %5399 = vpow2.f32 %v1724_v63 }
 0x597   :  { %12361 = vst [vmem:[#allocation337_spill] sm:$0xff] %v9003_v39  ;;  %v12366_v27 = vmax.f32 %v12364_v44, %v12365_v60  ;;  %v9012_v34 = vpop.eup %5387  ;;  %v3667_v50 = vsub.f32 %v12367_v52, %v8820_v36  ;;  %5401 = vpow2.f32 %v3691_v48  ;;  %v3693_v59 = vmul.f32 1.442695, %v3666_v3  ;;  %v12369_v44 = vld [vmem:[#allocation316_spill] sm:$0xff]  ;;  %v12371_v3 = vld [vmem:[#allocation258_spill] sm:$0xff] }
 0x598   :  { %v3707_v12 = vadd.f32 %v9003_v39, %v3706_v21  ;;  %v9017_v31 = vpop.eup %5389  ;;  %v3276_v10 = vadd.f32 %v3275_v22, %v8919_v38  ;;  %v1561_v53 = vadd.f32 %v1560_v54, %v1546_v24  ;;  %5403 = vrcp.f32 %v3559_v47  ;;  %v12372_v39 = vld [vmem:[#allocation70_spill] sm:$0xff] }
 0x599   :  { %v3812_v45 = vmax.f32 %v8989_v17, %v12366_v27  ;;  %12368 = vst [vmem:[#allocation339_spill] sm:$0xff] %v9017_v31  ;;  %v9020_v63 = vmax.f32 %v1909_v6, %v1910_v58  ;;  %v1699_v27 = vsub.f32 %v12369_v44, %v8719_v25  ;;  %v1728_v23 = vmul.f32 1.442695, %v1698_v28  ;;  %v12373_v6 = vld [vmem:[#allocation65_spill] sm:$0xff] }
 0x59a   :  { %v1741_v37 = vadd.f32 %v9012_v34, %v1740_v35  ;;  %v3708_v52 = vadd.f32 %v9017_v31, %v3707_v12  ;;  %v9026_v48 = vpop.eup %5391  ;;  %v1532_v21 = vmul.f32 %v8897_v15, %v12371_v3  ;;  %v1547_v9 = vmul.f32 %v1531_v19, %v12372_v39 }
 0x59b   :  { %12370 = vst [vmem:[#allocation311_spill] sm:$0xff] %v9026_v48  ;;  %5405 = vpow2.f32 %v1726_v26  ;;  %v3813_v38 = vrot.slane %v3812_v45, 4  ;;  %v9031_v24 = vpop.eup %5393  ;;  %v3668_v22 = vsub.f32 %v12373_v6, %v8820_v36  ;;  %v3695_v25 = vmul.f32 1.442695, %v3667_v50  ;;  %v12376_v26 = vld [vmem:[#allocation134_spill] sm:$0xff]  ;;  %v12377_v50 = vld [vmem:[#allocation175_spill] sm:$0xff] }
 0x59c   :  { %5407 = vpow2.f32 %v3693_v59  ;;  %v3709_v35 = vadd.f32 %v9026_v48, %v3708_v52  ;;  %v9036_v54 = vpop.eup %5395  ;;  %v9040_v47 = vadd.f32 %v8899_v51, %v8832_v32  ;;  %v3277_v58 = vadd.f32 %v3276_v10, %v8932_v20  ;;  %v12379_v6 = vld [vmem:[#allocation255_spill] sm:$0xff]  ;;  %v12380_v51 = vld [vmem:[#allocation93_spill] sm:$0xff] }
 0x59d   :  { %12374 = vst [vmem:[#allocation341_spill] sm:$0xff] %v9036_v54  ;;  %v1562_v28 = vadd.f32 %v1561_v53, %v1547_v9  ;;  %v1912_v19 = vsub.f32 %v12376_v26, %v9020_v63  ;;  %v1730_v12 = vmul.f32 1.442695, %v1699_v27  ;;  %v1742_v44 = vadd.f32 %v9031_v24, %v1741_v37 }
 0x59e   :  { %12375 = vst [vmem:[#allocation279_spill] sm:$0xff] %v9040_v47  ;;  %v3710_v59 = vadd.f32 %v9036_v54, %v3709_v35  ;;  %v1913_v52 = vsub.f32 %v12377_v50, %v9020_v63  ;;  %v9049_v3 = vpop.eup %5397  ;;  %v1533_v32 = vmul.f32 %v8897_v15, %v12379_v6  ;;  %v1548_v48 = vmul.f32 %v1532_v21, %v12380_v51  ;;  %v12383_v21 = vld [vmem:[#allocation182_spill] sm:$0xff]  ;;  %v12389_v47 = vld [vmem:[#allocation124_spill] sm:$0xff] }
 0x59f   :  { %12378 = vst [vmem:[#allocation35_spill] sm:$0xff] %v9049_v3  ;;  %5409 = vpow2.f32 %v1728_v23  ;;  %v3669_v20 = vsub.f32 %v8662_v49, %v8820_v36  ;;  %v3697_v9 = vmul.f32 1.442695, %v3668_v22  ;;  %v3814_v10 = vmax.f32 %v3812_v45, %v3813_v38  ;;  %v9068_v45 = vpop.permute.xlu1 %728 }
 0x5a0   :  { %5411 = vpow2.f32 %v3695_v25  ;;  %v3711_v37 = vadd.f32 %v9049_v3, %v3710_v59  ;;  %v9057_v53 = vpop.eup %5399  ;;  %v3264_v27 = vmul.f32 %v8890_v14, %v12301_v43  ;;  %v3278_v35 = vadd.f32 %v3277_v58, %v8970_v62  ;;  %12384 = vst [vmem:[#allocation327_spill] sm:$0xff] %v9068_v45  ;;  %v12385_v59 = vld [vmem:[#allocation90_spill] sm:$0xff] }
 0x5a1   :  { %12381 = vst [vmem:[#allocation42_spill] sm:$0xff] %v9057_v53  ;;  %v1563_v26 = vadd.f32 %v1562_v28, %v1548_v48  ;;  %v1928_v50 = vmul.f32 1.442695, %v1912_v19  ;;  %v9062_v6 = vpop.eup %5401  ;;  %v1534_v49 = vmul.f32 %v8897_v15, %v12383_v21  ;;  %v1743_v22 = vadd.f32 %v9057_v53, %v1742_v44  ;;  %v12386_v14 = vld [vmem:[#allocation318_spill] sm:$0xff] }
 0x5a2   :  { %12382 = vst [vmem:[#allocation343_spill] sm:$0xff] %v9062_v6  ;;  %v1930_v25 = vmul.f32 1.442695, %v1913_v52  ;;  %v9070_v38 = vpop.eup %5403  ;;  %v1549_v43 = vmul.f32 %v1533_v32, %v12385_v59  ;;  %5413 = vpow2.f32 %v1730_v12  ;;  %v3670_v62 = vsub.f32 %v12386_v14, %v8820_v36  ;;  %v12387_v28 = vld [vmem:[#allocation190_spill] sm:$0xff]  ;;  %v12392_v36 = vld [vmem:[#allocation264_spill] sm:$0xff] }
 0x5a3   :  { %v3712_v48 = vadd.f32 %v9062_v6, %v3711_v37  ;;  %5415 = vpow2.f32 %v3697_v9  ;;  %v3699_v58 = vmul.f32 1.442695, %v3669_v20  ;;  %v1914_v19 = vsub.f32 %v12387_v28, %v9020_v63  ;;  %v12393_v9 = vld [vmem:[#allocation219_spill] sm:$0xff] }
 0x5a4   :  { %v3815_v21 = vrot.slane %v3814_v10, 2  ;;  %v3279_v52 = vadd.f32 %v3278_v35, %v3264_v27  ;;  %v1564_v23 = vadd.f32 %v1563_v26, %v1549_v43  ;;  %5417 = vpow2.f32 %v1928_v50  ;;  %v12394_v28 = vld [vmem:[#allocation63_spill] sm:$0xff]  ;;  %v12395_v35 = vld [vmem:[#allocation98_spill] sm:$0xff]  ;;  %v12396_v43 = vld [vmem:[#allocation153_spill] sm:$0xff] }
 0x5a5   :  { %v9078_v44 = vpop.eup %5405  ;;  %v9082_v32 = vmul.f32 %v12389_v47, %v9068_v45  ;;  %v3561_v37 = vmul.f32 %v9070_v38, %v12392_v36  ;;  %v3562_v20 = vmul.f32 %v9070_v38, %v12393_v9  ;;  %5419 = vpow2.f32 %v1930_v25  ;;  %v12398_v9 = vld [vmem:[#allocation331_spill] sm:$0xff] }
 0x5a6   :  { %12388 = vst [vmem:[#allocation342_spill] sm:$0xff] %v9078_v44  ;;  %v9084_v12 = vpop.eup %5407  ;;  %v1744_v14 = vadd.f32 %v9078_v44, %v1743_v22  ;;  %v1535_v27 = vmul.f32 %v8897_v15, %v12394_v28  ;;  %v1550_v26 = vmul.f32 %v1534_v49, %v12395_v35  ;;  %v3701_v50 = vmul.f32 1.442695, %v3670_v62 }
 0x5a7   :  { %12390 = vst [vmem:[#allocation348_spill] sm:$0xff] %v9082_v32  ;;  %12391 = vst [vmem:[#allocation241_spill] sm:$0xff] %v9084_v12  ;;  %v3713_v47 = vadd.f32 %v9084_v12, %v3712_v48  ;;  %5421 = vpow2.f32 %v3699_v58  ;;  %v1915_v6 = vsub.f32 %v12396_v43, %v9020_v63  ;;  %v1932_v3 = vmul.f32 1.442695, %v1914_v19 }
 0x5a8   :  { %v3816_v36 = vmax.f32 %v3814_v10, %v3815_v21  ;;  %v1536_v22 = vmul.f32 %v8897_v15, %v12398_v9  ;;  %v1537_v25 = vmul.f32 %v8897_v15, %v8615_v18  ;;  %v1565_v28 = vadd.f32 %v1564_v23, %v1550_v26  ;;  %v12400_v21 = vld [vmem:[#allocation111_spill] sm:$0xff] }
 0x5a9   :  { %v9097_v54 = vpop.eup %5409  ;;  %v9105_v49 = vmax.f32 %v9082_v32, %v8706_v5  ;;  %v3280_v48 = vrot.slane %v3279_v52, 4  ;;  %v3577_v58 = vmul.f32 %v3561_v37, %v12339_v7  ;;  %v3578_v10 = vmul.f32 %v3562_v20, %v12340_v46  ;;  %v12401_v5 = vld [vmem:[#allocation263_spill] sm:$0xff]  ;;  %v12403_v7 = vld [vmem:[#allocation76_spill] sm:$0xff] }
 0x5aa   :  { %12397 = vst [vmem:[#allocation350_spill] sm:$0xff] %v9097_v54  ;;  %v9107_v62 = vpop.eup %5411  ;;  %v1745_v19 = vadd.f32 %v9097_v54, %v1744_v14  ;;  %v1551_v43 = vmul.f32 %v1535_v27, %v12400_v21  ;;  %v3563_v9 = vmul.f32 %v9070_v38, %v8625_v8  ;;  %5423 = vpow2.f32 %v3701_v50 }
 0x5ab   :  { %12399 = vst [vmem:[#allocation345_spill] sm:$0xff] %v9107_v62  ;;  %v3714_v18 = vadd.f32 %v9107_v62, %v3713_v47  ;;  %v1916_v23 = vsub.f32 %v12401_v5, %v9020_v63  ;;  %5425 = vpow2.f32 %v1932_v3  ;;  %v1934_v26 = vmul.f32 1.442695, %v1915_v6  ;;  %v12406_v5 = vld [vmem:[#allocation120_spill] sm:$0xff]  ;;  %v12407_v62 = vld [vmem:[#allocation221_spill] sm:$0xff] }
 0x5ac   :  { %v3817_v12 = vrot.slane %v3816_v36, 1  ;;  %v9118_v32 = vpop.eup %5413  ;;  %v1538_v46 = vmul.f32 %v8897_v15, %v12403_v7  ;;  %v1539_v37 = vmul.f32 %v8897_v15, %v8644_v4  ;;  %v1540_v8 = vmul.f32 %v8897_v15, %v8672_v61 }
 0x5ad   :  { %12402 = vst [vmem:[#allocation46_spill] sm:$0xff] %v9118_v32  ;;  %v1566_v20 = vadd.f32 %v1565_v28, %v1551_v43  ;;  %v9126_v14 = vpop.eup %5415  ;;  %v3281_v27 = vadd.f32 %v3280_v48, %v3279_v52  ;;  %v1541_v3 = vmul.f32 %v8897_v15, %v8692_v16  ;;  %v3593_v6 = vadd.f32 %v3578_v10, %v3577_v58  ;;  %v12409_v52 = vld [vmem:[#allocation172_spill] sm:$0xff]  ;;  %v12410_v58 = vld [vmem:[#allocation171_spill] sm:$0xff]  ;;  %v12412_v43 = vld [vmem:[#allocation265_spill] sm:$0xff] }
 0x5ae   :  { %12404 = vst [vmem:[#allocation297_spill] sm:$0xff] %v9126_v14  ;;  %v1746_v50 = vadd.f32 %v9118_v32, %v1745_v19  ;;  %v9131_v47 = vpop.eup %5417  ;;  %v1552_v7 = vmul.f32 %v1536_v22, %v12406_v5  ;;  %v3564_v4 = vmul.f32 %v9070_v38, %v12407_v62  ;;  %v3579_v31 = vmul.f32 %v3563_v9, %v12347_v1  ;;  %v12411_v19 = vld [vmem:[#allocation180_spill] sm:$0xff]  ;;  %v12414_v9 = vld [vmem:[#allocation347_spill] sm:$0xff] }
 0x5af   :  { %12405 = vst [vmem:[#allocation211_spill] sm:$0xff] %v9131_v47  ;;  %v3715_v61 = vadd.f32 %v9126_v14, %v3714_v18  ;;  %v9138_v28 = vpop.eup %5419  ;;  %v1917_v48 = vsub.f32 %v12409_v52, %v9020_v63  ;;  %5427 = vpow2.f32 %v1934_v26  ;;  %v1936_v16 = vmul.f32 1.442695, %v1916_v23  ;;  %v12415_v26 = vld [vmem:[#allocation314_spill] sm:$0xff] }
 0x5b0   :  { %12408 = vst [vmem:[#allocation353_spill] sm:$0xff] %v9138_v28  ;;  %v9142_v15 = vmax.f32 %v3816_v36, %v3817_v12  ;;  %v1553_v10 = vmul.f32 %v1537_v25, %v12410_v58  ;;  %v1554_v22 = vmul.f32 %v1538_v46, %v12411_v19  ;;  %v1555_v32 = vmul.f32 %v1539_v37, %v12412_v43 }
 0x5b1   :  { %v1567_v62 = vadd.f32 %v1566_v20, %v1552_v7  ;;  %v9147_v54 = vpop.eup %5421  ;;  %v3282_v1 = vrot.slane %v3281_v27, 2  ;;  %v9150_v18 = vmul.f32 %v1540_v8, %v12414_v9  ;;  %v3594_v14 = vadd.f32 %v3593_v6, %v3579_v31  ;;  %v12416_v8 = vld [vmem:[#allocation135_spill] sm:$0xff]  ;;  %v12417_v6 = vld [vmem:[#allocation284_spill] sm:$0xff] }
 0x5b2   :  { %12413 = vst [vmem:[#allocation54_spill] sm:$0xff] %v9147_v54  ;;  %v1747_v44 = vrot.slane %v1746_v50, 4  ;;  %v3565_v23 = vmul.f32 %v9070_v38, %v8650_v56  ;;  %v3580_v12 = vmul.f32 %v3564_v4, %v12355_v41  ;;  %v3716_v36 = vadd.f32 %v9147_v54, %v3715_v61  ;;  %v12418_v41 = vld [vmem:[#allocation177_spill] sm:$0xff]  ;;  %v12420_v54 = vld [vmem:[#allocation194_spill] sm:$0xff] }
 0x5b3   :  { %v1960_v25 = vadd.f32 %v9138_v28, %v9131_v47  ;;  %v1918_v46 = vsub.f32 %v12415_v26, %v9020_v63  ;;  %5429 = vpow2.f32 %v1936_v16  ;;  %v1938_v37 = vmul.f32 1.442695, %v1917_v48 }
 0x5b4   :  { %v3819_v20 = vsub.f32 %v12416_v8, %v9142_v15  ;;  %v9162_v31 = vpop.eup %5423  ;;  %v9165_v7 = vmul.f32 %v1541_v3, %v12417_v6  ;;  %v1568_v56 = vadd.f32 %v1567_v62, %v1553_v10  ;;  %v3820_v4 = vsub.f32 %v12418_v41, %v9142_v15  ;;  %v12419_v3 = vld [vmem:[#allocation206_spill] sm:$0xff] }
 0x5b5   :  { %v766_v61 = vrot.slane %v9105_v49, 4  ;;  %v9170_v52 = vpop.eup %5425  ;;  %v3283_v28 = vadd.f32 %v3282_v1, %v3281_v27  ;;  %v3566_v48 = vmul.f32 %v9070_v38, %v8664_v11  ;;  %v3595_v16 = vadd.f32 %v3594_v14, %v3580_v12  ;;  %v12421_v12 = vld [vmem:[#allocation333_spill] sm:$0xff] }
 0x5b6   :  { %v1748_v26 = vadd.f32 %v1747_v44, %v1746_v50  ;;  %v3581_v8 = vmul.f32 %v3565_v23, %v12363_v40  ;;  %v3717_v47 = vadd.f32 %v9162_v31, %v3716_v36  ;;  %v1919_v10 = vsub.f32 %v12419_v3, %v9020_v63 }
 0x5b7   :  { %v1961_v62 = vadd.f32 %v9170_v52, %v1960_v25  ;;  %5431 = vpow2.f32 %v1938_v37  ;;  %v1940_v41 = vmul.f32 1.442695, %v1918_v46  ;;  %v3821_v53 = vsub.f32 %v12420_v54, %v9142_v15 }
 0x5b8   :  { %v3835_v27 = vmul.f32 1.442695, %v3819_v20  ;;  %v1569_v1 = vadd.f32 %v1568_v56, %v1554_v22  ;;  %v3567_v11 = vmul.f32 %v9070_v38, %v8686_v33  ;;  %v3837_v44 = vmul.f32 1.442695, %v3820_v4  ;;  %v12422_v33 = vld [vmem:[#allocation156_spill] sm:$0xff] }
 0x5b9   :  { %v767_v40 = vmax.f32 %v9105_v49, %v766_v61  ;;  %v9184_v14 = vpop.eup %5427  ;;  %v3596_v50 = vadd.f32 %v3595_v16, %v3581_v8  ;;  %v1749_v23 = vrot.slane %v1748_v26, 2  ;;  %v1920_v36 = vsub.f32 %v12421_v12, %v9020_v63  ;;  %v12426_v12 = vld [vmem:[#allocation363_spill] sm:$0xff] }
 0x5ba   :  { %5433 = vpow2.f32 %v3835_v27  ;;  %v3718_v25 = vrot.slane %v3717_v47, 4  ;;  %v1942_v46 = vmul.f32 1.442695, %v1919_v10  ;;  %v1962_v54 = vadd.f32 %v9184_v14, %v1961_v62 }
 0x5bb   :  { %5435 = vpow2.f32 %v3837_v44  ;;  %v3582_v22 = vmul.f32 %v3566_v48, %v12372_v39  ;;  %v3822_v37 = vsub.f32 %v12422_v33, %v9142_v15  ;;  %v3839_v49 = vmul.f32 1.442695, %v3821_v53  ;;  %v12423_v39 = vld [vmem:[#allocation230_spill] sm:$0xff] }
 0x5bc   :  { %5437 = vpow2.f32 %v1940_v41  ;;  %v3284_v20 = vrot.slane %v3283_v28, 1  ;;  %v1570_v56 = vadd.f32 %v1569_v1, %v1555_v32  ;;  %v768_v4 = vrot.slane %v767_v40, 2 }
 0x5bd   :  { %v9194_v61 = vmul.f32 %v12027_v29, %v9068_v45  ;;  %v9196_v16 = vpop.eup %5429  ;;  %v3568_v8 = vmul.f32 %v9070_v38, %v8712_v55  ;;  %v3597_v3 = vadd.f32 %v3596_v50, %v3582_v22  ;;  %v1750_v10 = vadd.f32 %v1749_v23, %v1748_v26  ;;  %v12424_v29 = vld [vmem:[#allocation266_spill] sm:$0xff] }
 0x5be   :  { %v1921_v48 = vsub.f32 %v12423_v39, %v9020_v63  ;;  %v3719_v62 = vadd.f32 %v3718_v25, %v3717_v47  ;;  %5439 = vpow2.f32 %v1942_v46  ;;  %v1944_v53 = vmul.f32 1.442695, %v1920_v36 }
 0x5bf   :  { %v1963_v32 = vadd.f32 %v9196_v16, %v1962_v54  ;;  %v3583_v41 = vmul.f32 %v3567_v11, %v12380_v51  ;;  %v3823_v27 = vsub.f32 %v12424_v29, %v9142_v15  ;;  %5441 = vpow2.f32 %v3839_v49 }
 0x5c0   :  { %v3841_v1 = vmul.f32 1.442695, %v3822_v37  ;;  %v9206_v44 = vadd.f32 %v3284_v20, %v3283_v28  ;;  %v1571_v55 = vadd.f32 %v1570_v56, %v9150_v18  ;;  %v3569_v26 = vmul.f32 %v9070_v38, %v8741_v42  ;;  %v12427_v42 = vld [vmem:[#allocation174_spill] sm:$0xff]  ;;  %v12429_v20 = vld [vmem:[#allocation368_spill] sm:$0xff] }
 0x5c1   :  { %v9213_v47 = vmax.f32 %v9194_v61, %v8733_v13  ;;  %v9215_v50 = vpop.eup %5431  ;;  %v3584_v51 = vmul.f32 %v3568_v8, %v12385_v59  ;;  %v3598_v11 = vadd.f32 %v3597_v3, %v3583_v41  ;;  %v1751_v23 = vrot.slane %v1750_v10, 1 }
 0x5c2   :  { %12425 = vst [vmem:[#allocation225_spill] sm:$0xff] %v9206_v44  ;;  %v1922_v36 = vsub.f32 %v12426_v12, %v9020_v63  ;;  %v3720_v28 = vrot.slane %v3719_v62, 2  ;;  %5443 = vpow2.f32 %v1944_v53  ;;  %v1946_v25 = vmul.f32 1.442695, %v1921_v48  ;;  %v12476_v44 = vld [vmem:[#allocation349_spill] sm:$0xff] }
 0x5c3   :  { %v1964_v18 = vadd.f32 %v9215_v50, %v1963_v32  ;;  %v3824_v13 = vsub.f32 %v12427_v42, %v9142_v15  ;;  %5445 = vpow2.f32 %v3841_v1  ;;  %v3843_v54 = vmul.f32 1.442695, %v3823_v27 }
 0x5c4   :  { %v9221_v46 = vpop.eup %5433  ;;  %v769_v22 = vmax.f32 %v767_v40, %v768_v4  ;;  %v9228_v59 = vadd.f32 %v1571_v55, %v9165_v7  ;;  %v3570_v37 = vmul.f32 %v9070_v38, %v8766_v30  ;;  %v3585_v49 = vmul.f32 %v3569_v26, %v12395_v35  ;;  %v12430_v40 = vld [vmem:[#allocation315_spill] sm:$0xff]  ;;  %v12431_v35 = vld [vmem:[#allocation209_spill] sm:$0xff] }
 0x5c5   :  { %v9225_v33 = vpop.eup %5435  ;;  %v1923_v56 = vsub.f32 %v12429_v20, %v9020_v63  ;;  %v3599_v3 = vadd.f32 %v3598_v11, %v3584_v51  ;;  %v1752_v39 = vadd.f32 %v1751_v23, %v1750_v10  ;;  %v1948_v48 = vmul.f32 1.442695, %v1922_v36  ;;  %v12433_v23 = vld [vmem:[#allocation338_spill] sm:$0xff] }
 0x5c6   :  { %12428 = vst [vmem:[#allocation253_spill] sm:$0xff] %v9228_v59  ;;  %v9235_v8 = vpop.eup %5437  ;;  %v3825_v4 = vsub.f32 %v12430_v40, %v9142_v15  ;;  %v3721_v53 = vadd.f32 %v3720_v28, %v3719_v62  ;;  %5447 = vpow2.f32 %v1946_v25  ;;  %v3867_v30 = vadd.f32 %v9225_v33, %v9221_v46  ;;  %v12432_v62 = vld [vmem:[#allocation291_spill] sm:$0xff]  ;;  %v12436_v20 = vld [vmem:[#allocation210_spill] sm:$0xff]  ;;  %v12470_v59 = vld [vmem:[#allocation73_spill] sm:$0xff] }
 0x5c7   :  { %v1965_v7 = vadd.f32 %v9235_v8, %v1964_v18  ;;  %v3826_v32 = vsub.f32 %v12431_v35, %v9142_v15  ;;  %5449 = vpow2.f32 %v3843_v54  ;;  %v3845_v41 = vmul.f32 1.442695, %v3824_v13  ;;  %v12437_v40 = vld [vmem:[#allocation366_spill] sm:$0xff] }
 0x5c8   :  { %v770_v29 = vrot.slane %v769_v22, 1  ;;  %v9244_v27 = vpop.eup %5439  ;;  %v3571_v10 = vmul.f32 %v9070_v38, %v8781_v0  ;;  %v3586_v1 = vmul.f32 %v3570_v37, %v12400_v21  ;;  %v1924_v55 = vsub.f32 %v12432_v62, %v9020_v63  ;;  %v12434_v21 = vld [vmem:[#allocation231_spill] sm:$0xff]  ;;  %v12438_v35 = vld [vmem:[#allocation370_spill] sm:$0xff] }
 0x5c9   :  { %v1950_v26 = vmul.f32 1.442695, %v1923_v56  ;;  %v9251_v51 = vpop.eup %5441  ;;  %v3600_v11 = vadd.f32 %v3599_v3, %v3585_v49  ;;  %5451 = vrcp.f32 %v1752_v39  ;;  %v3827_v12 = vsub.f32 %v12433_v23, %v9142_v15  ;;  %v12435_v37 = vld [vmem:[#allocation275_spill] sm:$0xff] }
 0x5ca   :  { %v3847_v36 = vmul.f32 1.442695, %v3825_v4  ;;  %v3722_v28 = vrot.slane %v3721_v53, 1  ;;  %5453 = vpow2.f32 %v1948_v48  ;;  %v1966_v25 = vadd.f32 %v9244_v27, %v1965_v7 }
 0x5cb   :  { %v3868_v0 = vadd.f32 %v9251_v51, %v3867_v30  ;;  %v3828_v18 = vsub.f32 %v12434_v21, %v9142_v15  ;;  %5455 = vpow2.f32 %v3845_v41  ;;  %v3849_v42 = vmul.f32 1.442695, %v3826_v32 }
 0x5cc   :  { %v9259_v13 = vmax.f32 %v769_v22, %v770_v29  ;;  %v9261_v54 = vpop.eup %5443  ;;  %v3572_v49 = vmul.f32 %v9070_v38, %v12435_v37  ;;  %v1925_v56 = vsub.f32 %v12436_v20, %v9020_v63  ;;  %5457 = vpow2.f32 %v1950_v26  ;;  %v12443_v20 = vld [vmem:[#allocation157_spill] sm:$0xff] }
 0x5cd   :  { %v1952_v3 = vmul.f32 1.442695, %v1924_v55  ;;  %v9267_v39 = vpop.eup %5445  ;;  %v3601_v48 = vadd.f32 %v3600_v11, %v3586_v1  ;;  %v3829_v4 = vsub.f32 %v12437_v40, %v9142_v15  ;;  %5459 = vpow2.f32 %v3847_v36  ;;  %v12439_v55 = vld [vmem:[#allocation129_spill] sm:$0xff]  ;;  %v12440_v11 = vld [vmem:[#allocation96_spill] sm:$0xff] }
 0x5ce   :  { %v3851_v7 = vmul.f32 1.442695, %v3827_v12  ;;  %v3723_v22 = vadd.f32 %v3722_v28, %v3721_v53  ;;  %v1967_v30 = vadd.f32 %v9261_v54, %v1966_v25  ;;  %v3830_v32 = vsub.f32 %v12438_v35, %v9142_v15  ;;  %v12441_v12 = vld [vmem:[#allocation292_spill] sm:$0xff] }
 0x5cf   :  { %v3869_v41 = vadd.f32 %v9267_v39, %v3868_v0  ;;  %v3587_v29 = vmul.f32 %v3571_v10, %v12406_v5  ;;  %5461 = vpow2.f32 %v3849_v42  ;;  %v3853_v62 = vmul.f32 1.442695, %v3828_v18  ;;  %v12442_v25 = vld [vmem:[#allocation332_spill] sm:$0xff] }
 0x5d0   :  { %v772_v1 = vsub.f32 %v12439_v55, %v9259_v13  ;;  %v9278_v26 = vpop.eup %5447  ;;  %v3573_v23 = vmul.f32 %v9070_v38, %v12440_v11  ;;  %5463 = vpow2.f32 %v1952_v3  ;;  %v1954_v53 = vmul.f32 1.442695, %v1925_v56  ;;  %v12444_v3 = vld [vmem:[#allocation178_spill] sm:$0xff] }
 0x5d1   :  { %v3831_v36 = vsub.f32 %v12441_v12, %v9142_v15  ;;  %v9284_v28 = vpop.eup %5449  ;;  %v3574_v5 = vmul.f32 %v9070_v38, %v12442_v25  ;;  %v3602_v10 = vadd.f32 %v3601_v48, %v3587_v29  ;;  %5465 = vpow2.f32 %v3851_v7 }
 0x5d2   :  { %v3855_v0 = vmul.f32 1.442695, %v3829_v4  ;;  %5467 = vrcp.f32 %v3723_v22  ;;  %v1968_v21 = vadd.f32 %v9278_v26, %v1967_v30  ;;  %v3857_v18 = vmul.f32 1.442695, %v3830_v32  ;;  %v12446_v4 = vld [vmem:[#allocation103_spill] sm:$0xff]  ;;  %v12447_v32 = vld [vmem:[#allocation277_spill] sm:$0xff] }
 0x5d3   :  { %v3870_v42 = vadd.f32 %v9284_v28, %v3869_v41  ;;  %v9290_v37 = vpop.eup %5451  ;;  %5469 = vpow2.f32 %v3853_v62  ;;  %v773_v56 = vsub.f32 %v12443_v20, %v9259_v13  ;;  %v774_v40 = vsub.f32 %v12444_v3, %v9259_v13 }
 0x5d4   :  { %v788_v35 = vmul.f32 1.442695, %v772_v1  ;;  %v9296_v55 = vpop.eup %5453  ;;  %v3588_v48 = vmul.f32 %v3572_v49, %v12410_v58  ;;  %v1926_v7 = vsub.f32 %v12446_v4, %v9020_v63  ;;  %5471 = vpow2.f32 %v1954_v53  ;;  %v12449_v49 = vld [vmem:[#allocation214_spill] sm:$0xff] }
 0x5d5   :  { %12445 = vst [vmem:[#allocation133_spill] sm:$0xff] %v9296_v55  ;;  %v3859_v22 = vmul.f32 1.442695, %v3831_v36  ;;  %v9301_v30 = vpop.eup %5455  ;;  %v3575_v41 = vmul.f32 %v9070_v38, %v12447_v32  ;;  %v3589_v29 = vmul.f32 %v3573_v23, %v12411_v19  ;;  %v3832_v62 = vsub.f32 %v12365_v60, %v9142_v15  ;;  %v12450_v23 = vld [vmem:[#allocation321_spill] sm:$0xff] }
 0x5d6   :  { %5473 = vpow2.f32 %v3855_v0  ;;  %v9308_v1 = vpop.eup %5457  ;;  %v3603_v11 = vadd.f32 %v3602_v10, %v3588_v48  ;;  %v3871_v58 = vadd.f32 %v9301_v30, %v3870_v42  ;;  %v775_v53 = vsub.f32 %v12449_v49, %v9259_v13 }
 0x5d7   :  { %12448 = vst [vmem:[#allocation357_spill] sm:$0xff] %v9308_v1  ;;  %5475 = vpow2.f32 %v3857_v18  ;;  %v9313_v12 = vpop.eup %5459  ;;  %v1969_v36 = vadd.f32 %v9296_v55, %v1968_v21  ;;  %v790_v25 = vmul.f32 1.442695, %v773_v56  ;;  %v792_v19 = vmul.f32 1.442695, %v774_v40  ;;  %v12452_v56 = vld [vmem:[#allocation229_spill] sm:$0xff] }
 0x5d8   :  { %5477 = vpow2.f32 %v788_v35  ;;  %v1927_v60 = vsub.f32 %v12450_v23, %v9020_v63  ;;  %v1956_v0 = vmul.f32 1.442695, %v1926_v7  ;;  %v3872_v10 = vadd.f32 %v9313_v12, %v3871_v58  ;;  %v12453_v35 = vld [vmem:[#allocation247_spill] sm:$0xff] }
 0x5d9   :  { %5479 = vpow2.f32 %v3859_v22  ;;  %v9319_v18 = vpop.eup %5461  ;;  %v3833_v42 = vsub.f32 %v8989_v17, %v9142_v15  ;;  %v3861_v20 = vmul.f32 1.442695, %v3832_v62  ;;  %v2993_v3 = vrot.slane %v9213_v47, 4 }
 0x5da   :  { %5481 = vpow2.f32 %v790_v25  ;;  %v9324_v21 = vpop.eup %5463  ;;  %v3576_v40 = vmul.f32 %v9070_v38, %v12452_v56  ;;  %v3873_v63 = vadd.f32 %v9319_v18, %v3872_v10  ;;  %v776_v48 = vsub.f32 %v12453_v35, %v9259_v13  ;;  %v9339_v25 = vpop.permute.xlu1 %1184 }
 0x5db   :  { %12451 = vst [vmem:[#allocation361_spill] sm:$0xff] %v9324_v21  ;;  %v794_v4 = vmul.f32 1.442695, %v775_v53  ;;  %v9331_v7 = vpop.eup %5465  ;;  %v3590_v22 = vmul.f32 %v3574_v5, %v12412_v43  ;;  %v3604_v17 = vadd.f32 %v3603_v11, %v3589_v29  ;;  %v1970_v32 = vadd.f32 %v9308_v1, %v1969_v36  ;;  %12454 = vst [vmem:[#allocation61_spill] sm:$0xff] %v9339_v25  ;;  %v12455_v53 = vld [vmem:[#allocation322_spill] sm:$0xff] }
 0x5dc   :  { %5483 = vpow2.f32 %v792_v19  ;;  %v9335_v62 = vpop.eup %5467  ;;  %v3591_v58 = vmul.f32 %v3575_v41, %v12414_v9  ;;  %v1958_v38 = vmul.f32 1.442695, %v1927_v60  ;;  %v3874_v49 = vadd.f32 %v9331_v7, %v3873_v63  ;;  %v12457_v9 = vld [vmem:[#allocation272_spill] sm:$0xff]  ;;  %v12472_v1 = vld [vmem:[#allocation158_spill] sm:$0xff] }
 0x5dd   :  { %5485 = vpow2.f32 %v1956_v0  ;;  %v9341_v23 = vpop.eup %5469  ;;  %v3834_v10 = vsub.f32 %v12455_v53, %v9142_v15  ;;  %v3863_v43 = vmul.f32 1.442695, %v3833_v42  ;;  %v2994_v5 = vmax.f32 %v9213_v47, %v2993_v3  ;;  %v12459_v42 = vld [vmem:[#allocation125_spill] sm:$0xff] }
 0x5de   :  { %5487 = vpow2.f32 %v3861_v20  ;;  %v9346_v29 = vpop.eup %5471  ;;  %v3875_v11 = vadd.f32 %v9341_v23, %v3874_v49  ;;  %v777_v41 = vsub.f32 %v12457_v9, %v9259_v13  ;;  %v796_v36 = vmul.f32 1.442695, %v776_v48  ;;  %v12466_v49 = vld [vmem:[#allocation169_spill] sm:$0xff] }
 0x5df   :  { %12456 = vst [vmem:[#allocation326_spill] sm:$0xff] %v9346_v29  ;;  %5489 = vpow2.f32 %v794_v4  ;;  %v9354_v60 = vmul.f32 %v3576_v40, %v12417_v6  ;;  %v3605_v0 = vadd.f32 %v3604_v17, %v3590_v22  ;;  %v1971_v15 = vadd.f32 %v9324_v21, %v1970_v32  ;;  %v12462_v40 = vld [vmem:[#allocation298_spill] sm:$0xff] }
 0x5e0   :  { %v9351_v19 = vpop.eup %5473  ;;  %v9359_v47 = vmul.f32 %v12459_v42, %v9339_v25  ;;  %v3725_v3 = vmul.f32 %v9335_v62, %v8943_v57  ;;  %v3726_v56 = vmul.f32 %v9335_v62, %v8947_v2  ;;  %5491 = vpow2.f32 %v1958_v38  ;;  %v12464_v57 = vld [vmem:[#allocation309_spill] sm:$0xff] }
 0x5e1   :  { %12458 = vst [vmem:[#allocation183_spill] sm:$0xff] %v9351_v19  ;;  %v9361_v20 = vpop.eup %5475  ;;  %v3876_v63 = vadd.f32 %v9351_v19, %v3875_v11  ;;  %v1754_v35 = vmul.f32 %v9290_v37, %v12462_v40  ;;  %5493 = vpow2.f32 %v3863_v43  ;;  %v3865_v48 = vmul.f32 1.442695, %v3834_v10  ;;  %v12467_v11 = vld [vmem:[#allocation335_spill] sm:$0xff]  ;;  %v12468_v43 = vld [vmem:[#allocation112_spill] sm:$0xff] }
 0x5e2   :  { %12460 = vst [vmem:[#allocation66_spill] sm:$0xff] %v9361_v20  ;;  %v9368_v6 = vpop.eup %5477  ;;  %v2995_v4 = vrot.slane %v2994_v5, 2  ;;  %v778_v32 = vsub.f32 %v12464_v57, %v9259_v13  ;;  %5495 = vpow2.f32 %v796_v36  ;;  %v798_v2 = vmul.f32 1.442695, %v777_v41 }
 0x5e3   :  { %12461 = vst [vmem:[#allocation220_spill] sm:$0xff] %v9368_v6  ;;  %v9372_v22 = vpop.eup %5479  ;;  %v3877_v17 = vadd.f32 %v9361_v20, %v3876_v63  ;;  %v1755_v53 = vmul.f32 %v9290_v37, %v12466_v49  ;;  %v1756_v9 = vmul.f32 %v9290_v37, %v12467_v11  ;;  %v9385_v10 = vmul.f32 %v9290_v37, %v12468_v43  ;;  %v12469_v63 = vld [vmem:[#allocation38_spill] sm:$0xff]  ;;  %v12473_v43 = vld [vmem:[#allocation324_spill] sm:$0xff] }
 0x5e4   :  { %12463 = vst [vmem:[#allocation79_spill] sm:$0xff] %v9372_v22  ;;  %v9377_v38 = vpop.eup %5481  ;;  %v1972_v42 = vadd.f32 %v9346_v29, %v1971_v15  ;;  %v3741_v40 = vmul.f32 %v3725_v3, %v12469_v63  ;;  %v3742_v57 = vmul.f32 %v3726_v56, %v12470_v59  ;;  %v3606_v49 = vadd.f32 %v3605_v0, %v3591_v58 }
 0x5e5   :  { %12465 = vst [vmem:[#allocation278_spill] sm:$0xff] %v9377_v38  ;;  %v3878_v41 = vadd.f32 %v9372_v22, %v3877_v17  ;;  %v820_v36 = vadd.f32 %v9377_v38, %v9368_v6  ;;  %v3727_v11 = vmul.f32 %v9335_v62, %v12472_v1  ;;  %5497 = vpow2.f32 %v3865_v48  ;;  %v12486_v38 = vld [vmem:[#allocation259_spill] sm:$0xff]  ;;  %v12487_v6 = vld [vmem:[#allocation294_spill] sm:$0xff]  ;;  %v12489_v22 = vld [vmem:[#allocation149_spill] sm:$0xff] }
 0x5e6   :  { %v9393_v21 = vpop.eup %5483  ;;  %v779_v55 = vsub.f32 %v12473_v43, %v9259_v13  ;;  %5499 = vpow2.f32 %v798_v2  ;;  %v800_v3 = vmul.f32 1.442695, %v778_v32  ;;  %v2996_v17 = vmax.f32 %v2994_v5, %v2995_v4  ;;  %v12478_v43 = vld [vmem:[#allocation163_spill] sm:$0xff]  ;;  %v12479_v32 = vld [vmem:[#allocation252_spill] sm:$0xff] }
 0x5e7   :  { %12471 = vst [vmem:[#allocation146_spill] sm:$0xff] %v9393_v21  ;;  %v9399_v15 = vpop.eup %5485  ;;  %v821_v56 = vadd.f32 %v9393_v21, %v820_v36  ;;  %v1758_v45 = vmul.f32 %v9290_v37, %v12476_v44  ;;  %v1770_v58 = vmul.f32 %v1754_v35, %v12469_v63  ;;  %v1771_v1 = vmul.f32 %v1755_v53, %v12470_v59  ;;  %v12480_v21 = vld [vmem:[#allocation257_spill] sm:$0xff]  ;;  %v12481_v35 = vld [vmem:[#allocation352_spill] sm:$0xff]  ;;  %v12482_v53 = vld [vmem:[#allocation203_spill] sm:$0xff] }
 0x5e8   :  { %12474 = vst [vmem:[#allocation193_spill] sm:$0xff] %v9399_v15  ;;  %v9402_v29 = vpop.eup %5487  ;;  %v1973_v0 = vadd.f32 %v9399_v15, %v1972_v42  ;;  %v1759_v2 = vmul.f32 %v9290_v37, %v12478_v43  ;;  %v9415_v36 = vmul.f32 %v9290_v37, %v12479_v32  ;;  %v3757_v5 = vadd.f32 %v3742_v57, %v3741_v40  ;;  %v12484_v15 = vld [vmem:[#allocation49_spill] sm:$0xff] }
 0x5e9   :  { %12475 = vst [vmem:[#allocation87_spill] sm:$0xff] %v9402_v29  ;;  %v9409_v48 = vpop.eup %5489  ;;  %v3879_v4 = vadd.f32 %v9402_v29, %v3878_v41  ;;  %v9420_v44 = vmul.f32 %v9290_v37, %v12480_v21  ;;  %v3728_v59 = vmul.f32 %v9335_v62, %v12481_v35  ;;  %v780_v42 = vsub.f32 %v12482_v53, %v9259_v13 }
 0x5ea   :  { %12477 = vst [vmem:[#allocation150_spill] sm:$0xff] %v9409_v48  ;;  %v822_v63 = vadd.f32 %v9409_v48, %v821_v56  ;;  %v9427_v43 = vpop.eup %5491  ;;  %v3743_v32 = vmul.f32 %v3727_v11, %v12484_v15  ;;  %5501 = vpow2.f32 %v800_v3  ;;  %v802_v40 = vmul.f32 1.442695, %v779_v55 }
 0x5eb   :  { %12483 = vst [vmem:[#allocation281_spill] sm:$0xff] %v9427_v43  ;;  %v2997_v57 = vrot.slane %v2996_v17, 1  ;;  %v9430_v41 = vpop.eup %5493  ;;  %v1762_v21 = vmul.f32 %v9290_v37, %v12486_v38  ;;  %v9436_v35 = vmul.f32 %v9290_v37, %v12487_v6  ;;  %v1786_v29 = vadd.f32 %v1771_v1, %v1770_v58  ;;  %v12490_v58 = vld [vmem:[#allocation351_spill] sm:$0xff] }
 0x5ec   :  { %12485 = vst [vmem:[#allocation267_spill] sm:$0xff] %v9430_v41  ;;  %v1974_v53 = vadd.f32 %v9427_v43, %v1973_v0  ;;  %v9439_v56 = vpop.eup %5495  ;;  %v9442_v48 = vadd.f32 %v3606_v49, %v9354_v60  ;;  %v9446_v55 = vmul.f32 %v9290_v37, %v9012_v34  ;;  %v3758_v11 = vadd.f32 %v3757_v5, %v3743_v32  ;;  %v12491_v43 = vld [vmem:[#allocation57_spill] sm:$0xff] }
 0x5ed   :  { %12488 = vst [vmem:[#allocation260_spill] sm:$0xff] %v9439_v56  ;;  %v3880_v3 = vadd.f32 %v9430_v41, %v3879_v4  ;;  %v1772_v38 = vmul.f32 %v1756_v9, %v12484_v15  ;;  %v3729_v6 = vmul.f32 %v9335_v62, %v12489_v22  ;;  %v781_v1 = vsub.f32 %v12490_v58, %v9259_v13  ;;  %v12493_v9 = vld [vmem:[#allocation42_spill] sm:$0xff]  ;;  %v12499_v58 = vld [vmem:[#allocation337_spill] sm:$0xff] }
 0x5ee   :  { %v823_v0 = vadd.f32 %v9439_v56, %v822_v63  ;;  %v3744_v60 = vmul.f32 %v3728_v59, %v12491_v43  ;;  %5503 = vpow2.f32 %v802_v40  ;;  %v804_v49 = vmul.f32 1.442695, %v780_v42  ;;  %v12495_v63 = vld [vmem:[#allocation342_spill] sm:$0xff] }
 0x5ef   :  { %v9456_v20 = vmax.f32 %v2996_v17, %v2997_v57  ;;  %v9458_v34 = vpop.eup %5497  ;;  %v9462_v5 = vmul.f32 %v9290_v37, %v9031_v24  ;;  %v9466_v22 = vmul.f32 %v9290_v37, %v12493_v9  ;;  %v1787_v15 = vadd.f32 %v1786_v29, %v1772_v38  ;;  %v12497_v17 = vld [vmem:[#allocation350_spill] sm:$0xff] }
 0x5f0   :  { %12492 = vst [vmem:[#allocation313_spill] sm:$0xff] %v9458_v34  ;;  %v1975_v4 = vrot.slane %v1974_v53, 4  ;;  %v9468_v32 = vpop.eup %5499  ;;  %v9472_v59 = vmul.f32 %v9290_v37, %v12495_v63  ;;  %v9476_v42 = vmul.f32 %v9290_v37, %v12497_v17  ;;  %v3759_v40 = vadd.f32 %v3758_v11, %v3744_v60  ;;  %v12500_v38 = vld [vmem:[#allocation358_spill] sm:$0xff]  ;;  %v12501_v63 = vld [vmem:[#allocation84_spill] sm:$0xff] }
 0x5f1   :  { %12494 = vst [vmem:[#allocation104_spill] sm:$0xff] %v9468_v32  ;;  %v3881_v24 = vadd.f32 %v9458_v34, %v3880_v3  ;;  %v1773_v57 = vmul.f32 %v9385_v10, %v12491_v43  ;;  %v3730_v29 = vmul.f32 %v9335_v62, %v12499_v58  ;;  %v782_v9 = vsub.f32 %v12500_v38, %v9259_v13  ;;  %v12502_v17 = vld [vmem:[#allocation130_spill] sm:$0xff]  ;;  %v12505_v58 = vld [vmem:[#allocation161_spill] sm:$0xff]  ;;  %v12507_v38 = vld [vmem:[#allocation72_spill] sm:$0xff] }
 0x5f2   :  { %12496 = vst [vmem:[#allocation307_spill] sm:$0xff] %v9472_v59  ;;  %12498 = vst [vmem:[#allocation107_spill] sm:$0xff] %v9476_v42  ;;  %v824_v56 = vadd.f32 %v9468_v32, %v823_v0  ;;  %v3745_v59 = vmul.f32 %v3729_v6, %v12501_v63  ;;  %5505 = vpow2.f32 %v804_v49  ;;  %v806_v41 = vmul.f32 1.442695, %v781_v1  ;;  %v12503_v60 = vld [vmem:[#allocation46_spill] sm:$0xff] }
 0x5f3   :  { %v2999_v11 = vsub.f32 %v12502_v17, %v9456_v20  ;;  %v9491_v3 = vmul.f32 %v9290_v37, %v12503_v60  ;;  %v1788_v10 = vadd.f32 %v1787_v15, %v1773_v57  ;;  %v1976_v43 = vadd.f32 %v1975_v4, %v1974_v53  ;;  %v12508_v17 = vld [vmem:[#allocation240_spill] sm:$0xff]  ;;  %v12509_v53 = vld [vmem:[#allocation339_spill] sm:$0xff] }
 0x5f4   :  { %v3000_v42 = vsub.f32 %v12505_v58, %v9456_v20  ;;  %v9495_v34 = vpop.eup %5501  ;;  %v3608_v0 = vrot.slane %v9442_v48, 4  ;;  %v1774_v6 = vmul.f32 %v1758_v45, %v12501_v63  ;;  %v3760_v49 = vadd.f32 %v3759_v40, %v3745_v59  ;;  %v12510_v58 = vld [vmem:[#allocation95_spill] sm:$0xff] }
 0x5f5   :  { %12504 = vst [vmem:[#allocation196_spill] sm:$0xff] %v9491_v3  ;;  %12506 = vst [vmem:[#allocation312_spill] sm:$0xff] %v9495_v34  ;;  %v3882_v1 = vrot.slane %v3881_v24, 4  ;;  %v1775_v32 = vmul.f32 %v1759_v2, %v12507_v38  ;;  %v783_v19 = vsub.f32 %v12508_v17, %v9259_v13  ;;  %v808_v37 = vmul.f32 1.442695, %v782_v9  ;;  %v12512_v3 = vld [vmem:[#allocation92_spill] sm:$0xff] }
 0x5f6   :  { %v825_v15 = vadd.f32 %v9495_v34, %v824_v56  ;;  %v3731_v4 = vmul.f32 %v9335_v62, %v12509_v53  ;;  %v3746_v57 = vmul.f32 %v3730_v29, %v12507_v38  ;;  %5507 = vpow2.f32 %v806_v41  ;;  %v12513_v17 = vld [vmem:[#allocation108_spill] sm:$0xff]  ;;  %v12514_v29 = vld [vmem:[#allocation373_spill] sm:$0xff] }
 0x5f7   :  { %v3015_v60 = vmul.f32 1.442695, %v2999_v11  ;;  %v1776_v45 = vmul.f32 %v9415_v36, %v12510_v58  ;;  %v1789_v59 = vadd.f32 %v1788_v10, %v1774_v6  ;;  %v1977_v40 = vrot.slane %v1976_v43, 2  ;;  %v12515_v36 = vld [vmem:[#allocation179_spill] sm:$0xff] }
 0x5f8   :  { %v3017_v63 = vmul.f32 1.442695, %v3000_v42  ;;  %v9508_v2 = vpop.eup %5503  ;;  %v1777_v9 = vmul.f32 %v9420_v44, %v12512_v3  ;;  %v9513_v56 = vmul.f32 %v1762_v21, %v12513_v17  ;;  %v3761_v34 = vadd.f32 %v3760_v49, %v3746_v57  ;;  %v12516_v42 = vld [vmem:[#allocation311_spill] sm:$0xff] }
 0x5f9   :  { %12511 = vst [vmem:[#allocation367_spill] sm:$0xff] %v9508_v2  ;;  %v3883_v53 = vadd.f32 %v3882_v1, %v3881_v24  ;;  %v784_v41 = vsub.f32 %v12514_v29, %v9259_v13  ;;  %5509 = vpow2.f32 %v808_v37  ;;  %v826_v11 = vadd.f32 %v9508_v2, %v825_v15  ;;  %v12518_v37 = vld [vmem:[#allocation110_spill] sm:$0xff]  ;;  %v12529_v2 = vld [vmem:[#allocation35_spill] sm:$0xff] }
 0x5fa   :  { %v3001_v10 = vsub.f32 %v12515_v36, %v9456_v20  ;;  %v3732_v6 = vmul.f32 %v9335_v62, %v12516_v42  ;;  %v3747_v38 = vmul.f32 %v3731_v4, %v12510_v58  ;;  %v810_v44 = vmul.f32 1.442695, %v783_v19  ;;  %v12519_v36 = vld [vmem:[#allocation142_spill] sm:$0xff]  ;;  %v12520_v19 = vld [vmem:[#allocation295_spill] sm:$0xff] }
 0x5fb   :  { %5511 = vpow2.f32 %v3015_v60  ;;  %v9524_v21 = vadd.f32 %v3608_v0, %v9442_v48  ;;  %v1790_v24 = vadd.f32 %v1789_v59, %v1775_v32  ;;  %v1978_v49 = vadd.f32 %v1977_v40, %v1976_v43  ;;  %v12521_v32 = vld [vmem:[#allocation215_spill] sm:$0xff]  ;;  %v12522_v60 = vld [vmem:[#allocation341_spill] sm:$0xff] }
 0x5fc   :  { %5513 = vpow2.f32 %v3017_v63  ;;  %v9526_v1 = vpop.eup %5505  ;;  %v9530_v15 = vmul.f32 %v9436_v35, %v12518_v37  ;;  %v3762_v57 = vadd.f32 %v3761_v34, %v3747_v38  ;;  %v3884_v29 = vrot.slane %v3883_v53, 2  ;;  %v12523_v59 = vld [vmem:[#allocation121_spill] sm:$0xff]  ;;  %v12524_v63 = vld [vmem:[#allocation126_spill] sm:$0xff] }
 0x5fd   :  { %12517 = vst [vmem:[#allocation141_spill] sm:$0xff] %v9526_v1  ;;  %v1221_v42 = vmax.f32 %v9359_v47, %v12519_v36  ;;  %v785_v4 = vsub.f32 %v12520_v19, %v9259_v13  ;;  %v827_v48 = vadd.f32 %v9526_v1, %v826_v11  ;;  %v3002_v43 = vsub.f32 %v12521_v32, %v9456_v20 }
 0x5fe   :  { %v3019_v0 = vmul.f32 1.442695, %v3001_v10  ;;  %v3733_v58 = vmul.f32 %v9335_v62, %v12522_v60  ;;  %v3748_v35 = vmul.f32 %v3732_v6, %v12512_v3  ;;  %5515 = vpow2.f32 %v810_v44  ;;  %v12527_v60 = vld [vmem:[#allocation287_spill] sm:$0xff]  ;;  %v12528_v6 = vld [vmem:[#allocation248_spill] sm:$0xff] }
 0x5ff   :  { %v812_v34 = vmul.f32 1.442695, %v784_v41  ;;  %v9544_v40 = vmul.f32 %v9446_v55, %v12523_v59  ;;  %v9548_v38 = vmul.f32 %v9462_v5, %v12524_v63  ;;  %v1791_v11 = vadd.f32 %v1790_v24, %v1776_v45 }
 0x600   :  { %v1979_v36 = vrot.slane %v1978_v49, 1  ;;  %v9550_v19 = vpop.eup %5507  ;;  %v3763_v10 = vadd.f32 %v3762_v57, %v3748_v35  ;;  %v3885_v32 = vadd.f32 %v3884_v29, %v3883_v53  ;;  %v786_v1 = vsub.f32 %v12527_v60, %v9259_v13 }
 0x601   :  { %12525 = vst [vmem:[#allocation233_spill] sm:$0xff] %v9548_v38  ;;  %12526 = vst [vmem:[#allocation376_spill] sm:$0xff] %v9550_v19  ;;  %v1222_v3 = vrot.slane %v1221_v42, 4  ;;  %v828_v41 = vadd.f32 %v9550_v19, %v827_v48  ;;  %v3003_v55 = vsub.f32 %v12528_v6, %v9456_v20  ;;  %5517 = vpow2.f32 %v3019_v0  ;;  %v12530_v48 = vld [vmem:[#allocation276_spill] sm:$0xff] }
 0x602   :  { %v3021_v44 = vmul.f32 1.442695, %v3002_v43  ;;  %v3734_v5 = vmul.f32 %v9335_v62, %v12529_v2  ;;  %v3749_v45 = vmul.f32 %v3733_v58, %v12513_v17  ;;  %5519 = vpow2.f32 %v812_v34  ;;  %v12531_v6 = vld [vmem:[#allocation348_spill] sm:$0xff]  ;;  %v12532_v58 = vld [vmem:[#allocation310_spill] sm:$0xff] }
 0x603   :  { %v814_v24 = vmul.f32 1.442695, %v785_v4  ;;  %v9560_v57 = vpop.eup %5509  ;;  %v3610_v53 = vrot.slane %v9524_v21, 2  ;;  %v1792_v29 = vadd.f32 %v1791_v11, %v1777_v9  ;;  %v1980_v35 = vadd.f32 %v1979_v36, %v1978_v49  ;;  %v12533_v49 = vld [vmem:[#allocation343_spill] sm:$0xff] }
 0x604   :  { %v3004_v60 = vsub.f32 %v12530_v48, %v9456_v20  ;;  %v3764_v0 = vadd.f32 %v3763_v10, %v3749_v45  ;;  %v3886_v43 = vrot.slane %v3885_v32, 1  ;;  %v787_v2 = vsub.f32 %v12531_v6, %v9259_v13  ;;  %v12534_v13 = vld [vmem:[#allocation173_spill] sm:$0xff] }
 0x605   :  { %v9565_v38 = vpop.eup %5511  ;;  %v1223_v19 = vmax.f32 %v1221_v42, %v1222_v3  ;;  %v829_v4 = vadd.f32 %v9560_v57, %v828_v41  ;;  %v3005_v34 = vsub.f32 %v12532_v58, %v9456_v20  ;;  %5521 = vpow2.f32 %v3021_v44 }
 0x606   :  { %v9569_v17 = vpop.eup %5513  ;;  %v3023_v9 = vmul.f32 1.442695, %v3003_v55  ;;  %v3735_v11 = vmul.f32 %v9335_v62, %v12533_v49  ;;  %v3750_v36 = vmul.f32 %v3734_v5, %v12518_v37  ;;  %5523 = vpow2.f32 %v814_v24  ;;  %v12535_v37 = vld [vmem:[#allocation204_spill] sm:$0xff]  ;;  %v12536_v5 = vld [vmem:[#allocation241_spill] sm:$0xff] }
 0x607   :  { %v816_v10 = vmul.f32 1.442695, %v786_v1  ;;  %v1793_v45 = vadd.f32 %v1792_v29, %v9513_v56  ;;  %5525 = vrcp.f32 %v1980_v35  ;;  %v3006_v42 = vsub.f32 %v12534_v13, %v9456_v20 }
 0x608   :  { %v3025_v3 = vmul.f32 1.442695, %v3004_v60  ;;  %v9580_v41 = vpop.eup %5515  ;;  %v3765_v48 = vadd.f32 %v3764_v0, %v3750_v36  ;;  %v3887_v6 = vadd.f32 %v3886_v43, %v3885_v32  ;;  %v3047_v55 = vadd.f32 %v9569_v17, %v9565_v38  ;;  %v12537_v32 = vld [vmem:[#allocation30_spill] sm:$0xff]  ;;  %v12539_v36 = vld [vmem:[#allocation245_spill] sm:$0xff] }
 0x609   :  { %v1224_v44 = vrot.slane %v1223_v19, 2  ;;  %v830_v58 = vadd.f32 %v9580_v41, %v829_v4  ;;  %v3007_v1 = vsub.f32 %v12535_v37, %v9456_v20  ;;  %5527 = vpow2.f32 %v3023_v9  ;;  %v12538_v4 = vld [vmem:[#allocation31_spill] sm:$0xff]  ;;  %v12542_v37 = vld [vmem:[#allocation345_spill] sm:$0xff] }
 0x60a   :  { %v3027_v56 = vmul.f32 1.442695, %v3005_v34  ;;  %v3736_v24 = vmul.f32 %v9335_v62, %v12536_v5  ;;  %v3751_v29 = vmul.f32 %v3735_v11, %v12523_v59  ;;  %5529 = vpow2.f32 %v816_v10 }
 0x60b   :  { %v818_v35 = vmul.f32 1.442695, %v787_v2  ;;  %v9590_v60 = vpop.eup %5517  ;;  %v3008_v0 = vsub.f32 %v12537_v32, %v9456_v20  ;;  %5531 = vpow2.f32 %v3025_v3  ;;  %v3029_v43 = vmul.f32 1.442695, %v3006_v42  ;;  %v12540_v3 = vld [vmem:[#allocation195_spill] sm:$0xff] }
 0x60c   :  { %v9596_v49 = vmul.f32 %v12538_v4, %v9339_v25  ;;  %v9598_v9 = vpop.eup %5519  ;;  %v3766_v34 = vadd.f32 %v3765_v48, %v3751_v29  ;;  %5533 = vrcp.f32 %v3887_v6  ;;  %v3009_v59 = vsub.f32 %v12539_v36, %v9456_v20  ;;  %v12543_v29 = vld [vmem:[#allocation242_spill] sm:$0xff]  ;;  %v12547_v4 = vld [vmem:[#allocation297_spill] sm:$0xff] }
 0x60d   :  { %v3048_v2 = vadd.f32 %v9590_v60, %v3047_v55  ;;  %v831_v11 = vadd.f32 %v9598_v9, %v830_v58  ;;  %5535 = vpow2.f32 %v3027_v56  ;;  %v3031_v10 = vmul.f32 1.442695, %v3007_v1  ;;  %v12544_v56 = vld [vmem:[#allocation144_spill] sm:$0xff] }
 0x60e   :  { %v1225_v13 = vmax.f32 %v1223_v19, %v1224_v44  ;;  %v9606_v42 = vmul.f32 %v9466_v22, %v12540_v3  ;;  %v3737_v5 = vmul.f32 %v9335_v62, %v12542_v37  ;;  %v3752_v48 = vmul.f32 %v3736_v24, %v12524_v63  ;;  %v12548_v37 = vld [vmem:[#allocation54_spill] sm:$0xff] }
 0x60f   :  { %5537 = vpow2.f32 %v818_v35  ;;  %v9611_v6 = vpop.eup %5521  ;;  %v3010_v55 = vsub.f32 %v12543_v29, %v9456_v20  ;;  %v3033_v58 = vmul.f32 1.442695, %v3008_v0  ;;  %v3320_v19 = vmax.f32 %v9596_v49, %v12544_v56  ;;  %v12552_v56 = vld [vmem:[#allocation211_spill] sm:$0xff] }
 0x610   :  { %12541 = vst [vmem:[#allocation186_spill] sm:$0xff] %v9606_v42  ;;  %5539 = vpow2.f32 %v3029_v43  ;;  %v9617_v44 = vpop.eup %5523  ;;  %v9620_v22 = vadd.f32 %v3610_v53, %v9524_v21  ;;  %v1794_v1 = vadd.f32 %v1793_v45, %v9530_v15  ;;  %v3767_v32 = vadd.f32 %v3766_v34, %v3752_v48  ;;  %v12549_v45 = vld [vmem:[#allocation378_spill] sm:$0xff] }
 0x611   :  { %v3049_v63 = vadd.f32 %v9611_v6, %v3048_v2  ;;  %v9624_v24 = vpop.eup %5525  ;;  %v832_v35 = vadd.f32 %v9617_v44, %v831_v11  ;;  %5541 = vpow2.f32 %v3031_v10  ;;  %v3035_v43 = vmul.f32 1.442695, %v3009_v59 }
 0x612   :  { %12545 = vst [vmem:[#allocation116_spill] sm:$0xff] %v9620_v22  ;;  %12546 = vst [vmem:[#allocation369_spill] sm:$0xff] %v9624_v24  ;;  %v1226_v0 = vrot.slane %v1225_v13, 1  ;;  %v3738_v36 = vmul.f32 %v9335_v62, %v12547_v4  ;;  %v3739_v29 = vmul.f32 %v9335_v62, %v12548_v37  ;;  %v3740_v21 = vmul.f32 %v9335_v62, %v9162_v31 }
 0x613   :  { %v3753_v15 = vmul.f32 %v3737_v5, %v12540_v3  ;;  %v9634_v53 = vpop.eup %5527  ;;  %v3011_v34 = vsub.f32 %v12549_v45, %v9456_v20  ;;  %5543 = vpow2.f32 %v3033_v58  ;;  %v3037_v2 = vmul.f32 1.442695, %v3010_v55  ;;  %v12553_v3 = vld [vmem:[#allocation353_spill] sm:$0xff]  ;;  %v12556_v45 = vld [vmem:[#allocation296_spill] sm:$0xff] }
 0x614   :  { %v3321_v59 = vrot.slane %v3320_v19, 4  ;;  %v9638_v11 = vpop.eup %5529  ;;  %v9641_v10 = vadd.f32 %v1794_v1, %v9544_v40  ;;  %v1982_v4 = vmul.f32 %v9624_v24, %v12552_v56  ;;  %v3050_v31 = vadd.f32 %v9634_v53, %v3049_v63  ;;  %v12554_v40 = vld [vmem:[#allocation273_spill] sm:$0xff] }
 0x615   :  { %12550 = vst [vmem:[#allocation164_spill] sm:$0xff] %v9638_v11  ;;  %v3768_v48 = vadd.f32 %v3767_v32, %v3753_v15  ;;  %v9646_v62 = vpop.eup %5531  ;;  %v1983_v5 = vmul.f32 %v9624_v24, %v12553_v3  ;;  %v833_v58 = vadd.f32 %v9638_v11, %v832_v35  ;;  %5545 = vpow2.f32 %v3035_v43  ;;  %v12555_v32 = vld [vmem:[#allocation274_spill] sm:$0xff] }
 0x616   :  { %12551 = vst [vmem:[#allocation246_spill] sm:$0xff] %v9641_v10  ;;  %v9651_v55 = vmax.f32 %v1225_v13, %v1226_v0  ;;  %v9653_v37 = vpop.eup %5533  ;;  %v3754_v1 = vmul.f32 %v3738_v36, %v12554_v40  ;;  %v3755_v15 = vmul.f32 %v3739_v29, %v12555_v32  ;;  %v3756_v56 = vmul.f32 %v3740_v21, %v12556_v45  ;;  %v12557_v10 = vld [vmem:[#allocation299_spill] sm:$0xff] }
 0x617   :  { %v3051_v63 = vadd.f32 %v9646_v62, %v3050_v31  ;;  %v9659_v42 = vpop.eup %5535  ;;  %v3012_v3 = vsub.f32 %v12557_v10, %v9456_v20  ;;  %5547 = vpow2.f32 %v3037_v2  ;;  %v3039_v35 = vmul.f32 1.442695, %v3011_v34  ;;  %v12559_v36 = vld [vmem:[#allocation271_spill] sm:$0xff]  ;;  %v12562_v34 = vld [vmem:[#allocation136_spill] sm:$0xff] }
 0x618   :  { %v9663_v43 = vmax.f32 %v3320_v19, %v3321_v59  ;;  %v3769_v0 = vadd.f32 %v3768_v48, %v3754_v1  ;;  %v3013_v22 = vsub.f32 %v12559_v36, %v9456_v20  ;;  %v3014_v29 = vsub.f32 %v9194_v61, %v9456_v20  ;;  %v12560_v45 = vld [vmem:[#allocation67_spill] sm:$0xff] }
 0x619   :  { %v9665_v13 = vpop.eup %5537  ;;  %v3052_v21 = vadd.f32 %v9659_v42, %v3051_v63  ;;  %v1998_v32 = vmul.f32 %v1982_v4, %v12560_v45  ;;  %v12561_v10 = vld [vmem:[#allocation43_spill] sm:$0xff]  ;;  %v1228_v59 = vsub.f32 %v12562_v34, %v9651_v55  ;;  %v3889_v48 = vmul.f32 %v9653_v37, %v9221_v46 }
 0x61a   :  { %12558 = vst [vmem:[#allocation119_spill] sm:$0xff] %v9665_v13  ;;  %v9672_v31 = vpop.eup %5539  ;;  %v1999_v2 = vmul.f32 %v1983_v5, %v12561_v10  ;;  %v834_v19 = vadd.f32 %v9665_v13, %v833_v58  ;;  %v3890_v1 = vmul.f32 %v9653_v37, %v9225_v33  ;;  %v12563_v20 = vld [vmem:[#allocation139_spill] sm:$0xff]  ;;  %v1984_v4 = vmul.f32 %v9624_v24, %v9170_v52 }
 0x61b   :  { %v3053_v61 = vadd.f32 %v9672_v31, %v3052_v21  ;;  %v1229_v63 = vsub.f32 %v12563_v20, %v9651_v55  ;;  %v9686_v36 = vpop.eup %5541  ;;  %v1985_v5 = vmul.f32 %v9624_v24, %v9184_v14  ;;  %5549 = vpow2.f32 %v3039_v35 }
 0x61c   :  { %v3041_v58 = vmul.f32 1.442695, %v3012_v3  ;;  %v3770_v34 = vadd.f32 %v3769_v0, %v3755_v15  ;;  %v1986_v46 = vmul.f32 %v9624_v24, %v9196_v16  ;;  %v1987_v33 = vmul.f32 %v9624_v24, %v9215_v50  ;;  %v12564_v0 = vld [vmem:[#allocation50_spill] sm:$0xff] }
 0x61d   :  { %v3054_v21 = vadd.f32 %v9686_v36, %v3053_v61  ;;  %v9697_v20 = vpop.eup %5543  ;;  %v1988_v40 = vmul.f32 %v9624_v24, %v9235_v8  ;;  %v2014_v52 = vadd.f32 %v1999_v2, %v1998_v32  ;;  %v835_v13 = vrot.slane %v834_v19, 4 }
 0x61e   :  { %v1244_v25 = vmul.f32 1.442695, %v1228_v59  ;;  %v3905_v14 = vmul.f32 %v3889_v48, %v12560_v45  ;;  %v3906_v15 = vmul.f32 %v3890_v1, %v12561_v10  ;;  %v1246_v16 = vmul.f32 1.442695, %v1229_v63  ;;  %v12565_v10 = vld [vmem:[#allocation184_spill] sm:$0xff] }
 0x61f   :  { %v3055_v3 = vadd.f32 %v9697_v20, %v3054_v21  ;;  %v9704_v35 = vpop.eup %5545  ;;  %v1989_v50 = vmul.f32 %v9624_v24, %v9244_v27  ;;  %v2000_v61 = vmul.f32 %v1984_v4, %v12564_v0  ;;  %5551 = vpow2.f32 %v3041_v58  ;;  %v12566_v4 = vld [vmem:[#allocation224_spill] sm:$0xff]  ;;  %v12567_v58 = vld [vmem:[#allocation78_spill] sm:$0xff] }
 0x620   :  { %v3043_v11 = vmul.f32 1.442695, %v3013_v22  ;;  %v1990_v8 = vmul.f32 %v9624_v24, %v9261_v54  ;;  %v3891_v32 = vmul.f32 %v9653_v37, %v9251_v51  ;;  %v1230_v2 = vsub.f32 %v12565_v10, %v9651_v55 }
 0x621   :  { %v3056_v45 = vadd.f32 %v9704_v35, %v3055_v3  ;;  %v9716_v59 = vpop.eup %5547  ;;  %v3771_v48 = vadd.f32 %v3770_v34, %v3756_v56  ;;  %v2015_v1 = vadd.f32 %v2014_v52, %v2000_v61  ;;  %v836_v27 = vadd.f32 %v835_v13, %v834_v19  ;;  %v12571_v61 = vld [vmem:[#allocation62_spill] sm:$0xff] }
 0x622   :  { %5553 = vpow2.f32 %v1244_v25  ;;  %v3921_v63 = vadd.f32 %v3906_v15, %v3905_v14  ;;  %v1231_v54 = vsub.f32 %v12566_v4, %v9651_v55  ;;  %v2001_v51 = vmul.f32 %v1985_v5, %v12567_v58  ;;  %v12568_v25 = vld [vmem:[#allocation145_spill] sm:$0xff] }
 0x623   :  { %v3057_v22 = vadd.f32 %v9716_v59, %v3056_v45  ;;  %5555 = vpow2.f32 %v1246_v16  ;;  %v3045_v21 = vmul.f32 1.442695, %v3014_v29  ;;  %v3323_v3 = vrot.slane %v9663_v43, 2 }
 0x624   :  { %5557 = vpow2.f32 %v3043_v11  ;;  %v3892_v10 = vmul.f32 %v9653_v37, %v9267_v39  ;;  %v3907_v56 = vmul.f32 %v3891_v32, %v12564_v0  ;;  %v1232_v13 = vsub.f32 %v12568_v25, %v9651_v55  ;;  %v12570_v39 = vld [vmem:[#allocation289_spill] sm:$0xff] }
 0x625   :  { %v1248_v19 = vmul.f32 1.442695, %v1230_v2  ;;  %v9728_v34 = vpop.eup %5549  ;;  %v3772_v52 = vrot.slane %v3771_v48, 4  ;;  %v9732_v14 = vmul.f32 %v9624_v24, %v9278_v26  ;;  %v2016_v11 = vadd.f32 %v2015_v1, %v2001_v51  ;;  %v12572_v1 = vld [vmem:[#allocation188_spill] sm:$0xff]  ;;  %v12573_v51 = vld [vmem:[#allocation89_spill] sm:$0xff] }
 0x626   :  { %v837_v29 = vrot.slane %v836_v27, 2  ;;  %v3922_v5 = vadd.f32 %v3921_v63, %v3907_v56  ;;  %v3058_v15 = vadd.f32 %v9728_v34, %v3057_v22  ;;  %v1233_v16 = vsub.f32 %v12570_v39, %v9651_v55 }
 0x627   :  { %12569 = vst [vmem:[#allocation168_spill] sm:$0xff] %v9732_v14  ;;  %v1250_v0 = vmul.f32 1.442695, %v1231_v54  ;;  %v2002_v32 = vmul.f32 %v1986_v46, %v12571_v61  ;;  %v3893_v45 = vmul.f32 %v9653_v37, %v9284_v28  ;;  %5559 = vpow2.f32 %v3045_v21  ;;  %v12574_v46 = vld [vmem:[#allocation208_spill] sm:$0xff] }
 0x628   :  { %v3324_v2 = vmax.f32 %v9663_v43, %v3323_v3  ;;  %v3908_v26 = vmul.f32 %v3892_v10, %v12567_v58  ;;  %v1234_v4 = vsub.f32 %v12572_v1, %v9651_v55  ;;  %5561 = vpow2.f32 %v1248_v19  ;;  %v12576_v3 = vld [vmem:[#allocation81_spill] sm:$0xff]  ;;  %v12577_v19 = vld [vmem:[#allocation100_spill] sm:$0xff] }
 0x629   :  { %v1252_v63 = vmul.f32 1.442695, %v1232_v13  ;;  %v9744_v22 = vpop.eup %5551  ;;  %v2003_v56 = vmul.f32 %v1987_v33, %v12573_v51  ;;  %v2017_v54 = vadd.f32 %v2016_v11, %v2002_v32  ;;  %v838_v25 = vadd.f32 %v837_v29, %v836_v27  ;;  %v12579_v29 = vld [vmem:[#allocation216_spill] sm:$0xff] }
 0x62a   :  { %v1235_v39 = vsub.f32 %v12574_v46, %v9651_v55  ;;  %v3923_v28 = vadd.f32 %v3922_v5, %v3908_v26  ;;  %v3059_v21 = vadd.f32 %v9744_v22, %v3058_v15  ;;  %5563 = vpow2.f32 %v1250_v0  ;;  %v12580_v0 = vld [vmem:[#allocation99_spill] sm:$0xff]  ;;  %v12582_v26 = vld [vmem:[#allocation354_spill] sm:$0xff] }
 0x62b   :  { %v1254_v43 = vmul.f32 1.442695, %v1233_v16  ;;  %v2004_v10 = vmul.f32 %v1988_v40, %v12576_v3  ;;  %v2005_v13 = vmul.f32 %v1989_v50, %v12577_v19  ;;  %v3894_v1 = vmul.f32 %v9653_v37, %v9301_v30 }
 0x62c   :  { %v9750_v58 = vpop.eup %5553  ;;  %v3325_v33 = vrot.slane %v3324_v2, 1  ;;  %v3909_v27 = vmul.f32 %v3893_v45, %v12571_v61  ;;  %v1236_v5 = vsub.f32 %v12579_v29, %v9651_v55  ;;  %5565 = vpow2.f32 %v1252_v63  ;;  %v9769_v45 = vpop.permute.xlu1 %2092 }
 0x62d   :  { %12575 = vst [vmem:[#allocation254_spill] sm:$0xff] %v9750_v58  ;;  %v9756_v11 = vpop.eup %5555  ;;  %v1256_v15 = vmul.f32 1.442695, %v1234_v4  ;;  %v9764_v32 = vmul.f32 %v1990_v8, %v12580_v0  ;;  %v2018_v40 = vadd.f32 %v2017_v54, %v2003_v56  ;;  %v839_v50 = vrot.slane %v838_v25, 1  ;;  %12583 = vst [vmem:[#allocation325_spill] sm:$0xff] %v9769_v45  ;;  %v12585_v54 = vld [vmem:[#allocation359_spill] sm:$0xff] }
 0x62e   :  { %12578 = vst [vmem:[#allocation143_spill] sm:$0xff] %v9756_v11  ;;  %v9761_v16 = vpop.eup %5557  ;;  %v1237_v30 = vsub.f32 %v12582_v26, %v9651_v55  ;;  %v3924_v46 = vadd.f32 %v3923_v28, %v3909_v27  ;;  %5567 = vpow2.f32 %v1254_v43  ;;  %v1258_v61 = vmul.f32 1.442695, %v1235_v39 }
 0x62f   :  { %12581 = vst [vmem:[#allocation300_spill] sm:$0xff] %v9764_v32  ;;  %v3060_v14 = vadd.f32 %v9761_v16, %v3059_v21  ;;  %v9771_v29 = vadd.f32 %v3772_v52, %v3771_v48  ;;  %v3895_v4 = vmul.f32 %v9653_v37, %v9313_v12  ;;  %v1276_v8 = vadd.f32 %v9756_v11, %v9750_v58  ;;  %v12586_v12 = vld [vmem:[#allocation128_spill] sm:$0xff]  ;;  %v12609_v32 = vld [vmem:[#allocation302_spill] sm:$0xff] }
 0x630   :  { %v9777_v63 = vmax.f32 %v3324_v2, %v3325_v33  ;;  %v3910_v56 = vmul.f32 %v3894_v1, %v12573_v51  ;;  %v1238_v28 = vsub.f32 %v12585_v54, %v9651_v55  ;;  %5569 = vpow2.f32 %v1256_v15  ;;  %v12589_v15 = vld [vmem:[#allocation249_spill] sm:$0xff] }
 0x631   :  { %12584 = vst [vmem:[#allocation270_spill] sm:$0xff] %v9771_v29  ;;  %v1260_v21 = vmul.f32 1.442695, %v1236_v5  ;;  %v9782_v39 = vpop.eup %5559  ;;  %v2019_v43 = vadd.f32 %v2018_v40, %v2004_v10  ;;  %v3896_v48 = vmul.f32 %v9653_v37, %v9319_v18  ;;  %v840_v52 = vadd.f32 %v839_v50, %v838_v25  ;;  %v12590_v18 = vld [vmem:[#allocation138_spill] sm:$0xff] }
 0x632   :  { %v9788_v27 = vmul.f32 %v12586_v12, %v9769_v45  ;;  %v9790_v2 = vpop.eup %5561  ;;  %v3925_v33 = vadd.f32 %v3924_v46, %v3910_v56  ;;  %v3061_v51 = vadd.f32 %v9782_v39, %v3060_v14  ;;  %5571 = vpow2.f32 %v1258_v61  ;;  %v12592_v46 = vld [vmem:[#allocation140_spill] sm:$0xff] }
 0x633   :  { %12588 = vst [vmem:[#allocation197_spill] sm:$0xff] %v9790_v2  ;;  %v1262_v1 = vmul.f32 1.442695, %v1237_v30  ;;  %v3911_v5 = vmul.f32 %v3895_v4, %v12576_v3  ;;  %v1239_v10 = vsub.f32 %v12589_v15, %v9651_v55  ;;  %v1277_v40 = vadd.f32 %v9790_v2, %v1276_v8  ;;  %v12594_v30 = vld [vmem:[#allocation33_spill] sm:$0xff] }
 0x634   :  { %12587 = vst [vmem:[#allocation379_spill] sm:$0xff] %v9788_v27  ;;  %v3327_v25 = vsub.f32 %v12590_v18, %v9777_v63  ;;  %v9799_v50 = vpop.eup %5563  ;;  %v3062_v26 = vrot.slane %v3061_v51, 4  ;;  %5573 = vpow2.f32 %v1260_v21  ;;  %v1264_v54 = vmul.f32 1.442695, %v1238_v28 }
 0x635   :  { %12591 = vst [vmem:[#allocation127_spill] sm:$0xff] %v9799_v50  ;;  %v3328_v14 = vsub.f32 %v12592_v46, %v9777_v63  ;;  %v9803_v61 = vadd.f32 %v2019_v43, %v2005_v13  ;;  %5575 = vrcp.f32 %v840_v52  ;;  %v1278_v3 = vadd.f32 %v9799_v50, %v1277_v40  ;;  %v12597_v13 = vld [vmem:[#allocation380_spill] sm:$0xff] }
 0x636   :  { %v9808_v4 = vmul.f32 %v12594_v30, %v9769_v45  ;;  %v9810_v8 = vpop.eup %5565  ;;  %v3897_v56 = vmul.f32 %v9653_v37, %v9331_v7  ;;  %v3926_v15 = vadd.f32 %v3925_v33, %v3911_v5  ;;  %v3063_v21 = vadd.f32 %v3062_v26, %v3061_v51  ;;  %v12599_v7 = vld [vmem:[#allocation185_spill] sm:$0xff]  ;;  %v12600_v51 = vld [vmem:[#allocation375_spill] sm:$0xff]  ;;  %v12604_v26 = vld [vmem:[#allocation382_spill] sm:$0xff] }
 0x637   :  { %12593 = vst [vmem:[#allocation147_spill] sm:$0xff] %v9803_v61  ;;  %12596 = vst [vmem:[#allocation152_spill] sm:$0xff] %v9810_v8  ;;  %5577 = vpow2.f32 %v1262_v1  ;;  %v3912_v28 = vmul.f32 %v3896_v48, %v12577_v19  ;;  %v1240_v43 = vsub.f32 %v12597_v13, %v9651_v55  ;;  %v1279_v52 = vadd.f32 %v9810_v8, %v1278_v3  ;;  %v12601_v1 = vld [vmem:[#allocation381_spill] sm:$0xff]  ;;  %v12634_v8 = vld [vmem:[#allocation34_spill] sm:$0xff] }
 0x638   :  { %12595 = vst [vmem:[#allocation151_spill] sm:$0xff] %v9808_v4  ;;  %v3343_v40 = vmul.f32 1.442695, %v3327_v25  ;;  %v9818_v18 = vpop.eup %5567  ;;  %v3064_v46 = vrot.slane %v3063_v21, 2  ;;  %5579 = vpow2.f32 %v1264_v54  ;;  %v1266_v45 = vmul.f32 1.442695, %v1239_v10 }
 0x639   :  { %12598 = vst [vmem:[#allocation40_spill] sm:$0xff] %v9818_v18  ;;  %v3345_v29 = vmul.f32 1.442695, %v3328_v14  ;;  %v1280_v24 = vadd.f32 %v9818_v18, %v1279_v52  ;;  %v3329_v33 = vsub.f32 %v12599_v7, %v9777_v63  ;;  %v12602_v19 = vmax.f32 %v12600_v51, %v12601_v1  ;;  %v12603_v5 = vld [vmem:[#allocation377_spill] sm:$0xff]  ;;  %v12607_v52 = vld [vmem:[#allocation183_spill] sm:$0xff] }
 0x63a   :  { %v12605_v3 = vmax.f32 %v12603_v5, %v12604_v26  ;;  %v9833_v13 = vpop.eup %5569  ;;  %v3898_v10 = vmul.f32 %v9653_v37, %v9341_v23  ;;  %v3927_v54 = vadd.f32 %v3926_v15, %v3912_v28  ;;  %v3065_v14 = vadd.f32 %v3064_v46, %v3063_v21  ;;  %v9845_v23 = vpop.permute.xlu1 %2096  ;;  %v12611_v15 = vld [vmem:[#allocation66_spill] sm:$0xff]  ;;  %v12614_v46 = vld [vmem:[#allocation79_spill] sm:$0xff] }
 0x63b   :  { %v2132_v48 = vmax.f32 %v9788_v27, %v12602_v19  ;;  %12606 = vst [vmem:[#allocation330_spill] sm:$0xff] %v9833_v13  ;;  %5581 = vpow2.f32 %v3343_v40  ;;  %v3899_v7 = vmul.f32 %v9653_v37, %v12607_v52  ;;  %v1268_v51 = vmul.f32 1.442695, %v1240_v43  ;;  %12610 = vst [vmem:[#allocation328_spill] sm:$0xff] %v9845_v23  ;;  %v12612_v43 = vld [vmem:[#allocation227_spill] sm:$0xff] }
 0x63c   :  { %v9831_v25 = vmax.f32 %v9808_v4, %v12605_v3  ;;  %v1281_v19 = vadd.f32 %v9833_v13, %v1280_v24  ;;  %5583 = vpow2.f32 %v3345_v29  ;;  %v9840_v61 = vpop.eup %5571  ;;  %v3913_v5 = vmul.f32 %v3897_v56, %v12580_v0  ;;  %v12615_v56 = vld [vmem:[#allocation87_spill] sm:$0xff]  ;;  %v12625_v13 = vld [vmem:[#allocation278_spill] sm:$0xff] }
 0x63d   :  { %12608 = vst [vmem:[#allocation44_spill] sm:$0xff] %v9840_v61  ;;  %v3066_v3 = vrot.slane %v3065_v14, 1  ;;  %v1241_v4 = vsub.f32 %v12609_v32, %v9651_v55  ;;  %5585 = vpow2.f32 %v1266_v45  ;;  %v3900_v21 = vmul.f32 %v9653_v37, %v12611_v15  ;;  %v12617_v15 = vld [vmem:[#allocation113_spill] sm:$0xff] }
 0x63e   :  { %v1282_v28 = vadd.f32 %v9840_v61, %v1281_v19  ;;  %v3330_v24 = vsub.f32 %v12612_v43, %v9777_v63  ;;  %v3347_v29 = vmul.f32 1.442695, %v3329_v33  ;;  %v9852_v40 = vpop.eup %5573  ;;  %v9856_v0 = vmul.f32 %v9653_v37, %v12614_v46  ;;  %v12620_v46 = vld [vmem:[#allocation83_spill] sm:$0xff] }
 0x63f   :  { %12613 = vst [vmem:[#allocation192_spill] sm:$0xff] %v9852_v40  ;;  %v9860_v32 = vmul.f32 %v9653_v37, %v12615_v56  ;;  %v3928_v45 = vadd.f32 %v3927_v54, %v3913_v5  ;;  %v3067_v52 = vadd.f32 %v3066_v3, %v3065_v14  ;;  %v9862_v26 = vpop.eup %5575  ;;  %v3914_v19 = vmul.f32 %v3898_v10, %v12617_v15  ;;  %v12621_v10 = vld [vmem:[#allocation148_spill] sm:$0xff] }
 0x640   :  { %12616 = vst [vmem:[#allocation256_spill] sm:$0xff] %v9862_v26  ;;  %5587 = vpow2.f32 %v1268_v51  ;;  %v1283_v43 = vadd.f32 %v9852_v40, %v1282_v28  ;;  %v9868_v33 = vmul.f32 %v12586_v12, %v9845_v23  ;;  %v1242_v56 = vsub.f32 %v12620_v46, %v9651_v55  ;;  %v12623_v12 = vld [vmem:[#allocation267_spill] sm:$0xff]  ;;  %v12624_v40 = vld [vmem:[#allocation220_spill] sm:$0xff] }
 0x641   :  { %v9870_v61 = vpop.eup %5577  ;;  %5589 = vrcp.f32 %v3067_v52  ;;  %v1243_v54 = vsub.f32 %v9359_v47, %v9651_v55  ;;  %v1270_v14 = vmul.f32 1.442695, %v1241_v4  ;;  %v3331_v51 = vsub.f32 %v12621_v10, %v9777_v63  ;;  %v12626_v55 = vld [vmem:[#allocation313_spill] sm:$0xff] }
 0x642   :  { %12618 = vst [vmem:[#allocation59_spill] sm:$0xff] %v9868_v33  ;;  %12619 = vst [vmem:[#allocation199_spill] sm:$0xff] %v9870_v61  ;;  %v1284_v5 = vadd.f32 %v9870_v61, %v1283_v43  ;;  %5591 = vpow2.f32 %v3347_v29  ;;  %v3349_v3 = vmul.f32 1.442695, %v3330_v24  ;;  %v9879_v28 = vpop.eup %5579  ;;  %v9883_v15 = vmul.f32 %v9653_v37, %v12623_v12  ;;  %v12627_v24 = vld [vmem:[#allocation290_spill] sm:$0xff]  ;;  %v12630_v61 = vld [vmem:[#allocation181_spill] sm:$0xff] }
 0x643   :  { %12622 = vst [vmem:[#allocation308_spill] sm:$0xff] %v9879_v28  ;;  %v3929_v52 = vadd.f32 %v3928_v45, %v3914_v19  ;;  %v842_v46 = vmul.f32 %v9862_v26, %v12624_v40  ;;  %v843_v47 = vmul.f32 %v9862_v26, %v12625_v13  ;;  %v9891_v4 = vmul.f32 %v9653_v37, %v12626_v55  ;;  %v12629_v45 = vld [vmem:[#allocation123_spill] sm:$0xff]  ;;  %v12632_v55 = vld [vmem:[#allocation189_spill] sm:$0xff] }
 0x644   :  { %v1285_v29 = vadd.f32 %v9879_v28, %v1284_v5  ;;  %v3332_v43 = vsub.f32 %v12627_v24, %v9777_v63  ;;  %v2133_v10 = vmax.f32 %v9868_v33, %v2132_v48  ;;  %v3915_v19 = vmul.f32 %v3899_v7, %v12629_v45  ;;  %v12635_v7 = vld [vmem:[#allocation41_spill] sm:$0xff] }
 0x645   :  { %v9897_v12 = vpop.eup %5581  ;;  %v9901_v40 = vmul.f32 %v3900_v21, %v12630_v61  ;;  %5593 = vpow2.f32 %v1270_v14  ;;  %v1272_v13 = vmul.f32 1.442695, %v1242_v56  ;;  %v1274_v37 = vmul.f32 1.442695, %v1243_v54  ;;  %v12636_v54 = vld [vmem:[#allocation243_spill] sm:$0xff] }
 0x646   :  { %12628 = vst [vmem:[#allocation222_spill] sm:$0xff] %v9897_v12  ;;  %v9903_v18 = vpop.eup %5583  ;;  %v3333_v5 = vsub.f32 %v12632_v55, %v9777_v63  ;;  %5595 = vpow2.f32 %v3349_v3  ;;  %v3351_v28 = vmul.f32 1.442695, %v3331_v51  ;;  %v9909_v48 = vadd.f32 %v3929_v52, %v3915_v19  ;;  %v12637_v51 = vld [vmem:[#allocation146_spill] sm:$0xff] }
 0x647   :  { %12631 = vst [vmem:[#allocation372_spill] sm:$0xff] %v9903_v18  ;;  %v9907_v24 = vpop.eup %5585  ;;  %v858_v50 = vmul.f32 %v842_v46, %v12634_v8  ;;  %v859_v45 = vmul.f32 %v843_v47, %v12635_v7  ;;  %v9915_v21 = vmul.f32 %v12594_v30, %v9845_v23  ;;  %v3334_v14 = vsub.f32 %v12636_v54, %v9777_v63  ;;  %v12638_v52 = vld [vmem:[#allocation150_spill] sm:$0xff]  ;;  %v12640_v30 = vld [vmem:[#allocation260_spill] sm:$0xff]  ;;  %v12641_v23 = vld [vmem:[#allocation217_spill] sm:$0xff] }
 0x648   :  { %12633 = vst [vmem:[#allocation235_spill] sm:$0xff] %v9907_v24  ;;  %v1286_v56 = vadd.f32 %v9907_v24, %v1285_v29  ;;  %v3353_v55 = vmul.f32 1.442695, %v3332_v43  ;;  %v2134_v3 = vrot.slane %v2133_v10, 4  ;;  %v844_v61 = vmul.f32 %v9862_v26, %v12637_v51  ;;  %v12642_v51 = vld [vmem:[#allocation104_spill] sm:$0xff] }
 0x649   :  { %v845_v19 = vmul.f32 %v9862_v26, %v12638_v52  ;;  %5597 = vpow2.f32 %v1272_v13  ;;  %v3375_v46 = vadd.f32 %v9903_v18, %v9897_v12  ;;  %v846_v29 = vmul.f32 %v9862_v26, %v12640_v30  ;;  %v12643_v52 = vld [vmem:[#allocation355_spill] sm:$0xff] }
 0x64a   :  { %v9926_v47 = vpop.eup %5587  ;;  %v3335_v54 = vsub.f32 %v12641_v23, %v9777_v63  ;;  %5599 = vpow2.f32 %v3351_v28  ;;  %v3355_v43 = vmul.f32 1.442695, %v3333_v5  ;;  %v9936_v2 = vmul.f32 %v9862_v26, %v12642_v51  ;;  %v12645_v28 = vld [vmem:[#allocation45_spill] sm:$0xff] }
 0x64b   :  { %12639 = vst [vmem:[#allocation170_spill] sm:$0xff] %v9926_v47  ;;  %v9932_v24 = vpop.eup %5589  ;;  %v874_v13 = vadd.f32 %v859_v45, %v858_v50  ;;  %5601 = vpow2.f32 %v1274_v37  ;;  %v3336_v18 = vsub.f32 %v12643_v52, %v9777_v63  ;;  %v1287_v30 = vadd.f32 %v9926_v47, %v1286_v56  ;;  %v12646_v45 = vld [vmem:[#allocation312_spill] sm:$0xff] }
 0x64c   :  { %v9940_v12 = vpop.eup %5591  ;;  %5603 = vpow2.f32 %v3353_v55  ;;  %v3357_v33 = vmul.f32 1.442695, %v3334_v14  ;;  %v2135_v23 = vmax.f32 %v2133_v10, %v2134_v3  ;;  %v860_v5 = vmul.f32 %v844_v61, %v12645_v28  ;;  %v12647_v52 = vld [vmem:[#allocation360_spill] sm:$0xff]  ;;  %v12649_v61 = vld [vmem:[#allocation367_spill] sm:$0xff] }
 0x64d   :  { %12644 = vst [vmem:[#allocation165_spill] sm:$0xff] %v9940_v12  ;;  %v3069_v27 = vmul.f32 %v9932_v24, %v9565_v38  ;;  %v3070_v51 = vmul.f32 %v9932_v24, %v9569_v17  ;;  %v3376_v50 = vadd.f32 %v9940_v12, %v3375_v46  ;;  %v9951_v37 = vmul.f32 %v9862_v26, %v12646_v45  ;;  %v12650_v38 = vld [vmem:[#allocation53_spill] sm:$0xff]  ;;  %v12651_v46 = vld [vmem:[#allocation250_spill] sm:$0xff] }
 0x64e   :  { %v3337_v56 = vsub.f32 %v12647_v52, %v9777_v63  ;;  %5605 = vpow2.f32 %v3355_v43  ;;  %v3359_v14 = vmul.f32 1.442695, %v3335_v54  ;;  %v9959_v55 = vmul.f32 %v9862_v26, %v12649_v61 }
 0x64f   :  { %v9955_v10 = vpop.eup %5593  ;;  %v861_v3 = vmul.f32 %v845_v19, %v12650_v38  ;;  %v875_v17 = vadd.f32 %v874_v13, %v860_v5  ;;  %v3338_v47 = vsub.f32 %v12651_v46, %v9777_v63  ;;  %5607 = vpow2.f32 %v3357_v33  ;;  %v12652_v13 = vld [vmem:[#allocation60_spill] sm:$0xff]  ;;  %v12653_v46 = vld [vmem:[#allocation131_spill] sm:$0xff] }
 0x650   :  { %12648 = vst [vmem:[#allocation162_spill] sm:$0xff] %v9955_v10  ;;  %v9964_v12 = vpop.eup %5595  ;;  %v1288_v45 = vadd.f32 %v9955_v10, %v1287_v30  ;;  %v3361_v52 = vmul.f32 1.442695, %v3336_v18  ;;  %v2136_v43 = vrot.slane %v2135_v23, 2  ;;  %v3071_v54 = vmul.f32 %v9932_v24, %v9590_v60  ;;  %v12655_v60 = vld [vmem:[#allocation303_spill] sm:$0xff] }
 0x651   :  { %v3085_v11 = vmul.f32 %v3069_v27, %v12634_v8  ;;  %v3086_v61 = vmul.f32 %v3070_v51, %v12635_v7  ;;  %v3377_v19 = vadd.f32 %v9964_v12, %v3376_v50  ;;  %v862_v5 = vmul.f32 %v846_v29, %v12652_v13  ;;  %v12656_v8 = vld [vmem:[#allocation288_spill] sm:$0xff] }
 0x652   :  { %v3339_v58 = vsub.f32 %v12653_v46, %v9777_v63  ;;  %5609 = vpow2.f32 %v3359_v14  ;;  %v3363_v1 = vmul.f32 1.442695, %v3337_v56  ;;  %v876_v18 = vadd.f32 %v875_v17, %v861_v3 }
 0x653   :  { %v9975_v30 = vpop.eup %5597  ;;  %v3072_v33 = vmul.f32 %v9932_v24, %v9611_v6  ;;  %v3340_v27 = vsub.f32 %v12655_v60, %v9777_v63  ;;  %v3341_v7 = vsub.f32 %v12656_v8, %v9777_v63  ;;  %v3073_v29 = vmul.f32 %v9932_v24, %v9634_v53 }
 0x654   :  { %12654 = vst [vmem:[#allocation268_spill] sm:$0xff] %v9975_v30  ;;  %v9983_v51 = vpop.eup %5599  ;;  %5611 = vpow2.f32 %v3361_v52  ;;  %v3365_v50 = vmul.f32 1.442695, %v3338_v47  ;;  %v2137_v56 = vmax.f32 %v2135_v23, %v2136_v43  ;;  %v3087_v3 = vmul.f32 %v3071_v54, %v12645_v28 }
 0x655   :  { %v9987_v14 = vpop.eup %5601  ;;  %v3101_v17 = vadd.f32 %v3086_v61, %v3085_v11  ;;  %v1289_v6 = vadd.f32 %v9975_v30, %v1288_v45  ;;  %v3378_v46 = vadd.f32 %v9983_v51, %v3377_v19  ;;  %v3074_v8 = vmul.f32 %v9932_v24, %v9646_v62 }
 0x656   :  { %12657 = vst [vmem:[#allocation301_spill] sm:$0xff] %v9987_v14  ;;  %v9992_v60 = vpop.eup %5603  ;;  %v3342_v53 = vsub.f32 %v9596_v49, %v9777_v63  ;;  %5613 = vpow2.f32 %v3363_v1  ;;  %v3367_v47 = vmul.f32 1.442695, %v3339_v58  ;;  %v3088_v23 = vmul.f32 %v3072_v33, %v12650_v38 }
 0x657   :  { %v3102_v52 = vadd.f32 %v3101_v17, %v3087_v3  ;;  %v1290_v28 = vadd.f32 %v9987_v14, %v1289_v6  ;;  %v3379_v11 = vadd.f32 %v9992_v60, %v3378_v46  ;;  %v3075_v43 = vmul.f32 %v9932_v24, %v9659_v42  ;;  %v12658_v3 = vld [vmem:[#allocation64_spill] sm:$0xff] }
 0x658   :  { %v10001_v45 = vpop.eup %5605  ;;  %5615 = vpow2.f32 %v3365_v50  ;;  %v3369_v54 = vmul.f32 1.442695, %v3340_v27  ;;  %v2138_v62 = vrot.slane %v2137_v56, 1  ;;  %v3089_v61 = vmul.f32 %v3073_v29, %v12652_v13 }
 0x659   :  { %v3103_v49 = vadd.f32 %v3102_v52, %v3088_v23  ;;  %v1291_v63 = vrot.slane %v1290_v28, 4  ;;  %v3380_v58 = vadd.f32 %v10001_v45, %v3379_v11  ;;  %v10007_v1 = vpop.eup %5607  ;;  %v877_v38 = vadd.f32 %v876_v18, %v862_v5 }
 0x65a   :  { %v3076_v19 = vmul.f32 %v9932_v24, %v9672_v31  ;;  %5617 = vpow2.f32 %v3367_v47  ;;  %v3371_v33 = vmul.f32 1.442695, %v3341_v7  ;;  %v3090_v17 = vmul.f32 %v3074_v8, %v12658_v3  ;;  %v12659_v31 = vld [vmem:[#allocation77_spill] sm:$0xff] }
 0x65b   :  { %v3104_v42 = vadd.f32 %v3103_v49, %v3089_v61  ;;  %v1292_v50 = vadd.f32 %v1291_v63, %v1290_v28  ;;  %v3381_v27 = vadd.f32 %v10007_v1, %v3380_v58  ;;  %v863_v13 = vmul.f32 %v9936_v2, %v12658_v3  ;;  %v12660_v28 = vld [vmem:[#allocation85_spill] sm:$0xff]  ;;  %v12661_v49 = vld [vmem:[#allocation154_spill] sm:$0xff] }
 0x65c   :  { %v10013_v6 = vpop.eup %5609  ;;  %v3077_v29 = vmul.f32 %v9932_v24, %v9686_v36  ;;  %5619 = vpow2.f32 %v3369_v54  ;;  %v10019_v5 = vmax.f32 %v2137_v56, %v2138_v62  ;;  %v3091_v18 = vmul.f32 %v3075_v43, %v12659_v31 }
 0x65d   :  { %v3105_v7 = vadd.f32 %v3104_v42, %v3090_v17  ;;  %v1293_v46 = vrot.slane %v1292_v50, 2  ;;  %v3382_v8 = vadd.f32 %v10013_v6, %v3381_v27  ;;  %v878_v23 = vadd.f32 %v877_v38, %v863_v13  ;;  %v12665_v27 = vld [vmem:[#allocation105_spill] sm:$0xff] }
 0x65e   :  { %v10023_v47 = vpop.eup %5611  ;;  %v3078_v52 = vmul.f32 %v9932_v24, %v9697_v20  ;;  %5621 = vpow2.f32 %v3371_v33  ;;  %v3373_v2 = vmul.f32 1.442695, %v3342_v53  ;;  %v3092_v11 = vmul.f32 %v3076_v19, %v12660_v28  ;;  %v12662_v53 = vld [vmem:[#allocation102_spill] sm:$0xff]  ;;  %v12663_v33 = vld [vmem:[#allocation159_spill] sm:$0xff] }
 0x65f   :  { %v3106_v36 = vadd.f32 %v3105_v7, %v3091_v18  ;;  %v1294_v54 = vadd.f32 %v1293_v46, %v1292_v50  ;;  %v3383_v56 = vadd.f32 %v10023_v47, %v3382_v8  ;;  %v864_v43 = vmul.f32 %v9951_v37, %v12659_v31  ;;  %v12664_v37 = vld [vmem:[#allocation213_spill] sm:$0xff] }
 0x660   :  { %v10029_v62 = vpop.eup %5613  ;;  %v3079_v61 = vmul.f32 %v9932_v24, %v9704_v35  ;;  %v2140_v63 = vsub.f32 %v12661_v49, %v10019_v5  ;;  %v3976_v20 = vmax.f32 %v9915_v21, %v9831_v25  ;;  %v3093_v58 = vmul.f32 %v3077_v29, %v12662_v53  ;;  %v12669_v49 = vld [vmem:[#allocation141_spill] sm:$0xff] }
 0x661   :  { %v3107_v38 = vadd.f32 %v3106_v36, %v3092_v11  ;;  %v3384_v19 = vadd.f32 %v10029_v62, %v3383_v56  ;;  %v2141_v3 = vsub.f32 %v12663_v33, %v10019_v5  ;;  %v3917_v42 = vmul.f32 %v9856_v0, %v12664_v37  ;;  %v12666_v11 = vld [vmem:[#allocation114_spill] sm:$0xff]  ;;  %v12722_v37 = vld [vmem:[#allocation365_spill] sm:$0xff] }
 0x662   :  { %v10043_v17 = vpop.eup %5615  ;;  %v3931_v35 = vadd.f32 %v9909_v48, %v9901_v40  ;;  %v879_v50 = vadd.f32 %v878_v23, %v864_v43  ;;  %5623 = vpow2.f32 %v3373_v2  ;;  %v3094_v25 = vmul.f32 %v3078_v52, %v12665_v27  ;;  %v12668_v36 = vld [vmem:[#allocation286_spill] sm:$0xff] }
 0x663   :  { %v3108_v13 = vadd.f32 %v3107_v38, %v3093_v58  ;;  %v1295_v29 = vrot.slane %v1294_v54, 1  ;;  %v3385_v31 = vadd.f32 %v10043_v17, %v3384_v19  ;;  %v865_v7 = vmul.f32 %v9959_v55, %v12660_v28 }
 0x664   :  { %v10051_v18 = vpop.eup %5617  ;;  %v3080_v46 = vmul.f32 %v9932_v24, %v9716_v59  ;;  %v2156_v0 = vmul.f32 1.442695, %v2140_v63  ;;  %v3977_v8 = vrot.slane %v3976_v20, 4  ;;  %v3095_v40 = vmul.f32 %v3079_v61, %v12666_v11  ;;  %v12670_v61 = vld [vmem:[#allocation202_spill] sm:$0xff] }
 0x665   :  { %v3109_v48 = vadd.f32 %v3108_v13, %v3094_v25  ;;  %v3386_v23 = vadd.f32 %v10051_v18, %v3385_v31  ;;  %v2158_v52 = vmul.f32 1.442695, %v2141_v3  ;;  %v3918_v56 = vmul.f32 %v9860_v32, %v12668_v36  ;;  %v12672_v3 = vld [vmem:[#allocation117_spill] sm:$0xff] }
 0x666   :  { %v10059_v2 = vpop.eup %5619  ;;  %v3932_v43 = vadd.f32 %v3931_v35, %v3917_v42  ;;  %v850_v55 = vmul.f32 %v9862_v26, %v12669_v49  ;;  %v880_v28 = vadd.f32 %v879_v50, %v865_v7  ;;  %v1296_v59 = vadd.f32 %v1295_v29, %v1294_v54  ;;  %v12673_v42 = vld [vmem:[#allocation344_spill] sm:$0xff]  ;;  %v12674_v54 = vld [vmem:[#allocation237_spill] sm:$0xff] }
 0x667   :  { %12667 = vst [vmem:[#allocation362_spill] sm:$0xff] %v10059_v2  ;;  %v3110_v58 = vadd.f32 %v3109_v48, %v3095_v40  ;;  %v3387_v63 = vadd.f32 %v10059_v2, %v3386_v23  ;;  %v2142_v38 = vsub.f32 %v12670_v61, %v10019_v5  ;;  %v3081_v33 = vmul.f32 %v9932_v24, %v9728_v34  ;;  %v12675_v29 = vld [vmem:[#allocation305_spill] sm:$0xff]  ;;  %v12676_v7 = vld [vmem:[#allocation376_spill] sm:$0xff] }
 0x668   :  { %v10068_v19 = vpop.eup %5621  ;;  %v3096_v25 = vmul.f32 %v3080_v46, %v12672_v3  ;;  %5625 = vpow2.f32 %v2156_v0  ;;  %v3978_v32 = vmax.f32 %v3976_v20, %v3977_v8  ;;  %v3919_v35 = vmul.f32 %v9883_v15, %v12673_v42  ;;  %v12677_v20 = vld [vmem:[#allocation166_spill] sm:$0xff]  ;;  %v12679_v49 = vld [vmem:[#allocation205_spill] sm:$0xff] }
 0x669   :  { %12671 = vst [vmem:[#allocation261_spill] sm:$0xff] %v10068_v19  ;;  %v3388_v50 = vadd.f32 %v10068_v19, %v3387_v63  ;;  %v2143_v13 = vsub.f32 %v12674_v54, %v10019_v5  ;;  %5627 = vpow2.f32 %v2158_v52  ;;  %v3920_v31 = vmul.f32 %v9891_v4, %v12675_v29  ;;  %v12704_v42 = vld [vmem:[#allocation69_spill] sm:$0xff] }
 0x66a   :  { %v851_v40 = vmul.f32 %v9862_v26, %v12676_v7  ;;  %v866_v34 = vmul.f32 %v850_v55, %v12662_v53  ;;  %v3111_v46 = vadd.f32 %v3110_v58, %v3096_v25  ;;  %v3933_v0 = vadd.f32 %v3932_v43, %v3918_v56  ;;  %v12680_v56 = vld [vmem:[#allocation304_spill] sm:$0xff]  ;;  %v2285_v2 = vld [vmem:[%s5845_s19 + $0x40] sm:$0xff] }
 0x66b   :  { %5629 = vrcp.f32 %v1296_v59  ;;  %v2144_v15 = vsub.f32 %v12677_v20, %v10019_v5  ;;  %v2160_v8 = vmul.f32 1.442695, %v2142_v38  ;;  %v3082_v52 = vmul.f32 %v9932_v24, %v9744_v22 }
 0x66c   :  { %v10085_v48 = vpop.eup %5623  ;;  %v881_v23 = vadd.f32 %v880_v28, %v866_v34  ;;  %v3097_v4 = vmul.f32 %v3081_v33, %v12679_v49  ;;  %v3979_v63 = vrot.slane %v3978_v32, 2  ;;  %v852_v61 = vmul.f32 %v9862_v26, %v9560_v57  ;;  %v12681_v33 = vld [vmem:[#allocation200_spill] sm:$0xff] }
 0x66d   :  { %12678 = vst [vmem:[#allocation198_spill] sm:$0xff] %v10085_v48  ;;  %v3389_v53 = vadd.f32 %v10085_v48, %v3388_v50  ;;  %v2145_v43 = vsub.f32 %v12680_v56, %v10019_v5  ;;  %v2162_v55 = vmul.f32 1.442695, %v2143_v13  ;;  %v853_v58 = vmul.f32 %v9862_v26, %v9580_v41  ;;  %v12682_v13 = vld [vmem:[#allocation226_spill] sm:$0xff] }
 0x66e   :  { %v854_v28 = vmul.f32 %v9862_v26, %v9598_v9  ;;  %v867_v22 = vmul.f32 %v851_v40, %v12665_v27  ;;  %v3112_v59 = vadd.f32 %v3111_v46, %v3097_v4  ;;  %v3934_v38 = vadd.f32 %v3933_v0, %v3919_v35 }
 0x66f   :  { %v2146_v25 = vsub.f32 %v12681_v33, %v10019_v5  ;;  %5631 = vpow2.f32 %v2160_v8  ;;  %v2164_v57 = vmul.f32 1.442695, %v2144_v15  ;;  %v3083_v54 = vmul.f32 %v9932_v24, %v9761_v16  ;;  %v12685_v16 = vld [vmem:[#allocation176_spill] sm:$0xff] }
 0x670   :  { %v882_v50 = vadd.f32 %v881_v23, %v867_v22  ;;  %v3098_v7 = vmul.f32 %v3082_v52, %v12682_v13  ;;  %v3980_v34 = vmax.f32 %v3978_v32, %v3979_v63  ;;  %v3084_v41 = vmul.f32 %v9932_v24, %v9782_v39  ;;  %v12689_v23 = vld [vmem:[#allocation320_spill] sm:$0xff]  ;;  %v12690_v63 = vld [vmem:[#allocation327_spill] sm:$0xff] }
 0x671   :  { %v3390_v9 = vrot.slane %v3389_v53, 4  ;;  %5633 = vpow2.f32 %v2162_v55  ;;  %v2166_v27 = vmul.f32 1.442695, %v2145_v43  ;;  %v10111_v35 = vmul.f32 %v9862_v26, %v9617_v44  ;;  %v12692_v55 = vld [vmem:[#allocation234_spill] sm:$0xff]  ;;  %v12693_v22 = vld [vmem:[#allocation364_spill] sm:$0xff] }
 0x672   :  { %v10107_v40 = vpop.eup %5625  ;;  %v868_v46 = vmul.f32 %v852_v61, %v12666_v11  ;;  %v3113_v0 = vadd.f32 %v3112_v59, %v3098_v7  ;;  %v2147_v20 = vsub.f32 %v12685_v16, %v10019_v5  ;;  %v10118_v32 = vadd.f32 %v3934_v38, %v3920_v31  ;;  %v12691_v31 = vld [vmem:[#allocation340_spill] sm:$0xff]  ;;  %v12694_v38 = vld [vmem:[#allocation371_spill] sm:$0xff] }
 0x673   :  { %12683 = vst [vmem:[#allocation37_spill] sm:$0xff] %v10107_v40  ;;  %12684 = vst [vmem:[#allocation71_spill] sm:$0xff] %v10111_v35  ;;  %v10116_v15 = vpop.eup %5627  ;;  %v10121_v39 = vmul.f32 %v853_v58, %v12672_v3  ;;  %5635 = vpow2.f32 %v2164_v57  ;;  %v2168_v24 = vmul.f32 1.442695, %v2146_v25  ;;  %v10124_v8 = vmul.f32 %v854_v28, %v12679_v49  ;;  %v12696_v57 = vld [vmem:[#allocation254_spill] sm:$0xff]  ;;  %v12700_v16 = vld [vmem:[#allocation379_spill] sm:$0xff] }
 0x674   :  { %12686 = vst [vmem:[#allocation329_spill] sm:$0xff] %v10116_v15  ;;  %12687 = vst [vmem:[#allocation293_spill] sm:$0xff] %v10118_v32  ;;  %v10126_v44 = vadd.f32 %v882_v50, %v868_v46  ;;  %v3099_v11 = vmul.f32 %v3083_v54, %v12689_v23  ;;  %v3981_v52 = vrot.slane %v3980_v34, 1  ;;  %v3100_v61 = vmul.f32 %v3084_v41, %v12690_v63  ;;  %v12697_v54 = vld [vmem:[#allocation143_spill] sm:$0xff]  ;;  %v2281_v23 = vld [vmem:[%s5845_s19 + $0x20] sm:$0xff] }
 0x675   :  { %12688 = vst [vmem:[#allocation282_spill] sm:$0xff] %v10124_v8  ;;  %v10129_v4 = vpop.eup %5629  ;;  %v3391_v56 = vadd.f32 %v3390_v9, %v3389_v53  ;;  %v2148_v43 = vsub.f32 %v12691_v31, %v10019_v5  ;;  %5637 = vpow2.f32 %v2166_v27  ;;  %v2149_v58 = vsub.f32 %v12692_v55, %v10019_v5  ;;  %v12695_v53 = vld [vmem:[#allocation381_spill] sm:$0xff]  ;;  %v12698_v41 = vld [vmem:[#allocation319_spill] sm:$0xff]  ;;  %v12736_v32 = vld [vmem:[#allocation68_spill] sm:$0xff] }
 0x676   :  { %v3114_v3 = vadd.f32 %v3113_v0, %v3099_v11  ;;  %v2170_v49 = vmul.f32 1.442695, %v2147_v20  ;;  %v2188_v28 = vadd.f32 %v10116_v15, %v10107_v40  ;;  %v2150_v59 = vsub.f32 %v12693_v22, %v10019_v5  ;;  %v12701_v11 = vld [vmem:[#allocation59_spill] sm:$0xff]  ;;  %v12723_v15 = vld [vmem:[#allocation152_spill] sm:$0xff]  ;;  %v12726_v40 = vld [vmem:[#allocation330_spill] sm:$0xff] }
 0x677   :  { %v2151_v33 = vsub.f32 %v12694_v38, %v10019_v5  ;;  %v2152_v25 = vsub.f32 %v12695_v53, %v10019_v5  ;;  %5639 = vpow2.f32 %v2168_v24  ;;  %v1298_v50 = vmul.f32 %v10129_v4, %v12696_v57 }
 0x678   :  { %v1299_v7 = vmul.f32 %v10129_v4, %v12697_v54  ;;  %v2153_v9 = vsub.f32 %v12698_v41, %v10019_v5  ;;  %v10150_v27 = vmax.f32 %v3980_v34, %v3981_v52  ;;  %v3392_v0 = vrot.slane %v3391_v56, 2  ;;  %v12703_v41 = vld [vmem:[#allocation36_spill] sm:$0xff] }
 0x679   :  { %v10152_v46 = vpop.eup %5631  ;;  %v2154_v20 = vsub.f32 %v12700_v16, %v10019_v5  ;;  %v2155_v24 = vsub.f32 %v12701_v11, %v10019_v5  ;;  %v2172_v31 = vmul.f32 1.442695, %v2148_v43  ;;  %v3115_v55 = vadd.f32 %v3114_v3, %v3100_v61  ;;  %v12705_v5 = vld [vmem:[#allocation155_spill] sm:$0xff] }
 0x67a   :  { %12699 = vst [vmem:[#allocation223_spill] sm:$0xff] %v10152_v46  ;;  %5641 = vpow2.f32 %v2170_v49  ;;  %v2174_v22 = vmul.f32 1.442695, %v2149_v58  ;;  %v2189_v38 = vadd.f32 %v10152_v46, %v2188_v28  ;;  %v3393_v57 = vadd.f32 %v3392_v0, %v3391_v56  ;;  %v12707_v56 = vld [vmem:[#allocation160_spill] sm:$0xff] }
 0x67b   :  { %v10159_v53 = vpop.eup %5633  ;;  %v2176_v34 = vmul.f32 1.442695, %v2150_v59  ;;  %v2178_v52 = vmul.f32 1.442695, %v2151_v33  ;;  %v2180_v54 = vmul.f32 1.442695, %v2152_v25  ;;  %v1314_v29 = vmul.f32 %v1298_v50, %v12703_v41 }
 0x67c   :  { %12702 = vst [vmem:[#allocation356_spill] sm:$0xff] %v10159_v53  ;;  %v1315_v36 = vmul.f32 %v1299_v7, %v12704_v42  ;;  %v2190_v16 = vadd.f32 %v10159_v53, %v2189_v38  ;;  %v3983_v43 = vsub.f32 %v12705_v5, %v10150_v27  ;;  %v3394_v3 = vrot.slane %v3393_v57, 1  ;;  %v12708_v33 = vld [vmem:[#allocation197_spill] sm:$0xff]  ;;  %v2280_v46 = vld [vmem:[%s5845_s19 + $0x18] sm:$0xff] }
 0x67d   :  { %v10166_v61 = vpop.eup %5635  ;;  %v10168_v58 = vmul.f32 1.442695, %v2153_v9  ;;  %v10170_v49 = vmul.f32 1.442695, %v2154_v20  ;;  %v3984_v28 = vsub.f32 %v12707_v56, %v10150_v27  ;;  %v3116_v59 = vrot.slane %v3115_v55, 4  ;;  %v12710_v9 = vld [vmem:[#allocation207_spill] sm:$0xff] }
 0x67e   :  { %12706 = vst [vmem:[#allocation48_spill] sm:$0xff] %v10166_v61  ;;  %v1300_v25 = vmul.f32 %v10129_v4, %v12708_v33  ;;  %5643 = vpow2.f32 %v2172_v31  ;;  %v2191_v50 = vadd.f32 %v10166_v61, %v2190_v16  ;;  %v3395_v0 = vadd.f32 %v3394_v3, %v3393_v57  ;;  %v12712_v31 = vld [vmem:[#allocation239_spill] sm:$0xff] }
 0x67f   :  { %v10177_v7 = vpop.eup %5637  ;;  %5645 = vpow2.f32 %v2174_v22  ;;  %v10179_v11 = vmul.f32 1.442695, %v2155_v24  ;;  %v3985_v20 = vsub.f32 %v12710_v9, %v10150_v27  ;;  %v1330_v38 = vadd.f32 %v1315_v36, %v1314_v29  ;;  %v12713_v22 = vld [vmem:[#allocation167_spill] sm:$0xff]  ;;  %v2278_v9 = vld [vmem:[%s5845_s19 + $0x8] sm:$0xff] }
 0x680   :  { %12709 = vst [vmem:[#allocation132_spill] sm:$0xff] %v10177_v7  ;;  %5647 = vpow2.f32 %v2176_v34  ;;  %v2192_v5 = vadd.f32 %v10177_v7, %v2191_v50  ;;  %v3999_v56 = vmul.f32 1.442695, %v3983_v43  ;;  %v3986_v16 = vsub.f32 %v12712_v31, %v10150_v27  ;;  %v12714_v61 = vld [vmem:[#allocation127_spill] sm:$0xff]  ;;  %v2277_v50 = vld [vmem:[%s5845_s19] sm:$0xff] }
 0x681   :  { %v10184_v33 = vpop.eup %5639  ;;  %5649 = vrcp.f32 %v3395_v0  ;;  %v3987_v57 = vsub.f32 %v12713_v22, %v10150_v27  ;;  %v4001_v24 = vmul.f32 1.442695, %v3984_v28  ;;  %v3117_v3 = vadd.f32 %v3116_v59, %v3115_v55  ;;  %v12715_v29 = vld [vmem:[#allocation47_spill] sm:$0xff]  ;;  %v12716_v0 = vld [vmem:[#allocation306_spill] sm:$0xff]  ;;  %v12717_v7 = vld [vmem:[#allocation201_spill] sm:$0xff] }
 0x682   :  { %12711 = vst [vmem:[#allocation187_spill] sm:$0xff] %v10184_v33  ;;  %v1301_v36 = vmul.f32 %v10129_v4, %v12714_v61  ;;  %v1316_v34 = vmul.f32 %v1300_v25, %v12715_v29  ;;  %v2193_v43 = vadd.f32 %v10184_v33, %v2192_v5  ;;  %5651 = vpow2.f32 %v2178_v52  ;;  %v12718_v28 = vld [vmem:[#allocation269_spill] sm:$0xff]  ;;  %v12720_v61 = vld [vmem:[#allocation346_spill] sm:$0xff]  ;;  %v12721_v5 = vld [vmem:[#allocation236_spill] sm:$0xff] }
 0x683   :  { %v3988_v31 = vsub.f32 %v12716_v0, %v10150_v27  ;;  %5653 = vpow2.f32 %v3999_v56  ;;  %v2279_v52 = vld [vmem:[%s5845_s19 + $0x10] sm:$0xff]  ;;  %v4852_v14 = vpack.c.bf16 %v2278_v9, %v2277_v50  ;;  %v3118_v55 = vrot.slane %v3117_v3, 2  ;;  %v12729_v9 = vld [vmem:[#allocation44_spill] sm:$0xff] }
 0x684   :  { %v10202_v59 = vpop.eup %5641  ;;  %v1331_v53 = vadd.f32 %v1330_v38, %v1316_v34  ;;  %5655 = vpow2.f32 %v4001_v24  ;;  %v1302_v38 = vmul.f32 %v10129_v4, %v12723_v15  ;;  %v12724_v34 = vld [vmem:[#allocation40_spill] sm:$0xff]  ;;  %v12725_v33 = vld [vmem:[#allocation55_spill] sm:$0xff]  ;;  %v1304_v30 = vmul.f32 %v10129_v4, %v12726_v40  ;;  %v2282_v40 = vld [vmem:[%s5845_s19 + $0x28] sm:$0xff] }
 0x685   :  { %12719 = vst [vmem:[#allocation228_spill] sm:$0xff] %v10202_v59  ;;  %v2194_v0 = vadd.f32 %v10202_v59, %v2193_v43  ;;  %v1303_v25 = vmul.f32 %v10129_v4, %v12724_v34  ;;  %v1317_v56 = vmul.f32 %v1301_v36, %v12725_v33  ;;  %v12727_v43 = vld [vmem:[#allocation212_spill] sm:$0xff]  ;;  %v4003_v22 = vmul.f32 1.442695, %v3985_v20  ;;  %4853 = vmatpush3.bf16.msra.mxu0 %v4852_v14  ;;  %v12730_v34 = vld [vmem:[#allocation382_spill] sm:$0xff] }
 0x686   :  { %v4855_v24 = vpack.c.bf16 %v2280_v46, %v2279_v52  ;;  %v1305_v63 = vmul.f32 %v10129_v4, %v12729_v9  ;;  %5657 = vpow2.f32 %v2180_v54  ;;  %v12731_v36 = vmov 0.0|0.0   ;;  %v12733_v59 = vld [vmem:[#allocation192_spill] sm:$0xff]  ;;  %v12734_v46 = vld [vmem:[#allocation199_spill] sm:$0xff] }
 0x687   :  { %v1332_v15 = vadd.f32 %v1331_v53, %v1317_v56  ;;  %4854 = vmatprep.subr.bf16.mxu0 %v12731_v36  ;;  %v1306_v14 = vmul.f32 %v10129_v4, %v12733_v59  ;;  %v10237_v20 = vmul.f32 %v10129_v4, %v12734_v46  ;;  %v4005_v53 = vmul.f32 1.442695, %v3986_v16  ;;  %v12735_v9 = vld [vmem:[#allocation80_spill] sm:$0xff]  ;;  %v12737_v59 = vld [vmem:[#allocation91_spill] sm:$0xff] }
 0x688   :  { %v10222_v50 = vpop.eup %5643  ;;  %v3119_v56 = vadd.f32 %v3118_v55, %v3117_v3  ;;  %v1318_v10 = vmul.f32 %v1302_v38, %v12735_v9  ;;  %v1319_v48 = vmul.f32 %v1303_v25, %v12736_v32  ;;  %5659 = vpow2.f32 %v10168_v58  ;;  %v12738_v16 = vld [vmem:[#allocation88_spill] sm:$0xff]  ;;  %v2283_v55 = vld [vmem:[%s5845_s19 + $0x30] sm:$0xff]  ;;  %v12739_v38 = vld [vmem:[#allocation222_spill] sm:$0xff] }
 0x689   :  { %12728 = vst [vmem:[#allocation52_spill] sm:$0xff] %v10222_v50  ;;  %v10231_v26 = vpop.eup %5645  ;;  %v2195_v52 = vadd.f32 %v10222_v50, %v2194_v0  ;;  %v1320_v8 = vmul.f32 %v1304_v30, %v12737_v59  ;;  %5661 = vpow2.f32 %v4003_v22  ;;  %v4007_v46 = vmul.f32 1.442695, %v3987_v57  ;;  %4856 = vmatpush3.bf16.msra.mxu0 %v4855_v24  ;;  %v2284_v25 = vld [vmem:[%s5845_s19 + $0x38] sm:$0xff]  ;;  %v12742_v24 = vld [vmem:[#allocation323_spill] sm:$0xff] }
 0x68a   :  { %12732 = vst [vmem:[#allocation56_spill] sm:$0xff] %v10231_v26  ;;  %v10240_v54 = vpop.eup %5647  ;;  %v4858_v0 = vpack.c.bf16 %v2282_v40, %v2281_v23  ;;  %v10249_v50 = vmul.f32 %v1305_v63, %v12738_v16  ;;  %v1333_v35 = vadd.f32 %v1332_v15, %v1318_v10  ;;  %5663 = vpow2.f32 %v10170_v49  ;;  %4857 = vmatprep.subr.bf16.mxu0 %v12731_v36  ;;  %v12740_v22 = vld [vmem:[#allocation372_spill] sm:$0xff]  ;;  %v12741_v49 = vld [vmem:[#allocation106_spill] sm:$0xff] }
 0x68b   :  { %v10245_v19 = vpop.eup %5649  ;;  %v4009_v3 = vmul.f32 1.442695, %v3988_v31  ;;  %v2196_v23 = vadd.f32 %v10231_v26, %v2195_v52  ;;  %5665 = vpow2.f32 %v4005_v53  ;;  %v3120_v10 = vrot.slane %v3119_v56, 1 }
 0x68c   :  { %v10255_v58 = vpop.eup %5651  ;;  %v3397_v30 = vmul.f32 %v10245_v19, %v12739_v38  ;;  %v3398_v57 = vmul.f32 %v10245_v19, %v12740_v22  ;;  %v10265_v31 = vmul.f32 %v1306_v14, %v12741_v49  ;;  %5667 = vpow2.f32 %v10179_v11  ;;  %v12743_v38 = vld [vmem:[#allocation151_spill] sm:$0xff] }
 0x68d   :  { %v10262_v63 = vpop.eup %5653  ;;  %v3996_v15 = vsub.f32 %v12742_v24, %v10150_v27  ;;  %v3997_v22 = vsub.f32 %v12743_v38, %v10150_v27  ;;  %5669 = vpow2.f32 %v4007_v46  ;;  %v12744_v52 = vsub.f32 %v12717_v7, %v10150_v27  ;;  %4859 = vmatpush3.bf16.msra.mxu0 %v4858_v0  ;;  %v2286_v46 = vld [vmem:[%s5845_s19 + $0x48] sm:$0xff]  ;;  %v12746_v38 = vld [vmem:[#allocation165_spill] sm:$0xff] }
 0x68e   :  { %v10270_v40 = vpop.eup %5655  ;;  %v4861_v26 = vpack.c.bf16 %v2284_v25, %v2283_v55  ;;  %v1334_v13 = vadd.f32 %v1333_v35, %v1319_v48  ;;  %v3998_v14 = vsub.f32 %v9915_v21, %v10150_v27  ;;  %5671 = vpow2.f32 %v4009_v3  ;;  %4860 = vmatprep.subr.bf16.mxu0 %v12731_v36 }
 0x68f   :  { %v4011_v53 = vmul.f32 1.442695, %v12744_v52  ;;  %v12745_v11 = vsub.f32 %v12718_v28, %v10150_v27  ;;  %v3399_v7 = vmul.f32 %v10245_v19, %v12746_v38  ;;  %v3413_v0 = vmul.f32 %v3397_v30, %v12703_v41 }
 0x690   :  { %v3414_v48 = vmul.f32 %v3398_v57, %v12704_v42  ;;  %v2197_v21 = vadd.f32 %v10240_v54, %v2196_v23  ;;  %v10290_v35 = vpop.eup %5657  ;;  %v10292_v3 = vadd.f32 %v3120_v10, %v3119_v56  ;;  %v12747_v28 = vsub.f32 %v12720_v61, %v10150_v27  ;;  %v2287_v57 = vld [vmem:[%s5845_s19 + $0x50] sm:$0xff]  ;;  %v2288_v61 = vld [vmem:[%s5845_s19 + $0x58] sm:$0xff] }
 0x691   :  { %v4013_v24 = vmul.f32 1.442695, %v12745_v11  ;;  %v12748_v25 = vsub.f32 %v12721_v5, %v10150_v27  ;;  %v4031_v11 = vadd.f32 %v10270_v40, %v10262_v63  ;;  %v3400_v42 = vmul.f32 %v10245_v19, %v9964_v12  ;;  %4862 = vmatpush3.bf16.msra.mxu0 %v4861_v26 }
 0x692   :  { %v4015_v55 = vmul.f32 1.442695, %v12747_v28  ;;  %5673 = vpow2.f32 %v4011_v53  ;;  %v12749_v41 = vsub.f32 %v12722_v37, %v10150_v27  ;;  %v4864_v30 = vpack.c.bf16 %v2286_v46, %v2285_v2  ;;  %v10309_v23 = vpop.eup %5659  ;;  %4863 = vmatprep.subr.bf16.mxu0 %v12731_v36  ;;  %v2289_v46 = vld [vmem:[%s5845_s19 + $0x60] sm:$0xff] }
 0x693   :  { %v4017_v52 = vmul.f32 1.442695, %v12748_v25  ;;  %v10311_v5 = vadd.f32 %v1334_v13, %v1320_v8  ;;  %5675 = vpow2.f32 %v4013_v24  ;;  %v12750_v10 = vsub.f32 %v12727_v43, %v10150_v27  ;;  %v10320_v26 = vpop.eup %5661 }
 0x694   :  { %v4019_v56 = vmul.f32 1.442695, %v12749_v41  ;;  %v12751_v12 = vsub.f32 %v12730_v34, %v10150_v27  ;;  %v3401_v37 = vmul.f32 %v10245_v19, %v9983_v51  ;;  %v3415_v2 = vmul.f32 %v3399_v7, %v12715_v29  ;;  %v10326_v43 = vpop.eup %5663 }
 0x695   :  { %v4021_v38 = vmul.f32 1.442695, %v12750_v10  ;;  %v3429_v13 = vadd.f32 %v3414_v48, %v3413_v0  ;;  %v2198_v8 = vadd.f32 %v10255_v58, %v2197_v21  ;;  %5677 = vpow2.f32 %v4015_v55  ;;  %v10332_v28 = vpop.eup %5665  ;;  %4865 = vmatpush3.bf16.msra.mxu0 %v4864_v30  ;;  %v2290_v48 = vld [vmem:[%s5845_s19 + $0x68] sm:$0xff]  ;;  %v10343_v21 = vld [vmem:[%s5845_s19 + $0x78] sm:$0xff] }
 0x696   :  { %v4023_v53 = vmul.f32 1.442695, %v12751_v12  ;;  %v10328_v27 = vmul.f32 1.442695, %v3996_v15  ;;  %v4032_v34 = vadd.f32 %v10320_v26, %v4031_v11  ;;  %v4867_v24 = vpack.c.bf16 %v2288_v61, %v2287_v57  ;;  %v10340_v15 = vld [vmem:[%s5845_s19 + $0x70] sm:$0xff]  ;;  %v10345_v55 = vpop.eup %5667  ;;  %4866 = vmatprep.subr.bf16.mxu0 %v12731_v36  ;;  %v2388_v57 = vld [vmem:[%s5865_s12 + $0x8] sm:$0xff] }
 0x697   :  { %v3402_v51 = vmul.f32 %v10245_v19, %v9992_v60  ;;  %v3416_v29 = vmul.f32 %v3400_v42, %v12725_v33  ;;  %v3430_v7 = vadd.f32 %v3429_v13, %v3415_v2  ;;  %v2199_v0 = vadd.f32 %v10290_v35, %v2198_v8  ;;  %v10353_v33 = vpop.eup %5669  ;;  %v2389_v13 = vld [vmem:[%s5865_s12 + $0x10] sm:$0xff]  ;;  %v2390_v8 = vld [vmem:[%s5865_s12 + $0x18] sm:$0xff]  ;;  %s12851_s19 = sld [smem:[#allocation14_spill]] }
 0x698   :  { %5679 = vpow2.f32 %v4017_v52  ;;  %v10347_v25 = vmul.f32 1.442695, %v3997_v22  ;;  %v10349_v11 = vmul.f32 1.442695, %v3998_v14  ;;  %v4033_v60 = vadd.f32 %v10332_v28, %v4032_v34  ;;  %v2387_v22 = vld [vmem:[%s5865_s12] sm:$0xff]  ;;  %v10361_v14 = vpop.eup %5671 }
 0x699   :  { %v3403_v42 = vmul.f32 %v10245_v19, %v10001_v45  ;;  %v3417_v41 = vmul.f32 %v3401_v37, %v12735_v9  ;;  %v3431_v30 = vadd.f32 %v3430_v7, %v3416_v29  ;;  %v2200_v52 = vadd.f32 %v10309_v23, %v2199_v0  ;;  %4868 = vmatpush3.bf16.msra.mxu0 %v4867_v24 }
 0x69a   :  { %5681 = vpow2.f32 %v4019_v56  ;;  %v4034_v61 = vadd.f32 %v10353_v33, %v4033_v60  ;;  %v4870_v10 = vpack.c.bf16 %v2290_v48, %v2289_v46  ;;  %v4873_v12 = vpack.c.bf16 %v10343_v21, %v10340_v15  ;;  %4869 = vmatprep.subr.bf16.mxu0 %v12731_v36  ;;  %v2392_v21 = vld [vmem:[%s5865_s12 + $0x28] sm:$0xff] }
 0x69b   :  { %v3404_v45 = vmul.f32 %v10245_v19, %v10007_v1  ;;  %v3418_v9 = vmul.f32 %v3402_v51, %v12736_v32  ;;  %v3432_v37 = vadd.f32 %v3431_v30, %v3417_v41  ;;  %v2201_v2 = vadd.f32 %v10326_v43, %v2200_v52 }
 0x69c   :  { %5683 = vpow2.f32 %v4021_v38  ;;  %v4035_v56 = vadd.f32 %v10361_v14, %v4034_v61  ;;  %v4876_v34 = vpack.c.bf16 %v2388_v57, %v2387_v22  ;;  %v10374_v46 = vpop.eup %5673  ;;  %v3405_v1 = vmul.f32 %v10245_v19, %v10013_v6  ;;  %v12753_v61 = vld [vmem:[#allocation225_spill] sm:$0xff] }
 0x69d   :  { %v3419_v32 = vmul.f32 %v3403_v42, %v12737_v59  ;;  %v3433_v51 = vadd.f32 %v3432_v37, %v3418_v9  ;;  %v2202_v24 = vadd.f32 %v10345_v55, %v2201_v2  ;;  %v10380_v29 = vpop.eup %5675  ;;  %v3406_v38 = vmul.f32 %v10245_v19, %v10023_v47  ;;  %4871 = vmatpush3.bf16.msra.mxu0 %v4870_v10  ;;  %v2391_v59 = vld [vmem:[%s5865_s12 + $0x20] sm:$0xff]  ;;  %v2394_v37 = vld [vmem:[%s5865_s12 + $0x38] sm:$0xff] }
 0x69e   :  { %5685 = vpow2.f32 %v4023_v53  ;;  %v4036_v7 = vadd.f32 %v10374_v46, %v4035_v56  ;;  %4877 = vmatpush3.bf16.msra.mxu1 %v4876_v34  ;;  %v4879_v0 = vpack.c.bf16 %v2390_v8, %v2389_v13  ;;  %v3420_v48 = vmul.f32 %v3404_v45, %v12738_v16  ;;  %4872 = vmatprep.subr.bf16.mxu0 %v12731_v36  ;;  %v12752_v16 = vld [vmem:[#allocation285_spill] sm:$0xff]  ;;  %v12755_v13 = vld [vmem:[#allocation308_spill] sm:$0xff] }
 0x69f   :  { %v3434_v6 = vadd.f32 %v3433_v51, %v3419_v32  ;;  %v2203_v15 = vrot.slane %v2202_v24, 4  ;;  %4878 = vmatprep.subr.bf16.mxu1 %v12731_v36  ;;  %v10389_v60 = vpop.eup %5677  ;;  %v1336_v47 = vadd.f32 %v10311_v5, %v10249_v50  ;;  %v3407_v53 = vmul.f32 %v10245_v19, %v10029_v62 }
 0x6a0   :  { %v4037_v42 = vadd.f32 %v10380_v29, %v4036_v7  ;;  %v4106_v41 = vsel %vm2263_vm3, %v12752_v16, %v10292_v3  ;;  %v3421_v30 = vmul.f32 %v3405_v1, %v12741_v49  ;;  %5687 = vpow2.f32 %v10328_v27  ;;  %v12754_v49 = vld [vmem:[#allocation109_spill] sm:$0xff]  ;;  %v2393_v27 = vld [vmem:[%s5865_s12 + $0x30] sm:$0xff] }
 0x6a1   :  { %v3435_v52 = vadd.f32 %v3434_v6, %v3420_v48  ;;  %v2204_v22 = vadd.f32 %v2203_v15, %v2202_v24  ;;  %v3408_v62 = vmul.f32 %v10245_v19, %v10043_v17  ;;  %v4882_v57 = vpack.c.bf16 %v2392_v21, %v2391_v59  ;;  %4874 = vmatpush3.bf16.msra.mxu0 %v4873_v12  ;;  %v12756_v12 = vld [vmem:[#allocation118_spill] sm:$0xff]  ;;  %v2395_v15 = vld [vmem:[%s5865_s12 + $0x40] sm:$0xff] }
 0x6a2   :  { %v10402_v50 = vpop.eup %5679  ;;  %v4038_v5 = vadd.f32 %v10389_v60, %v4037_v42  ;;  %4880 = vmatpush3.bf16.msra.mxu1 %v4879_v0  ;;  %v10409_v3 = vsel %vm2265_vm4, %v4106_v41, %v12753_v61  ;;  %v3422_v10 = vmul.f32 %v3406_v38, %v12754_v49  ;;  %5689 = vpow2.f32 %v10347_v25  ;;  %4899 = vmatprep.subr.bf16.mxu0 %v12731_v36  ;;  %v12758_v0 = vld [vmem:[#allocation122_spill] sm:$0xff]  ;;  %v12764_v61 = vld [vmem:[#allocation235_spill] sm:$0xff] }
 0x6a3   :  { %v3436_v45 = vadd.f32 %v3435_v52, %v3421_v30  ;;  %v2205_v9 = vrot.slane %v2204_v22, 2  ;;  %4881 = vmatprep.subr.bf16.mxu1 %v12731_v36  ;;  %v884_v2 = vadd.f32 %v10126_v44, %v10121_v39  ;;  %v1308_v8 = vmul.f32 %v10129_v4, %v12755_v13  ;;  %v12757_v44 = vld [vmem:[#allocation362_spill] sm:$0xff]  ;;  %v12762_v52 = vld [vmem:[#allocation261_spill] sm:$0xff] }
 0x6a4   :  { %v10416_v17 = vpop.eup %5681  ;;  %v1337_v56 = vadd.f32 %v1336_v47, %v10265_v31  ;;  %v4039_v34 = vadd.f32 %v10402_v50, %v4038_v5  ;;  %v3409_v25 = vmul.f32 %v10245_v19, %v10051_v18  ;;  %v3423_v1 = vmul.f32 %v3407_v53, %v12756_v12  ;;  %v2396_v59 = vld [vmem:[%s5865_s12 + $0x48] sm:$0xff]  ;;  %v12760_v47 = vld [vmem:[#allocation71_spill] sm:$0xff] }
 0x6a5   :  { %v3437_v32 = vadd.f32 %v3436_v45, %v3422_v10  ;;  %v2206_v51 = vadd.f32 %v2205_v9, %v2204_v22  ;;  %v1323_v39 = vmul.f32 %v10237_v20, %v12754_v49  ;;  %v3410_v31 = vmul.f32 %v10245_v19, %v12757_v44  ;;  %v12759_v20 = vld [vmem:[#allocation226_spill] sm:$0xff] }
 0x6a6   :  { %v10428_v24 = vpop.eup %5683  ;;  %v4040_v38 = vadd.f32 %v10416_v17, %v4039_v34  ;;  %4883 = vmatpush3.bf16.msra.mxu1 %v4882_v57  ;;  %v4885_v7 = vpack.c.bf16 %v2394_v37, %v2393_v27  ;;  %v3424_v48 = vmul.f32 %v3408_v62, %v12758_v0  ;;  %5691 = vpow2.f32 %v10349_v11  ;;  %v12761_v42 = vld [vmem:[#allocation282_spill] sm:$0xff] }
 0x6a7   :  { %v3438_v18 = vadd.f32 %v3437_v32, %v3423_v1  ;;  %v2207_v6 = vrot.slane %v2206_v51, 1  ;;  %4884 = vmatprep.subr.bf16.mxu1 %v12731_v36  ;;  %v871_v53 = vmul.f32 %v12760_v47, %v12759_v20  ;;  %v885_v16 = vadd.f32 %v884_v2, %v12761_v42  ;;  %v12763_v62 = vld [vmem:[#allocation218_spill] sm:$0xff]  ;;  %v2398_v1 = vld [vmem:[%s5865_s12 + $0x58] sm:$0xff]  ;;  %v12767_v32 = vld [vmem:[#allocation293_spill] sm:$0xff] }
 0x6a8   :  { %v10440_v21 = vpop.eup %5685  ;;  %v1338_v41 = vadd.f32 %v1337_v56, %v1323_v39  ;;  %v4041_v30 = vadd.f32 %v10428_v24, %v4040_v38  ;;  %v3411_v22 = vmul.f32 %v10245_v19, %v12762_v52  ;;  %v3425_v11 = vmul.f32 %v3409_v25, %v12763_v62  ;;  %v12765_v37 = vld [vmem:[#allocation198_spill] sm:$0xff]  ;;  %v2397_v25 = vld [vmem:[%s5865_s12 + $0x50] sm:$0xff]  ;;  %v12775_v52 = vld [vmem:[#allocation133_spill] sm:$0xff] }
 0x6a9   :  { %v3439_v5 = vadd.f32 %v3438_v18, %v3424_v48  ;;  %v2208_v57 = vadd.f32 %v2207_v6, %v2206_v51  ;;  %v1309_v49 = vmul.f32 %v10129_v4, %v12764_v61  ;;  %v1324_v10 = vmul.f32 %v1308_v8, %v12756_v12  ;;  %v12766_v13 = vld [vmem:[#allocation238_spill] sm:$0xff]  ;;  %v12768_v8 = vld [vmem:[#allocation164_spill] sm:$0xff] }
 0x6aa   :  { %v4042_v45 = vadd.f32 %v10440_v21, %v4041_v30  ;;  %4886 = vmatpush3.bf16.msra.mxu1 %v4885_v7  ;;  %v4888_v9 = vpack.c.bf16 %v2396_v59, %v2395_v15  ;;  %v10453_v27 = vpop.eup %5687  ;;  %v3412_v2 = vmul.f32 %v10245_v19, %v12765_v37  ;;  %v3426_v56 = vmul.f32 %v3410_v31, %v12766_v13  ;;  %v12769_v12 = vld [vmem:[#allocation256_spill] sm:$0xff]  ;;  %v12772_v19 = vld [vmem:[#allocation147_spill] sm:$0xff]  ;;  %v12774_v20 = vld [vmem:[#allocation170_spill] sm:$0xff] }
 0x6ab   :  { %v3440_v34 = vadd.f32 %v3439_v5, %v3425_v11  ;;  %5693 = vrcp.f32 %v2208_v57  ;;  %4887 = vmatprep.subr.bf16.mxu1 %v12731_v36  ;;  %v3936_v51 = vrot.slane %v12767_v32, 4  ;;  %v856_v39 = vmul.f32 %v12769_v12, %v12768_v8  ;;  %v12771_v48 = vld [vmem:[#allocation300_spill] sm:$0xff]  ;;  %v12776_v11 = vld [vmem:[#allocation369_spill] sm:$0xff]  ;;  %v12780_v37 = vld [vmem:[#allocation119_spill] sm:$0xff] }
 0x6ac   :  { %v1339_v44 = vadd.f32 %v1338_v41, %v1324_v10  ;;  %v4043_v38 = vadd.f32 %v10453_v27, %v4042_v45  ;;  %v10465_v7 = vpop.eup %5689  ;;  %v2021_v18 = vadd.f32 %v12772_v19, %v12771_v48  ;;  %v886_v31 = vadd.f32 %v885_v16, %v871_v53  ;;  %v12773_v6 = vld [vmem:[#allocation336_spill] sm:$0xff]  ;;  %v12777_v57 = vld [vmem:[#allocation113_spill] sm:$0xff] }
 0x6ad   :  { %12770 = vst [vmem:[#allocation32_spill] sm:$0xff] %v10465_v7  ;;  %v3427_v15 = vmul.f32 %v3411_v22, %v12773_v6  ;;  %v3441_v59 = vadd.f32 %v3440_v34, %v3426_v56  ;;  %v1310_v47 = vmul.f32 %v10129_v4, %v12774_v20  ;;  %v1325_v42 = vmul.f32 %v1309_v49, %v12758_v0  ;;  %v12778_v61 = vld [vmem:[#allocation168_spill] sm:$0xff]  ;;  %v12779_v45 = vld [vmem:[#allocation61_spill] sm:$0xff] }
 0x6ae   :  { %v4044_v30 = vadd.f32 %v10465_v7, %v4043_v38  ;;  %4889 = vmatpush3.bf16.msra.mxu1 %v4888_v9  ;;  %v4891_v41 = vpack.c.bf16 %v2398_v1, %v2397_v25  ;;  %v1992_v5 = vmul.f32 %v12776_v11, %v12775_v52  ;;  %v2007_v10 = vmul.f32 %v12778_v61, %v12777_v57  ;;  %v12781_v49 = vld [vmem:[#allocation320_spill] sm:$0xff]  ;;  %v12783_v25 = vld [vmem:[#allocation273_spill] sm:$0xff]  ;;  %v12784_v1 = vld [vmem:[#allocation307_spill] sm:$0xff] }
 0x6af   :  { %v3428_v53 = vmul.f32 %v3412_v2, %v12779_v45  ;;  %v3442_v16 = vadd.f32 %v3441_v59, %v3427_v15  ;;  %4890 = vmatprep.subr.bf16.mxu1 %v12731_v36  ;;  %v3937_v22 = vadd.f32 %v3936_v51, %v12767_v32  ;;  %v857_v0 = vmul.f32 %v12769_v12, %v12780_v37  ;;  %v12785_v38 = vld [vmem:[#allocation270_spill] sm:$0xff]  ;;  %v12788_v20 = vld [vmem:[#allocation357_spill] sm:$0xff]  ;;  %v12789_v52 = vld [vmem:[#allocation123_spill] sm:$0xff] }
 0x6b0   :  { %v872_v56 = vmul.f32 %v856_v39, %v12781_v49  ;;  %v1340_v9 = vadd.f32 %v1339_v44, %v1325_v42  ;;  %v10484_v34 = vpop.eup %5691  ;;  %v10488_v8 = vmul.f32 %v12784_v1, %v12783_v25  ;;  %v3774_v48 = vrot.slane %v12785_v38, 2  ;;  %v12786_v59 = vld [vmem:[#allocation162_spill] sm:$0xff]  ;;  %v12787_v39 = vld [vmem:[#allocation116_spill] sm:$0xff]  ;;  %v12802_v7 = vld [vmem:[#allocation223_spill] sm:$0xff] }
 0x6b1   :  { %12782 = vst [vmem:[#allocation262_spill] sm:$0xff] %v10484_v34  ;;  %v2022_v2 = vadd.f32 %v2021_v18, %v2007_v10  ;;  %v3443_v19 = vadd.f32 %v3442_v16, %v3428_v53  ;;  %v1311_v32 = vmul.f32 %v10129_v4, %v12786_v59  ;;  %v1326_v51 = vmul.f32 %v1310_v47, %v12763_v62  ;;  %v12790_v18 = vld [vmem:[#allocation233_spill] sm:$0xff]  ;;  %v12792_v16 = vld [vmem:[#allocation327_spill] sm:$0xff]  ;;  %v12794_v1 = vld [vmem:[#allocation268_spill] sm:$0xff] }
 0x6b2   :  { %v887_v15 = vadd.f32 %v886_v31, %v872_v56  ;;  %v4045_v12 = vadd.f32 %v10484_v34, %v4044_v30  ;;  %4892 = vmatpush3.bf16.msra.mxu1 %v4891_v41  ;;  %v3612_v44 = vrot.slane %v12787_v39, 1  ;;  %v1993_v42 = vmul.f32 %v12776_v11, %v12788_v20  ;;  %v12791_v31 = vld [vmem:[#allocation246_spill] sm:$0xff]  ;;  %v12793_v41 = vld [vmem:[#allocation361_spill] sm:$0xff] }
 0x6b3   :  { %v2008_v57 = vmul.f32 %v1992_v5, %v12789_v52  ;;  %v3444_v61 = vrot.slane %v3443_v19, 4  ;;  %4893 = vmatprep.subr.bf16.mxu1 %v12731_v36  ;;  %v1796_v10 = vadd.f32 %v12791_v31, %v12790_v18  ;;  %v3938_v53 = vrot.slane %v3937_v22, 2  ;;  %v12795_v18 = vld [vmem:[#allocation181_spill] sm:$0xff] }
 0x6b4   :  { %v873_v37 = vmul.f32 %v857_v0, %v12792_v16  ;;  %v1341_v62 = vadd.f32 %v1340_v9, %v1326_v51  ;;  %v3775_v30 = vadd.f32 %v3774_v48, %v12785_v38  ;;  %v1994_v49 = vmul.f32 %v12776_v11, %v12793_v41  ;;  %v12796_v9 = vld [vmem:[#allocation37_spill] sm:$0xff]  ;;  %v12798_v48 = vld [vmem:[#allocation186_spill] sm:$0xff] }
 0x6b5   :  { %v10503_v47 = vpop.eup %5693  ;;  %v2023_v56 = vadd.f32 %v2022_v2, %v2008_v57  ;;  %v3445_v25 = vadd.f32 %v3444_v61, %v3443_v19  ;;  %v1312_v59 = vmul.f32 %v10129_v4, %v12794_v1  ;;  %v1327_v20 = vmul.f32 %v1311_v32, %v12766_v13  ;;  %v12797_v16 = vld [vmem:[#allocation329_spill] sm:$0xff]  ;;  %v12800_v61 = vld [vmem:[#allocation326_spill] sm:$0xff] }
 0x6b6   :  { %v888_v5 = vadd.f32 %v887_v15, %v873_v37  ;;  %v4046_v52 = vrot.slane %v4045_v12, 4  ;;  %v2009_v31 = vmul.f32 %v1993_v42, %v12795_v18  ;;  %v2210_v51 = vmul.f32 %v10503_v47, %v12796_v9  ;;  %v12799_v2 = vld [vmem:[#allocation301_spill] sm:$0xff] }
 0x6b7   :  { %v3446_v0 = vrot.slane %v3445_v25, 2  ;;  %v2211_v38 = vmul.f32 %v10503_v47, %v12797_v16  ;;  %v1797_v41 = vadd.f32 %v1796_v10, %v12798_v48  ;;  %v1313_v19 = vmul.f32 %v10129_v4, %v12799_v2  ;;  %v12801_v32 = vld [vmem:[#allocation213_spill] sm:$0xff]  ;;  %v12803_v48 = vld [vmem:[#allocation39_spill] sm:$0xff] }
 0x6b8   :  { %v1342_v15 = vadd.f32 %v1341_v62, %v1327_v20  ;;  %v3939_v57 = vadd.f32 %v3938_v53, %v3937_v22  ;;  %v1995_v13 = vmul.f32 %v12776_v11, %v12800_v61  ;;  %v2010_v37 = vmul.f32 %v1994_v49, %v12801_v32  ;;  %v12804_v62 = vld [vmem:[#allocation75_spill] sm:$0xff] }
 0x6b9   :  { %v2024_v42 = vadd.f32 %v2023_v56, %v2009_v31  ;;  %v3447_v1 = vadd.f32 %v3446_v0, %v3445_v25  ;;  %v889_v18 = vrot.slane %v888_v5, 4  ;;  %v1328_v9 = vmul.f32 %v1312_v59, %v12773_v6  ;;  %v12805_v25 = vld [vmem:[#allocation356_spill] sm:$0xff] }
 0x6ba   :  { %v4047_v36 = vadd.f32 %v4046_v52, %v4045_v12  ;;  %v3776_v34 = vrot.slane %v3775_v30, 1  ;;  %v2212_v10 = vmul.f32 %v10503_v47, %v12802_v7  ;;  %v2226_v4 = vmul.f32 %v2210_v51, %v12803_v48  ;;  %v12806_v6 = vld [vmem:[#allocation48_spill] sm:$0xff]  ;;  %v12807_v52 = vld [vmem:[#allocation51_spill] sm:$0xff] }
 0x6bb   :  { %v3448_v16 = vrot.slane %v3447_v1, 1  ;;  %v2227_v22 = vmul.f32 %v2211_v38, %v12804_v62  ;;  %v1329_v53 = vmul.f32 %v1313_v19, %v12779_v45  ;;  %v1343_v20 = vadd.f32 %v1342_v15, %v1328_v9  ;;  %v12808_v19 = vld [vmem:[#allocation132_spill] sm:$0xff] }
 0x6bc   :  { %v3940_v49 = vrot.slane %v3939_v57, 1  ;;  %v2213_v31 = vmul.f32 %v10503_v47, %v12805_v25  ;;  %v2214_v12 = vmul.f32 %v10503_v47, %v12806_v6  ;;  %v3613_v7 = vadd.f32 %v3612_v44, %v12787_v39 }
 0x6bd   :  { %v3449_v56 = vadd.f32 %v3448_v16, %v3447_v1  ;;  %v3777_v59 = vadd.f32 %v3776_v34, %v3775_v30  ;;  %v2228_v0 = vmul.f32 %v2212_v10, %v12807_v52  ;;  %v2242_v51 = vadd.f32 %v2227_v22, %v2226_v4  ;;  %v12809_v1 = vld [vmem:[#allocation58_spill] sm:$0xff] }
 0x6be   :  { %v4048_v45 = vrot.slane %v4047_v36, 2  ;;  %v1344_v2 = vadd.f32 %v1343_v20, %v1329_v53  ;;  %v2215_v15 = vmul.f32 %v10503_v47, %v12808_v19  ;;  %v3941_v61 = vadd.f32 %v3940_v49, %v3939_v57  ;;  %v12811_v22 = vld [vmem:[#allocation86_spill] sm:$0xff] }
 0x6bf   :  { %v4108_v38 = vsel %vm2267_vm5, %v10409_v3, %v3449_v56  ;;  %v2229_v9 = vmul.f32 %v2213_v31, %v12809_v1  ;;  %v2243_v16 = vadd.f32 %v2242_v51, %v2228_v0  ;;  %v1798_v39 = vadd.f32 %v1797_v41, %v10488_v8  ;;  %v12810_v3 = vld [vmem:[#allocation187_spill] sm:$0xff]  ;;  %v12812_v49 = vld [vmem:[#allocation274_spill] sm:$0xff] }
 0x6c0   :  { %v4109_v32 = vsel %vm2269_vm6, %v4108_v38, %v3613_v7  ;;  %v4049_v25 = vadd.f32 %v4048_v45, %v4047_v36  ;;  %v2025_v44 = vadd.f32 %v2024_v42, %v2010_v37  ;;  %v890_v30 = vadd.f32 %v889_v18, %v888_v5  ;;  %v12813_v56 = vld [vmem:[#allocation107_spill] sm:$0xff]  ;;  %v12814_v36 = vld [vmem:[#allocation193_spill] sm:$0xff]  ;;  %v12815_v7 = vld [vmem:[#allocation286_spill] sm:$0xff] }
 0x6c1   :  { %v4110_v34 = vsel %vm2271_vm7, %v4109_v32, %v3777_v59  ;;  %v2216_v4 = vmul.f32 %v10503_v47, %v12810_v3  ;;  %v2230_v57 = vmul.f32 %v2214_v12, %v12811_v22  ;;  %v2244_v53 = vadd.f32 %v2243_v16, %v2229_v9  ;;  %v12816_v5 = vld [vmem:[#allocation228_spill] sm:$0xff]  ;;  %v12817_v42 = vld [vmem:[#allocation74_spill] sm:$0xff]  ;;  %v12818_v51 = vld [vmem:[#allocation279_spill] sm:$0xff] }
 0x6c2   :  { %v10543_v10 = vsel %vm2273_vm8, %v4110_v34, %v3941_v61  ;;  %v4050_v20 = vrot.slane %v4049_v25, 1  ;;  %v1784_v31 = vmul.f32 %v12813_v56, %v12812_v49  ;;  %v1996_v6 = vmul.f32 %v12776_v11, %v12814_v36  ;;  %v12820_v32 = vld [vmem:[#allocation52_spill] sm:$0xff]  ;;  %v12821_v16 = vld [vmem:[#allocation97_spill] sm:$0xff] }
 0x6c3   :  { %v2011_v8 = vmul.f32 %v1995_v13, %v12815_v7  ;;  %v1345_v41 = vrot.slane %v1344_v2, 4  ;;  %v2217_v37 = vmul.f32 %v10503_v47, %v12816_v5  ;;  %v2231_v18 = vmul.f32 %v2215_v15, %v12817_v42  ;;  %v12822_v3 = vld [vmem:[#allocation296_spill] sm:$0xff]  ;;  %v12824_v15 = vld [vmem:[#allocation281_spill] sm:$0xff]  ;;  %v12828_v7 = vld [vmem:[#allocation94_spill] sm:$0xff] }
 0x6c4   :  { %v2245_v59 = vadd.f32 %v2244_v53, %v2230_v57  ;;  %v4051_v0 = vadd.f32 %v4050_v20, %v4049_v25  ;;  %v12819_v12 = vrot.slane %v12818_v51, 4  ;;  %v1799_v38 = vadd.f32 %v1798_v39, %v1784_v31  ;;  %v12823_v49 = vld [vmem:[#allocation196_spill] sm:$0xff]  ;;  %v12826_v36 = vld [vmem:[#allocation253_spill] sm:$0xff] }
 0x6c5   :  { %v2026_v19 = vadd.f32 %v2025_v44, %v2011_v8  ;;  %v891_v61 = vrot.slane %v890_v30, 2  ;;  %v2218_v9 = vmul.f32 %v10503_v47, %v12820_v32  ;;  %v2232_v13 = vmul.f32 %v2216_v4, %v12821_v16  ;;  %v12825_v57 = vld [vmem:[#allocation344_spill] sm:$0xff]  ;;  %v12830_v32 = vld [vmem:[#allocation334_spill] sm:$0xff] }
 0x6c6   :  { %v1118_v45 = vadd.f32 %v12819_v12, %v12818_v51  ;;  %v2246_v34 = vadd.f32 %v2245_v59, %v2231_v18  ;;  %5695 = vrcp.f32 %v4051_v0  ;;  %v1785_v56 = vmul.f32 %v12823_v49, %v12822_v3  ;;  %v12827_v44 = vld [vmem:[#allocation56_spill] sm:$0xff]  ;;  %v12829_v51 = vld [vmem:[#allocation101_spill] sm:$0xff] }
 0x6c7   :  { %v1997_v25 = vmul.f32 %v12776_v11, %v12824_v15  ;;  %v2012_v53 = vmul.f32 %v1996_v6, %v12825_v57  ;;  %v1346_v20 = vadd.f32 %v1345_v41, %v1344_v2  ;;  %v1573_v39 = vrot.slane %v12826_v36, 4  ;;  %v12832_v3 = vld [vmem:[#allocation305_spill] sm:$0xff] }
 0x6c8   :  { %v2219_v31 = vmul.f32 %v10503_v47, %v12827_v44  ;;  %v2233_v8 = vmul.f32 %v2217_v37, %v12828_v7  ;;  %v2247_v5 = vadd.f32 %v2246_v34, %v2232_v13  ;;  %v1800_v4 = vadd.f32 %v1799_v38, %v1785_v56  ;;  %v12834_v56 = vld [vmem:[#allocation137_spill] sm:$0xff] }
 0x6c9   :  { %v2027_v18 = vadd.f32 %v2026_v19, %v2012_v53  ;;  %v892_v59 = vadd.f32 %v891_v61, %v890_v30  ;;  %v2220_v0 = vmul.f32 %v10503_v47, %v10240_v54  ;;  %v2234_v12 = vmul.f32 %v2218_v9, %v12829_v51  ;;  %v12833_v30 = vld [vmem:[#allocation115_spill] sm:$0xff] }
 0x6ca   :  { %v2248_v11 = vadd.f32 %v2247_v5, %v2233_v8  ;;  %v12831_v2 = vrot.slane %v12830_v32, 2  ;;  %v1119_v41 = vrot.slane %v1118_v45, 2  ;;  %v2013_v49 = vmul.f32 %v1997_v25, %v12832_v3 }
 0x6cb   :  { %v1347_v15 = vrot.slane %v1346_v20, 2  ;;  %v1574_v37 = vadd.f32 %v1573_v39, %v12826_v36  ;;  %v2221_v38 = vmul.f32 %v10503_v47, %v10255_v58  ;;  %v2235_v19 = vmul.f32 %v2219_v31, %v12833_v30  ;;  %v12835_v39 = vld [vmem:[#allocation191_spill] sm:$0xff] }
 0x6cc   :  { %v664_v6 = vadd.f32 %v12831_v2, %v12830_v32  ;;  %v2249_v61 = vadd.f32 %v2248_v11, %v2234_v12  ;;  %v1801_v54 = vrot.slane %v1800_v4, 4  ;;  %v2028_v13 = vadd.f32 %v2027_v18, %v2013_v49 }
 0x6cd   :  { %v893_v9 = vrot.slane %v892_v59, 1  ;;  %v2222_v34 = vmul.f32 %v10503_v47, %v10290_v35  ;;  %v2236_v57 = vmul.f32 %v2220_v0, %v12834_v56  ;;  %v1120_v25 = vadd.f32 %v1119_v41, %v1118_v45  ;;  %v12836_v0 = vld [vmem:[#allocation232_spill] sm:$0xff] }
 0x6ce   :  { %v2250_v53 = vadd.f32 %v2249_v61, %v2235_v19  ;;  %v665_v44 = vrot.slane %v664_v6, 1  ;;  %v1348_v8 = vadd.f32 %v1347_v15, %v1346_v20  ;;  %v1575_v36 = vrot.slane %v1574_v37, 2 }
 0x6cf   :  { %v2223_v58 = vmul.f32 %v10503_v47, %v10309_v23  ;;  %v2237_v31 = vmul.f32 %v2221_v38, %v12835_v39  ;;  %v1802_v18 = vadd.f32 %v1801_v54, %v1800_v4  ;;  %v2029_v11 = vrot.slane %v2028_v13, 4  ;;  %v12838_v54 = vld [vmem:[#allocation325_spill] sm:$0xff] }
 0x6d0   :  { %v10585_v5 = vpop.eup %5695  ;;  %v2251_v12 = vadd.f32 %v2250_v53, %v2236_v57  ;;  %v894_v32 = vadd.f32 %v893_v9, %v892_v59  ;;  %v2224_v35 = vmul.f32 %v10503_v47, %v10326_v43  ;;  %v2238_v2 = vmul.f32 %v2222_v34, %v12836_v0  ;;  %v12837_v59 = vld [vmem:[#allocation317_spill] sm:$0xff] }
 0x6d1   :  { %v4053_v45 = vmul.f32 %v10585_v5, %v10262_v63  ;;  %v4054_v20 = vmul.f32 %v10585_v5, %v10270_v40  ;;  %v666_v41 = vadd.f32 %v665_v44, %v664_v6  ;;  %v1121_v23 = vrot.slane %v1120_v25, 1 }
 0x6d2   :  { %v2252_v3 = vadd.f32 %v2251_v12, %v2237_v31  ;;  %v1349_v49 = vrot.slane %v1348_v8, 1  ;;  %v1576_v15 = vadd.f32 %v1575_v36, %v1574_v37  ;;  %v2225_v4 = vmul.f32 %v10503_v47, %v10345_v55  ;;  %v12839_v55 = vld [vmem:[#allocation328_spill] sm:$0xff] }
 0x6d3   :  { %v2239_v38 = vmul.f32 %v2223_v58, %v12837_v59  ;;  %v1803_v43 = vrot.slane %v1802_v18, 2  ;;  %v2030_v61 = vadd.f32 %v2029_v11, %v2028_v13  ;;  %v2240_v9 = vmul.f32 %v2224_v35, %v12838_v54 }
 0x6d4   :  { %v2253_v19 = vadd.f32 %v2252_v3, %v2238_v2  ;;  %v2264_v34 = vsel %vm2263_vm3, %v666_v41, %v894_v32  ;;  %v4055_v40 = vmul.f32 %v10585_v5, %v10320_v26  ;;  %v4069_v6 = vmul.f32 %v4053_v45, %v12803_v48 }
 0x6d5   :  { %v4070_v37 = vmul.f32 %v4054_v20, %v12804_v62  ;;  %v1122_v57 = vadd.f32 %v1121_v23, %v1120_v25  ;;  %v1350_v53 = vadd.f32 %v1349_v49, %v1348_v8  ;;  %v2241_v47 = vmul.f32 %v2225_v4, %v12839_v55 }
 0x6d6   :  { %v2254_v63 = vadd.f32 %v2253_v19, %v2239_v38  ;;  %v4056_v13 = vmul.f32 %v10585_v5, %v10332_v28  ;;  %v1577_v36 = vrot.slane %v1576_v15, 1  ;;  %v1804_v58 = vadd.f32 %v1803_v43, %v1802_v18 }
 0x6d7   :  { %v2031_v31 = vrot.slane %v2030_v61, 2  ;;  %v2266_v12 = vsel %vm2265_vm4, %v2264_v34, %v1122_v57  ;;  %v4057_v26 = vmul.f32 %v10585_v5, %v10353_v33  ;;  %v4071_v48 = vmul.f32 %v4055_v40, %v12807_v52 }
 0x6d8   :  { %v2255_v44 = vadd.f32 %v2254_v63, %v2240_v9  ;;  %v4085_v62 = vadd.f32 %v4070_v37, %v4069_v6  ;;  %v2268_v25 = vsel %vm2267_vm5, %v2266_v12, %v1350_v53  ;;  %v4058_v32 = vmul.f32 %v10585_v5, %v10361_v14  ;;  %v12842_v12 = vld [vmem:[#allocation262_spill] sm:$0xff] }
 0x6d9   :  { %v4072_v28 = vmul.f32 %v4056_v13, %v12809_v1  ;;  %v1578_v18 = vadd.f32 %v1577_v36, %v1576_v15  ;;  %v1805_v2 = vrot.slane %v1804_v58, 1  ;;  %v2032_v3 = vadd.f32 %v2031_v31, %v2030_v61 }
 0x6da   :  { %v2256_v11 = vadd.f32 %v2255_v44, %v2241_v47  ;;  %v4086_v35 = vadd.f32 %v4085_v62, %v4071_v48  ;;  %v4059_v20 = vmul.f32 %v10585_v5, %v10374_v46  ;;  %v4073_v33 = vmul.f32 %v4057_v26, %v12811_v22 }
 0x6db   :  { %v2270_v41 = vsel %vm2269_vm6, %v2268_v25, %v1578_v18  ;;  %v4060_v49 = vmul.f32 %v10585_v5, %v10380_v29  ;;  %v4074_v14 = vmul.f32 %v4058_v32, %v12817_v42  ;;  %v1806_v4 = vadd.f32 %v1805_v2, %v1804_v58  ;;  %v2401_v18 = vld [vmem:[%s5865_s12 + $0x70] sm:$0xff] }
 0x6dc   :  { %v2257_v8 = vrot.slane %v2256_v11, 4  ;;  %v4087_v52 = vadd.f32 %v4086_v35, %v4072_v28  ;;  %v2033_v15 = vrot.slane %v2032_v3, 1  ;;  %v4061_v19 = vmul.f32 %v10585_v5, %v10389_v60  ;;  %v2400_v35 = vld [vmem:[%s5865_s12 + $0x68] sm:$0xff] }
 0x6dd   :  { %v4075_v46 = vmul.f32 %v4059_v20, %v12821_v16  ;;  %v2272_v22 = vsel %vm2271_vm7, %v2270_v41, %v1806_v4  ;;  %v4062_v61 = vmul.f32 %v10585_v5, %v10402_v50  ;;  %v4076_v9 = vmul.f32 %v4060_v49, %v12828_v7  ;;  %v2499_v20 = vld [vmem:[%s5885_s6 + $0x10] sm:$0xff]  ;;  %v2500_v41 = vld [vmem:[%s5885_s6 + $0x18] sm:$0xff]  ;;  %v4485_v49 = vld [vmem:[%s5850_s24] ss:$0 sm:$0xff]  ;;  %s12852_s24 = sld [smem:[#allocation22_spill]] }
 0x6de   :  { %v2258_v45 = vadd.f32 %v2257_v8, %v2256_v11  ;;  %v4088_v1 = vadd.f32 %v4087_v52, %v4073_v33  ;;  %v2034_v42 = vadd.f32 %v2033_v15, %v2032_v3  ;;  %v4063_v63 = vmul.f32 %v10585_v5, %v10416_v17  ;;  %v2497_v3 = vld [vmem:[%s5885_s6] sm:$0xff] }
 0x6df   :  { %v4077_v40 = vmul.f32 %v4061_v19, %v12829_v51  ;;  %v4064_v37 = vmul.f32 %v10585_v5, %v10428_v24  ;;  %v4078_v50 = vmul.f32 %v4062_v61, %v12833_v30  ;;  %v4065_v53 = vmul.f32 %v10585_v5, %v10440_v21  ;;  %v12841_v30 = vld [vmem:[#allocation32_spill] sm:$0xff]  ;;  %v4486_v15 = vld [vmem:[%s12843_s17] ss:$0 sm:$0xff]  ;;  %v2502_v61 = vld [vmem:[%s5885_s6 + $0x28] sm:$0xff] }
 0x6e0   :  { %v2259_v23 = vrot.slane %v2258_v45, 2  ;;  %v4089_v43 = vadd.f32 %v4088_v1, %v4074_v14  ;;  %v2274_v16 = vsel %vm2273_vm8, %v2272_v22, %v2034_v42  ;;  %v4079_v17 = vmul.f32 %v4063_v63, %v12834_v56  ;;  %v4487_v19 = vld [vmem:[%s12844_s21] ss:$0 sm:$0xff] }
 0x6e1   :  { %v12840_v51 = vmov 0.0   ;;  %v4066_v44 = vmul.f32 %v10585_v5, %v10453_v27  ;;  %v4080_v24 = vmul.f32 %v4064_v37, %v12835_v39  ;;  %v4067_v36 = vmul.f32 %v10585_v5, %v12841_v30  ;;  %v2501_v22 = vld [vmem:[%s5885_s6 + $0x20] sm:$0xff] }
 0x6e2   :  { %v2260_v38 = vadd.f32 %v2259_v23, %v2258_v45  ;;  %v4090_v29 = vadd.f32 %v4089_v43, %v4075_v46  ;;  %v4081_v58 = vmul.f32 %v4065_v53, %v12836_v0  ;;  %v4068_v21 = vmul.f32 %v10585_v5, %v12842_v12  ;;  %v2498_v45 = vld [vmem:[%s5885_s6 + $0x8] sm:$0xff]  ;;  %v4488_v63 = vld [vmem:[%s12846_s25] ss:$0 sm:$0xff] }
 0x6e3   :  { %v4082_v56 = vmul.f32 %v4066_v44, %v12837_v59  ;;  %v4083_v27 = vmul.f32 %v4067_v36, %v12838_v54  ;;  %v2399_v54 = vld [vmem:[%s5865_s12 + $0x60] sm:$0xff]  ;;  %v4900_v52 = vpack.c.bf16 %v2498_v45, %v2497_v3  ;;  %v12845_v23 = vmov 0.0|0.0   ;;  %v4123_v3 = vld [vmem:[%s12852_s24 + $0x50] sm:$0xff]  ;;  %v4124_v45 = vld [vmem:[%s12852_s24 + $0x58] sm:$0xff] }
 0x6e4   :  { %v2261_v34 = vrot.slane %v2260_v38, 1  ;;  %v4091_v60 = vadd.f32 %v4090_v29, %v4076_v9  ;;  %v4084_v26 = vmul.f32 %v4068_v21, %v12839_v55  ;;  %v4894_v2 = vpack.c.bf16 %v2400_v35, %v2399_v54  ;;  %v2402_v55 = vld [vmem:[%s5865_s12 + $0x78] sm:$0xff]  ;;  %v2503_v9 = vld [vmem:[%s5885_s6 + $0x30] sm:$0xff]  ;;  %v2602_v53 = vld [vmem:[%s12849_s8] sm:$0xff]  ;;  %s12854_s12 = sld [smem:[#allocation20_spill]] }
 0x6e5   :  { %v4897_v33 = vpack.c.bf16 %v2402_v55, %v2401_v18  ;;  %v4906_v29 = vpack.c.bf16 %v2502_v61, %v2501_v22  ;;  %v4491_v30 = vld [vmem:[%s12850_s14] ss:$0 sm:$0xff]  ;;  %v4120_v54 = vld [vmem:[%s12852_s24 + $0x38] sm:$0xff] }
 0x6e6   :  { %v2262_v6 = vadd.f32 %v2261_v34, %v2260_v38  ;;  %v4092_v57 = vadd.f32 %v4091_v60, %v4077_v40  ;;  %4895 = vmatpush3.bf16.msra.mxu1 %v4894_v2  ;;  %v2504_v34 = vld [vmem:[%s5885_s6 + $0x38] sm:$0xff]  ;;  %s12853_s6 = sld [smem:[#allocation15_spill]]  ;;  %v4493_v12 = vld [vmem:[%s12851_s19] ss:$0 sm:$0xff]  ;;  %v4122_v2 = vld [vmem:[%s12852_s24 + $0x48] sm:$0xff] }
 0x6e7   :  { %4896 = vmatprep.subr.bf16.mxu1 %v12845_v23  ;;  %v4909_v42 = vpack.c.bf16 %v2504_v34, %v2503_v9  ;;  %v4121_v18 = vld [vmem:[%s12852_s24 + $0x40] sm:$0xff]  ;;  %v4224_v9 = vld [vmem:[%s12857_s2 + $0x8] sm:$0xff] }
 0x6e8   :  { %v2276_v7 = vsel %vm2275_vm9, %v2274_v16, %v2262_v6  ;;  %v4093_v47 = vadd.f32 %v4092_v57, %v4078_v50  ;;  %v4489_v16 = vld [vmem:[%s12847_s29] ss:$0 sm:$0xff]  ;;  %v4933_v55 = vpack.c.bf16 %v4122_v2, %v4121_v18 }
 0x6e9   :  { %4678 = vmatmul.mubr.f32.vlgmr.msra.gmra.mrb[2].mxu0 %v2276_v7  ;;  %v4490_v50 = vld [vmem:[%s12848_s3] ss:$0 sm:$0xff] }
 0x6ea   :  { %4731 = vmatprep.mubr.msk.f32.mxu0 %vm5776_vm0, %v12840_v51  ;;  %v4094_v13 = vadd.f32 %v4093_v47, %v4079_v17  ;;  %4901 = vmatpush3.bf16.msra.mxu0 %v4900_v52  ;;  %v2603_v17 = vld [vmem:[%s12849_s8 + $0x8] sm:$0xff]  ;;  %v2604_v47 = vld [vmem:[%s12849_s8 + $0x10] sm:$0xff]  ;;  %v4497_v22 = vld [vmem:[%s12856_s1] ss:$0 sm:$0xff] }
 0x6eb   :  { %4902 = vmatprep.subr.bf16.mxu0 %v12845_v23  ;;  %4898 = vmatpush3.bf16.msra.mxu1 %v4897_v33  ;;  %v4912_v44 = vpack.c.bf16 %v2603_v17, %v2602_v53  ;;  %v4125_v33 = vld [vmem:[%s12852_s24 + $0x60] sm:$0xff]  ;;  %v4126_v52 = vld [vmem:[%s12852_s24 + $0x68] sm:$0xff] }
 0x6ec   :  { %v4095_v31 = vadd.f32 %v4094_v13, %v4080_v24  ;;  %4911 = vmatprep.subr.bf16.mxu1 %v12845_v23  ;;  %v2605_v24 = vld [vmem:[%s12849_s8 + $0x18] sm:$0xff]  ;;  %v4232_v17 = vld [vmem:[%s12857_s2 + $0x48] sm:$0xff]  ;;  %v4499_v18 = vld [vmem:[%s12862_s16] ss:$0 sm:$0xff] }
 0x6ed   :  { %v4915_v13 = vpack.c.bf16 %v2605_v24, %v2604_v47  ;;  %v4234_v24 = vld [vmem:[%s12857_s2 + $0x58] sm:$0xff] }
 0x6ee   :  { %v4096_v11 = vadd.f32 %v4095_v31, %v4081_v58 }
 0x6f0   :  { %v4097_v39 = vadd.f32 %v4096_v11, %v4082_v56  ;;  %v4113_v56 = vld [vmem:[%s12852_s24] sm:$0xff]  ;;  %v4114_v11 = vld [vmem:[%s12852_s24 + $0x8] sm:$0xff] }
 0x6f2   :  { %v4098_v48 = vadd.f32 %v4097_v39, %v4083_v27  ;;  %v4494_v27 = vld [vmem:[%s12853_s6] ss:$0 sm:$0xff] }
 0x6f4   :  { %v4099_v0 = vadd.f32 %v4098_v48, %v4084_v26  ;;  %v4921_v26 = vpack.c.bf16 %v4114_v11, %v4113_v56 }
 0x6f6   :  { %v4100_v62 = vrot.slane %v4099_v0, 4 }
 0x6f8   :  { %v4101_v25 = vadd.f32 %v4100_v62, %v4099_v0  ;;  %v4115_v0 = vld [vmem:[%s12852_s24 + $0x10] sm:$0xff]  ;;  %v4116_v62 = vld [vmem:[%s12852_s24 + $0x18] sm:$0xff] }
 0x6fa   :  { %v4102_v8 = vrot.slane %v4101_v25, 2 }
 0x6fc   :  { %v4103_v5 = vadd.f32 %v4102_v8, %v4101_v25  ;;  %v4924_v25 = vpack.c.bf16 %v4116_v62, %v4115_v0  ;;  %v4117_v8 = vld [vmem:[%s12852_s24 + $0x20] sm:$0xff] }
 0x6fd   :  { %v4505_v0 = vld [vmem:[%s12861_s15] ss:$0 sm:$0xff] }
 0x6fe   :  { %v4104_v32 = vrot.slane %v4103_v5, 1 }
 0x700   :  { %v4105_v59 = vadd.f32 %v4104_v32, %v4103_v5  ;;  %v4118_v5 = vld [vmem:[%s12852_s24 + $0x28] sm:$0xff] }
 0x701   :  { %v4927_v32 = vpack.c.bf16 %v4118_v5, %v4117_v8  ;;  %v4333_v8 = vld [vmem:[%s5975_s27] sm:$0xff]  ;;  %v4334_v5 = vld [vmem:[%s5975_s27 + $0x8] sm:$0xff] }
 0x702   :  { %v10657_v28 = vsel %vm2275_vm9, %v10543_v10, %v4105_v59  ;;  %v4903_v10 = vpack.c.bf16 %v2500_v41, %v2499_v20  ;;  %v4119_v59 = vld [vmem:[%s12852_s24 + $0x30] sm:$0xff]  ;;  %v4936_v20 = vpack.c.bf16 %v4124_v45, %v4123_v3  ;;  %v4939_v41 = vpack.c.bf16 %v4126_v52, %v4125_v33  ;;  %v4506_v45 = vld [vmem:[%s12863_s18] ss:$0 sm:$0xff] }
 0x703   :  { %v4930_v35 = vpack.c.bf16 %v4120_v54, %v4119_v59  ;;  %v4969_v59 = vpack.c.bf16 %v4334_v5, %v4333_v8  ;;  %v4336_v54 = vld [vmem:[%s5975_s27 + $0x18] sm:$0xff] }
 0x704   :  { %4904 = vmatpush3.bf16.msra.mxu0 %v4903_v10  ;;  %v4127_v10 = vld [vmem:[%s12852_s24 + $0x70] sm:$0xff] }
 0x705   :  { %4905 = vmatprep.subr.bf16.mxu0 %v12845_v23 }
 0x708   :  { %4907 = vmatpush3.bf16.msra.mxu0 %v4906_v29  ;;  %v4498_v29 = vld [vmem:[%s12858_s7] ss:$0 sm:$0xff] }
 0x709   :  { %4908 = vmatprep.subr.bf16.mxu0 %v12845_v23 }
 0x70c   :  { %4910 = vmatpush3.bf16.msra.mxu0 %v4909_v42 }
 0x70d   :  { %4917 = vmatprep.subr.bf16.mxu0 %v12845_v23 }
 0x7bc   :  { %v2366_v14 = vpop.f32.mrb[2].mxu0 }
 0x7bd   :  { %v2367_v1 = vadd.f32 %v4485_v49, %v2366_v14  ;;  %v4679_v4 = vpop.f32.mrb[3].mxu0  ;;  %v4128_v49 = vld [vmem:[%s12852_s24 + $0x78] sm:$0xff] }
 0x7be   :  { %v4942_v14 = vpack.c.bf16 %v4128_v49, %v4127_v10  ;;  %v2704_v4 = vld [vmem:[%s12854_s12 + $0x8] sm:$0xff]  ;;  %v4508_v49 = vld [vmem:[%s12865_s23] ss:$0 sm:$0xff] }
 0x7bf   :  { %v2370_v38 = vmax.f32 %v2367_v1, 0.0  ;;  %v2703_v1 = vld [vmem:[%s12854_s12] sm:$0xff] }
 0x7c1   :  { %v2378_v46 = vmul.f32 %v4486_v15, %v2370_v38  ;;  %v4918_v15 = vpack.c.bf16 %v2704_v4, %v2703_v1  ;;  %v4495_v38 = vld [vmem:[%s12855_s28] ss:$0 sm:$0xff] }
 0x7c2   :  { %v4509_v4 = vld [vmem:[%s5980_s4] ss:$0 sm:$0xff] }
 0x7c3   :  { %v2386_v43 = vadd.f32 %v4487_v19, %v2378_v46 }
 0x7c5   :  { %4713 = vmatmul.mubr.f32.vlgmr.msra.gmra.mrb[2].mxu1 %v2386_v43 }
 0x7c6   :  { %4742 = vmatprep.mubr.msk.f32.mxu1 %vm5776_vm0, %v12840_v51  ;;  %4913 = vmatpush3.bf16.msra.mxu1 %v4912_v44  ;;  %v4233_v44 = vld [vmem:[%s12857_s2 + $0x50] sm:$0xff] }
 0x7c7   :  { %4914 = vmatprep.subr.bf16.mxu1 %v12845_v23 }
 0x7ca   :  { %4916 = vmatpush3.bf16.msra.mxu1 %v4915_v13  ;;  %v4960_v13 = vpack.c.bf16 %v4234_v24, %v4233_v44 }
 0x7cb   :  { %4920 = vmatprep.subr.bf16.mxu1 %v12845_v23 }
 0x898   :  { %v2476_v40 = vpop.f32.mrb[2].mxu1 }
 0x899   :  { %v2477_v60 = vadd.f32 %v4488_v63, %v2476_v40  ;;  %v4714_v6 = vpop.f32.mrb[3].mxu1  ;;  %v4225_v40 = vld [vmem:[%s12857_s2 + $0x10] sm:$0xff] }
 0x89b   :  { %v2480_v37 = vmax.f32 %v2477_v60, 0.0  ;;  %v4226_v60 = vld [vmem:[%s12857_s2 + $0x18] sm:$0xff] }
 0x89c   :  { %v4948_v6 = vpack.c.bf16 %v4226_v60, %v4225_v40 }
 0x89d   :  { %v2488_v57 = vmul.f32 %v4489_v16, %v2480_v37  ;;  %v4227_v16 = vld [vmem:[%s12857_s2 + $0x20] sm:$0xff]  ;;  %v4228_v37 = vld [vmem:[%s12857_s2 + $0x28] sm:$0xff] }
 0x89f   :  { %v2496_v7 = vadd.f32 %v4490_v50, %v2488_v57  ;;  %v4951_v50 = vpack.c.bf16 %v4228_v37, %v4227_v16  ;;  %v4229_v57 = vld [vmem:[%s12857_s2 + $0x30] sm:$0xff] }
 0x8a1   :  { %4732 = vmatmul.mubr.msk.f32.vlgmr.msra.gmra.mrb[4].mxu0 %vm293_vm2, %v2496_v7  ;;  %v4230_v7 = vld [vmem:[%s12857_s2 + $0x38] sm:$0xff] }
 0x8a2   :  { %4749 = vmatprep.mubr.msk.f32.mxu0 %vm5776_vm0, %v12840_v51  ;;  %4919 = vmatpush3.bf16.msra.mxu0 %v4918_v15  ;;  %v4954_v53 = vpack.c.bf16 %v4230_v7, %v4229_v57 }
 0x8a3   :  { %4944 = vmatprep.subr.bf16.mxu0 %v12845_v23 }
 0x974   :  { %v2581_v36 = vpop.f32.mrb[4].mxu0 }
 0x975   :  { %v2582_v58 = vadd.f32 %v4491_v30, %v2581_v36  ;;  %v4733_v31 = vpop.f32.mrb[5].mxu0  ;;  %v4235_v30 = vld [vmem:[%s12857_s2 + $0x60] sm:$0xff]  ;;  %v4236_v36 = vld [vmem:[%s12857_s2 + $0x68] sm:$0xff] }
 0x976   :  { %v4963_v31 = vpack.c.bf16 %v4236_v36, %v4235_v30 }
 0x977   :  { %v2585_v21 = vmax.f32 %v2582_v58, 0.0  ;;  %v4503_v58 = vld [vmem:[%s12859_s10] ss:$0 sm:$0xff] }
 0x979   :  { %v2593_v39 = vmul.f32 %v4493_v12, %v2585_v21  ;;  %v4237_v12 = vld [vmem:[%s12857_s2 + $0x70] sm:$0xff]  ;;  %v4238_v21 = vld [vmem:[%s12857_s2 + $0x78] sm:$0xff] }
 0x97b   :  { %v2601_v48 = vadd.f32 %v4494_v27, %v2593_v39  ;;  %v4504_v39 = vld [vmem:[%s12860_s11] ss:$0 sm:$0xff] }
 0x97d   :  { %4743 = vmatmul.mubr.msk.f32.vlgmr.msra.gmra.mrb[4].mxu1 %vm187_vm1, %v2601_v48 }
 0x97e   :  { %4922 = vmatpush3.bf16.msra.mxu1 %v4921_v26  ;;  %4784 = vmatprep.mubr.msk.f32.mxu1 %vm5776_vm0, %v12840_v51  ;;  %v4966_v26 = vpack.c.bf16 %v4238_v21, %v4237_v12 }
 0x97f   :  { %4923 = vmatprep.subr.bf16.mxu1 %v12845_v23 }
 0x982   :  { %4925 = vmatpush3.bf16.msra.mxu1 %v4924_v25 }
 0x983   :  { %4926 = vmatprep.subr.bf16.mxu1 %v12845_v23 }
 0x986   :  { %4928 = vmatpush3.bf16.msra.mxu1 %v4927_v32  ;;  %v4335_v32 = vld [vmem:[%s5975_s27 + $0x10] sm:$0xff]  ;;  %s5786_s27 = smov [#allocation5]  }
 0x987   :  { %4929 = vmatprep.subr.bf16.mxu1 %v12845_v23  ;;  %s4426_s26 = sshll.u32 %s5786_s27, 4  ;;  %s4427_s26 = int_to_ptr.vmem [resolvable:$true] %s4426_s26 }
 0x988   :  { %p5714_p6 = scmp.lt.s32.totalorder %s4427_s26, %s4427_s26 }
 0x98a   :  { %4931 = vmatpush3.bf16.msra.mxu1 %v4930_v35  ;;  %v4972_v35 = vpack.c.bf16 %v4336_v54, %v4335_v32 }
 0x98b   :  { %4932 = vmatprep.subr.bf16.mxu1 %v12845_v23 }
 0x98e   :  { %4934 = vmatpush3.bf16.msra.mxu1 %v4933_v55 }
 0x98f   :  { %4935 = vmatprep.subr.bf16.mxu1 %v12845_v23 }
 0x992   :  { %4937 = vmatpush3.bf16.msra.mxu1 %v4936_v20 }
 0x993   :  { %4938 = vmatprep.subr.bf16.mxu1 %v12845_v23 }
 0x996   :  { %4940 = vmatpush3.bf16.msra.mxu1 %v4939_v41  ;;  %v4507_v41 = vld [vmem:[%s12864_s22] ss:$0 sm:$0xff] }
 0x997   :  { %4941 = vmatprep.subr.bf16.mxu1 %v12845_v23 }
 0x99a   :  { %4943 = vmatpush3.bf16.msra.mxu1 %v4942_v14 }
 0x99b   :  { %4968 = vmatprep.subr.bf16.mxu1 %v12845_v23 }
 0x99d   :  { %4785 = vmatmul.mubr.f32.vlgmr.msra.gmra.mrb[6].mxu1 %v10657_v28  ;;  %v4223_v28 = vld [vmem:[%s12857_s2] sm:$0xff] }
 0x99e   :  { %4830 = vmatprep.mubr.msk.f32.mxu1 %vm5776_vm0, %v12840_v51  ;;  %v4945_v42 = vpack.c.bf16 %v4224_v9, %v4223_v28  ;;  %4970 = vmatpush3.bf16.msra.mxu1 %v4969_v59 }
 0x99f   :  { %4971 = vmatprep.subr.bf16.mxu1 %v12845_v23 }
 0x9a2   :  { %4973 = vmatpush3.bf16.msra.mxu1 %v4972_v35 }
 0xa50   :  { %v2682_v19 = vpop.f32.mrb[4].mxu1 }
 0xa51   :  { %v2683_v46 = vadd.f32 %v4495_v38, %v2682_v19  ;;  %v4744_v43 = vpop.f32.mrb[5].mxu1 }
 0xa53   :  { %v2686_v61 = vmax.f32 %v2683_v46, 0.0 }
 0xa55   :  { %v2694_v34 = vmul.f32 %v4497_v22, %v2686_v61 }
 0xa57   :  { %v2702_v63 = vadd.f32 %v4498_v29, %v2694_v34 }
 0xa59   :  { %4750 = vmatmul.mubr.msk.f32.vlgmr.msra.gmra.mrb[6].mxu0 %vm2712_vm10, %v2702_v63 }
 0xa5a   :  { %4946 = vmatpush3.bf16.msra.mxu0 %v4945_v42  ;;  %4819 = vmatprep.mubr.msk.f32.mxu0 %vm5776_vm0, %v12840_v51  ;;  %v4231_v51 = vld [vmem:[%s12857_s2 + $0x40] sm:$0xff] }
 0xa5b   :  { %4947 = vmatprep.subr.bf16.mxu0 %v12845_v23  ;;  %v4957_v47 = vpack.c.bf16 %v4232_v17, %v4231_v51 }
 0xa5e   :  { %4949 = vmatpush3.bf16.msra.mxu0 %v4948_v6 }
 0xa5f   :  { %4950 = vmatprep.subr.bf16.mxu0 %v12845_v23 }
 0xa62   :  { %4952 = vmatpush3.bf16.msra.mxu0 %v4951_v50 }
 0xa63   :  { %4953 = vmatprep.subr.bf16.mxu0 %v12845_v23 }
 0xa66   :  { %4955 = vmatpush3.bf16.msra.mxu0 %v4954_v53 }
 0xa67   :  { %4956 = vmatprep.subr.bf16.mxu0 %v12845_v23 }
 0xa6a   :  { %4958 = vmatpush3.bf16.msra.mxu0 %v4957_v47 }
 0xa6b   :  { %4959 = vmatprep.subr.bf16.mxu0 %v12845_v23 }
 0xa6e   :  { %4961 = vmatpush3.bf16.msra.mxu0 %v4960_v13 }
 0xa6f   :  { %4962 = vmatprep.subr.bf16.mxu0 %v12845_v23 }
 0xa70   :  { %v4202_v56 = vpop.f32.mrb[6].mxu1 }
 0xa71   :  { %v4203_v11 = vadd.f32 %v4503_v58, %v4202_v56  ;;  %v4786_v27 = vpop.f32.mrb[7].mxu1 }
 0xa72   :  { %4964 = vmatpush3.bf16.msra.mxu0 %v4963_v31 }
 0xa73   :  { %v4206_v48 = vmax.f32 %v4203_v11, 0.0  ;;  %4965 = vmatprep.subr.bf16.mxu0 %v12845_v23 }
 0xa75   :  { %v4214_v62 = vmul.f32 %v4504_v39, %v4206_v48 }
 0xa76   :  { %4967 = vmatpush3.bf16.msra.mxu0 %v4966_v26 }
 0xa77   :  { %v4222_v25 = vadd.f32 %v4505_v0, %v4214_v62 }
 0xa79   :  { %4820 = vmatmul.mubr.f32.vlgmr.msra.gmra.mrb[8].mxu0 %v4222_v25 }
 0xb2c   :  { %v2782_v2 = vpop.f32.mrb[6].mxu0 }
 0xb2d   :  { %v2783_v55 = vadd.f32 %v4499_v18, %v2782_v2  ;;  %v4751_v3 = vpop.f32.mrb[7].mxu0 }
 0xb2f   :  { %2786 = vst [vmem:[%s5985_s30] sm:$0xff] %v2783_v55  ;;  %s5709_s30 = scalar_lea.vmem %s4427_s26, 128 }
 0xb30   :  { %p5710_p5 = scmp.ne.s32.totalorder %s4427_s26, %s5709_s30  ;;  %p5715_p7 = scmp.lt.s32.totalorder %s5709_s30, %s5709_s30 }
 0xb32   :  { %p5716_p8 = por %p5715_p7, %p5714_p6 }
 0xb34   :  { %p5717_p9 = pnand %p5716_p8, %p5710_p5 }
 0xb4c   :  { %v4312_v20 = vpop.f32.mrb[8].mxu0 }
 0xb4d   :  { %v4313_v33 = vadd.f32 %v4506_v45, %v4312_v20  ;;  %v4821_v52 = vpop.f32.mrb[9].mxu0 }
 0xb4f   :  { %v4316_v10 = vmax.f32 %v4313_v33, 0.0 }
 0xb51   :  { %v4324_v14 = vmul.f32 %v4507_v41, %v4316_v10 }
 0xb53   :  { %v4332_v1 = vadd.f32 %v4508_v49, %v4324_v14 }
 0xb55   :  { %4831 = vmatmul.mubr.msk.f32.vlgmr.msra.gmra.mrb[8].mxu1 %vm187_vm1, %v4332_v1 }
 0xc28   :  { %v4413_v23 = vpop.f32.mrb[8].mxu1 }
 0xc29   :  { %v4414_v15 = vadd.f32 %v4509_v4, %v4413_v23  ;;  %v4832_v38 = vpop.f32.mrb[9].mxu1 }
 0xc2b   :  { %4417 = vst [vmem:[#allocation5] sm:$0xff] %v4414_v15 }
 0xc2c   :  { %5720 = shalt.err (!%p5717_p9)
}
 0xc2d   :  { %s5721_s0 = scalar_lea.hbm %s5990_s20, 128 }
 0xc2e   :  { %p5722_p10 = scmp.ne.s32.totalorder %s5990_s20, %s5721_s0  ;;  %p5725_p11 = scmp.lt.u32.totalorder %s5721_s0, %s5990_s20 }
 0xc30   :  { %p5727_p12 = pnand %p5725_p11, %p5722_p10 }
 0xc32   :  { %5730 = shalt.err (!%p5727_p12)
}
 0xc33   :  { %4429 = dma.vmem_to_hbm [thread:$0]  %s4427_s26, 128, %s5990_s20, [#allocation3]  }
 0xc34   :  { %5733 = dma.done.wait [#allocation3], 128  }
 0xc35   :  { %5734 = vsyncadd [#allocation3], 4294967168 }
 0xc36   :  { %4435 = vsyncpa [#allocation3], 1 }
 0xc37   :  { %4436 = vsyncpa [#allocation4], 1 }

</bundles_post_ra>
